<compile_context>
chip_gen: v5e
topology: v5e:2x2
jax: 0.10.0
libtpu: 0.0.40
codegen_flags: <defaults>
</compile_context>

<pallas_src>
import functools

import jax
import jax.numpy as jnp
from jax import lax
from jax.experimental import pallas as pl
from jax.experimental.pallas import tpu as pltpu


def _tcr_kernel(x_ref, c_ref, out_ref, *, sinkhorn_alpha, weight_loss_tcr,
                stop_thr, max_iter, eps, c_on_lanes, check_interval):
    x = x_ref[...].astype(jnp.float32)        # (T, D) topic embeddings
    c = c_ref[...].astype(jnp.float32)        # (C, D) cluster centers
    T, D = x.shape
    C = c.shape[0]

    # Orient K so the larger of (T, C) sits on the lane (last) axis.
    #   c_on_lanes=True : K is (T, C)  -> u:(T,1) sublanes, v:(1,C) lanes
    #   c_on_lanes=False: K is (C, T)  -> v:(C,1) sublanes, u:(1,T) lanes
    if c_on_lanes:
        row, lane = x, c
        v_axis, u_axis = 0, 1          # reduce axes producing the v / u vectors
        u0 = jnp.full((T, 1), 1.0 / T, jnp.float32)
    else:
        row, lane = c, x
        v_axis, u_axis = 1, 0
        u0 = jnp.full((1, T), 1.0 / T, jnp.float32)

    # ---- cost matrix M = cdist(row, lane): a single one-time MXU matmul -----
    r2 = jnp.sum(row * row, axis=1, keepdims=True)                  # (R, 1) XLU
    # lane-side row norms are needed lane-oriented (1, L); the ones-matmul
    # produces them directly in that layout (one-time, avoids a relayout).
    ones_d = jnp.ones((1, D), jnp.float32)
    l2 = lax.dot_general(ones_d, lane * lane, (((1,), (1,)), ((), ())),
                         preferred_element_type=jnp.float32)        # (1, L)
    rl = lax.dot_general(row, lane, (((1,), (1,)), ((), ())),
                         preferred_element_type=jnp.float32)        # (R, L)
    M = jnp.sqrt(jnp.maximum(r2 + l2 - 2.0 * rl, 0.0))              # (R, L)
    K = jnp.exp(-M * sinkhorn_alpha)                                # (R, L)
    # M is intentionally NOT referenced after this point; the epilogue
    # recomputes K*M from K so M need not stay live across the while_loop.

    C_f = jnp.float32(C)
    T_f = jnp.float32(T)
    eps_f = jnp.float32(eps)
    eps_c = jnp.float32(eps * C)
    eps_t = jnp.float32(eps * T)
    inv_C = jnp.float32(1.0 / C)
    inv_T = jnp.float32(1.0 / T)

    def one_iter(u, exact=False):
        # v-update:  v = (1/C) / (K^T u + eps)
        #   (hot path folds the marginal: 1/(C*ktu + C*eps) via approx recip)
        ktu = jnp.sum(K * u, axis=v_axis, keepdims=True)
        if exact:
            v = inv_C / (ktu + eps_f)
        else:
            v = pl.reciprocal(ktu * C_f + eps_c, approx=True)
        # u-update:  u = (1/T) / (K v + eps)
        kv = jnp.sum(K * v, axis=u_axis, keepdims=True)
        if exact:
            u = inv_T / (kv + eps_f)
        else:
            u = pl.reciprocal(kv * T_f + eps_t, approx=True)
        return u, v

    def err_of(u, v):
        # torch: bb = v * (K^T u);  err = sum_c |bb_c - 1/C|
        ktu = jnp.sum(K * u, axis=v_axis, keepdims=True)
        return jnp.sum(jnp.abs(v * ktu - inv_C))

    # ---- iteration 1 (always runs: torch starts with err = 1 > stopThr).
    #      Exact division because its result feeds the first check. ----------
    u, v = one_iter(u0, exact=True)
    err = err_of(u, v)                                              # cpt = 1

    chunk = int(check_interval)            # 50 => torch cpt % 50 == 1 cadence
    num_chunks = max((max_iter - 1) // chunk, 0)                    # static
    tail_n = (max_iter - 1) % chunk                                 # static

    def approx_steps(u, v, n):
        if n <= 0:
            return u, v
        return lax.fori_loop(0, n, lambda _, uv: one_iter(uv[0]), (u, v),
                             unroll=True)

    # ---- full chunks; err re-checked at cpt = 51, 101, ... (for chunk=50) ---
    def chunk_cond(carry):
        k, e, _u, _v = carry
        return jnp.logical_and(e > stop_thr, k < num_chunks)

    def chunk_body(carry):
        k, _e, u, v = carry
        u, v = approx_steps(u, v, chunk - 1)        # 49 approx-recip iters
        u, v = one_iter(u, exact=True)              # check iter: exact divide
        return k + 1, err_of(u, v), u, v

    _k, err, u, v = lax.while_loop(
        chunk_cond, chunk_body,
        (jnp.array(0, jnp.int32), err, u, v))

    # ---- static tail: remaining iterations up to max_iter (no err check,
    #      exactly like torch when cpt % 50 never hits 1 again).  Last tail
    #      step is exact so the final plan never comes from an approx recip. --
    if tail_n > 0:
        def run_tail(uv):
            tu, tv = approx_steps(uv[0], uv[1], tail_n - 1)
            return one_iter(tu, exact=True)
        u, v = lax.cond(err > stop_thr, run_tail, lambda uv: uv, (u, v))

    # ---- loss = sum(u * (K ∘ v) * M), with K*M recomputed as -K*log(K)/alpha
    #      (one-time EUP log pass; K==0 guarded -> contribution 0, as torch). -
    alpha_inv = jnp.float32(1.0 / sinkhorn_alpha)
    k_log_k = jnp.where(K > 0.0, K * jnp.log(K), jnp.float32(0.0))  # (R, L)
    contrib = (-alpha_inv) * k_log_k * u * v                        # (R, L)
    loss2d = jnp.sum(jnp.sum(contrib, axis=1, keepdims=True),
                     axis=0, keepdims=True)                         # (1, 1)
    out_ref[...] = loss2d * jnp.float32(weight_loss_tcr)


def tcr_loss(topic_emb, cluster_center, *, weight_loss_TCR, sinkhorn_alpha,
             OT_max_iter=5000, stopThr=0.005, check_interval=50):
    """Pallas implementation of TCR.forward(topic_emb).

    check_interval=50 reproduces the torch `cpt % 50 == 1` convergence-check
    cadence exactly; any other value deviates from the reference semantics
    (earlier exit opportunities) and is only a perf knob.
    """
    if weight_loss_TCR <= 1e-06:
        # Python-level early exit like the torch module, but returning a JAX
        # scalar so the output type is consistent with the normal path.
        return jnp.float32(0.0)

    T, D = topic_emb.shape
    C = cluster_center.shape[0]
    max_iter = max(int(OT_max_iter), 1)   # the torch loop always runs >= once
    c_on_lanes = C >= T                   # larger of (T, C) on the lane axis

    kernel = functools.partial(
        _tcr_kernel,
        sinkhorn_alpha=float(sinkhorn_alpha),
        weight_loss_tcr=float(weight_loss_TCR),
        stop_thr=float(stopThr),
        max_iter=max_iter,
        eps=1e-16,
        c_on_lanes=c_on_lanes,
        check_interval=int(check_interval),
    )

    # Explicit VMEM budget (review item, mainly for v7x's 64 MiB physical):
    # K plus a couple of (R, L) prologue/epilogue temporaries plus the two
    # inputs, padded to the f32 (8, 128) tile, with generous headroom.
    def _pad(n, m):
        return -(-n // m) * m

    R, L = (T, C) if c_on_lanes else (C, T)
    est_bytes = 4 * (3 * _pad(R, 8) * _pad(L, 128)
                     + _pad(T, 8) * _pad(D, 128)
                     + _pad(C, 8) * _pad(D, 128))
    vmem_limit = int(min(64 * 1024 * 1024, max(16 * 1024 * 1024, 4 * est_bytes)))

    out = pl.pallas_call(
        kernel,
        out_shape=jax.ShapeDtypeStruct((1, 1), jnp.float32),
        in_specs=[
            pl.BlockSpec(memory_space=pltpu.MemorySpace.VMEM),
            pl.BlockSpec(memory_space=pltpu.MemorySpace.VMEM),
        ],
        out_specs=pl.BlockSpec(memory_space=pltpu.MemorySpace.VMEM),
        compiler_params=pltpu.CompilerParams(vmem_limit_bytes=vmem_limit),
    )(topic_emb, cluster_center)
    return out[0, 0]


def _tcr_loss_ref(topic_emb, cluster_center, *, weight_loss_TCR, sinkhorn_alpha,
                  OT_max_iter=5000, stopThr=0.005, eps=1e-16):
    """Pure-JAX reference mirroring the torch forward exactly."""
    x = topic_emb.astype(jnp.float32)
    c = cluster_center.astype(jnp.float32)
    T, C = x.shape[0], c.shape[0]
    d2 = (jnp.sum(x * x, 1)[:, None] + jnp.sum(c * c, 1)[None, :]
          - 2.0 * x @ c.T)
    M = jnp.sqrt(jnp.maximum(d2, 0.0))
    a = jnp.full((T, 1), 1.0 / T)
    b = jnp.full((C, 1), 1.0 / C)
    K = jnp.exp(-M * sinkhorn_alpha)

    def cond(carry):
        cpt, err, _u, _v = carry
        return jnp.logical_and(err > stopThr, cpt < OT_max_iter)

    def body(carry):
        cpt, err, u, v = carry
        v = b / (K.T @ u + eps)
        u = a / (K @ v + eps)
        cpt = cpt + 1
        err = jnp.where(cpt % 50 == 1,
                        jnp.sum(jnp.abs(v * (K.T @ u) - b)), err)
        return cpt, err, u, v

    _, _, u, v = lax.while_loop(
        cond, body, (jnp.int32(0), jnp.float32(1.0),
                     jnp.full((T, 1), 1.0 / T), jnp.zeros((C, 1))))
    transp = u * (K * v.T)
    return jnp.sum(transp * M) * weight_loss_TCR


if __name__ == "__main__":
    key = jax.random.PRNGKey(0)
    k1, k2, k3, k4 = jax.random.split(key, 4)

    params = dict(weight_loss_TCR=250.0, sinkhorn_alpha=20.0,
                  OT_max_iter=5000, stopThr=0.005)

    # 0.1 scale keeps exp(-alpha * M) inside normal f32 range so the Sinkhorn
    # loop genuinely exercises its convergence / stopping path.
    D = 32

    # Case 1: typical topic-model shape, T > C -> kernel builds K as (C, T)
    # with topics dense on the lane axis (the new orientation path).
    T1, C1 = 50, 10
    te1 = 0.1 * jax.random.normal(k1, (T1, D), dtype=jnp.float32)
    cc1 = 0.1 * jax.random.normal(k2, (C1, D), dtype=jnp.float32)
    loss1 = jax.block_until_ready(tcr_loss(te1, cc1, **params))
    ref1 = jax.block_until_ready(_tcr_loss_ref(te1, cc1, **params))
    # Tolerance covers the approx-reciprocal hot loop (exact division is only
    # used on check iterations / the final step); near stopThr the chunked
    # exit can in principle land one 50-iteration chunk apart from the exact
    # reference, both being valid <=stopThr-converged plans.
    assert jnp.allclose(loss1, ref1, rtol=1e-2, atol=2e-2), (loss1, ref1)

    # Case 2: C >= T -> K stays (T, C) (clusters on lanes), original path.
    T2, C2 = 8, 16
    te2 = 0.1 * jax.random.normal(k3, (T2, D), dtype=jnp.float32)
    cc2 = 0.1 * jax.random.normal(k4, (C2, D), dtype=jnp.float32)
    loss2 = jax.block_until_ready(tcr_loss(te2, cc2, **params))
    ref2 = jax.block_until_ready(_tcr_loss_ref(te2, cc2, **params))
    assert jnp.allclose(loss2, ref2, rtol=1e-2, atol=2e-2), (loss2, ref2)

    print("KERNEL_OK")
</pallas_src>

<mosaic_0001>
module attributes {stable_mosaic.version = 11 : i64} {
  func.func @_tcr_kernel(%arg0: memref<50x32xf32, #tpu.memory_space<vmem>>, %arg1: memref<10x32xf32, #tpu.memory_space<vmem>>, %arg2: memref<1x1xf32, #tpu.memory_space<vmem>>) attributes {dimension_semantics = [], scalar_prefetch = 0 : i64, scratch_operands = 0 : i64, tpu.core_type = #tpu.core_type<tc>} {
    %c0 = arith.constant 0 : index
    %c0_0 = arith.constant 0 : index
    %0 = vector.load %arg0[%c0, %c0_0] : memref<50x32xf32, #tpu.memory_space<vmem>>, vector<50x32xf32>
    %c0_1 = arith.constant 0 : index
    %c0_2 = arith.constant 0 : index
    %1 = vector.load %arg1[%c0_1, %c0_2] : memref<10x32xf32, #tpu.memory_space<vmem>>, vector<10x32xf32>
    %cst = arith.constant 2.000000e-02 : f32
    %2 = vector.broadcast %cst : f32 to vector<1x50xf32>
    %3 = arith.mulf %1, %1 : vector<10x32xf32>
    %cst_3 = arith.constant dense<0.000000e+00> : vector<10xf32>
    %4 = vector.multi_reduction <add>, %3, %cst_3 [1] : vector<10x32xf32> to vector<10xf32>
    %5 = vector.shape_cast %4 : vector<10xf32> to vector<10x1xf32>
    %cst_4 = arith.constant 1.000000e+00 : f32
    %6 = vector.broadcast %cst_4 : f32 to vector<1x32xf32>
    %7 = arith.mulf %0, %0 : vector<50x32xf32>
    %cst_5 = arith.constant dense<0.000000e+00> : vector<1x50xf32>
    %8 = tpu.matmul %6, %7, %cst_5 {dimension_numbers = #tpu.dot_dimension_numbers<[1], [1], [0], [0], [0, 0, 1, 0], [], []>} : vector<1x32xf32>, vector<50x32xf32>, vector<1x50xf32> -> vector<1x50xf32>
    %cst_6 = arith.constant dense<0.000000e+00> : vector<10x50xf32>
    %9 = tpu.matmul %1, %0, %cst_6 {dimension_numbers = #tpu.dot_dimension_numbers<[1], [1], [0], [0], [0, 0, 1, 0], [], []>} : vector<10x32xf32>, vector<50x32xf32>, vector<10x50xf32> -> vector<10x50xf32>
    %10 = vector.broadcast %5 : vector<10x1xf32> to vector<10x50xf32>
    %11 = vector.broadcast %8 : vector<1x50xf32> to vector<10x50xf32>
    %12 = arith.addf %10, %11 : vector<10x50xf32>
    %cst_7 = arith.constant 2.000000e+00 : f32
    %13 = vector.broadcast %cst_7 : f32 to vector<10x50xf32>
    %14 = arith.mulf %13, %9 : vector<10x50xf32>
    %15 = arith.subf %12, %14 : vector<10x50xf32>
    %cst_8 = arith.constant 0.000000e+00 : f32
    %16 = vector.broadcast %cst_8 : f32 to vector<10x50xf32>
    %17 = arith.maximumf %15, %16 : vector<10x50xf32>
    %18 = math.sqrt %17 : vector<10x50xf32>
    %cst_9 = arith.constant 0.000000e+00 : f32
    %19 = vector.broadcast %cst_9 : f32 to vector<10x50xf32>
    %20 = arith.subf %19, %18 : vector<10x50xf32>
    %cst_10 = arith.constant 2.000000e+01 : f32
    %21 = vector.broadcast %cst_10 : f32 to vector<10x50xf32>
    %22 = arith.mulf %20, %21 : vector<10x50xf32>
    %23 = math.exp %22 : vector<10x50xf32>
    %24 = vector.broadcast %2 : vector<1x50xf32> to vector<10x50xf32>
    %25 = arith.mulf %23, %24 : vector<10x50xf32>
    %cst_11 = arith.constant dense<0.000000e+00> : vector<10xf32>
    %26 = vector.multi_reduction <add>, %25, %cst_11 [1] : vector<10x50xf32> to vector<10xf32>
    %27 = vector.shape_cast %26 : vector<10xf32> to vector<10x1xf32>
    %cst_12 = arith.constant 1.000000e-16 : f32
    %28 = vector.broadcast %cst_12 : f32 to vector<10x1xf32>
    %29 = arith.addf %27, %28 : vector<10x1xf32>
    %cst_13 = arith.constant 1.000000e-01 : f32
    %30 = vector.broadcast %cst_13 : f32 to vector<10x1xf32>
    %31 = arith.divf %30, %29 : vector<10x1xf32>
    %32 = vector.broadcast %31 : vector<10x1xf32> to vector<10x50xf32>
    %33 = arith.mulf %23, %32 : vector<10x50xf32>
    %cst_14 = arith.constant dense<0.000000e+00> : vector<50xf32>
    %34 = vector.multi_reduction <add>, %33, %cst_14 [0] : vector<10x50xf32> to vector<50xf32>
    %35 = vector.shape_cast %34 : vector<50xf32> to vector<1x50xf32>
    %cst_15 = arith.constant 1.000000e-16 : f32
    %36 = vector.broadcast %cst_15 : f32 to vector<1x50xf32>
    %37 = arith.addf %35, %36 : vector<1x50xf32>
    %cst_16 = arith.constant 2.000000e-02 : f32
    %38 = vector.broadcast %cst_16 : f32 to vector<1x50xf32>
    %39 = arith.divf %38, %37 : vector<1x50xf32>
    %40 = vector.broadcast %39 : vector<1x50xf32> to vector<10x50xf32>
    %41 = arith.mulf %23, %40 : vector<10x50xf32>
    %cst_17 = arith.constant dense<0.000000e+00> : vector<10xf32>
    %42 = vector.multi_reduction <add>, %41, %cst_17 [1] : vector<10x50xf32> to vector<10xf32>
    %43 = vector.shape_cast %42 : vector<10xf32> to vector<10x1xf32>
    %44 = arith.mulf %31, %43 : vector<10x1xf32>
    %cst_18 = arith.constant 1.000000e-01 : f32
    %45 = vector.broadcast %cst_18 : f32 to vector<10x1xf32>
    %46 = arith.subf %44, %45 : vector<10x1xf32>
    %47 = math.absf %46 : vector<10x1xf32>
    %48 = vector.shape_cast %47 : vector<10x1xf32> to vector<1x10x1xf32>
    %cst_19 = arith.constant dense<0.000000e+00> : vector<1xf32>
    %49 = vector.multi_reduction <add>, %48, %cst_19 [1, 2] : vector<1x10x1xf32> to vector<1xf32>
    %50 = vector.shape_cast %49 : vector<1xf32> to vector<1x1x1xf32>
    %51 = vector.extract %50[0, 0, 0] : f32 from vector<1x1x1xf32>
    %cst_20 = arith.constant 1.000000e+01 : f32
    %cst_21 = arith.constant 1.000000e-15 : f32
    %cst_22 = arith.constant 5.000000e+01 : f32
    %cst_23 = arith.constant 5.000000e-15 : f32
    %cst_24 = arith.constant 1.000000e-16 : f32
    %cst_25 = arith.constant 1.000000e-01 : f32
    %cst_26 = arith.constant 2.000000e-02 : f32
    %c0_i32 = arith.constant 0 : i32
    %52:4 = scf.while (%arg3 = %c0_i32, %arg4 = %51, %arg5 = %39, %arg6 = %31) : (i32, f32, vector<1x50xf32>, vector<10x1xf32>) -> (i32, f32, vector<1x50xf32>, vector<10x1xf32>) {
      %cst_45 = arith.constant 5.000000e-03 : f32
      %77 = arith.cmpf ogt, %arg4, %cst_45 : f32
      %c99_i32 = arith.constant 99 : i32
      %78 = arith.cmpi slt, %arg3, %c99_i32 : i32
      %79 = arith.andi %77, %78 : i1
      scf.condition(%79) %arg3, %arg4, %arg5, %arg6 : i32, f32, vector<1x50xf32>, vector<10x1xf32>
    } do {
    ^bb0(%arg3: i32, %arg4: f32, %arg5: vector<1x50xf32>, %arg6: vector<10x1xf32>):
      %c0_i32_45 = arith.constant 0 : i32
      %77 = vector.broadcast %arg5 : vector<1x50xf32> to vector<10x50xf32>
      %78 = arith.mulf %23, %77 : vector<10x50xf32>
      %cst_46 = arith.constant dense<0.000000e+00> : vector<10xf32>
      %79 = vector.multi_reduction <add>, %78, %cst_46 [1] : vector<10x50xf32> to vector<10xf32>
      %80 = vector.shape_cast %79 : vector<10xf32> to vector<10x1xf32>
      %81 = vector.broadcast %cst_20 : f32 to vector<10x1xf32>
      %82 = arith.mulf %80, %81 : vector<10x1xf32>
      %83 = vector.broadcast %cst_21 : f32 to vector<10x1xf32>
      %84 = arith.addf %82, %83 : vector<10x1xf32>
      %85 = tpu.reciprocal %84 {approx = true} : vector<10x1xf32> -> vector<10x1xf32>
      %86 = vector.broadcast %85 : vector<10x1xf32> to vector<10x50xf32>
      %87 = arith.mulf %23, %86 : vector<10x50xf32>
      %cst_47 = arith.constant dense<0.000000e+00> : vector<50xf32>
      %88 = vector.multi_reduction <add>, %87, %cst_47 [0] : vector<10x50xf32> to vector<50xf32>
      %89 = vector.shape_cast %88 : vector<50xf32> to vector<1x50xf32>
      %90 = vector.broadcast %cst_22 : f32 to vector<1x50xf32>
      %91 = arith.mulf %89, %90 : vector<1x50xf32>
      %92 = vector.broadcast %cst_23 : f32 to vector<1x50xf32>
      %93 = arith.addf %91, %92 : vector<1x50xf32>
      %94 = tpu.reciprocal %93 {approx = true} : vector<1x50xf32> -> vector<1x50xf32>
      %c1_i32 = arith.constant 1 : i32
      %95 = vector.broadcast %94 : vector<1x50xf32> to vector<10x50xf32>
      %96 = arith.mulf %23, %95 : vector<10x50xf32>
      %cst_48 = arith.constant dense<0.000000e+00> : vector<10xf32>
      %97 = vector.multi_reduction <add>, %96, %cst_48 [1] : vector<10x50xf32> to vector<10xf32>
      %98 = vector.shape_cast %97 : vector<10xf32> to vector<10x1xf32>
      %99 = vector.broadcast %cst_20 : f32 to vector<10x1xf32>
      %100 = arith.mulf %98, %99 : vector<10x1xf32>
      %101 = vector.broadcast %cst_21 : f32 to vector<10x1xf32>
      %102 = arith.addf %100, %101 : vector<10x1xf32>
      %103 = tpu.reciprocal %102 {approx = true} : vector<10x1xf32> -> vector<10x1xf32>
      %104 = vector.broadcast %103 : vector<10x1xf32> to vector<10x50xf32>
      %105 = arith.mulf %23, %104 : vector<10x50xf32>
      %cst_49 = arith.constant dense<0.000000e+00> : vector<50xf32>
      %106 = vector.multi_reduction <add>, %105, %cst_49 [0] : vector<10x50xf32> to vector<50xf32>
      %107 = vector.shape_cast %106 : vector<50xf32> to vector<1x50xf32>
      %108 = vector.broadcast %cst_22 : f32 to vector<1x50xf32>
      %109 = arith.mulf %107, %108 : vector<1x50xf32>
      %110 = vector.broadcast %cst_23 : f32 to vector<1x50xf32>
      %111 = arith.addf %109, %110 : vector<1x50xf32>
      %112 = tpu.reciprocal %111 {approx = true} : vector<1x50xf32> -> vector<1x50xf32>
      %c2_i32 = arith.constant 2 : i32
      %113 = vector.broadcast %112 : vector<1x50xf32> to vector<10x50xf32>
      %114 = arith.mulf %23, %113 : vector<10x50xf32>
      %cst_50 = arith.constant dense<0.000000e+00> : vector<10xf32>
      %115 = vector.multi_reduction <add>, %114, %cst_50 [1] : vector<10x50xf32> to vector<10xf32>
      %116 = vector.shape_cast %115 : vector<10xf32> to vector<10x1xf32>
      %117 = vector.broadcast %cst_20 : f32 to vector<10x1xf32>
      %118 = arith.mulf %116, %117 : vector<10x1xf32>
      %119 = vector.broadcast %cst_21 : f32 to vector<10x1xf32>
      %120 = arith.addf %118, %119 : vector<10x1xf32>
      %121 = tpu.reciprocal %120 {approx = true} : vector<10x1xf32> -> vector<10x1xf32>
      %122 = vector.broadcast %121 : vector<10x1xf32> to vector<10x50xf32>
      %123 = arith.mulf %23, %122 : vector<10x50xf32>
      %cst_51 = arith.constant dense<0.000000e+00> : vector<50xf32>
      %124 = vector.multi_reduction <add>, %123, %cst_51 [0] : vector<10x50xf32> to vector<50xf32>
      %125 = vector.shape_cast %124 : vector<50xf32> to vector<1x50xf32>
      %126 = vector.broadcast %cst_22 : f32 to vector<1x50xf32>
      %127 = arith.mulf %125, %126 : vector<1x50xf32>
      %128 = vector.broadcast %cst_23 : f32 to vector<1x50xf32>
      %129 = arith.addf %127, %128 : vector<1x50xf32>
      %130 = tpu.reciprocal %129 {approx = true} : vector<1x50xf32> -> vector<1x50xf32>
      %c3_i32 = arith.constant 3 : i32
      %131 = vector.broadcast %130 : vector<1x50xf32> to vector<10x50xf32>
      %132 = arith.mulf %23, %131 : vector<10x50xf32>
      %cst_52 = arith.constant dense<0.000000e+00> : vector<10xf32>
      %133 = vector.multi_reduction <add>, %132, %cst_52 [1] : vector<10x50xf32> to vector<10xf32>
      %134 = vector.shape_cast %133 : vector<10xf32> to vector<10x1xf32>
      %135 = vector.broadcast %cst_20 : f32 to vector<10x1xf32>
      %136 = arith.mulf %134, %135 : vector<10x1xf32>
      %137 = vector.broadcast %cst_21 : f32 to vector<10x1xf32>
      %138 = arith.addf %136, %137 : vector<10x1xf32>
      %139 = tpu.reciprocal %138 {approx = true} : vector<10x1xf32> -> vector<10x1xf32>
      %140 = vector.broadcast %139 : vector<10x1xf32> to vector<10x50xf32>
      %141 = arith.mulf %23, %140 : vector<10x50xf32>
      %cst_53 = arith.constant dense<0.000000e+00> : vector<50xf32>
      %142 = vector.multi_reduction <add>, %141, %cst_53 [0] : vector<10x50xf32> to vector<50xf32>
      %143 = vector.shape_cast %142 : vector<50xf32> to vector<1x50xf32>
      %144 = vector.broadcast %cst_22 : f32 to vector<1x50xf32>
      %145 = arith.mulf %143, %144 : vector<1x50xf32>
      %146 = vector.broadcast %cst_23 : f32 to vector<1x50xf32>
      %147 = arith.addf %145, %146 : vector<1x50xf32>
      %148 = tpu.reciprocal %147 {approx = true} : vector<1x50xf32> -> vector<1x50xf32>
      %c4_i32 = arith.constant 4 : i32
      %149 = vector.broadcast %148 : vector<1x50xf32> to vector<10x50xf32>
      %150 = arith.mulf %23, %149 : vector<10x50xf32>
      %cst_54 = arith.constant dense<0.000000e+00> : vector<10xf32>
      %151 = vector.multi_reduction <add>, %150, %cst_54 [1] : vector<10x50xf32> to vector<10xf32>
      %152 = vector.shape_cast %151 : vector<10xf32> to vector<10x1xf32>
      %153 = vector.broadcast %cst_20 : f32 to vector<10x1xf32>
      %154 = arith.mulf %152, %153 : vector<10x1xf32>
      %155 = vector.broadcast %cst_21 : f32 to vector<10x1xf32>
      %156 = arith.addf %154, %155 : vector<10x1xf32>
      %157 = tpu.reciprocal %156 {approx = true} : vector<10x1xf32> -> vector<10x1xf32>
      %158 = vector.broadcast %157 : vector<10x1xf32> to vector<10x50xf32>
      %159 = arith.mulf %23, %158 : vector<10x50xf32>
      %cst_55 = arith.constant dense<0.000000e+00> : vector<50xf32>
      %160 = vector.multi_reduction <add>, %159, %cst_55 [0] : vector<10x50xf32> to vector<50xf32>
      %161 = vector.shape_cast %160 : vector<50xf32> to vector<1x50xf32>
      %162 = vector.broadcast %cst_22 : f32 to vector<1x50xf32>
      %163 = arith.mulf %161, %162 : vector<1x50xf32>
      %164 = vector.broadcast %cst_23 : f32 to vector<1x50xf32>
      %165 = arith.addf %163, %164 : vector<1x50xf32>
      %166 = tpu.reciprocal %165 {approx = true} : vector<1x50xf32> -> vector<1x50xf32>
      %c5_i32 = arith.constant 5 : i32
      %167 = vector.broadcast %166 : vector<1x50xf32> to vector<10x50xf32>
      %168 = arith.mulf %23, %167 : vector<10x50xf32>
      %cst_56 = arith.constant dense<0.000000e+00> : vector<10xf32>
      %169 = vector.multi_reduction <add>, %168, %cst_56 [1] : vector<10x50xf32> to vector<10xf32>
      %170 = vector.shape_cast %169 : vector<10xf32> to vector<10x1xf32>
      %171 = vector.broadcast %cst_20 : f32 to vector<10x1xf32>
      %172 = arith.mulf %170, %171 : vector<10x1xf32>
      %173 = vector.broadcast %cst_21 : f32 to vector<10x1xf32>
      %174 = arith.addf %172, %173 : vector<10x1xf32>
      %175 = tpu.reciprocal %174 {approx = true} : vector<10x1xf32> -> vector<10x1xf32>
      %176 = vector.broadcast %175 : vector<10x1xf32> to vector<10x50xf32>
      %177 = arith.mulf %23, %176 : vector<10x50xf32>
      %cst_57 = arith.constant dense<0.000000e+00> : vector<50xf32>
      %178 = vector.multi_reduction <add>, %177, %cst_57 [0] : vector<10x50xf32> to vector<50xf32>
      %179 = vector.shape_cast %178 : vector<50xf32> to vector<1x50xf32>
      %180 = vector.broadcast %cst_22 : f32 to vector<1x50xf32>
      %181 = arith.mulf %179, %180 : vector<1x50xf32>
      %182 = vector.broadcast %cst_23 : f32 to vector<1x50xf32>
      %183 = arith.addf %181, %182 : vector<1x50xf32>
      %184 = tpu.reciprocal %183 {approx = true} : vector<1x50xf32> -> vector<1x50xf32>
      %c6_i32 = arith.constant 6 : i32
      %185 = vector.broadcast %184 : vector<1x50xf32> to vector<10x50xf32>
      %186 = arith.mulf %23, %185 : vector<10x50xf32>
      %cst_58 = arith.constant dense<0.000000e+00> : vector<10xf32>
      %187 = vector.multi_reduction <add>, %186, %cst_58 [1] : vector<10x50xf32> to vector<10xf32>
      %188 = vector.shape_cast %187 : vector<10xf32> to vector<10x1xf32>
      %189 = vector.broadcast %cst_20 : f32 to vector<10x1xf32>
      %190 = arith.mulf %188, %189 : vector<10x1xf32>
      %191 = vector.broadcast %cst_21 : f32 to vector<10x1xf32>
      %192 = arith.addf %190, %191 : vector<10x1xf32>
      %193 = tpu.reciprocal %192 {approx = true} : vector<10x1xf32> -> vector<10x1xf32>
      %194 = vector.broadcast %193 : vector<10x1xf32> to vector<10x50xf32>
      %195 = arith.mulf %23, %194 : vector<10x50xf32>
      %cst_59 = arith.constant dense<0.000000e+00> : vector<50xf32>
      %196 = vector.multi_reduction <add>, %195, %cst_59 [0] : vector<10x50xf32> to vector<50xf32>
      %197 = vector.shape_cast %196 : vector<50xf32> to vector<1x50xf32>
      %198 = vector.broadcast %cst_22 : f32 to vector<1x50xf32>
      %199 = arith.mulf %197, %198 : vector<1x50xf32>
      %200 = vector.broadcast %cst_23 : f32 to vector<1x50xf32>
      %201 = arith.addf %199, %200 : vector<1x50xf32>
      %202 = tpu.reciprocal %201 {approx = true} : vector<1x50xf32> -> vector<1x50xf32>
      %c7_i32 = arith.constant 7 : i32
      %203 = vector.broadcast %202 : vector<1x50xf32> to vector<10x50xf32>
      %204 = arith.mulf %23, %203 : vector<10x50xf32>
      %cst_60 = arith.constant dense<0.000000e+00> : vector<10xf32>
      %205 = vector.multi_reduction <add>, %204, %cst_60 [1] : vector<10x50xf32> to vector<10xf32>
      %206 = vector.shape_cast %205 : vector<10xf32> to vector<10x1xf32>
      %207 = vector.broadcast %cst_20 : f32 to vector<10x1xf32>
      %208 = arith.mulf %206, %207 : vector<10x1xf32>
      %209 = vector.broadcast %cst_21 : f32 to vector<10x1xf32>
      %210 = arith.addf %208, %209 : vector<10x1xf32>
      %211 = tpu.reciprocal %210 {approx = true} : vector<10x1xf32> -> vector<10x1xf32>
      %212 = vector.broadcast %211 : vector<10x1xf32> to vector<10x50xf32>
      %213 = arith.mulf %23, %212 : vector<10x50xf32>
      %cst_61 = arith.constant dense<0.000000e+00> : vector<50xf32>
      %214 = vector.multi_reduction <add>, %213, %cst_61 [0] : vector<10x50xf32> to vector<50xf32>
      %215 = vector.shape_cast %214 : vector<50xf32> to vector<1x50xf32>
      %216 = vector.broadcast %cst_22 : f32 to vector<1x50xf32>
      %217 = arith.mulf %215, %216 : vector<1x50xf32>
      %218 = vector.broadcast %cst_23 : f32 to vector<1x50xf32>
      %219 = arith.addf %217, %218 : vector<1x50xf32>
      %220 = tpu.reciprocal %219 {approx = true} : vector<1x50xf32> -> vector<1x50xf32>
      %c8_i32 = arith.constant 8 : i32
      %221 = vector.broadcast %220 : vector<1x50xf32> to vector<10x50xf32>
      %222 = arith.mulf %23, %221 : vector<10x50xf32>
      %cst_62 = arith.constant dense<0.000000e+00> : vector<10xf32>
      %223 = vector.multi_reduction <add>, %222, %cst_62 [1] : vector<10x50xf32> to vector<10xf32>
      %224 = vector.shape_cast %223 : vector<10xf32> to vector<10x1xf32>
      %225 = vector.broadcast %cst_20 : f32 to vector<10x1xf32>
      %226 = arith.mulf %224, %225 : vector<10x1xf32>
      %227 = vector.broadcast %cst_21 : f32 to vector<10x1xf32>
      %228 = arith.addf %226, %227 : vector<10x1xf32>
      %229 = tpu.reciprocal %228 {approx = true} : vector<10x1xf32> -> vector<10x1xf32>
      %230 = vector.broadcast %229 : vector<10x1xf32> to vector<10x50xf32>
      %231 = arith.mulf %23, %230 : vector<10x50xf32>
      %cst_63 = arith.constant dense<0.000000e+00> : vector<50xf32>
      %232 = vector.multi_reduction <add>, %231, %cst_63 [0] : vector<10x50xf32> to vector<50xf32>
      %233 = vector.shape_cast %232 : vector<50xf32> to vector<1x50xf32>
      %234 = vector.broadcast %cst_22 : f32 to vector<1x50xf32>
      %235 = arith.mulf %233, %234 : vector<1x50xf32>
      %236 = vector.broadcast %cst_23 : f32 to vector<1x50xf32>
      %237 = arith.addf %235, %236 : vector<1x50xf32>
      %238 = tpu.reciprocal %237 {approx = true} : vector<1x50xf32> -> vector<1x50xf32>
      %c9_i32 = arith.constant 9 : i32
      %239 = vector.broadcast %238 : vector<1x50xf32> to vector<10x50xf32>
      %240 = arith.mulf %23, %239 : vector<10x50xf32>
      %cst_64 = arith.constant dense<0.000000e+00> : vector<10xf32>
      %241 = vector.multi_reduction <add>, %240, %cst_64 [1] : vector<10x50xf32> to vector<10xf32>
      %242 = vector.shape_cast %241 : vector<10xf32> to vector<10x1xf32>
      %243 = vector.broadcast %cst_20 : f32 to vector<10x1xf32>
      %244 = arith.mulf %242, %243 : vector<10x1xf32>
      %245 = vector.broadcast %cst_21 : f32 to vector<10x1xf32>
      %246 = arith.addf %244, %245 : vector<10x1xf32>
      %247 = tpu.reciprocal %246 {approx = true} : vector<10x1xf32> -> vector<10x1xf32>
      %248 = vector.broadcast %247 : vector<10x1xf32> to vector<10x50xf32>
      %249 = arith.mulf %23, %248 : vector<10x50xf32>
      %cst_65 = arith.constant dense<0.000000e+00> : vector<50xf32>
      %250 = vector.multi_reduction <add>, %249, %cst_65 [0] : vector<10x50xf32> to vector<50xf32>
      %251 = vector.shape_cast %250 : vector<50xf32> to vector<1x50xf32>
      %252 = vector.broadcast %cst_22 : f32 to vector<1x50xf32>
      %253 = arith.mulf %251, %252 : vector<1x50xf32>
      %254 = vector.broadcast %cst_23 : f32 to vector<1x50xf32>
      %255 = arith.addf %253, %254 : vector<1x50xf32>
      %256 = tpu.reciprocal %255 {approx = true} : vector<1x50xf32> -> vector<1x50xf32>
      %c10_i32 = arith.constant 10 : i32
      %257 = vector.broadcast %256 : vector<1x50xf32> to vector<10x50xf32>
      %258 = arith.mulf %23, %257 : vector<10x50xf32>
      %cst_66 = arith.constant dense<0.000000e+00> : vector<10xf32>
      %259 = vector.multi_reduction <add>, %258, %cst_66 [1] : vector<10x50xf32> to vector<10xf32>
      %260 = vector.shape_cast %259 : vector<10xf32> to vector<10x1xf32>
      %261 = vector.broadcast %cst_20 : f32 to vector<10x1xf32>
      %262 = arith.mulf %260, %261 : vector<10x1xf32>
      %263 = vector.broadcast %cst_21 : f32 to vector<10x1xf32>
      %264 = arith.addf %262, %263 : vector<10x1xf32>
      %265 = tpu.reciprocal %264 {approx = true} : vector<10x1xf32> -> vector<10x1xf32>
      %266 = vector.broadcast %265 : vector<10x1xf32> to vector<10x50xf32>
      %267 = arith.mulf %23, %266 : vector<10x50xf32>
      %cst_67 = arith.constant dense<0.000000e+00> : vector<50xf32>
      %268 = vector.multi_reduction <add>, %267, %cst_67 [0] : vector<10x50xf32> to vector<50xf32>
      %269 = vector.shape_cast %268 : vector<50xf32> to vector<1x50xf32>
      %270 = vector.broadcast %cst_22 : f32 to vector<1x50xf32>
      %271 = arith.mulf %269, %270 : vector<1x50xf32>
      %272 = vector.broadcast %cst_23 : f32 to vector<1x50xf32>
      %273 = arith.addf %271, %272 : vector<1x50xf32>
      %274 = tpu.reciprocal %273 {approx = true} : vector<1x50xf32> -> vector<1x50xf32>
      %c11_i32 = arith.constant 11 : i32
      %275 = vector.broadcast %274 : vector<1x50xf32> to vector<10x50xf32>
      %276 = arith.mulf %23, %275 : vector<10x50xf32>
      %cst_68 = arith.constant dense<0.000000e+00> : vector<10xf32>
      %277 = vector.multi_reduction <add>, %276, %cst_68 [1] : vector<10x50xf32> to vector<10xf32>
      %278 = vector.shape_cast %277 : vector<10xf32> to vector<10x1xf32>
      %279 = vector.broadcast %cst_20 : f32 to vector<10x1xf32>
      %280 = arith.mulf %278, %279 : vector<10x1xf32>
      %281 = vector.broadcast %cst_21 : f32 to vector<10x1xf32>
      %282 = arith.addf %280, %281 : vector<10x1xf32>
      %283 = tpu.reciprocal %282 {approx = true} : vector<10x1xf32> -> vector<10x1xf32>
      %284 = vector.broadcast %283 : vector<10x1xf32> to vector<10x50xf32>
      %285 = arith.mulf %23, %284 : vector<10x50xf32>
      %cst_69 = arith.constant dense<0.000000e+00> : vector<50xf32>
      %286 = vector.multi_reduction <add>, %285, %cst_69 [0] : vector<10x50xf32> to vector<50xf32>
      %287 = vector.shape_cast %286 : vector<50xf32> to vector<1x50xf32>
      %288 = vector.broadcast %cst_22 : f32 to vector<1x50xf32>
      %289 = arith.mulf %287, %288 : vector<1x50xf32>
      %290 = vector.broadcast %cst_23 : f32 to vector<1x50xf32>
      %291 = arith.addf %289, %290 : vector<1x50xf32>
      %292 = tpu.reciprocal %291 {approx = true} : vector<1x50xf32> -> vector<1x50xf32>
      %c12_i32 = arith.constant 12 : i32
      %293 = vector.broadcast %292 : vector<1x50xf32> to vector<10x50xf32>
      %294 = arith.mulf %23, %293 : vector<10x50xf32>
      %cst_70 = arith.constant dense<0.000000e+00> : vector<10xf32>
      %295 = vector.multi_reduction <add>, %294, %cst_70 [1] : vector<10x50xf32> to vector<10xf32>
      %296 = vector.shape_cast %295 : vector<10xf32> to vector<10x1xf32>
      %297 = vector.broadcast %cst_20 : f32 to vector<10x1xf32>
      %298 = arith.mulf %296, %297 : vector<10x1xf32>
      %299 = vector.broadcast %cst_21 : f32 to vector<10x1xf32>
      %300 = arith.addf %298, %299 : vector<10x1xf32>
      %301 = tpu.reciprocal %300 {approx = true} : vector<10x1xf32> -> vector<10x1xf32>
      %302 = vector.broadcast %301 : vector<10x1xf32> to vector<10x50xf32>
      %303 = arith.mulf %23, %302 : vector<10x50xf32>
      %cst_71 = arith.constant dense<0.000000e+00> : vector<50xf32>
      %304 = vector.multi_reduction <add>, %303, %cst_71 [0] : vector<10x50xf32> to vector<50xf32>
      %305 = vector.shape_cast %304 : vector<50xf32> to vector<1x50xf32>
      %306 = vector.broadcast %cst_22 : f32 to vector<1x50xf32>
      %307 = arith.mulf %305, %306 : vector<1x50xf32>
      %308 = vector.broadcast %cst_23 : f32 to vector<1x50xf32>
      %309 = arith.addf %307, %308 : vector<1x50xf32>
      %310 = tpu.reciprocal %309 {approx = true} : vector<1x50xf32> -> vector<1x50xf32>
      %c13_i32 = arith.constant 13 : i32
      %311 = vector.broadcast %310 : vector<1x50xf32> to vector<10x50xf32>
      %312 = arith.mulf %23, %311 : vector<10x50xf32>
      %cst_72 = arith.constant dense<0.000000e+00> : vector<10xf32>
      %313 = vector.multi_reduction <add>, %312, %cst_72 [1] : vector<10x50xf32> to vector<10xf32>
      %314 = vector.shape_cast %313 : vector<10xf32> to vector<10x1xf32>
      %315 = vector.broadcast %cst_20 : f32 to vector<10x1xf32>
      %316 = arith.mulf %314, %315 : vector<10x1xf32>
      %317 = vector.broadcast %cst_21 : f32 to vector<10x1xf32>
      %318 = arith.addf %316, %317 : vector<10x1xf32>
      %319 = tpu.reciprocal %318 {approx = true} : vector<10x1xf32> -> vector<10x1xf32>
      %320 = vector.broadcast %319 : vector<10x1xf32> to vector<10x50xf32>
      %321 = arith.mulf %23, %320 : vector<10x50xf32>
      %cst_73 = arith.constant dense<0.000000e+00> : vector<50xf32>
      %322 = vector.multi_reduction <add>, %321, %cst_73 [0] : vector<10x50xf32> to vector<50xf32>
      %323 = vector.shape_cast %322 : vector<50xf32> to vector<1x50xf32>
      %324 = vector.broadcast %cst_22 : f32 to vector<1x50xf32>
      %325 = arith.mulf %323, %324 : vector<1x50xf32>
      %326 = vector.broadcast %cst_23 : f32 to vector<1x50xf32>
      %327 = arith.addf %325, %326 : vector<1x50xf32>
      %328 = tpu.reciprocal %327 {approx = true} : vector<1x50xf32> -> vector<1x50xf32>
      %c14_i32 = arith.constant 14 : i32
      %329 = vector.broadcast %328 : vector<1x50xf32> to vector<10x50xf32>
      %330 = arith.mulf %23, %329 : vector<10x50xf32>
      %cst_74 = arith.constant dense<0.000000e+00> : vector<10xf32>
      %331 = vector.multi_reduction <add>, %330, %cst_74 [1] : vector<10x50xf32> to vector<10xf32>
      %332 = vector.shape_cast %331 : vector<10xf32> to vector<10x1xf32>
      %333 = vector.broadcast %cst_20 : f32 to vector<10x1xf32>
      %334 = arith.mulf %332, %333 : vector<10x1xf32>
      %335 = vector.broadcast %cst_21 : f32 to vector<10x1xf32>
      %336 = arith.addf %334, %335 : vector<10x1xf32>
      %337 = tpu.reciprocal %336 {approx = true} : vector<10x1xf32> -> vector<10x1xf32>
      %338 = vector.broadcast %337 : vector<10x1xf32> to vector<10x50xf32>
      %339 = arith.mulf %23, %338 : vector<10x50xf32>
      %cst_75 = arith.constant dense<0.000000e+00> : vector<50xf32>
      %340 = vector.multi_reduction <add>, %339, %cst_75 [0] : vector<10x50xf32> to vector<50xf32>
      %341 = vector.shape_cast %340 : vector<50xf32> to vector<1x50xf32>
      %342 = vector.broadcast %cst_22 : f32 to vector<1x50xf32>
      %343 = arith.mulf %341, %342 : vector<1x50xf32>
      %344 = vector.broadcast %cst_23 : f32 to vector<1x50xf32>
      %345 = arith.addf %343, %344 : vector<1x50xf32>
      %346 = tpu.reciprocal %345 {approx = true} : vector<1x50xf32> -> vector<1x50xf32>
      %c15_i32 = arith.constant 15 : i32
      %347 = vector.broadcast %346 : vector<1x50xf32> to vector<10x50xf32>
      %348 = arith.mulf %23, %347 : vector<10x50xf32>
      %cst_76 = arith.constant dense<0.000000e+00> : vector<10xf32>
      %349 = vector.multi_reduction <add>, %348, %cst_76 [1] : vector<10x50xf32> to vector<10xf32>
      %350 = vector.shape_cast %349 : vector<10xf32> to vector<10x1xf32>
      %351 = vector.broadcast %cst_20 : f32 to vector<10x1xf32>
      %352 = arith.mulf %350, %351 : vector<10x1xf32>
      %353 = vector.broadcast %cst_21 : f32 to vector<10x1xf32>
      %354 = arith.addf %352, %353 : vector<10x1xf32>
      %355 = tpu.reciprocal %354 {approx = true} : vector<10x1xf32> -> vector<10x1xf32>
      %356 = vector.broadcast %355 : vector<10x1xf32> to vector<10x50xf32>
      %357 = arith.mulf %23, %356 : vector<10x50xf32>
      %cst_77 = arith.constant dense<0.000000e+00> : vector<50xf32>
      %358 = vector.multi_reduction <add>, %357, %cst_77 [0] : vector<10x50xf32> to vector<50xf32>
      %359 = vector.shape_cast %358 : vector<50xf32> to vector<1x50xf32>
      %360 = vector.broadcast %cst_22 : f32 to vector<1x50xf32>
      %361 = arith.mulf %359, %360 : vector<1x50xf32>
      %362 = vector.broadcast %cst_23 : f32 to vector<1x50xf32>
      %363 = arith.addf %361, %362 : vector<1x50xf32>
      %364 = tpu.reciprocal %363 {approx = true} : vector<1x50xf32> -> vector<1x50xf32>
      %c16_i32 = arith.constant 16 : i32
      %365 = vector.broadcast %364 : vector<1x50xf32> to vector<10x50xf32>
      %366 = arith.mulf %23, %365 : vector<10x50xf32>
      %cst_78 = arith.constant dense<0.000000e+00> : vector<10xf32>
      %367 = vector.multi_reduction <add>, %366, %cst_78 [1] : vector<10x50xf32> to vector<10xf32>
      %368 = vector.shape_cast %367 : vector<10xf32> to vector<10x1xf32>
      %369 = vector.broadcast %cst_20 : f32 to vector<10x1xf32>
      %370 = arith.mulf %368, %369 : vector<10x1xf32>
      %371 = vector.broadcast %cst_21 : f32 to vector<10x1xf32>
      %372 = arith.addf %370, %371 : vector<10x1xf32>
      %373 = tpu.reciprocal %372 {approx = true} : vector<10x1xf32> -> vector<10x1xf32>
      %374 = vector.broadcast %373 : vector<10x1xf32> to vector<10x50xf32>
      %375 = arith.mulf %23, %374 : vector<10x50xf32>
      %cst_79 = arith.constant dense<0.000000e+00> : vector<50xf32>
      %376 = vector.multi_reduction <add>, %375, %cst_79 [0] : vector<10x50xf32> to vector<50xf32>
      %377 = vector.shape_cast %376 : vector<50xf32> to vector<1x50xf32>
      %378 = vector.broadcast %cst_22 : f32 to vector<1x50xf32>
      %379 = arith.mulf %377, %378 : vector<1x50xf32>
      %380 = vector.broadcast %cst_23 : f32 to vector<1x50xf32>
      %381 = arith.addf %379, %380 : vector<1x50xf32>
      %382 = tpu.reciprocal %381 {approx = true} : vector<1x50xf32> -> vector<1x50xf32>
      %c17_i32 = arith.constant 17 : i32
      %383 = vector.broadcast %382 : vector<1x50xf32> to vector<10x50xf32>
      %384 = arith.mulf %23, %383 : vector<10x50xf32>
      %cst_80 = arith.constant dense<0.000000e+00> : vector<10xf32>
      %385 = vector.multi_reduction <add>, %384, %cst_80 [1] : vector<10x50xf32> to vector<10xf32>
      %386 = vector.shape_cast %385 : vector<10xf32> to vector<10x1xf32>
      %387 = vector.broadcast %cst_20 : f32 to vector<10x1xf32>
      %388 = arith.mulf %386, %387 : vector<10x1xf32>
      %389 = vector.broadcast %cst_21 : f32 to vector<10x1xf32>
      %390 = arith.addf %388, %389 : vector<10x1xf32>
      %391 = tpu.reciprocal %390 {approx = true} : vector<10x1xf32> -> vector<10x1xf32>
      %392 = vector.broadcast %391 : vector<10x1xf32> to vector<10x50xf32>
      %393 = arith.mulf %23, %392 : vector<10x50xf32>
      %cst_81 = arith.constant dense<0.000000e+00> : vector<50xf32>
      %394 = vector.multi_reduction <add>, %393, %cst_81 [0] : vector<10x50xf32> to vector<50xf32>
      %395 = vector.shape_cast %394 : vector<50xf32> to vector<1x50xf32>
      %396 = vector.broadcast %cst_22 : f32 to vector<1x50xf32>
      %397 = arith.mulf %395, %396 : vector<1x50xf32>
      %398 = vector.broadcast %cst_23 : f32 to vector<1x50xf32>
      %399 = arith.addf %397, %398 : vector<1x50xf32>
      %400 = tpu.reciprocal %399 {approx = true} : vector<1x50xf32> -> vector<1x50xf32>
      %c18_i32 = arith.constant 18 : i32
      %401 = vector.broadcast %400 : vector<1x50xf32> to vector<10x50xf32>
      %402 = arith.mulf %23, %401 : vector<10x50xf32>
      %cst_82 = arith.constant dense<0.000000e+00> : vector<10xf32>
      %403 = vector.multi_reduction <add>, %402, %cst_82 [1] : vector<10x50xf32> to vector<10xf32>
      %404 = vector.shape_cast %403 : vector<10xf32> to vector<10x1xf32>
      %405 = vector.broadcast %cst_20 : f32 to vector<10x1xf32>
      %406 = arith.mulf %404, %405 : vector<10x1xf32>
      %407 = vector.broadcast %cst_21 : f32 to vector<10x1xf32>
      %408 = arith.addf %406, %407 : vector<10x1xf32>
      %409 = tpu.reciprocal %408 {approx = true} : vector<10x1xf32> -> vector<10x1xf32>
      %410 = vector.broadcast %409 : vector<10x1xf32> to vector<10x50xf32>
      %411 = arith.mulf %23, %410 : vector<10x50xf32>
      %cst_83 = arith.constant dense<0.000000e+00> : vector<50xf32>
      %412 = vector.multi_reduction <add>, %411, %cst_83 [0] : vector<10x50xf32> to vector<50xf32>
      %413 = vector.shape_cast %412 : vector<50xf32> to vector<1x50xf32>
      %414 = vector.broadcast %cst_22 : f32 to vector<1x50xf32>
      %415 = arith.mulf %413, %414 : vector<1x50xf32>
      %416 = vector.broadcast %cst_23 : f32 to vector<1x50xf32>
      %417 = arith.addf %415, %416 : vector<1x50xf32>
      %418 = tpu.reciprocal %417 {approx = true} : vector<1x50xf32> -> vector<1x50xf32>
      %c19_i32 = arith.constant 19 : i32
      %419 = vector.broadcast %418 : vector<1x50xf32> to vector<10x50xf32>
      %420 = arith.mulf %23, %419 : vector<10x50xf32>
      %cst_84 = arith.constant dense<0.000000e+00> : vector<10xf32>
      %421 = vector.multi_reduction <add>, %420, %cst_84 [1] : vector<10x50xf32> to vector<10xf32>
      %422 = vector.shape_cast %421 : vector<10xf32> to vector<10x1xf32>
      %423 = vector.broadcast %cst_20 : f32 to vector<10x1xf32>
      %424 = arith.mulf %422, %423 : vector<10x1xf32>
      %425 = vector.broadcast %cst_21 : f32 to vector<10x1xf32>
      %426 = arith.addf %424, %425 : vector<10x1xf32>
      %427 = tpu.reciprocal %426 {approx = true} : vector<10x1xf32> -> vector<10x1xf32>
      %428 = vector.broadcast %427 : vector<10x1xf32> to vector<10x50xf32>
      %429 = arith.mulf %23, %428 : vector<10x50xf32>
      %cst_85 = arith.constant dense<0.000000e+00> : vector<50xf32>
      %430 = vector.multi_reduction <add>, %429, %cst_85 [0] : vector<10x50xf32> to vector<50xf32>
      %431 = vector.shape_cast %430 : vector<50xf32> to vector<1x50xf32>
      %432 = vector.broadcast %cst_22 : f32 to vector<1x50xf32>
      %433 = arith.mulf %431, %432 : vector<1x50xf32>
      %434 = vector.broadcast %cst_23 : f32 to vector<1x50xf32>
      %435 = arith.addf %433, %434 : vector<1x50xf32>
      %436 = tpu.reciprocal %435 {approx = true} : vector<1x50xf32> -> vector<1x50xf32>
      %c20_i32 = arith.constant 20 : i32
      %437 = vector.broadcast %436 : vector<1x50xf32> to vector<10x50xf32>
      %438 = arith.mulf %23, %437 : vector<10x50xf32>
      %cst_86 = arith.constant dense<0.000000e+00> : vector<10xf32>
      %439 = vector.multi_reduction <add>, %438, %cst_86 [1] : vector<10x50xf32> to vector<10xf32>
      %440 = vector.shape_cast %439 : vector<10xf32> to vector<10x1xf32>
      %441 = vector.broadcast %cst_20 : f32 to vector<10x1xf32>
      %442 = arith.mulf %440, %441 : vector<10x1xf32>
      %443 = vector.broadcast %cst_21 : f32 to vector<10x1xf32>
      %444 = arith.addf %442, %443 : vector<10x1xf32>
      %445 = tpu.reciprocal %444 {approx = true} : vector<10x1xf32> -> vector<10x1xf32>
      %446 = vector.broadcast %445 : vector<10x1xf32> to vector<10x50xf32>
      %447 = arith.mulf %23, %446 : vector<10x50xf32>
      %cst_87 = arith.constant dense<0.000000e+00> : vector<50xf32>
      %448 = vector.multi_reduction <add>, %447, %cst_87 [0] : vector<10x50xf32> to vector<50xf32>
      %449 = vector.shape_cast %448 : vector<50xf32> to vector<1x50xf32>
      %450 = vector.broadcast %cst_22 : f32 to vector<1x50xf32>
      %451 = arith.mulf %449, %450 : vector<1x50xf32>
      %452 = vector.broadcast %cst_23 : f32 to vector<1x50xf32>
      %453 = arith.addf %451, %452 : vector<1x50xf32>
      %454 = tpu.reciprocal %453 {approx = true} : vector<1x50xf32> -> vector<1x50xf32>
      %c21_i32 = arith.constant 21 : i32
      %455 = vector.broadcast %454 : vector<1x50xf32> to vector<10x50xf32>
      %456 = arith.mulf %23, %455 : vector<10x50xf32>
      %cst_88 = arith.constant dense<0.000000e+00> : vector<10xf32>
      %457 = vector.multi_reduction <add>, %456, %cst_88 [1] : vector<10x50xf32> to vector<10xf32>
      %458 = vector.shape_cast %457 : vector<10xf32> to vector<10x1xf32>
      %459 = vector.broadcast %cst_20 : f32 to vector<10x1xf32>
      %460 = arith.mulf %458, %459 : vector<10x1xf32>
      %461 = vector.broadcast %cst_21 : f32 to vector<10x1xf32>
      %462 = arith.addf %460, %461 : vector<10x1xf32>
      %463 = tpu.reciprocal %462 {approx = true} : vector<10x1xf32> -> vector<10x1xf32>
      %464 = vector.broadcast %463 : vector<10x1xf32> to vector<10x50xf32>
      %465 = arith.mulf %23, %464 : vector<10x50xf32>
      %cst_89 = arith.constant dense<0.000000e+00> : vector<50xf32>
      %466 = vector.multi_reduction <add>, %465, %cst_89 [0] : vector<10x50xf32> to vector<50xf32>
      %467 = vector.shape_cast %466 : vector<50xf32> to vector<1x50xf32>
      %468 = vector.broadcast %cst_22 : f32 to vector<1x50xf32>
      %469 = arith.mulf %467, %468 : vector<1x50xf32>
      %470 = vector.broadcast %cst_23 : f32 to vector<1x50xf32>
      %471 = arith.addf %469, %470 : vector<1x50xf32>
      %472 = tpu.reciprocal %471 {approx = true} : vector<1x50xf32> -> vector<1x50xf32>
      %c22_i32 = arith.constant 22 : i32
      %473 = vector.broadcast %472 : vector<1x50xf32> to vector<10x50xf32>
      %474 = arith.mulf %23, %473 : vector<10x50xf32>
      %cst_90 = arith.constant dense<0.000000e+00> : vector<10xf32>
      %475 = vector.multi_reduction <add>, %474, %cst_90 [1] : vector<10x50xf32> to vector<10xf32>
      %476 = vector.shape_cast %475 : vector<10xf32> to vector<10x1xf32>
      %477 = vector.broadcast %cst_20 : f32 to vector<10x1xf32>
      %478 = arith.mulf %476, %477 : vector<10x1xf32>
      %479 = vector.broadcast %cst_21 : f32 to vector<10x1xf32>
      %480 = arith.addf %478, %479 : vector<10x1xf32>
      %481 = tpu.reciprocal %480 {approx = true} : vector<10x1xf32> -> vector<10x1xf32>
      %482 = vector.broadcast %481 : vector<10x1xf32> to vector<10x50xf32>
      %483 = arith.mulf %23, %482 : vector<10x50xf32>
      %cst_91 = arith.constant dense<0.000000e+00> : vector<50xf32>
      %484 = vector.multi_reduction <add>, %483, %cst_91 [0] : vector<10x50xf32> to vector<50xf32>
      %485 = vector.shape_cast %484 : vector<50xf32> to vector<1x50xf32>
      %486 = vector.broadcast %cst_22 : f32 to vector<1x50xf32>
      %487 = arith.mulf %485, %486 : vector<1x50xf32>
      %488 = vector.broadcast %cst_23 : f32 to vector<1x50xf32>
      %489 = arith.addf %487, %488 : vector<1x50xf32>
      %490 = tpu.reciprocal %489 {approx = true} : vector<1x50xf32> -> vector<1x50xf32>
      %c23_i32 = arith.constant 23 : i32
      %491 = vector.broadcast %490 : vector<1x50xf32> to vector<10x50xf32>
      %492 = arith.mulf %23, %491 : vector<10x50xf32>
      %cst_92 = arith.constant dense<0.000000e+00> : vector<10xf32>
      %493 = vector.multi_reduction <add>, %492, %cst_92 [1] : vector<10x50xf32> to vector<10xf32>
      %494 = vector.shape_cast %493 : vector<10xf32> to vector<10x1xf32>
      %495 = vector.broadcast %cst_20 : f32 to vector<10x1xf32>
      %496 = arith.mulf %494, %495 : vector<10x1xf32>
      %497 = vector.broadcast %cst_21 : f32 to vector<10x1xf32>
      %498 = arith.addf %496, %497 : vector<10x1xf32>
      %499 = tpu.reciprocal %498 {approx = true} : vector<10x1xf32> -> vector<10x1xf32>
      %500 = vector.broadcast %499 : vector<10x1xf32> to vector<10x50xf32>
      %501 = arith.mulf %23, %500 : vector<10x50xf32>
      %cst_93 = arith.constant dense<0.000000e+00> : vector<50xf32>
      %502 = vector.multi_reduction <add>, %501, %cst_93 [0] : vector<10x50xf32> to vector<50xf32>
      %503 = vector.shape_cast %502 : vector<50xf32> to vector<1x50xf32>
      %504 = vector.broadcast %cst_22 : f32 to vector<1x50xf32>
      %505 = arith.mulf %503, %504 : vector<1x50xf32>
      %506 = vector.broadcast %cst_23 : f32 to vector<1x50xf32>
      %507 = arith.addf %505, %506 : vector<1x50xf32>
      %508 = tpu.reciprocal %507 {approx = true} : vector<1x50xf32> -> vector<1x50xf32>
      %c24_i32 = arith.constant 24 : i32
      %509 = vector.broadcast %508 : vector<1x50xf32> to vector<10x50xf32>
      %510 = arith.mulf %23, %509 : vector<10x50xf32>
      %cst_94 = arith.constant dense<0.000000e+00> : vector<10xf32>
      %511 = vector.multi_reduction <add>, %510, %cst_94 [1] : vector<10x50xf32> to vector<10xf32>
      %512 = vector.shape_cast %511 : vector<10xf32> to vector<10x1xf32>
      %513 = vector.broadcast %cst_20 : f32 to vector<10x1xf32>
      %514 = arith.mulf %512, %513 : vector<10x1xf32>
      %515 = vector.broadcast %cst_21 : f32 to vector<10x1xf32>
      %516 = arith.addf %514, %515 : vector<10x1xf32>
      %517 = tpu.reciprocal %516 {approx = true} : vector<10x1xf32> -> vector<10x1xf32>
      %518 = vector.broadcast %517 : vector<10x1xf32> to vector<10x50xf32>
      %519 = arith.mulf %23, %518 : vector<10x50xf32>
      %cst_95 = arith.constant dense<0.000000e+00> : vector<50xf32>
      %520 = vector.multi_reduction <add>, %519, %cst_95 [0] : vector<10x50xf32> to vector<50xf32>
      %521 = vector.shape_cast %520 : vector<50xf32> to vector<1x50xf32>
      %522 = vector.broadcast %cst_22 : f32 to vector<1x50xf32>
      %523 = arith.mulf %521, %522 : vector<1x50xf32>
      %524 = vector.broadcast %cst_23 : f32 to vector<1x50xf32>
      %525 = arith.addf %523, %524 : vector<1x50xf32>
      %526 = tpu.reciprocal %525 {approx = true} : vector<1x50xf32> -> vector<1x50xf32>
      %c25_i32 = arith.constant 25 : i32
      %527 = vector.broadcast %526 : vector<1x50xf32> to vector<10x50xf32>
      %528 = arith.mulf %23, %527 : vector<10x50xf32>
      %cst_96 = arith.constant dense<0.000000e+00> : vector<10xf32>
      %529 = vector.multi_reduction <add>, %528, %cst_96 [1] : vector<10x50xf32> to vector<10xf32>
      %530 = vector.shape_cast %529 : vector<10xf32> to vector<10x1xf32>
      %531 = vector.broadcast %cst_20 : f32 to vector<10x1xf32>
      %532 = arith.mulf %530, %531 : vector<10x1xf32>
      %533 = vector.broadcast %cst_21 : f32 to vector<10x1xf32>
      %534 = arith.addf %532, %533 : vector<10x1xf32>
      %535 = tpu.reciprocal %534 {approx = true} : vector<10x1xf32> -> vector<10x1xf32>
      %536 = vector.broadcast %535 : vector<10x1xf32> to vector<10x50xf32>
      %537 = arith.mulf %23, %536 : vector<10x50xf32>
      %cst_97 = arith.constant dense<0.000000e+00> : vector<50xf32>
      %538 = vector.multi_reduction <add>, %537, %cst_97 [0] : vector<10x50xf32> to vector<50xf32>
      %539 = vector.shape_cast %538 : vector<50xf32> to vector<1x50xf32>
      %540 = vector.broadcast %cst_22 : f32 to vector<1x50xf32>
      %541 = arith.mulf %539, %540 : vector<1x50xf32>
      %542 = vector.broadcast %cst_23 : f32 to vector<1x50xf32>
      %543 = arith.addf %541, %542 : vector<1x50xf32>
      %544 = tpu.reciprocal %543 {approx = true} : vector<1x50xf32> -> vector<1x50xf32>
      %c26_i32 = arith.constant 26 : i32
      %545 = vector.broadcast %544 : vector<1x50xf32> to vector<10x50xf32>
      %546 = arith.mulf %23, %545 : vector<10x50xf32>
      %cst_98 = arith.constant dense<0.000000e+00> : vector<10xf32>
      %547 = vector.multi_reduction <add>, %546, %cst_98 [1] : vector<10x50xf32> to vector<10xf32>
      %548 = vector.shape_cast %547 : vector<10xf32> to vector<10x1xf32>
      %549 = vector.broadcast %cst_20 : f32 to vector<10x1xf32>
      %550 = arith.mulf %548, %549 : vector<10x1xf32>
      %551 = vector.broadcast %cst_21 : f32 to vector<10x1xf32>
      %552 = arith.addf %550, %551 : vector<10x1xf32>
      %553 = tpu.reciprocal %552 {approx = true} : vector<10x1xf32> -> vector<10x1xf32>
      %554 = vector.broadcast %553 : vector<10x1xf32> to vector<10x50xf32>
      %555 = arith.mulf %23, %554 : vector<10x50xf32>
      %cst_99 = arith.constant dense<0.000000e+00> : vector<50xf32>
      %556 = vector.multi_reduction <add>, %555, %cst_99 [0] : vector<10x50xf32> to vector<50xf32>
      %557 = vector.shape_cast %556 : vector<50xf32> to vector<1x50xf32>
      %558 = vector.broadcast %cst_22 : f32 to vector<1x50xf32>
      %559 = arith.mulf %557, %558 : vector<1x50xf32>
      %560 = vector.broadcast %cst_23 : f32 to vector<1x50xf32>
      %561 = arith.addf %559, %560 : vector<1x50xf32>
      %562 = tpu.reciprocal %561 {approx = true} : vector<1x50xf32> -> vector<1x50xf32>
      %c27_i32 = arith.constant 27 : i32
      %563 = vector.broadcast %562 : vector<1x50xf32> to vector<10x50xf32>
      %564 = arith.mulf %23, %563 : vector<10x50xf32>
      %cst_100 = arith.constant dense<0.000000e+00> : vector<10xf32>
      %565 = vector.multi_reduction <add>, %564, %cst_100 [1] : vector<10x50xf32> to vector<10xf32>
      %566 = vector.shape_cast %565 : vector<10xf32> to vector<10x1xf32>
      %567 = vector.broadcast %cst_20 : f32 to vector<10x1xf32>
      %568 = arith.mulf %566, %567 : vector<10x1xf32>
      %569 = vector.broadcast %cst_21 : f32 to vector<10x1xf32>
      %570 = arith.addf %568, %569 : vector<10x1xf32>
      %571 = tpu.reciprocal %570 {approx = true} : vector<10x1xf32> -> vector<10x1xf32>
      %572 = vector.broadcast %571 : vector<10x1xf32> to vector<10x50xf32>
      %573 = arith.mulf %23, %572 : vector<10x50xf32>
      %cst_101 = arith.constant dense<0.000000e+00> : vector<50xf32>
      %574 = vector.multi_reduction <add>, %573, %cst_101 [0] : vector<10x50xf32> to vector<50xf32>
      %575 = vector.shape_cast %574 : vector<50xf32> to vector<1x50xf32>
      %576 = vector.broadcast %cst_22 : f32 to vector<1x50xf32>
      %577 = arith.mulf %575, %576 : vector<1x50xf32>
      %578 = vector.broadcast %cst_23 : f32 to vector<1x50xf32>
      %579 = arith.addf %577, %578 : vector<1x50xf32>
      %580 = tpu.reciprocal %579 {approx = true} : vector<1x50xf32> -> vector<1x50xf32>
      %c28_i32 = arith.constant 28 : i32
      %581 = vector.broadcast %580 : vector<1x50xf32> to vector<10x50xf32>
      %582 = arith.mulf %23, %581 : vector<10x50xf32>
      %cst_102 = arith.constant dense<0.000000e+00> : vector<10xf32>
      %583 = vector.multi_reduction <add>, %582, %cst_102 [1] : vector<10x50xf32> to vector<10xf32>
      %584 = vector.shape_cast %583 : vector<10xf32> to vector<10x1xf32>
      %585 = vector.broadcast %cst_20 : f32 to vector<10x1xf32>
      %586 = arith.mulf %584, %585 : vector<10x1xf32>
      %587 = vector.broadcast %cst_21 : f32 to vector<10x1xf32>
      %588 = arith.addf %586, %587 : vector<10x1xf32>
      %589 = tpu.reciprocal %588 {approx = true} : vector<10x1xf32> -> vector<10x1xf32>
      %590 = vector.broadcast %589 : vector<10x1xf32> to vector<10x50xf32>
      %591 = arith.mulf %23, %590 : vector<10x50xf32>
      %cst_103 = arith.constant dense<0.000000e+00> : vector<50xf32>
      %592 = vector.multi_reduction <add>, %591, %cst_103 [0] : vector<10x50xf32> to vector<50xf32>
      %593 = vector.shape_cast %592 : vector<50xf32> to vector<1x50xf32>
      %594 = vector.broadcast %cst_22 : f32 to vector<1x50xf32>
      %595 = arith.mulf %593, %594 : vector<1x50xf32>
      %596 = vector.broadcast %cst_23 : f32 to vector<1x50xf32>
      %597 = arith.addf %595, %596 : vector<1x50xf32>
      %598 = tpu.reciprocal %597 {approx = true} : vector<1x50xf32> -> vector<1x50xf32>
      %c29_i32 = arith.constant 29 : i32
      %599 = vector.broadcast %598 : vector<1x50xf32> to vector<10x50xf32>
      %600 = arith.mulf %23, %599 : vector<10x50xf32>
      %cst_104 = arith.constant dense<0.000000e+00> : vector<10xf32>
      %601 = vector.multi_reduction <add>, %600, %cst_104 [1] : vector<10x50xf32> to vector<10xf32>
      %602 = vector.shape_cast %601 : vector<10xf32> to vector<10x1xf32>
      %603 = vector.broadcast %cst_20 : f32 to vector<10x1xf32>
      %604 = arith.mulf %602, %603 : vector<10x1xf32>
      %605 = vector.broadcast %cst_21 : f32 to vector<10x1xf32>
      %606 = arith.addf %604, %605 : vector<10x1xf32>
      %607 = tpu.reciprocal %606 {approx = true} : vector<10x1xf32> -> vector<10x1xf32>
      %608 = vector.broadcast %607 : vector<10x1xf32> to vector<10x50xf32>
      %609 = arith.mulf %23, %608 : vector<10x50xf32>
      %cst_105 = arith.constant dense<0.000000e+00> : vector<50xf32>
      %610 = vector.multi_reduction <add>, %609, %cst_105 [0] : vector<10x50xf32> to vector<50xf32>
      %611 = vector.shape_cast %610 : vector<50xf32> to vector<1x50xf32>
      %612 = vector.broadcast %cst_22 : f32 to vector<1x50xf32>
      %613 = arith.mulf %611, %612 : vector<1x50xf32>
      %614 = vector.broadcast %cst_23 : f32 to vector<1x50xf32>
      %615 = arith.addf %613, %614 : vector<1x50xf32>
      %616 = tpu.reciprocal %615 {approx = true} : vector<1x50xf32> -> vector<1x50xf32>
      %c30_i32 = arith.constant 30 : i32
      %617 = vector.broadcast %616 : vector<1x50xf32> to vector<10x50xf32>
      %618 = arith.mulf %23, %617 : vector<10x50xf32>
      %cst_106 = arith.constant dense<0.000000e+00> : vector<10xf32>
      %619 = vector.multi_reduction <add>, %618, %cst_106 [1] : vector<10x50xf32> to vector<10xf32>
      %620 = vector.shape_cast %619 : vector<10xf32> to vector<10x1xf32>
      %621 = vector.broadcast %cst_20 : f32 to vector<10x1xf32>
      %622 = arith.mulf %620, %621 : vector<10x1xf32>
      %623 = vector.broadcast %cst_21 : f32 to vector<10x1xf32>
      %624 = arith.addf %622, %623 : vector<10x1xf32>
      %625 = tpu.reciprocal %624 {approx = true} : vector<10x1xf32> -> vector<10x1xf32>
      %626 = vector.broadcast %625 : vector<10x1xf32> to vector<10x50xf32>
      %627 = arith.mulf %23, %626 : vector<10x50xf32>
      %cst_107 = arith.constant dense<0.000000e+00> : vector<50xf32>
      %628 = vector.multi_reduction <add>, %627, %cst_107 [0] : vector<10x50xf32> to vector<50xf32>
      %629 = vector.shape_cast %628 : vector<50xf32> to vector<1x50xf32>
      %630 = vector.broadcast %cst_22 : f32 to vector<1x50xf32>
      %631 = arith.mulf %629, %630 : vector<1x50xf32>
      %632 = vector.broadcast %cst_23 : f32 to vector<1x50xf32>
      %633 = arith.addf %631, %632 : vector<1x50xf32>
      %634 = tpu.reciprocal %633 {approx = true} : vector<1x50xf32> -> vector<1x50xf32>
      %c31_i32 = arith.constant 31 : i32
      %635 = vector.broadcast %634 : vector<1x50xf32> to vector<10x50xf32>
      %636 = arith.mulf %23, %635 : vector<10x50xf32>
      %cst_108 = arith.constant dense<0.000000e+00> : vector<10xf32>
      %637 = vector.multi_reduction <add>, %636, %cst_108 [1] : vector<10x50xf32> to vector<10xf32>
      %638 = vector.shape_cast %637 : vector<10xf32> to vector<10x1xf32>
      %639 = vector.broadcast %cst_20 : f32 to vector<10x1xf32>
      %640 = arith.mulf %638, %639 : vector<10x1xf32>
      %641 = vector.broadcast %cst_21 : f32 to vector<10x1xf32>
      %642 = arith.addf %640, %641 : vector<10x1xf32>
      %643 = tpu.reciprocal %642 {approx = true} : vector<10x1xf32> -> vector<10x1xf32>
      %644 = vector.broadcast %643 : vector<10x1xf32> to vector<10x50xf32>
      %645 = arith.mulf %23, %644 : vector<10x50xf32>
      %cst_109 = arith.constant dense<0.000000e+00> : vector<50xf32>
      %646 = vector.multi_reduction <add>, %645, %cst_109 [0] : vector<10x50xf32> to vector<50xf32>
      %647 = vector.shape_cast %646 : vector<50xf32> to vector<1x50xf32>
      %648 = vector.broadcast %cst_22 : f32 to vector<1x50xf32>
      %649 = arith.mulf %647, %648 : vector<1x50xf32>
      %650 = vector.broadcast %cst_23 : f32 to vector<1x50xf32>
      %651 = arith.addf %649, %650 : vector<1x50xf32>
      %652 = tpu.reciprocal %651 {approx = true} : vector<1x50xf32> -> vector<1x50xf32>
      %c32_i32 = arith.constant 32 : i32
      %653 = vector.broadcast %652 : vector<1x50xf32> to vector<10x50xf32>
      %654 = arith.mulf %23, %653 : vector<10x50xf32>
      %cst_110 = arith.constant dense<0.000000e+00> : vector<10xf32>
      %655 = vector.multi_reduction <add>, %654, %cst_110 [1] : vector<10x50xf32> to vector<10xf32>
      %656 = vector.shape_cast %655 : vector<10xf32> to vector<10x1xf32>
      %657 = vector.broadcast %cst_20 : f32 to vector<10x1xf32>
      %658 = arith.mulf %656, %657 : vector<10x1xf32>
      %659 = vector.broadcast %cst_21 : f32 to vector<10x1xf32>
      %660 = arith.addf %658, %659 : vector<10x1xf32>
      %661 = tpu.reciprocal %660 {approx = true} : vector<10x1xf32> -> vector<10x1xf32>
      %662 = vector.broadcast %661 : vector<10x1xf32> to vector<10x50xf32>
      %663 = arith.mulf %23, %662 : vector<10x50xf32>
      %cst_111 = arith.constant dense<0.000000e+00> : vector<50xf32>
      %664 = vector.multi_reduction <add>, %663, %cst_111 [0] : vector<10x50xf32> to vector<50xf32>
      %665 = vector.shape_cast %664 : vector<50xf32> to vector<1x50xf32>
      %666 = vector.broadcast %cst_22 : f32 to vector<1x50xf32>
      %667 = arith.mulf %665, %666 : vector<1x50xf32>
      %668 = vector.broadcast %cst_23 : f32 to vector<1x50xf32>
      %669 = arith.addf %667, %668 : vector<1x50xf32>
      %670 = tpu.reciprocal %669 {approx = true} : vector<1x50xf32> -> vector<1x50xf32>
      %c33_i32 = arith.constant 33 : i32
      %671 = vector.broadcast %670 : vector<1x50xf32> to vector<10x50xf32>
      %672 = arith.mulf %23, %671 : vector<10x50xf32>
      %cst_112 = arith.constant dense<0.000000e+00> : vector<10xf32>
      %673 = vector.multi_reduction <add>, %672, %cst_112 [1] : vector<10x50xf32> to vector<10xf32>
      %674 = vector.shape_cast %673 : vector<10xf32> to vector<10x1xf32>
      %675 = vector.broadcast %cst_20 : f32 to vector<10x1xf32>
      %676 = arith.mulf %674, %675 : vector<10x1xf32>
      %677 = vector.broadcast %cst_21 : f32 to vector<10x1xf32>
      %678 = arith.addf %676, %677 : vector<10x1xf32>
      %679 = tpu.reciprocal %678 {approx = true} : vector<10x1xf32> -> vector<10x1xf32>
      %680 = vector.broadcast %679 : vector<10x1xf32> to vector<10x50xf32>
      %681 = arith.mulf %23, %680 : vector<10x50xf32>
      %cst_113 = arith.constant dense<0.000000e+00> : vector<50xf32>
      %682 = vector.multi_reduction <add>, %681, %cst_113 [0] : vector<10x50xf32> to vector<50xf32>
      %683 = vector.shape_cast %682 : vector<50xf32> to vector<1x50xf32>
      %684 = vector.broadcast %cst_22 : f32 to vector<1x50xf32>
      %685 = arith.mulf %683, %684 : vector<1x50xf32>
      %686 = vector.broadcast %cst_23 : f32 to vector<1x50xf32>
      %687 = arith.addf %685, %686 : vector<1x50xf32>
      %688 = tpu.reciprocal %687 {approx = true} : vector<1x50xf32> -> vector<1x50xf32>
      %c34_i32 = arith.constant 34 : i32
      %689 = vector.broadcast %688 : vector<1x50xf32> to vector<10x50xf32>
      %690 = arith.mulf %23, %689 : vector<10x50xf32>
      %cst_114 = arith.constant dense<0.000000e+00> : vector<10xf32>
      %691 = vector.multi_reduction <add>, %690, %cst_114 [1] : vector<10x50xf32> to vector<10xf32>
      %692 = vector.shape_cast %691 : vector<10xf32> to vector<10x1xf32>
      %693 = vector.broadcast %cst_20 : f32 to vector<10x1xf32>
      %694 = arith.mulf %692, %693 : vector<10x1xf32>
      %695 = vector.broadcast %cst_21 : f32 to vector<10x1xf32>
      %696 = arith.addf %694, %695 : vector<10x1xf32>
      %697 = tpu.reciprocal %696 {approx = true} : vector<10x1xf32> -> vector<10x1xf32>
      %698 = vector.broadcast %697 : vector<10x1xf32> to vector<10x50xf32>
      %699 = arith.mulf %23, %698 : vector<10x50xf32>
      %cst_115 = arith.constant dense<0.000000e+00> : vector<50xf32>
      %700 = vector.multi_reduction <add>, %699, %cst_115 [0] : vector<10x50xf32> to vector<50xf32>
      %701 = vector.shape_cast %700 : vector<50xf32> to vector<1x50xf32>
      %702 = vector.broadcast %cst_22 : f32 to vector<1x50xf32>
      %703 = arith.mulf %701, %702 : vector<1x50xf32>
      %704 = vector.broadcast %cst_23 : f32 to vector<1x50xf32>
      %705 = arith.addf %703, %704 : vector<1x50xf32>
      %706 = tpu.reciprocal %705 {approx = true} : vector<1x50xf32> -> vector<1x50xf32>
      %c35_i32 = arith.constant 35 : i32
      %707 = vector.broadcast %706 : vector<1x50xf32> to vector<10x50xf32>
      %708 = arith.mulf %23, %707 : vector<10x50xf32>
      %cst_116 = arith.constant dense<0.000000e+00> : vector<10xf32>
      %709 = vector.multi_reduction <add>, %708, %cst_116 [1] : vector<10x50xf32> to vector<10xf32>
      %710 = vector.shape_cast %709 : vector<10xf32> to vector<10x1xf32>
      %711 = vector.broadcast %cst_20 : f32 to vector<10x1xf32>
      %712 = arith.mulf %710, %711 : vector<10x1xf32>
      %713 = vector.broadcast %cst_21 : f32 to vector<10x1xf32>
      %714 = arith.addf %712, %713 : vector<10x1xf32>
      %715 = tpu.reciprocal %714 {approx = true} : vector<10x1xf32> -> vector<10x1xf32>
      %716 = vector.broadcast %715 : vector<10x1xf32> to vector<10x50xf32>
      %717 = arith.mulf %23, %716 : vector<10x50xf32>
      %cst_117 = arith.constant dense<0.000000e+00> : vector<50xf32>
      %718 = vector.multi_reduction <add>, %717, %cst_117 [0] : vector<10x50xf32> to vector<50xf32>
      %719 = vector.shape_cast %718 : vector<50xf32> to vector<1x50xf32>
      %720 = vector.broadcast %cst_22 : f32 to vector<1x50xf32>
      %721 = arith.mulf %719, %720 : vector<1x50xf32>
      %722 = vector.broadcast %cst_23 : f32 to vector<1x50xf32>
      %723 = arith.addf %721, %722 : vector<1x50xf32>
      %724 = tpu.reciprocal %723 {approx = true} : vector<1x50xf32> -> vector<1x50xf32>
      %c36_i32 = arith.constant 36 : i32
      %725 = vector.broadcast %724 : vector<1x50xf32> to vector<10x50xf32>
      %726 = arith.mulf %23, %725 : vector<10x50xf32>
      %cst_118 = arith.constant dense<0.000000e+00> : vector<10xf32>
      %727 = vector.multi_reduction <add>, %726, %cst_118 [1] : vector<10x50xf32> to vector<10xf32>
      %728 = vector.shape_cast %727 : vector<10xf32> to vector<10x1xf32>
      %729 = vector.broadcast %cst_20 : f32 to vector<10x1xf32>
      %730 = arith.mulf %728, %729 : vector<10x1xf32>
      %731 = vector.broadcast %cst_21 : f32 to vector<10x1xf32>
      %732 = arith.addf %730, %731 : vector<10x1xf32>
      %733 = tpu.reciprocal %732 {approx = true} : vector<10x1xf32> -> vector<10x1xf32>
      %734 = vector.broadcast %733 : vector<10x1xf32> to vector<10x50xf32>
      %735 = arith.mulf %23, %734 : vector<10x50xf32>
      %cst_119 = arith.constant dense<0.000000e+00> : vector<50xf32>
      %736 = vector.multi_reduction <add>, %735, %cst_119 [0] : vector<10x50xf32> to vector<50xf32>
      %737 = vector.shape_cast %736 : vector<50xf32> to vector<1x50xf32>
      %738 = vector.broadcast %cst_22 : f32 to vector<1x50xf32>
      %739 = arith.mulf %737, %738 : vector<1x50xf32>
      %740 = vector.broadcast %cst_23 : f32 to vector<1x50xf32>
      %741 = arith.addf %739, %740 : vector<1x50xf32>
      %742 = tpu.reciprocal %741 {approx = true} : vector<1x50xf32> -> vector<1x50xf32>
      %c37_i32 = arith.constant 37 : i32
      %743 = vector.broadcast %742 : vector<1x50xf32> to vector<10x50xf32>
      %744 = arith.mulf %23, %743 : vector<10x50xf32>
      %cst_120 = arith.constant dense<0.000000e+00> : vector<10xf32>
      %745 = vector.multi_reduction <add>, %744, %cst_120 [1] : vector<10x50xf32> to vector<10xf32>
      %746 = vector.shape_cast %745 : vector<10xf32> to vector<10x1xf32>
      %747 = vector.broadcast %cst_20 : f32 to vector<10x1xf32>
      %748 = arith.mulf %746, %747 : vector<10x1xf32>
      %749 = vector.broadcast %cst_21 : f32 to vector<10x1xf32>
      %750 = arith.addf %748, %749 : vector<10x1xf32>
      %751 = tpu.reciprocal %750 {approx = true} : vector<10x1xf32> -> vector<10x1xf32>
      %752 = vector.broadcast %751 : vector<10x1xf32> to vector<10x50xf32>
      %753 = arith.mulf %23, %752 : vector<10x50xf32>
      %cst_121 = arith.constant dense<0.000000e+00> : vector<50xf32>
      %754 = vector.multi_reduction <add>, %753, %cst_121 [0] : vector<10x50xf32> to vector<50xf32>
      %755 = vector.shape_cast %754 : vector<50xf32> to vector<1x50xf32>
      %756 = vector.broadcast %cst_22 : f32 to vector<1x50xf32>
      %757 = arith.mulf %755, %756 : vector<1x50xf32>
      %758 = vector.broadcast %cst_23 : f32 to vector<1x50xf32>
      %759 = arith.addf %757, %758 : vector<1x50xf32>
      %760 = tpu.reciprocal %759 {approx = true} : vector<1x50xf32> -> vector<1x50xf32>
      %c38_i32 = arith.constant 38 : i32
      %761 = vector.broadcast %760 : vector<1x50xf32> to vector<10x50xf32>
      %762 = arith.mulf %23, %761 : vector<10x50xf32>
      %cst_122 = arith.constant dense<0.000000e+00> : vector<10xf32>
      %763 = vector.multi_reduction <add>, %762, %cst_122 [1] : vector<10x50xf32> to vector<10xf32>
      %764 = vector.shape_cast %763 : vector<10xf32> to vector<10x1xf32>
      %765 = vector.broadcast %cst_20 : f32 to vector<10x1xf32>
      %766 = arith.mulf %764, %765 : vector<10x1xf32>
      %767 = vector.broadcast %cst_21 : f32 to vector<10x1xf32>
      %768 = arith.addf %766, %767 : vector<10x1xf32>
      %769 = tpu.reciprocal %768 {approx = true} : vector<10x1xf32> -> vector<10x1xf32>
      %770 = vector.broadcast %769 : vector<10x1xf32> to vector<10x50xf32>
      %771 = arith.mulf %23, %770 : vector<10x50xf32>
      %cst_123 = arith.constant dense<0.000000e+00> : vector<50xf32>
      %772 = vector.multi_reduction <add>, %771, %cst_123 [0] : vector<10x50xf32> to vector<50xf32>
      %773 = vector.shape_cast %772 : vector<50xf32> to vector<1x50xf32>
      %774 = vector.broadcast %cst_22 : f32 to vector<1x50xf32>
      %775 = arith.mulf %773, %774 : vector<1x50xf32>
      %776 = vector.broadcast %cst_23 : f32 to vector<1x50xf32>
      %777 = arith.addf %775, %776 : vector<1x50xf32>
      %778 = tpu.reciprocal %777 {approx = true} : vector<1x50xf32> -> vector<1x50xf32>
      %c39_i32 = arith.constant 39 : i32
      %779 = vector.broadcast %778 : vector<1x50xf32> to vector<10x50xf32>
      %780 = arith.mulf %23, %779 : vector<10x50xf32>
      %cst_124 = arith.constant dense<0.000000e+00> : vector<10xf32>
      %781 = vector.multi_reduction <add>, %780, %cst_124 [1] : vector<10x50xf32> to vector<10xf32>
      %782 = vector.shape_cast %781 : vector<10xf32> to vector<10x1xf32>
      %783 = vector.broadcast %cst_20 : f32 to vector<10x1xf32>
      %784 = arith.mulf %782, %783 : vector<10x1xf32>
      %785 = vector.broadcast %cst_21 : f32 to vector<10x1xf32>
      %786 = arith.addf %784, %785 : vector<10x1xf32>
      %787 = tpu.reciprocal %786 {approx = true} : vector<10x1xf32> -> vector<10x1xf32>
      %788 = vector.broadcast %787 : vector<10x1xf32> to vector<10x50xf32>
      %789 = arith.mulf %23, %788 : vector<10x50xf32>
      %cst_125 = arith.constant dense<0.000000e+00> : vector<50xf32>
      %790 = vector.multi_reduction <add>, %789, %cst_125 [0] : vector<10x50xf32> to vector<50xf32>
      %791 = vector.shape_cast %790 : vector<50xf32> to vector<1x50xf32>
      %792 = vector.broadcast %cst_22 : f32 to vector<1x50xf32>
      %793 = arith.mulf %791, %792 : vector<1x50xf32>
      %794 = vector.broadcast %cst_23 : f32 to vector<1x50xf32>
      %795 = arith.addf %793, %794 : vector<1x50xf32>
      %796 = tpu.reciprocal %795 {approx = true} : vector<1x50xf32> -> vector<1x50xf32>
      %c40_i32 = arith.constant 40 : i32
      %797 = vector.broadcast %796 : vector<1x50xf32> to vector<10x50xf32>
      %798 = arith.mulf %23, %797 : vector<10x50xf32>
      %cst_126 = arith.constant dense<0.000000e+00> : vector<10xf32>
      %799 = vector.multi_reduction <add>, %798, %cst_126 [1] : vector<10x50xf32> to vector<10xf32>
      %800 = vector.shape_cast %799 : vector<10xf32> to vector<10x1xf32>
      %801 = vector.broadcast %cst_20 : f32 to vector<10x1xf32>
      %802 = arith.mulf %800, %801 : vector<10x1xf32>
      %803 = vector.broadcast %cst_21 : f32 to vector<10x1xf32>
      %804 = arith.addf %802, %803 : vector<10x1xf32>
      %805 = tpu.reciprocal %804 {approx = true} : vector<10x1xf32> -> vector<10x1xf32>
      %806 = vector.broadcast %805 : vector<10x1xf32> to vector<10x50xf32>
      %807 = arith.mulf %23, %806 : vector<10x50xf32>
      %cst_127 = arith.constant dense<0.000000e+00> : vector<50xf32>
      %808 = vector.multi_reduction <add>, %807, %cst_127 [0] : vector<10x50xf32> to vector<50xf32>
      %809 = vector.shape_cast %808 : vector<50xf32> to vector<1x50xf32>
      %810 = vector.broadcast %cst_22 : f32 to vector<1x50xf32>
      %811 = arith.mulf %809, %810 : vector<1x50xf32>
      %812 = vector.broadcast %cst_23 : f32 to vector<1x50xf32>
      %813 = arith.addf %811, %812 : vector<1x50xf32>
      %814 = tpu.reciprocal %813 {approx = true} : vector<1x50xf32> -> vector<1x50xf32>
      %c41_i32 = arith.constant 41 : i32
      %815 = vector.broadcast %814 : vector<1x50xf32> to vector<10x50xf32>
      %816 = arith.mulf %23, %815 : vector<10x50xf32>
      %cst_128 = arith.constant dense<0.000000e+00> : vector<10xf32>
      %817 = vector.multi_reduction <add>, %816, %cst_128 [1] : vector<10x50xf32> to vector<10xf32>
      %818 = vector.shape_cast %817 : vector<10xf32> to vector<10x1xf32>
      %819 = vector.broadcast %cst_20 : f32 to vector<10x1xf32>
      %820 = arith.mulf %818, %819 : vector<10x1xf32>
      %821 = vector.broadcast %cst_21 : f32 to vector<10x1xf32>
      %822 = arith.addf %820, %821 : vector<10x1xf32>
      %823 = tpu.reciprocal %822 {approx = true} : vector<10x1xf32> -> vector<10x1xf32>
      %824 = vector.broadcast %823 : vector<10x1xf32> to vector<10x50xf32>
      %825 = arith.mulf %23, %824 : vector<10x50xf32>
      %cst_129 = arith.constant dense<0.000000e+00> : vector<50xf32>
      %826 = vector.multi_reduction <add>, %825, %cst_129 [0] : vector<10x50xf32> to vector<50xf32>
      %827 = vector.shape_cast %826 : vector<50xf32> to vector<1x50xf32>
      %828 = vector.broadcast %cst_22 : f32 to vector<1x50xf32>
      %829 = arith.mulf %827, %828 : vector<1x50xf32>
      %830 = vector.broadcast %cst_23 : f32 to vector<1x50xf32>
      %831 = arith.addf %829, %830 : vector<1x50xf32>
      %832 = tpu.reciprocal %831 {approx = true} : vector<1x50xf32> -> vector<1x50xf32>
      %c42_i32 = arith.constant 42 : i32
      %833 = vector.broadcast %832 : vector<1x50xf32> to vector<10x50xf32>
      %834 = arith.mulf %23, %833 : vector<10x50xf32>
      %cst_130 = arith.constant dense<0.000000e+00> : vector<10xf32>
      %835 = vector.multi_reduction <add>, %834, %cst_130 [1] : vector<10x50xf32> to vector<10xf32>
      %836 = vector.shape_cast %835 : vector<10xf32> to vector<10x1xf32>
      %837 = vector.broadcast %cst_20 : f32 to vector<10x1xf32>
      %838 = arith.mulf %836, %837 : vector<10x1xf32>
      %839 = vector.broadcast %cst_21 : f32 to vector<10x1xf32>
      %840 = arith.addf %838, %839 : vector<10x1xf32>
      %841 = tpu.reciprocal %840 {approx = true} : vector<10x1xf32> -> vector<10x1xf32>
      %842 = vector.broadcast %841 : vector<10x1xf32> to vector<10x50xf32>
      %843 = arith.mulf %23, %842 : vector<10x50xf32>
      %cst_131 = arith.constant dense<0.000000e+00> : vector<50xf32>
      %844 = vector.multi_reduction <add>, %843, %cst_131 [0] : vector<10x50xf32> to vector<50xf32>
      %845 = vector.shape_cast %844 : vector<50xf32> to vector<1x50xf32>
      %846 = vector.broadcast %cst_22 : f32 to vector<1x50xf32>
      %847 = arith.mulf %845, %846 : vector<1x50xf32>
      %848 = vector.broadcast %cst_23 : f32 to vector<1x50xf32>
      %849 = arith.addf %847, %848 : vector<1x50xf32>
      %850 = tpu.reciprocal %849 {approx = true} : vector<1x50xf32> -> vector<1x50xf32>
      %c43_i32 = arith.constant 43 : i32
      %851 = vector.broadcast %850 : vector<1x50xf32> to vector<10x50xf32>
      %852 = arith.mulf %23, %851 : vector<10x50xf32>
      %cst_132 = arith.constant dense<0.000000e+00> : vector<10xf32>
      %853 = vector.multi_reduction <add>, %852, %cst_132 [1] : vector<10x50xf32> to vector<10xf32>
      %854 = vector.shape_cast %853 : vector<10xf32> to vector<10x1xf32>
      %855 = vector.broadcast %cst_20 : f32 to vector<10x1xf32>
      %856 = arith.mulf %854, %855 : vector<10x1xf32>
      %857 = vector.broadcast %cst_21 : f32 to vector<10x1xf32>
      %858 = arith.addf %856, %857 : vector<10x1xf32>
      %859 = tpu.reciprocal %858 {approx = true} : vector<10x1xf32> -> vector<10x1xf32>
      %860 = vector.broadcast %859 : vector<10x1xf32> to vector<10x50xf32>
      %861 = arith.mulf %23, %860 : vector<10x50xf32>
      %cst_133 = arith.constant dense<0.000000e+00> : vector<50xf32>
      %862 = vector.multi_reduction <add>, %861, %cst_133 [0] : vector<10x50xf32> to vector<50xf32>
      %863 = vector.shape_cast %862 : vector<50xf32> to vector<1x50xf32>
      %864 = vector.broadcast %cst_22 : f32 to vector<1x50xf32>
      %865 = arith.mulf %863, %864 : vector<1x50xf32>
      %866 = vector.broadcast %cst_23 : f32 to vector<1x50xf32>
      %867 = arith.addf %865, %866 : vector<1x50xf32>
      %868 = tpu.reciprocal %867 {approx = true} : vector<1x50xf32> -> vector<1x50xf32>
      %c44_i32 = arith.constant 44 : i32
      %869 = vector.broadcast %868 : vector<1x50xf32> to vector<10x50xf32>
      %870 = arith.mulf %23, %869 : vector<10x50xf32>
      %cst_134 = arith.constant dense<0.000000e+00> : vector<10xf32>
      %871 = vector.multi_reduction <add>, %870, %cst_134 [1] : vector<10x50xf32> to vector<10xf32>
      %872 = vector.shape_cast %871 : vector<10xf32> to vector<10x1xf32>
      %873 = vector.broadcast %cst_20 : f32 to vector<10x1xf32>
      %874 = arith.mulf %872, %873 : vector<10x1xf32>
      %875 = vector.broadcast %cst_21 : f32 to vector<10x1xf32>
      %876 = arith.addf %874, %875 : vector<10x1xf32>
      %877 = tpu.reciprocal %876 {approx = true} : vector<10x1xf32> -> vector<10x1xf32>
      %878 = vector.broadcast %877 : vector<10x1xf32> to vector<10x50xf32>
      %879 = arith.mulf %23, %878 : vector<10x50xf32>
      %cst_135 = arith.constant dense<0.000000e+00> : vector<50xf32>
      %880 = vector.multi_reduction <add>, %879, %cst_135 [0] : vector<10x50xf32> to vector<50xf32>
      %881 = vector.shape_cast %880 : vector<50xf32> to vector<1x50xf32>
      %882 = vector.broadcast %cst_22 : f32 to vector<1x50xf32>
      %883 = arith.mulf %881, %882 : vector<1x50xf32>
      %884 = vector.broadcast %cst_23 : f32 to vector<1x50xf32>
      %885 = arith.addf %883, %884 : vector<1x50xf32>
      %886 = tpu.reciprocal %885 {approx = true} : vector<1x50xf32> -> vector<1x50xf32>
      %c45_i32 = arith.constant 45 : i32
      %887 = vector.broadcast %886 : vector<1x50xf32> to vector<10x50xf32>
      %888 = arith.mulf %23, %887 : vector<10x50xf32>
      %cst_136 = arith.constant dense<0.000000e+00> : vector<10xf32>
      %889 = vector.multi_reduction <add>, %888, %cst_136 [1] : vector<10x50xf32> to vector<10xf32>
      %890 = vector.shape_cast %889 : vector<10xf32> to vector<10x1xf32>
      %891 = vector.broadcast %cst_20 : f32 to vector<10x1xf32>
      %892 = arith.mulf %890, %891 : vector<10x1xf32>
      %893 = vector.broadcast %cst_21 : f32 to vector<10x1xf32>
      %894 = arith.addf %892, %893 : vector<10x1xf32>
      %895 = tpu.reciprocal %894 {approx = true} : vector<10x1xf32> -> vector<10x1xf32>
      %896 = vector.broadcast %895 : vector<10x1xf32> to vector<10x50xf32>
      %897 = arith.mulf %23, %896 : vector<10x50xf32>
      %cst_137 = arith.constant dense<0.000000e+00> : vector<50xf32>
      %898 = vector.multi_reduction <add>, %897, %cst_137 [0] : vector<10x50xf32> to vector<50xf32>
      %899 = vector.shape_cast %898 : vector<50xf32> to vector<1x50xf32>
      %900 = vector.broadcast %cst_22 : f32 to vector<1x50xf32>
      %901 = arith.mulf %899, %900 : vector<1x50xf32>
      %902 = vector.broadcast %cst_23 : f32 to vector<1x50xf32>
      %903 = arith.addf %901, %902 : vector<1x50xf32>
      %904 = tpu.reciprocal %903 {approx = true} : vector<1x50xf32> -> vector<1x50xf32>
      %c46_i32 = arith.constant 46 : i32
      %905 = vector.broadcast %904 : vector<1x50xf32> to vector<10x50xf32>
      %906 = arith.mulf %23, %905 : vector<10x50xf32>
      %cst_138 = arith.constant dense<0.000000e+00> : vector<10xf32>
      %907 = vector.multi_reduction <add>, %906, %cst_138 [1] : vector<10x50xf32> to vector<10xf32>
      %908 = vector.shape_cast %907 : vector<10xf32> to vector<10x1xf32>
      %909 = vector.broadcast %cst_20 : f32 to vector<10x1xf32>
      %910 = arith.mulf %908, %909 : vector<10x1xf32>
      %911 = vector.broadcast %cst_21 : f32 to vector<10x1xf32>
      %912 = arith.addf %910, %911 : vector<10x1xf32>
      %913 = tpu.reciprocal %912 {approx = true} : vector<10x1xf32> -> vector<10x1xf32>
      %914 = vector.broadcast %913 : vector<10x1xf32> to vector<10x50xf32>
      %915 = arith.mulf %23, %914 : vector<10x50xf32>
      %cst_139 = arith.constant dense<0.000000e+00> : vector<50xf32>
      %916 = vector.multi_reduction <add>, %915, %cst_139 [0] : vector<10x50xf32> to vector<50xf32>
      %917 = vector.shape_cast %916 : vector<50xf32> to vector<1x50xf32>
      %918 = vector.broadcast %cst_22 : f32 to vector<1x50xf32>
      %919 = arith.mulf %917, %918 : vector<1x50xf32>
      %920 = vector.broadcast %cst_23 : f32 to vector<1x50xf32>
      %921 = arith.addf %919, %920 : vector<1x50xf32>
      %922 = tpu.reciprocal %921 {approx = true} : vector<1x50xf32> -> vector<1x50xf32>
      %c47_i32 = arith.constant 47 : i32
      %923 = vector.broadcast %922 : vector<1x50xf32> to vector<10x50xf32>
      %924 = arith.mulf %23, %923 : vector<10x50xf32>
      %cst_140 = arith.constant dense<0.000000e+00> : vector<10xf32>
      %925 = vector.multi_reduction <add>, %924, %cst_140 [1] : vector<10x50xf32> to vector<10xf32>
      %926 = vector.shape_cast %925 : vector<10xf32> to vector<10x1xf32>
      %927 = vector.broadcast %cst_20 : f32 to vector<10x1xf32>
      %928 = arith.mulf %926, %927 : vector<10x1xf32>
      %929 = vector.broadcast %cst_21 : f32 to vector<10x1xf32>
      %930 = arith.addf %928, %929 : vector<10x1xf32>
      %931 = tpu.reciprocal %930 {approx = true} : vector<10x1xf32> -> vector<10x1xf32>
      %932 = vector.broadcast %931 : vector<10x1xf32> to vector<10x50xf32>
      %933 = arith.mulf %23, %932 : vector<10x50xf32>
      %cst_141 = arith.constant dense<0.000000e+00> : vector<50xf32>
      %934 = vector.multi_reduction <add>, %933, %cst_141 [0] : vector<10x50xf32> to vector<50xf32>
      %935 = vector.shape_cast %934 : vector<50xf32> to vector<1x50xf32>
      %936 = vector.broadcast %cst_22 : f32 to vector<1x50xf32>
      %937 = arith.mulf %935, %936 : vector<1x50xf32>
      %938 = vector.broadcast %cst_23 : f32 to vector<1x50xf32>
      %939 = arith.addf %937, %938 : vector<1x50xf32>
      %940 = tpu.reciprocal %939 {approx = true} : vector<1x50xf32> -> vector<1x50xf32>
      %c48_i32 = arith.constant 48 : i32
      %941 = vector.broadcast %940 : vector<1x50xf32> to vector<10x50xf32>
      %942 = arith.mulf %23, %941 : vector<10x50xf32>
      %cst_142 = arith.constant dense<0.000000e+00> : vector<10xf32>
      %943 = vector.multi_reduction <add>, %942, %cst_142 [1] : vector<10x50xf32> to vector<10xf32>
      %944 = vector.shape_cast %943 : vector<10xf32> to vector<10x1xf32>
      %945 = vector.broadcast %cst_20 : f32 to vector<10x1xf32>
      %946 = arith.mulf %944, %945 : vector<10x1xf32>
      %947 = vector.broadcast %cst_21 : f32 to vector<10x1xf32>
      %948 = arith.addf %946, %947 : vector<10x1xf32>
      %949 = tpu.reciprocal %948 {approx = true} : vector<10x1xf32> -> vector<10x1xf32>
      %950 = vector.broadcast %949 : vector<10x1xf32> to vector<10x50xf32>
      %951 = arith.mulf %23, %950 : vector<10x50xf32>
      %cst_143 = arith.constant dense<0.000000e+00> : vector<50xf32>
      %952 = vector.multi_reduction <add>, %951, %cst_143 [0] : vector<10x50xf32> to vector<50xf32>
      %953 = vector.shape_cast %952 : vector<50xf32> to vector<1x50xf32>
      %954 = vector.broadcast %cst_22 : f32 to vector<1x50xf32>
      %955 = arith.mulf %953, %954 : vector<1x50xf32>
      %956 = vector.broadcast %cst_23 : f32 to vector<1x50xf32>
      %957 = arith.addf %955, %956 : vector<1x50xf32>
      %958 = tpu.reciprocal %957 {approx = true} : vector<1x50xf32> -> vector<1x50xf32>
      %c49_i32 = arith.constant 49 : i32
      %959 = vector.broadcast %958 : vector<1x50xf32> to vector<10x50xf32>
      %960 = arith.mulf %23, %959 : vector<10x50xf32>
      %cst_144 = arith.constant dense<0.000000e+00> : vector<10xf32>
      %961 = vector.multi_reduction <add>, %960, %cst_144 [1] : vector<10x50xf32> to vector<10xf32>
      %962 = vector.shape_cast %961 : vector<10xf32> to vector<10x1xf32>
      %963 = vector.broadcast %cst_24 : f32 to vector<10x1xf32>
      %964 = arith.addf %962, %963 : vector<10x1xf32>
      %965 = vector.broadcast %cst_25 : f32 to vector<10x1xf32>
      %966 = arith.divf %965, %964 : vector<10x1xf32>
      %967 = vector.broadcast %966 : vector<10x1xf32> to vector<10x50xf32>
      %968 = arith.mulf %23, %967 : vector<10x50xf32>
      %cst_145 = arith.constant dense<0.000000e+00> : vector<50xf32>
      %969 = vector.multi_reduction <add>, %968, %cst_145 [0] : vector<10x50xf32> to vector<50xf32>
      %970 = vector.shape_cast %969 : vector<50xf32> to vector<1x50xf32>
      %971 = vector.broadcast %cst_24 : f32 to vector<1x50xf32>
      %972 = arith.addf %970, %971 : vector<1x50xf32>
      %973 = vector.broadcast %cst_26 : f32 to vector<1x50xf32>
      %974 = arith.divf %973, %972 : vector<1x50xf32>
      %c1_i32_146 = arith.constant 1 : i32
      %975 = arith.addi %arg3, %c1_i32_146 : i32
      %976 = vector.broadcast %974 : vector<1x50xf32> to vector<10x50xf32>
      %977 = arith.mulf %23, %976 : vector<10x50xf32>
      %cst_147 = arith.constant dense<0.000000e+00> : vector<10xf32>
      %978 = vector.multi_reduction <add>, %977, %cst_147 [1] : vector<10x50xf32> to vector<10xf32>
      %979 = vector.shape_cast %978 : vector<10xf32> to vector<10x1xf32>
      %980 = arith.mulf %966, %979 : vector<10x1xf32>
      %981 = vector.broadcast %cst_25 : f32 to vector<10x1xf32>
      %982 = arith.subf %980, %981 : vector<10x1xf32>
      %983 = math.absf %982 : vector<10x1xf32>
      %984 = vector.shape_cast %983 : vector<10x1xf32> to vector<1x10x1xf32>
      %cst_148 = arith.constant dense<0.000000e+00> : vector<1xf32>
      %985 = vector.multi_reduction <add>, %984, %cst_148 [1, 2] : vector<1x10x1xf32> to vector<1xf32>
      %986 = vector.shape_cast %985 : vector<1xf32> to vector<1x1x1xf32>
      %987 = vector.extract %986[0, 0, 0] : f32 from vector<1x1x1xf32>
      scf.yield %975, %987, %974, %966 : i32, f32, vector<1x50xf32>, vector<10x1xf32>
    }
    %cst_27 = arith.constant 5.000000e-03 : f32
    %53 = arith.cmpf ogt, %52#1, %cst_27 : f32
    %54 = arith.extui %53 : i1 to i32
    %cst_28 = arith.constant 1.000000e+01 : f32
    %cst_29 = arith.constant 1.000000e-15 : f32
    %cst_30 = arith.constant 5.000000e+01 : f32
    %cst_31 = arith.constant 5.000000e-15 : f32
    %cst_32 = arith.constant 1.000000e-16 : f32
    %cst_33 = arith.constant 1.000000e-01 : f32
    %cst_34 = arith.constant 2.000000e-02 : f32
    %c0_i32_35 = arith.constant 0 : i32
    %55 = arith.cmpi ne, %54, %c0_i32_35 : i32
    %56:2 = scf.if %55 -> (vector<1x50xf32>, vector<10x1xf32>) {
      %c0_i32_45 = arith.constant 0 : i32
      %77 = vector.broadcast %52#2 : vector<1x50xf32> to vector<10x50xf32>
      %78 = arith.mulf %23, %77 : vector<10x50xf32>
      %cst_46 = arith.constant dense<0.000000e+00> : vector<10xf32>
      %79 = vector.multi_reduction <add>, %78, %cst_46 [1] : vector<10x50xf32> to vector<10xf32>
      %80 = vector.shape_cast %79 : vector<10xf32> to vector<10x1xf32>
      %81 = vector.broadcast %cst_28 : f32 to vector<10x1xf32>
      %82 = arith.mulf %80, %81 : vector<10x1xf32>
      %83 = vector.broadcast %cst_29 : f32 to vector<10x1xf32>
      %84 = arith.addf %82, %83 : vector<10x1xf32>
      %85 = tpu.reciprocal %84 {approx = true} : vector<10x1xf32> -> vector<10x1xf32>
      %86 = vector.broadcast %85 : vector<10x1xf32> to vector<10x50xf32>
      %87 = arith.mulf %23, %86 : vector<10x50xf32>
      %cst_47 = arith.constant dense<0.000000e+00> : vector<50xf32>
      %88 = vector.multi_reduction <add>, %87, %cst_47 [0] : vector<10x50xf32> to vector<50xf32>
      %89 = vector.shape_cast %88 : vector<50xf32> to vector<1x50xf32>
      %90 = vector.broadcast %cst_30 : f32 to vector<1x50xf32>
      %91 = arith.mulf %89, %90 : vector<1x50xf32>
      %92 = vector.broadcast %cst_31 : f32 to vector<1x50xf32>
      %93 = arith.addf %91, %92 : vector<1x50xf32>
      %94 = tpu.reciprocal %93 {approx = true} : vector<1x50xf32> -> vector<1x50xf32>
      %c1_i32 = arith.constant 1 : i32
      %95 = vector.broadcast %94 : vector<1x50xf32> to vector<10x50xf32>
      %96 = arith.mulf %23, %95 : vector<10x50xf32>
      %cst_48 = arith.constant dense<0.000000e+00> : vector<10xf32>
      %97 = vector.multi_reduction <add>, %96, %cst_48 [1] : vector<10x50xf32> to vector<10xf32>
      %98 = vector.shape_cast %97 : vector<10xf32> to vector<10x1xf32>
      %99 = vector.broadcast %cst_28 : f32 to vector<10x1xf32>
      %100 = arith.mulf %98, %99 : vector<10x1xf32>
      %101 = vector.broadcast %cst_29 : f32 to vector<10x1xf32>
      %102 = arith.addf %100, %101 : vector<10x1xf32>
      %103 = tpu.reciprocal %102 {approx = true} : vector<10x1xf32> -> vector<10x1xf32>
      %104 = vector.broadcast %103 : vector<10x1xf32> to vector<10x50xf32>
      %105 = arith.mulf %23, %104 : vector<10x50xf32>
      %cst_49 = arith.constant dense<0.000000e+00> : vector<50xf32>
      %106 = vector.multi_reduction <add>, %105, %cst_49 [0] : vector<10x50xf32> to vector<50xf32>
      %107 = vector.shape_cast %106 : vector<50xf32> to vector<1x50xf32>
      %108 = vector.broadcast %cst_30 : f32 to vector<1x50xf32>
      %109 = arith.mulf %107, %108 : vector<1x50xf32>
      %110 = vector.broadcast %cst_31 : f32 to vector<1x50xf32>
      %111 = arith.addf %109, %110 : vector<1x50xf32>
      %112 = tpu.reciprocal %111 {approx = true} : vector<1x50xf32> -> vector<1x50xf32>
      %c2_i32 = arith.constant 2 : i32
      %113 = vector.broadcast %112 : vector<1x50xf32> to vector<10x50xf32>
      %114 = arith.mulf %23, %113 : vector<10x50xf32>
      %cst_50 = arith.constant dense<0.000000e+00> : vector<10xf32>
      %115 = vector.multi_reduction <add>, %114, %cst_50 [1] : vector<10x50xf32> to vector<10xf32>
      %116 = vector.shape_cast %115 : vector<10xf32> to vector<10x1xf32>
      %117 = vector.broadcast %cst_28 : f32 to vector<10x1xf32>
      %118 = arith.mulf %116, %117 : vector<10x1xf32>
      %119 = vector.broadcast %cst_29 : f32 to vector<10x1xf32>
      %120 = arith.addf %118, %119 : vector<10x1xf32>
      %121 = tpu.reciprocal %120 {approx = true} : vector<10x1xf32> -> vector<10x1xf32>
      %122 = vector.broadcast %121 : vector<10x1xf32> to vector<10x50xf32>
      %123 = arith.mulf %23, %122 : vector<10x50xf32>
      %cst_51 = arith.constant dense<0.000000e+00> : vector<50xf32>
      %124 = vector.multi_reduction <add>, %123, %cst_51 [0] : vector<10x50xf32> to vector<50xf32>
      %125 = vector.shape_cast %124 : vector<50xf32> to vector<1x50xf32>
      %126 = vector.broadcast %cst_30 : f32 to vector<1x50xf32>
      %127 = arith.mulf %125, %126 : vector<1x50xf32>
      %128 = vector.broadcast %cst_31 : f32 to vector<1x50xf32>
      %129 = arith.addf %127, %128 : vector<1x50xf32>
      %130 = tpu.reciprocal %129 {approx = true} : vector<1x50xf32> -> vector<1x50xf32>
      %c3_i32 = arith.constant 3 : i32
      %131 = vector.broadcast %130 : vector<1x50xf32> to vector<10x50xf32>
      %132 = arith.mulf %23, %131 : vector<10x50xf32>
      %cst_52 = arith.constant dense<0.000000e+00> : vector<10xf32>
      %133 = vector.multi_reduction <add>, %132, %cst_52 [1] : vector<10x50xf32> to vector<10xf32>
      %134 = vector.shape_cast %133 : vector<10xf32> to vector<10x1xf32>
      %135 = vector.broadcast %cst_28 : f32 to vector<10x1xf32>
      %136 = arith.mulf %134, %135 : vector<10x1xf32>
      %137 = vector.broadcast %cst_29 : f32 to vector<10x1xf32>
      %138 = arith.addf %136, %137 : vector<10x1xf32>
      %139 = tpu.reciprocal %138 {approx = true} : vector<10x1xf32> -> vector<10x1xf32>
      %140 = vector.broadcast %139 : vector<10x1xf32> to vector<10x50xf32>
      %141 = arith.mulf %23, %140 : vector<10x50xf32>
      %cst_53 = arith.constant dense<0.000000e+00> : vector<50xf32>
      %142 = vector.multi_reduction <add>, %141, %cst_53 [0] : vector<10x50xf32> to vector<50xf32>
      %143 = vector.shape_cast %142 : vector<50xf32> to vector<1x50xf32>
      %144 = vector.broadcast %cst_30 : f32 to vector<1x50xf32>
      %145 = arith.mulf %143, %144 : vector<1x50xf32>
      %146 = vector.broadcast %cst_31 : f32 to vector<1x50xf32>
      %147 = arith.addf %145, %146 : vector<1x50xf32>
      %148 = tpu.reciprocal %147 {approx = true} : vector<1x50xf32> -> vector<1x50xf32>
      %c4_i32 = arith.constant 4 : i32
      %149 = vector.broadcast %148 : vector<1x50xf32> to vector<10x50xf32>
      %150 = arith.mulf %23, %149 : vector<10x50xf32>
      %cst_54 = arith.constant dense<0.000000e+00> : vector<10xf32>
      %151 = vector.multi_reduction <add>, %150, %cst_54 [1] : vector<10x50xf32> to vector<10xf32>
      %152 = vector.shape_cast %151 : vector<10xf32> to vector<10x1xf32>
      %153 = vector.broadcast %cst_28 : f32 to vector<10x1xf32>
      %154 = arith.mulf %152, %153 : vector<10x1xf32>
      %155 = vector.broadcast %cst_29 : f32 to vector<10x1xf32>
      %156 = arith.addf %154, %155 : vector<10x1xf32>
      %157 = tpu.reciprocal %156 {approx = true} : vector<10x1xf32> -> vector<10x1xf32>
      %158 = vector.broadcast %157 : vector<10x1xf32> to vector<10x50xf32>
      %159 = arith.mulf %23, %158 : vector<10x50xf32>
      %cst_55 = arith.constant dense<0.000000e+00> : vector<50xf32>
      %160 = vector.multi_reduction <add>, %159, %cst_55 [0] : vector<10x50xf32> to vector<50xf32>
      %161 = vector.shape_cast %160 : vector<50xf32> to vector<1x50xf32>
      %162 = vector.broadcast %cst_30 : f32 to vector<1x50xf32>
      %163 = arith.mulf %161, %162 : vector<1x50xf32>
      %164 = vector.broadcast %cst_31 : f32 to vector<1x50xf32>
      %165 = arith.addf %163, %164 : vector<1x50xf32>
      %166 = tpu.reciprocal %165 {approx = true} : vector<1x50xf32> -> vector<1x50xf32>
      %c5_i32 = arith.constant 5 : i32
      %167 = vector.broadcast %166 : vector<1x50xf32> to vector<10x50xf32>
      %168 = arith.mulf %23, %167 : vector<10x50xf32>
      %cst_56 = arith.constant dense<0.000000e+00> : vector<10xf32>
      %169 = vector.multi_reduction <add>, %168, %cst_56 [1] : vector<10x50xf32> to vector<10xf32>
      %170 = vector.shape_cast %169 : vector<10xf32> to vector<10x1xf32>
      %171 = vector.broadcast %cst_28 : f32 to vector<10x1xf32>
      %172 = arith.mulf %170, %171 : vector<10x1xf32>
      %173 = vector.broadcast %cst_29 : f32 to vector<10x1xf32>
      %174 = arith.addf %172, %173 : vector<10x1xf32>
      %175 = tpu.reciprocal %174 {approx = true} : vector<10x1xf32> -> vector<10x1xf32>
      %176 = vector.broadcast %175 : vector<10x1xf32> to vector<10x50xf32>
      %177 = arith.mulf %23, %176 : vector<10x50xf32>
      %cst_57 = arith.constant dense<0.000000e+00> : vector<50xf32>
      %178 = vector.multi_reduction <add>, %177, %cst_57 [0] : vector<10x50xf32> to vector<50xf32>
      %179 = vector.shape_cast %178 : vector<50xf32> to vector<1x50xf32>
      %180 = vector.broadcast %cst_30 : f32 to vector<1x50xf32>
      %181 = arith.mulf %179, %180 : vector<1x50xf32>
      %182 = vector.broadcast %cst_31 : f32 to vector<1x50xf32>
      %183 = arith.addf %181, %182 : vector<1x50xf32>
      %184 = tpu.reciprocal %183 {approx = true} : vector<1x50xf32> -> vector<1x50xf32>
      %c6_i32 = arith.constant 6 : i32
      %185 = vector.broadcast %184 : vector<1x50xf32> to vector<10x50xf32>
      %186 = arith.mulf %23, %185 : vector<10x50xf32>
      %cst_58 = arith.constant dense<0.000000e+00> : vector<10xf32>
      %187 = vector.multi_reduction <add>, %186, %cst_58 [1] : vector<10x50xf32> to vector<10xf32>
      %188 = vector.shape_cast %187 : vector<10xf32> to vector<10x1xf32>
      %189 = vector.broadcast %cst_28 : f32 to vector<10x1xf32>
      %190 = arith.mulf %188, %189 : vector<10x1xf32>
      %191 = vector.broadcast %cst_29 : f32 to vector<10x1xf32>
      %192 = arith.addf %190, %191 : vector<10x1xf32>
      %193 = tpu.reciprocal %192 {approx = true} : vector<10x1xf32> -> vector<10x1xf32>
      %194 = vector.broadcast %193 : vector<10x1xf32> to vector<10x50xf32>
      %195 = arith.mulf %23, %194 : vector<10x50xf32>
      %cst_59 = arith.constant dense<0.000000e+00> : vector<50xf32>
      %196 = vector.multi_reduction <add>, %195, %cst_59 [0] : vector<10x50xf32> to vector<50xf32>
      %197 = vector.shape_cast %196 : vector<50xf32> to vector<1x50xf32>
      %198 = vector.broadcast %cst_30 : f32 to vector<1x50xf32>
      %199 = arith.mulf %197, %198 : vector<1x50xf32>
      %200 = vector.broadcast %cst_31 : f32 to vector<1x50xf32>
      %201 = arith.addf %199, %200 : vector<1x50xf32>
      %202 = tpu.reciprocal %201 {approx = true} : vector<1x50xf32> -> vector<1x50xf32>
      %c7_i32 = arith.constant 7 : i32
      %203 = vector.broadcast %202 : vector<1x50xf32> to vector<10x50xf32>
      %204 = arith.mulf %23, %203 : vector<10x50xf32>
      %cst_60 = arith.constant dense<0.000000e+00> : vector<10xf32>
      %205 = vector.multi_reduction <add>, %204, %cst_60 [1] : vector<10x50xf32> to vector<10xf32>
      %206 = vector.shape_cast %205 : vector<10xf32> to vector<10x1xf32>
      %207 = vector.broadcast %cst_28 : f32 to vector<10x1xf32>
      %208 = arith.mulf %206, %207 : vector<10x1xf32>
      %209 = vector.broadcast %cst_29 : f32 to vector<10x1xf32>
      %210 = arith.addf %208, %209 : vector<10x1xf32>
      %211 = tpu.reciprocal %210 {approx = true} : vector<10x1xf32> -> vector<10x1xf32>
      %212 = vector.broadcast %211 : vector<10x1xf32> to vector<10x50xf32>
      %213 = arith.mulf %23, %212 : vector<10x50xf32>
      %cst_61 = arith.constant dense<0.000000e+00> : vector<50xf32>
      %214 = vector.multi_reduction <add>, %213, %cst_61 [0] : vector<10x50xf32> to vector<50xf32>
      %215 = vector.shape_cast %214 : vector<50xf32> to vector<1x50xf32>
      %216 = vector.broadcast %cst_30 : f32 to vector<1x50xf32>
      %217 = arith.mulf %215, %216 : vector<1x50xf32>
      %218 = vector.broadcast %cst_31 : f32 to vector<1x50xf32>
      %219 = arith.addf %217, %218 : vector<1x50xf32>
      %220 = tpu.reciprocal %219 {approx = true} : vector<1x50xf32> -> vector<1x50xf32>
      %c8_i32 = arith.constant 8 : i32
      %221 = vector.broadcast %220 : vector<1x50xf32> to vector<10x50xf32>
      %222 = arith.mulf %23, %221 : vector<10x50xf32>
      %cst_62 = arith.constant dense<0.000000e+00> : vector<10xf32>
      %223 = vector.multi_reduction <add>, %222, %cst_62 [1] : vector<10x50xf32> to vector<10xf32>
      %224 = vector.shape_cast %223 : vector<10xf32> to vector<10x1xf32>
      %225 = vector.broadcast %cst_28 : f32 to vector<10x1xf32>
      %226 = arith.mulf %224, %225 : vector<10x1xf32>
      %227 = vector.broadcast %cst_29 : f32 to vector<10x1xf32>
      %228 = arith.addf %226, %227 : vector<10x1xf32>
      %229 = tpu.reciprocal %228 {approx = true} : vector<10x1xf32> -> vector<10x1xf32>
      %230 = vector.broadcast %229 : vector<10x1xf32> to vector<10x50xf32>
      %231 = arith.mulf %23, %230 : vector<10x50xf32>
      %cst_63 = arith.constant dense<0.000000e+00> : vector<50xf32>
      %232 = vector.multi_reduction <add>, %231, %cst_63 [0] : vector<10x50xf32> to vector<50xf32>
      %233 = vector.shape_cast %232 : vector<50xf32> to vector<1x50xf32>
      %234 = vector.broadcast %cst_30 : f32 to vector<1x50xf32>
      %235 = arith.mulf %233, %234 : vector<1x50xf32>
      %236 = vector.broadcast %cst_31 : f32 to vector<1x50xf32>
      %237 = arith.addf %235, %236 : vector<1x50xf32>
      %238 = tpu.reciprocal %237 {approx = true} : vector<1x50xf32> -> vector<1x50xf32>
      %c9_i32 = arith.constant 9 : i32
      %239 = vector.broadcast %238 : vector<1x50xf32> to vector<10x50xf32>
      %240 = arith.mulf %23, %239 : vector<10x50xf32>
      %cst_64 = arith.constant dense<0.000000e+00> : vector<10xf32>
      %241 = vector.multi_reduction <add>, %240, %cst_64 [1] : vector<10x50xf32> to vector<10xf32>
      %242 = vector.shape_cast %241 : vector<10xf32> to vector<10x1xf32>
      %243 = vector.broadcast %cst_28 : f32 to vector<10x1xf32>
      %244 = arith.mulf %242, %243 : vector<10x1xf32>
      %245 = vector.broadcast %cst_29 : f32 to vector<10x1xf32>
      %246 = arith.addf %244, %245 : vector<10x1xf32>
      %247 = tpu.reciprocal %246 {approx = true} : vector<10x1xf32> -> vector<10x1xf32>
      %248 = vector.broadcast %247 : vector<10x1xf32> to vector<10x50xf32>
      %249 = arith.mulf %23, %248 : vector<10x50xf32>
      %cst_65 = arith.constant dense<0.000000e+00> : vector<50xf32>
      %250 = vector.multi_reduction <add>, %249, %cst_65 [0] : vector<10x50xf32> to vector<50xf32>
      %251 = vector.shape_cast %250 : vector<50xf32> to vector<1x50xf32>
      %252 = vector.broadcast %cst_30 : f32 to vector<1x50xf32>
      %253 = arith.mulf %251, %252 : vector<1x50xf32>
      %254 = vector.broadcast %cst_31 : f32 to vector<1x50xf32>
      %255 = arith.addf %253, %254 : vector<1x50xf32>
      %256 = tpu.reciprocal %255 {approx = true} : vector<1x50xf32> -> vector<1x50xf32>
      %c10_i32 = arith.constant 10 : i32
      %257 = vector.broadcast %256 : vector<1x50xf32> to vector<10x50xf32>
      %258 = arith.mulf %23, %257 : vector<10x50xf32>
      %cst_66 = arith.constant dense<0.000000e+00> : vector<10xf32>
      %259 = vector.multi_reduction <add>, %258, %cst_66 [1] : vector<10x50xf32> to vector<10xf32>
      %260 = vector.shape_cast %259 : vector<10xf32> to vector<10x1xf32>
      %261 = vector.broadcast %cst_28 : f32 to vector<10x1xf32>
      %262 = arith.mulf %260, %261 : vector<10x1xf32>
      %263 = vector.broadcast %cst_29 : f32 to vector<10x1xf32>
      %264 = arith.addf %262, %263 : vector<10x1xf32>
      %265 = tpu.reciprocal %264 {approx = true} : vector<10x1xf32> -> vector<10x1xf32>
      %266 = vector.broadcast %265 : vector<10x1xf32> to vector<10x50xf32>
      %267 = arith.mulf %23, %266 : vector<10x50xf32>
      %cst_67 = arith.constant dense<0.000000e+00> : vector<50xf32>
      %268 = vector.multi_reduction <add>, %267, %cst_67 [0] : vector<10x50xf32> to vector<50xf32>
      %269 = vector.shape_cast %268 : vector<50xf32> to vector<1x50xf32>
      %270 = vector.broadcast %cst_30 : f32 to vector<1x50xf32>
      %271 = arith.mulf %269, %270 : vector<1x50xf32>
      %272 = vector.broadcast %cst_31 : f32 to vector<1x50xf32>
      %273 = arith.addf %271, %272 : vector<1x50xf32>
      %274 = tpu.reciprocal %273 {approx = true} : vector<1x50xf32> -> vector<1x50xf32>
      %c11_i32 = arith.constant 11 : i32
      %275 = vector.broadcast %274 : vector<1x50xf32> to vector<10x50xf32>
      %276 = arith.mulf %23, %275 : vector<10x50xf32>
      %cst_68 = arith.constant dense<0.000000e+00> : vector<10xf32>
      %277 = vector.multi_reduction <add>, %276, %cst_68 [1] : vector<10x50xf32> to vector<10xf32>
      %278 = vector.shape_cast %277 : vector<10xf32> to vector<10x1xf32>
      %279 = vector.broadcast %cst_28 : f32 to vector<10x1xf32>
      %280 = arith.mulf %278, %279 : vector<10x1xf32>
      %281 = vector.broadcast %cst_29 : f32 to vector<10x1xf32>
      %282 = arith.addf %280, %281 : vector<10x1xf32>
      %283 = tpu.reciprocal %282 {approx = true} : vector<10x1xf32> -> vector<10x1xf32>
      %284 = vector.broadcast %283 : vector<10x1xf32> to vector<10x50xf32>
      %285 = arith.mulf %23, %284 : vector<10x50xf32>
      %cst_69 = arith.constant dense<0.000000e+00> : vector<50xf32>
      %286 = vector.multi_reduction <add>, %285, %cst_69 [0] : vector<10x50xf32> to vector<50xf32>
      %287 = vector.shape_cast %286 : vector<50xf32> to vector<1x50xf32>
      %288 = vector.broadcast %cst_30 : f32 to vector<1x50xf32>
      %289 = arith.mulf %287, %288 : vector<1x50xf32>
      %290 = vector.broadcast %cst_31 : f32 to vector<1x50xf32>
      %291 = arith.addf %289, %290 : vector<1x50xf32>
      %292 = tpu.reciprocal %291 {approx = true} : vector<1x50xf32> -> vector<1x50xf32>
      %c12_i32 = arith.constant 12 : i32
      %293 = vector.broadcast %292 : vector<1x50xf32> to vector<10x50xf32>
      %294 = arith.mulf %23, %293 : vector<10x50xf32>
      %cst_70 = arith.constant dense<0.000000e+00> : vector<10xf32>
      %295 = vector.multi_reduction <add>, %294, %cst_70 [1] : vector<10x50xf32> to vector<10xf32>
      %296 = vector.shape_cast %295 : vector<10xf32> to vector<10x1xf32>
      %297 = vector.broadcast %cst_28 : f32 to vector<10x1xf32>
      %298 = arith.mulf %296, %297 : vector<10x1xf32>
      %299 = vector.broadcast %cst_29 : f32 to vector<10x1xf32>
      %300 = arith.addf %298, %299 : vector<10x1xf32>
      %301 = tpu.reciprocal %300 {approx = true} : vector<10x1xf32> -> vector<10x1xf32>
      %302 = vector.broadcast %301 : vector<10x1xf32> to vector<10x50xf32>
      %303 = arith.mulf %23, %302 : vector<10x50xf32>
      %cst_71 = arith.constant dense<0.000000e+00> : vector<50xf32>
      %304 = vector.multi_reduction <add>, %303, %cst_71 [0] : vector<10x50xf32> to vector<50xf32>
      %305 = vector.shape_cast %304 : vector<50xf32> to vector<1x50xf32>
      %306 = vector.broadcast %cst_30 : f32 to vector<1x50xf32>
      %307 = arith.mulf %305, %306 : vector<1x50xf32>
      %308 = vector.broadcast %cst_31 : f32 to vector<1x50xf32>
      %309 = arith.addf %307, %308 : vector<1x50xf32>
      %310 = tpu.reciprocal %309 {approx = true} : vector<1x50xf32> -> vector<1x50xf32>
      %c13_i32 = arith.constant 13 : i32
      %311 = vector.broadcast %310 : vector<1x50xf32> to vector<10x50xf32>
      %312 = arith.mulf %23, %311 : vector<10x50xf32>
      %cst_72 = arith.constant dense<0.000000e+00> : vector<10xf32>
      %313 = vector.multi_reduction <add>, %312, %cst_72 [1] : vector<10x50xf32> to vector<10xf32>
      %314 = vector.shape_cast %313 : vector<10xf32> to vector<10x1xf32>
      %315 = vector.broadcast %cst_28 : f32 to vector<10x1xf32>
      %316 = arith.mulf %314, %315 : vector<10x1xf32>
      %317 = vector.broadcast %cst_29 : f32 to vector<10x1xf32>
      %318 = arith.addf %316, %317 : vector<10x1xf32>
      %319 = tpu.reciprocal %318 {approx = true} : vector<10x1xf32> -> vector<10x1xf32>
      %320 = vector.broadcast %319 : vector<10x1xf32> to vector<10x50xf32>
      %321 = arith.mulf %23, %320 : vector<10x50xf32>
      %cst_73 = arith.constant dense<0.000000e+00> : vector<50xf32>
      %322 = vector.multi_reduction <add>, %321, %cst_73 [0] : vector<10x50xf32> to vector<50xf32>
      %323 = vector.shape_cast %322 : vector<50xf32> to vector<1x50xf32>
      %324 = vector.broadcast %cst_30 : f32 to vector<1x50xf32>
      %325 = arith.mulf %323, %324 : vector<1x50xf32>
      %326 = vector.broadcast %cst_31 : f32 to vector<1x50xf32>
      %327 = arith.addf %325, %326 : vector<1x50xf32>
      %328 = tpu.reciprocal %327 {approx = true} : vector<1x50xf32> -> vector<1x50xf32>
      %c14_i32 = arith.constant 14 : i32
      %329 = vector.broadcast %328 : vector<1x50xf32> to vector<10x50xf32>
      %330 = arith.mulf %23, %329 : vector<10x50xf32>
      %cst_74 = arith.constant dense<0.000000e+00> : vector<10xf32>
      %331 = vector.multi_reduction <add>, %330, %cst_74 [1] : vector<10x50xf32> to vector<10xf32>
      %332 = vector.shape_cast %331 : vector<10xf32> to vector<10x1xf32>
      %333 = vector.broadcast %cst_28 : f32 to vector<10x1xf32>
      %334 = arith.mulf %332, %333 : vector<10x1xf32>
      %335 = vector.broadcast %cst_29 : f32 to vector<10x1xf32>
      %336 = arith.addf %334, %335 : vector<10x1xf32>
      %337 = tpu.reciprocal %336 {approx = true} : vector<10x1xf32> -> vector<10x1xf32>
      %338 = vector.broadcast %337 : vector<10x1xf32> to vector<10x50xf32>
      %339 = arith.mulf %23, %338 : vector<10x50xf32>
      %cst_75 = arith.constant dense<0.000000e+00> : vector<50xf32>
      %340 = vector.multi_reduction <add>, %339, %cst_75 [0] : vector<10x50xf32> to vector<50xf32>
      %341 = vector.shape_cast %340 : vector<50xf32> to vector<1x50xf32>
      %342 = vector.broadcast %cst_30 : f32 to vector<1x50xf32>
      %343 = arith.mulf %341, %342 : vector<1x50xf32>
      %344 = vector.broadcast %cst_31 : f32 to vector<1x50xf32>
      %345 = arith.addf %343, %344 : vector<1x50xf32>
      %346 = tpu.reciprocal %345 {approx = true} : vector<1x50xf32> -> vector<1x50xf32>
      %c15_i32 = arith.constant 15 : i32
      %347 = vector.broadcast %346 : vector<1x50xf32> to vector<10x50xf32>
      %348 = arith.mulf %23, %347 : vector<10x50xf32>
      %cst_76 = arith.constant dense<0.000000e+00> : vector<10xf32>
      %349 = vector.multi_reduction <add>, %348, %cst_76 [1] : vector<10x50xf32> to vector<10xf32>
      %350 = vector.shape_cast %349 : vector<10xf32> to vector<10x1xf32>
      %351 = vector.broadcast %cst_28 : f32 to vector<10x1xf32>
      %352 = arith.mulf %350, %351 : vector<10x1xf32>
      %353 = vector.broadcast %cst_29 : f32 to vector<10x1xf32>
      %354 = arith.addf %352, %353 : vector<10x1xf32>
      %355 = tpu.reciprocal %354 {approx = true} : vector<10x1xf32> -> vector<10x1xf32>
      %356 = vector.broadcast %355 : vector<10x1xf32> to vector<10x50xf32>
      %357 = arith.mulf %23, %356 : vector<10x50xf32>
      %cst_77 = arith.constant dense<0.000000e+00> : vector<50xf32>
      %358 = vector.multi_reduction <add>, %357, %cst_77 [0] : vector<10x50xf32> to vector<50xf32>
      %359 = vector.shape_cast %358 : vector<50xf32> to vector<1x50xf32>
      %360 = vector.broadcast %cst_30 : f32 to vector<1x50xf32>
      %361 = arith.mulf %359, %360 : vector<1x50xf32>
      %362 = vector.broadcast %cst_31 : f32 to vector<1x50xf32>
      %363 = arith.addf %361, %362 : vector<1x50xf32>
      %364 = tpu.reciprocal %363 {approx = true} : vector<1x50xf32> -> vector<1x50xf32>
      %c16_i32 = arith.constant 16 : i32
      %365 = vector.broadcast %364 : vector<1x50xf32> to vector<10x50xf32>
      %366 = arith.mulf %23, %365 : vector<10x50xf32>
      %cst_78 = arith.constant dense<0.000000e+00> : vector<10xf32>
      %367 = vector.multi_reduction <add>, %366, %cst_78 [1] : vector<10x50xf32> to vector<10xf32>
      %368 = vector.shape_cast %367 : vector<10xf32> to vector<10x1xf32>
      %369 = vector.broadcast %cst_28 : f32 to vector<10x1xf32>
      %370 = arith.mulf %368, %369 : vector<10x1xf32>
      %371 = vector.broadcast %cst_29 : f32 to vector<10x1xf32>
      %372 = arith.addf %370, %371 : vector<10x1xf32>
      %373 = tpu.reciprocal %372 {approx = true} : vector<10x1xf32> -> vector<10x1xf32>
      %374 = vector.broadcast %373 : vector<10x1xf32> to vector<10x50xf32>
      %375 = arith.mulf %23, %374 : vector<10x50xf32>
      %cst_79 = arith.constant dense<0.000000e+00> : vector<50xf32>
      %376 = vector.multi_reduction <add>, %375, %cst_79 [0] : vector<10x50xf32> to vector<50xf32>
      %377 = vector.shape_cast %376 : vector<50xf32> to vector<1x50xf32>
      %378 = vector.broadcast %cst_30 : f32 to vector<1x50xf32>
      %379 = arith.mulf %377, %378 : vector<1x50xf32>
      %380 = vector.broadcast %cst_31 : f32 to vector<1x50xf32>
      %381 = arith.addf %379, %380 : vector<1x50xf32>
      %382 = tpu.reciprocal %381 {approx = true} : vector<1x50xf32> -> vector<1x50xf32>
      %c17_i32 = arith.constant 17 : i32
      %383 = vector.broadcast %382 : vector<1x50xf32> to vector<10x50xf32>
      %384 = arith.mulf %23, %383 : vector<10x50xf32>
      %cst_80 = arith.constant dense<0.000000e+00> : vector<10xf32>
      %385 = vector.multi_reduction <add>, %384, %cst_80 [1] : vector<10x50xf32> to vector<10xf32>
      %386 = vector.shape_cast %385 : vector<10xf32> to vector<10x1xf32>
      %387 = vector.broadcast %cst_28 : f32 to vector<10x1xf32>
      %388 = arith.mulf %386, %387 : vector<10x1xf32>
      %389 = vector.broadcast %cst_29 : f32 to vector<10x1xf32>
      %390 = arith.addf %388, %389 : vector<10x1xf32>
      %391 = tpu.reciprocal %390 {approx = true} : vector<10x1xf32> -> vector<10x1xf32>
      %392 = vector.broadcast %391 : vector<10x1xf32> to vector<10x50xf32>
      %393 = arith.mulf %23, %392 : vector<10x50xf32>
      %cst_81 = arith.constant dense<0.000000e+00> : vector<50xf32>
      %394 = vector.multi_reduction <add>, %393, %cst_81 [0] : vector<10x50xf32> to vector<50xf32>
      %395 = vector.shape_cast %394 : vector<50xf32> to vector<1x50xf32>
      %396 = vector.broadcast %cst_30 : f32 to vector<1x50xf32>
      %397 = arith.mulf %395, %396 : vector<1x50xf32>
      %398 = vector.broadcast %cst_31 : f32 to vector<1x50xf32>
      %399 = arith.addf %397, %398 : vector<1x50xf32>
      %400 = tpu.reciprocal %399 {approx = true} : vector<1x50xf32> -> vector<1x50xf32>
      %c18_i32 = arith.constant 18 : i32
      %401 = vector.broadcast %400 : vector<1x50xf32> to vector<10x50xf32>
      %402 = arith.mulf %23, %401 : vector<10x50xf32>
      %cst_82 = arith.constant dense<0.000000e+00> : vector<10xf32>
      %403 = vector.multi_reduction <add>, %402, %cst_82 [1] : vector<10x50xf32> to vector<10xf32>
      %404 = vector.shape_cast %403 : vector<10xf32> to vector<10x1xf32>
      %405 = vector.broadcast %cst_28 : f32 to vector<10x1xf32>
      %406 = arith.mulf %404, %405 : vector<10x1xf32>
      %407 = vector.broadcast %cst_29 : f32 to vector<10x1xf32>
      %408 = arith.addf %406, %407 : vector<10x1xf32>
      %409 = tpu.reciprocal %408 {approx = true} : vector<10x1xf32> -> vector<10x1xf32>
      %410 = vector.broadcast %409 : vector<10x1xf32> to vector<10x50xf32>
      %411 = arith.mulf %23, %410 : vector<10x50xf32>
      %cst_83 = arith.constant dense<0.000000e+00> : vector<50xf32>
      %412 = vector.multi_reduction <add>, %411, %cst_83 [0] : vector<10x50xf32> to vector<50xf32>
      %413 = vector.shape_cast %412 : vector<50xf32> to vector<1x50xf32>
      %414 = vector.broadcast %cst_30 : f32 to vector<1x50xf32>
      %415 = arith.mulf %413, %414 : vector<1x50xf32>
      %416 = vector.broadcast %cst_31 : f32 to vector<1x50xf32>
      %417 = arith.addf %415, %416 : vector<1x50xf32>
      %418 = tpu.reciprocal %417 {approx = true} : vector<1x50xf32> -> vector<1x50xf32>
      %c19_i32 = arith.constant 19 : i32
      %419 = vector.broadcast %418 : vector<1x50xf32> to vector<10x50xf32>
      %420 = arith.mulf %23, %419 : vector<10x50xf32>
      %cst_84 = arith.constant dense<0.000000e+00> : vector<10xf32>
      %421 = vector.multi_reduction <add>, %420, %cst_84 [1] : vector<10x50xf32> to vector<10xf32>
      %422 = vector.shape_cast %421 : vector<10xf32> to vector<10x1xf32>
      %423 = vector.broadcast %cst_28 : f32 to vector<10x1xf32>
      %424 = arith.mulf %422, %423 : vector<10x1xf32>
      %425 = vector.broadcast %cst_29 : f32 to vector<10x1xf32>
      %426 = arith.addf %424, %425 : vector<10x1xf32>
      %427 = tpu.reciprocal %426 {approx = true} : vector<10x1xf32> -> vector<10x1xf32>
      %428 = vector.broadcast %427 : vector<10x1xf32> to vector<10x50xf32>
      %429 = arith.mulf %23, %428 : vector<10x50xf32>
      %cst_85 = arith.constant dense<0.000000e+00> : vector<50xf32>
      %430 = vector.multi_reduction <add>, %429, %cst_85 [0] : vector<10x50xf32> to vector<50xf32>
      %431 = vector.shape_cast %430 : vector<50xf32> to vector<1x50xf32>
      %432 = vector.broadcast %cst_30 : f32 to vector<1x50xf32>
      %433 = arith.mulf %431, %432 : vector<1x50xf32>
      %434 = vector.broadcast %cst_31 : f32 to vector<1x50xf32>
      %435 = arith.addf %433, %434 : vector<1x50xf32>
      %436 = tpu.reciprocal %435 {approx = true} : vector<1x50xf32> -> vector<1x50xf32>
      %c20_i32 = arith.constant 20 : i32
      %437 = vector.broadcast %436 : vector<1x50xf32> to vector<10x50xf32>
      %438 = arith.mulf %23, %437 : vector<10x50xf32>
      %cst_86 = arith.constant dense<0.000000e+00> : vector<10xf32>
      %439 = vector.multi_reduction <add>, %438, %cst_86 [1] : vector<10x50xf32> to vector<10xf32>
      %440 = vector.shape_cast %439 : vector<10xf32> to vector<10x1xf32>
      %441 = vector.broadcast %cst_28 : f32 to vector<10x1xf32>
      %442 = arith.mulf %440, %441 : vector<10x1xf32>
      %443 = vector.broadcast %cst_29 : f32 to vector<10x1xf32>
      %444 = arith.addf %442, %443 : vector<10x1xf32>
      %445 = tpu.reciprocal %444 {approx = true} : vector<10x1xf32> -> vector<10x1xf32>
      %446 = vector.broadcast %445 : vector<10x1xf32> to vector<10x50xf32>
      %447 = arith.mulf %23, %446 : vector<10x50xf32>
      %cst_87 = arith.constant dense<0.000000e+00> : vector<50xf32>
      %448 = vector.multi_reduction <add>, %447, %cst_87 [0] : vector<10x50xf32> to vector<50xf32>
      %449 = vector.shape_cast %448 : vector<50xf32> to vector<1x50xf32>
      %450 = vector.broadcast %cst_30 : f32 to vector<1x50xf32>
      %451 = arith.mulf %449, %450 : vector<1x50xf32>
      %452 = vector.broadcast %cst_31 : f32 to vector<1x50xf32>
      %453 = arith.addf %451, %452 : vector<1x50xf32>
      %454 = tpu.reciprocal %453 {approx = true} : vector<1x50xf32> -> vector<1x50xf32>
      %c21_i32 = arith.constant 21 : i32
      %455 = vector.broadcast %454 : vector<1x50xf32> to vector<10x50xf32>
      %456 = arith.mulf %23, %455 : vector<10x50xf32>
      %cst_88 = arith.constant dense<0.000000e+00> : vector<10xf32>
      %457 = vector.multi_reduction <add>, %456, %cst_88 [1] : vector<10x50xf32> to vector<10xf32>
      %458 = vector.shape_cast %457 : vector<10xf32> to vector<10x1xf32>
      %459 = vector.broadcast %cst_28 : f32 to vector<10x1xf32>
      %460 = arith.mulf %458, %459 : vector<10x1xf32>
      %461 = vector.broadcast %cst_29 : f32 to vector<10x1xf32>
      %462 = arith.addf %460, %461 : vector<10x1xf32>
      %463 = tpu.reciprocal %462 {approx = true} : vector<10x1xf32> -> vector<10x1xf32>
      %464 = vector.broadcast %463 : vector<10x1xf32> to vector<10x50xf32>
      %465 = arith.mulf %23, %464 : vector<10x50xf32>
      %cst_89 = arith.constant dense<0.000000e+00> : vector<50xf32>
      %466 = vector.multi_reduction <add>, %465, %cst_89 [0] : vector<10x50xf32> to vector<50xf32>
      %467 = vector.shape_cast %466 : vector<50xf32> to vector<1x50xf32>
      %468 = vector.broadcast %cst_30 : f32 to vector<1x50xf32>
      %469 = arith.mulf %467, %468 : vector<1x50xf32>
      %470 = vector.broadcast %cst_31 : f32 to vector<1x50xf32>
      %471 = arith.addf %469, %470 : vector<1x50xf32>
      %472 = tpu.reciprocal %471 {approx = true} : vector<1x50xf32> -> vector<1x50xf32>
      %c22_i32 = arith.constant 22 : i32
      %473 = vector.broadcast %472 : vector<1x50xf32> to vector<10x50xf32>
      %474 = arith.mulf %23, %473 : vector<10x50xf32>
      %cst_90 = arith.constant dense<0.000000e+00> : vector<10xf32>
      %475 = vector.multi_reduction <add>, %474, %cst_90 [1] : vector<10x50xf32> to vector<10xf32>
      %476 = vector.shape_cast %475 : vector<10xf32> to vector<10x1xf32>
      %477 = vector.broadcast %cst_28 : f32 to vector<10x1xf32>
      %478 = arith.mulf %476, %477 : vector<10x1xf32>
      %479 = vector.broadcast %cst_29 : f32 to vector<10x1xf32>
      %480 = arith.addf %478, %479 : vector<10x1xf32>
      %481 = tpu.reciprocal %480 {approx = true} : vector<10x1xf32> -> vector<10x1xf32>
      %482 = vector.broadcast %481 : vector<10x1xf32> to vector<10x50xf32>
      %483 = arith.mulf %23, %482 : vector<10x50xf32>
      %cst_91 = arith.constant dense<0.000000e+00> : vector<50xf32>
      %484 = vector.multi_reduction <add>, %483, %cst_91 [0] : vector<10x50xf32> to vector<50xf32>
      %485 = vector.shape_cast %484 : vector<50xf32> to vector<1x50xf32>
      %486 = vector.broadcast %cst_30 : f32 to vector<1x50xf32>
      %487 = arith.mulf %485, %486 : vector<1x50xf32>
      %488 = vector.broadcast %cst_31 : f32 to vector<1x50xf32>
      %489 = arith.addf %487, %488 : vector<1x50xf32>
      %490 = tpu.reciprocal %489 {approx = true} : vector<1x50xf32> -> vector<1x50xf32>
      %c23_i32 = arith.constant 23 : i32
      %491 = vector.broadcast %490 : vector<1x50xf32> to vector<10x50xf32>
      %492 = arith.mulf %23, %491 : vector<10x50xf32>
      %cst_92 = arith.constant dense<0.000000e+00> : vector<10xf32>
      %493 = vector.multi_reduction <add>, %492, %cst_92 [1] : vector<10x50xf32> to vector<10xf32>
      %494 = vector.shape_cast %493 : vector<10xf32> to vector<10x1xf32>
      %495 = vector.broadcast %cst_28 : f32 to vector<10x1xf32>
      %496 = arith.mulf %494, %495 : vector<10x1xf32>
      %497 = vector.broadcast %cst_29 : f32 to vector<10x1xf32>
      %498 = arith.addf %496, %497 : vector<10x1xf32>
      %499 = tpu.reciprocal %498 {approx = true} : vector<10x1xf32> -> vector<10x1xf32>
      %500 = vector.broadcast %499 : vector<10x1xf32> to vector<10x50xf32>
      %501 = arith.mulf %23, %500 : vector<10x50xf32>
      %cst_93 = arith.constant dense<0.000000e+00> : vector<50xf32>
      %502 = vector.multi_reduction <add>, %501, %cst_93 [0] : vector<10x50xf32> to vector<50xf32>
      %503 = vector.shape_cast %502 : vector<50xf32> to vector<1x50xf32>
      %504 = vector.broadcast %cst_30 : f32 to vector<1x50xf32>
      %505 = arith.mulf %503, %504 : vector<1x50xf32>
      %506 = vector.broadcast %cst_31 : f32 to vector<1x50xf32>
      %507 = arith.addf %505, %506 : vector<1x50xf32>
      %508 = tpu.reciprocal %507 {approx = true} : vector<1x50xf32> -> vector<1x50xf32>
      %c24_i32 = arith.constant 24 : i32
      %509 = vector.broadcast %508 : vector<1x50xf32> to vector<10x50xf32>
      %510 = arith.mulf %23, %509 : vector<10x50xf32>
      %cst_94 = arith.constant dense<0.000000e+00> : vector<10xf32>
      %511 = vector.multi_reduction <add>, %510, %cst_94 [1] : vector<10x50xf32> to vector<10xf32>
      %512 = vector.shape_cast %511 : vector<10xf32> to vector<10x1xf32>
      %513 = vector.broadcast %cst_28 : f32 to vector<10x1xf32>
      %514 = arith.mulf %512, %513 : vector<10x1xf32>
      %515 = vector.broadcast %cst_29 : f32 to vector<10x1xf32>
      %516 = arith.addf %514, %515 : vector<10x1xf32>
      %517 = tpu.reciprocal %516 {approx = true} : vector<10x1xf32> -> vector<10x1xf32>
      %518 = vector.broadcast %517 : vector<10x1xf32> to vector<10x50xf32>
      %519 = arith.mulf %23, %518 : vector<10x50xf32>
      %cst_95 = arith.constant dense<0.000000e+00> : vector<50xf32>
      %520 = vector.multi_reduction <add>, %519, %cst_95 [0] : vector<10x50xf32> to vector<50xf32>
      %521 = vector.shape_cast %520 : vector<50xf32> to vector<1x50xf32>
      %522 = vector.broadcast %cst_30 : f32 to vector<1x50xf32>
      %523 = arith.mulf %521, %522 : vector<1x50xf32>
      %524 = vector.broadcast %cst_31 : f32 to vector<1x50xf32>
      %525 = arith.addf %523, %524 : vector<1x50xf32>
      %526 = tpu.reciprocal %525 {approx = true} : vector<1x50xf32> -> vector<1x50xf32>
      %c25_i32 = arith.constant 25 : i32
      %527 = vector.broadcast %526 : vector<1x50xf32> to vector<10x50xf32>
      %528 = arith.mulf %23, %527 : vector<10x50xf32>
      %cst_96 = arith.constant dense<0.000000e+00> : vector<10xf32>
      %529 = vector.multi_reduction <add>, %528, %cst_96 [1] : vector<10x50xf32> to vector<10xf32>
      %530 = vector.shape_cast %529 : vector<10xf32> to vector<10x1xf32>
      %531 = vector.broadcast %cst_28 : f32 to vector<10x1xf32>
      %532 = arith.mulf %530, %531 : vector<10x1xf32>
      %533 = vector.broadcast %cst_29 : f32 to vector<10x1xf32>
      %534 = arith.addf %532, %533 : vector<10x1xf32>
      %535 = tpu.reciprocal %534 {approx = true} : vector<10x1xf32> -> vector<10x1xf32>
      %536 = vector.broadcast %535 : vector<10x1xf32> to vector<10x50xf32>
      %537 = arith.mulf %23, %536 : vector<10x50xf32>
      %cst_97 = arith.constant dense<0.000000e+00> : vector<50xf32>
      %538 = vector.multi_reduction <add>, %537, %cst_97 [0] : vector<10x50xf32> to vector<50xf32>
      %539 = vector.shape_cast %538 : vector<50xf32> to vector<1x50xf32>
      %540 = vector.broadcast %cst_30 : f32 to vector<1x50xf32>
      %541 = arith.mulf %539, %540 : vector<1x50xf32>
      %542 = vector.broadcast %cst_31 : f32 to vector<1x50xf32>
      %543 = arith.addf %541, %542 : vector<1x50xf32>
      %544 = tpu.reciprocal %543 {approx = true} : vector<1x50xf32> -> vector<1x50xf32>
      %c26_i32 = arith.constant 26 : i32
      %545 = vector.broadcast %544 : vector<1x50xf32> to vector<10x50xf32>
      %546 = arith.mulf %23, %545 : vector<10x50xf32>
      %cst_98 = arith.constant dense<0.000000e+00> : vector<10xf32>
      %547 = vector.multi_reduction <add>, %546, %cst_98 [1] : vector<10x50xf32> to vector<10xf32>
      %548 = vector.shape_cast %547 : vector<10xf32> to vector<10x1xf32>
      %549 = vector.broadcast %cst_28 : f32 to vector<10x1xf32>
      %550 = arith.mulf %548, %549 : vector<10x1xf32>
      %551 = vector.broadcast %cst_29 : f32 to vector<10x1xf32>
      %552 = arith.addf %550, %551 : vector<10x1xf32>
      %553 = tpu.reciprocal %552 {approx = true} : vector<10x1xf32> -> vector<10x1xf32>
      %554 = vector.broadcast %553 : vector<10x1xf32> to vector<10x50xf32>
      %555 = arith.mulf %23, %554 : vector<10x50xf32>
      %cst_99 = arith.constant dense<0.000000e+00> : vector<50xf32>
      %556 = vector.multi_reduction <add>, %555, %cst_99 [0] : vector<10x50xf32> to vector<50xf32>
      %557 = vector.shape_cast %556 : vector<50xf32> to vector<1x50xf32>
      %558 = vector.broadcast %cst_30 : f32 to vector<1x50xf32>
      %559 = arith.mulf %557, %558 : vector<1x50xf32>
      %560 = vector.broadcast %cst_31 : f32 to vector<1x50xf32>
      %561 = arith.addf %559, %560 : vector<1x50xf32>
      %562 = tpu.reciprocal %561 {approx = true} : vector<1x50xf32> -> vector<1x50xf32>
      %c27_i32 = arith.constant 27 : i32
      %563 = vector.broadcast %562 : vector<1x50xf32> to vector<10x50xf32>
      %564 = arith.mulf %23, %563 : vector<10x50xf32>
      %cst_100 = arith.constant dense<0.000000e+00> : vector<10xf32>
      %565 = vector.multi_reduction <add>, %564, %cst_100 [1] : vector<10x50xf32> to vector<10xf32>
      %566 = vector.shape_cast %565 : vector<10xf32> to vector<10x1xf32>
      %567 = vector.broadcast %cst_28 : f32 to vector<10x1xf32>
      %568 = arith.mulf %566, %567 : vector<10x1xf32>
      %569 = vector.broadcast %cst_29 : f32 to vector<10x1xf32>
      %570 = arith.addf %568, %569 : vector<10x1xf32>
      %571 = tpu.reciprocal %570 {approx = true} : vector<10x1xf32> -> vector<10x1xf32>
      %572 = vector.broadcast %571 : vector<10x1xf32> to vector<10x50xf32>
      %573 = arith.mulf %23, %572 : vector<10x50xf32>
      %cst_101 = arith.constant dense<0.000000e+00> : vector<50xf32>
      %574 = vector.multi_reduction <add>, %573, %cst_101 [0] : vector<10x50xf32> to vector<50xf32>
      %575 = vector.shape_cast %574 : vector<50xf32> to vector<1x50xf32>
      %576 = vector.broadcast %cst_30 : f32 to vector<1x50xf32>
      %577 = arith.mulf %575, %576 : vector<1x50xf32>
      %578 = vector.broadcast %cst_31 : f32 to vector<1x50xf32>
      %579 = arith.addf %577, %578 : vector<1x50xf32>
      %580 = tpu.reciprocal %579 {approx = true} : vector<1x50xf32> -> vector<1x50xf32>
      %c28_i32 = arith.constant 28 : i32
      %581 = vector.broadcast %580 : vector<1x50xf32> to vector<10x50xf32>
      %582 = arith.mulf %23, %581 : vector<10x50xf32>
      %cst_102 = arith.constant dense<0.000000e+00> : vector<10xf32>
      %583 = vector.multi_reduction <add>, %582, %cst_102 [1] : vector<10x50xf32> to vector<10xf32>
      %584 = vector.shape_cast %583 : vector<10xf32> to vector<10x1xf32>
      %585 = vector.broadcast %cst_28 : f32 to vector<10x1xf32>
      %586 = arith.mulf %584, %585 : vector<10x1xf32>
      %587 = vector.broadcast %cst_29 : f32 to vector<10x1xf32>
      %588 = arith.addf %586, %587 : vector<10x1xf32>
      %589 = tpu.reciprocal %588 {approx = true} : vector<10x1xf32> -> vector<10x1xf32>
      %590 = vector.broadcast %589 : vector<10x1xf32> to vector<10x50xf32>
      %591 = arith.mulf %23, %590 : vector<10x50xf32>
      %cst_103 = arith.constant dense<0.000000e+00> : vector<50xf32>
      %592 = vector.multi_reduction <add>, %591, %cst_103 [0] : vector<10x50xf32> to vector<50xf32>
      %593 = vector.shape_cast %592 : vector<50xf32> to vector<1x50xf32>
      %594 = vector.broadcast %cst_30 : f32 to vector<1x50xf32>
      %595 = arith.mulf %593, %594 : vector<1x50xf32>
      %596 = vector.broadcast %cst_31 : f32 to vector<1x50xf32>
      %597 = arith.addf %595, %596 : vector<1x50xf32>
      %598 = tpu.reciprocal %597 {approx = true} : vector<1x50xf32> -> vector<1x50xf32>
      %c29_i32 = arith.constant 29 : i32
      %599 = vector.broadcast %598 : vector<1x50xf32> to vector<10x50xf32>
      %600 = arith.mulf %23, %599 : vector<10x50xf32>
      %cst_104 = arith.constant dense<0.000000e+00> : vector<10xf32>
      %601 = vector.multi_reduction <add>, %600, %cst_104 [1] : vector<10x50xf32> to vector<10xf32>
      %602 = vector.shape_cast %601 : vector<10xf32> to vector<10x1xf32>
      %603 = vector.broadcast %cst_28 : f32 to vector<10x1xf32>
      %604 = arith.mulf %602, %603 : vector<10x1xf32>
      %605 = vector.broadcast %cst_29 : f32 to vector<10x1xf32>
      %606 = arith.addf %604, %605 : vector<10x1xf32>
      %607 = tpu.reciprocal %606 {approx = true} : vector<10x1xf32> -> vector<10x1xf32>
      %608 = vector.broadcast %607 : vector<10x1xf32> to vector<10x50xf32>
      %609 = arith.mulf %23, %608 : vector<10x50xf32>
      %cst_105 = arith.constant dense<0.000000e+00> : vector<50xf32>
      %610 = vector.multi_reduction <add>, %609, %cst_105 [0] : vector<10x50xf32> to vector<50xf32>
      %611 = vector.shape_cast %610 : vector<50xf32> to vector<1x50xf32>
      %612 = vector.broadcast %cst_30 : f32 to vector<1x50xf32>
      %613 = arith.mulf %611, %612 : vector<1x50xf32>
      %614 = vector.broadcast %cst_31 : f32 to vector<1x50xf32>
      %615 = arith.addf %613, %614 : vector<1x50xf32>
      %616 = tpu.reciprocal %615 {approx = true} : vector<1x50xf32> -> vector<1x50xf32>
      %c30_i32 = arith.constant 30 : i32
      %617 = vector.broadcast %616 : vector<1x50xf32> to vector<10x50xf32>
      %618 = arith.mulf %23, %617 : vector<10x50xf32>
      %cst_106 = arith.constant dense<0.000000e+00> : vector<10xf32>
      %619 = vector.multi_reduction <add>, %618, %cst_106 [1] : vector<10x50xf32> to vector<10xf32>
      %620 = vector.shape_cast %619 : vector<10xf32> to vector<10x1xf32>
      %621 = vector.broadcast %cst_28 : f32 to vector<10x1xf32>
      %622 = arith.mulf %620, %621 : vector<10x1xf32>
      %623 = vector.broadcast %cst_29 : f32 to vector<10x1xf32>
      %624 = arith.addf %622, %623 : vector<10x1xf32>
      %625 = tpu.reciprocal %624 {approx = true} : vector<10x1xf32> -> vector<10x1xf32>
      %626 = vector.broadcast %625 : vector<10x1xf32> to vector<10x50xf32>
      %627 = arith.mulf %23, %626 : vector<10x50xf32>
      %cst_107 = arith.constant dense<0.000000e+00> : vector<50xf32>
      %628 = vector.multi_reduction <add>, %627, %cst_107 [0] : vector<10x50xf32> to vector<50xf32>
      %629 = vector.shape_cast %628 : vector<50xf32> to vector<1x50xf32>
      %630 = vector.broadcast %cst_30 : f32 to vector<1x50xf32>
      %631 = arith.mulf %629, %630 : vector<1x50xf32>
      %632 = vector.broadcast %cst_31 : f32 to vector<1x50xf32>
      %633 = arith.addf %631, %632 : vector<1x50xf32>
      %634 = tpu.reciprocal %633 {approx = true} : vector<1x50xf32> -> vector<1x50xf32>
      %c31_i32 = arith.constant 31 : i32
      %635 = vector.broadcast %634 : vector<1x50xf32> to vector<10x50xf32>
      %636 = arith.mulf %23, %635 : vector<10x50xf32>
      %cst_108 = arith.constant dense<0.000000e+00> : vector<10xf32>
      %637 = vector.multi_reduction <add>, %636, %cst_108 [1] : vector<10x50xf32> to vector<10xf32>
      %638 = vector.shape_cast %637 : vector<10xf32> to vector<10x1xf32>
      %639 = vector.broadcast %cst_28 : f32 to vector<10x1xf32>
      %640 = arith.mulf %638, %639 : vector<10x1xf32>
      %641 = vector.broadcast %cst_29 : f32 to vector<10x1xf32>
      %642 = arith.addf %640, %641 : vector<10x1xf32>
      %643 = tpu.reciprocal %642 {approx = true} : vector<10x1xf32> -> vector<10x1xf32>
      %644 = vector.broadcast %643 : vector<10x1xf32> to vector<10x50xf32>
      %645 = arith.mulf %23, %644 : vector<10x50xf32>
      %cst_109 = arith.constant dense<0.000000e+00> : vector<50xf32>
      %646 = vector.multi_reduction <add>, %645, %cst_109 [0] : vector<10x50xf32> to vector<50xf32>
      %647 = vector.shape_cast %646 : vector<50xf32> to vector<1x50xf32>
      %648 = vector.broadcast %cst_30 : f32 to vector<1x50xf32>
      %649 = arith.mulf %647, %648 : vector<1x50xf32>
      %650 = vector.broadcast %cst_31 : f32 to vector<1x50xf32>
      %651 = arith.addf %649, %650 : vector<1x50xf32>
      %652 = tpu.reciprocal %651 {approx = true} : vector<1x50xf32> -> vector<1x50xf32>
      %c32_i32 = arith.constant 32 : i32
      %653 = vector.broadcast %652 : vector<1x50xf32> to vector<10x50xf32>
      %654 = arith.mulf %23, %653 : vector<10x50xf32>
      %cst_110 = arith.constant dense<0.000000e+00> : vector<10xf32>
      %655 = vector.multi_reduction <add>, %654, %cst_110 [1] : vector<10x50xf32> to vector<10xf32>
      %656 = vector.shape_cast %655 : vector<10xf32> to vector<10x1xf32>
      %657 = vector.broadcast %cst_28 : f32 to vector<10x1xf32>
      %658 = arith.mulf %656, %657 : vector<10x1xf32>
      %659 = vector.broadcast %cst_29 : f32 to vector<10x1xf32>
      %660 = arith.addf %658, %659 : vector<10x1xf32>
      %661 = tpu.reciprocal %660 {approx = true} : vector<10x1xf32> -> vector<10x1xf32>
      %662 = vector.broadcast %661 : vector<10x1xf32> to vector<10x50xf32>
      %663 = arith.mulf %23, %662 : vector<10x50xf32>
      %cst_111 = arith.constant dense<0.000000e+00> : vector<50xf32>
      %664 = vector.multi_reduction <add>, %663, %cst_111 [0] : vector<10x50xf32> to vector<50xf32>
      %665 = vector.shape_cast %664 : vector<50xf32> to vector<1x50xf32>
      %666 = vector.broadcast %cst_30 : f32 to vector<1x50xf32>
      %667 = arith.mulf %665, %666 : vector<1x50xf32>
      %668 = vector.broadcast %cst_31 : f32 to vector<1x50xf32>
      %669 = arith.addf %667, %668 : vector<1x50xf32>
      %670 = tpu.reciprocal %669 {approx = true} : vector<1x50xf32> -> vector<1x50xf32>
      %c33_i32 = arith.constant 33 : i32
      %671 = vector.broadcast %670 : vector<1x50xf32> to vector<10x50xf32>
      %672 = arith.mulf %23, %671 : vector<10x50xf32>
      %cst_112 = arith.constant dense<0.000000e+00> : vector<10xf32>
      %673 = vector.multi_reduction <add>, %672, %cst_112 [1] : vector<10x50xf32> to vector<10xf32>
      %674 = vector.shape_cast %673 : vector<10xf32> to vector<10x1xf32>
      %675 = vector.broadcast %cst_28 : f32 to vector<10x1xf32>
      %676 = arith.mulf %674, %675 : vector<10x1xf32>
      %677 = vector.broadcast %cst_29 : f32 to vector<10x1xf32>
      %678 = arith.addf %676, %677 : vector<10x1xf32>
      %679 = tpu.reciprocal %678 {approx = true} : vector<10x1xf32> -> vector<10x1xf32>
      %680 = vector.broadcast %679 : vector<10x1xf32> to vector<10x50xf32>
      %681 = arith.mulf %23, %680 : vector<10x50xf32>
      %cst_113 = arith.constant dense<0.000000e+00> : vector<50xf32>
      %682 = vector.multi_reduction <add>, %681, %cst_113 [0] : vector<10x50xf32> to vector<50xf32>
      %683 = vector.shape_cast %682 : vector<50xf32> to vector<1x50xf32>
      %684 = vector.broadcast %cst_30 : f32 to vector<1x50xf32>
      %685 = arith.mulf %683, %684 : vector<1x50xf32>
      %686 = vector.broadcast %cst_31 : f32 to vector<1x50xf32>
      %687 = arith.addf %685, %686 : vector<1x50xf32>
      %688 = tpu.reciprocal %687 {approx = true} : vector<1x50xf32> -> vector<1x50xf32>
      %c34_i32 = arith.constant 34 : i32
      %689 = vector.broadcast %688 : vector<1x50xf32> to vector<10x50xf32>
      %690 = arith.mulf %23, %689 : vector<10x50xf32>
      %cst_114 = arith.constant dense<0.000000e+00> : vector<10xf32>
      %691 = vector.multi_reduction <add>, %690, %cst_114 [1] : vector<10x50xf32> to vector<10xf32>
      %692 = vector.shape_cast %691 : vector<10xf32> to vector<10x1xf32>
      %693 = vector.broadcast %cst_28 : f32 to vector<10x1xf32>
      %694 = arith.mulf %692, %693 : vector<10x1xf32>
      %695 = vector.broadcast %cst_29 : f32 to vector<10x1xf32>
      %696 = arith.addf %694, %695 : vector<10x1xf32>
      %697 = tpu.reciprocal %696 {approx = true} : vector<10x1xf32> -> vector<10x1xf32>
      %698 = vector.broadcast %697 : vector<10x1xf32> to vector<10x50xf32>
      %699 = arith.mulf %23, %698 : vector<10x50xf32>
      %cst_115 = arith.constant dense<0.000000e+00> : vector<50xf32>
      %700 = vector.multi_reduction <add>, %699, %cst_115 [0] : vector<10x50xf32> to vector<50xf32>
      %701 = vector.shape_cast %700 : vector<50xf32> to vector<1x50xf32>
      %702 = vector.broadcast %cst_30 : f32 to vector<1x50xf32>
      %703 = arith.mulf %701, %702 : vector<1x50xf32>
      %704 = vector.broadcast %cst_31 : f32 to vector<1x50xf32>
      %705 = arith.addf %703, %704 : vector<1x50xf32>
      %706 = tpu.reciprocal %705 {approx = true} : vector<1x50xf32> -> vector<1x50xf32>
      %c35_i32 = arith.constant 35 : i32
      %707 = vector.broadcast %706 : vector<1x50xf32> to vector<10x50xf32>
      %708 = arith.mulf %23, %707 : vector<10x50xf32>
      %cst_116 = arith.constant dense<0.000000e+00> : vector<10xf32>
      %709 = vector.multi_reduction <add>, %708, %cst_116 [1] : vector<10x50xf32> to vector<10xf32>
      %710 = vector.shape_cast %709 : vector<10xf32> to vector<10x1xf32>
      %711 = vector.broadcast %cst_28 : f32 to vector<10x1xf32>
      %712 = arith.mulf %710, %711 : vector<10x1xf32>
      %713 = vector.broadcast %cst_29 : f32 to vector<10x1xf32>
      %714 = arith.addf %712, %713 : vector<10x1xf32>
      %715 = tpu.reciprocal %714 {approx = true} : vector<10x1xf32> -> vector<10x1xf32>
      %716 = vector.broadcast %715 : vector<10x1xf32> to vector<10x50xf32>
      %717 = arith.mulf %23, %716 : vector<10x50xf32>
      %cst_117 = arith.constant dense<0.000000e+00> : vector<50xf32>
      %718 = vector.multi_reduction <add>, %717, %cst_117 [0] : vector<10x50xf32> to vector<50xf32>
      %719 = vector.shape_cast %718 : vector<50xf32> to vector<1x50xf32>
      %720 = vector.broadcast %cst_30 : f32 to vector<1x50xf32>
      %721 = arith.mulf %719, %720 : vector<1x50xf32>
      %722 = vector.broadcast %cst_31 : f32 to vector<1x50xf32>
      %723 = arith.addf %721, %722 : vector<1x50xf32>
      %724 = tpu.reciprocal %723 {approx = true} : vector<1x50xf32> -> vector<1x50xf32>
      %c36_i32 = arith.constant 36 : i32
      %725 = vector.broadcast %724 : vector<1x50xf32> to vector<10x50xf32>
      %726 = arith.mulf %23, %725 : vector<10x50xf32>
      %cst_118 = arith.constant dense<0.000000e+00> : vector<10xf32>
      %727 = vector.multi_reduction <add>, %726, %cst_118 [1] : vector<10x50xf32> to vector<10xf32>
      %728 = vector.shape_cast %727 : vector<10xf32> to vector<10x1xf32>
      %729 = vector.broadcast %cst_28 : f32 to vector<10x1xf32>
      %730 = arith.mulf %728, %729 : vector<10x1xf32>
      %731 = vector.broadcast %cst_29 : f32 to vector<10x1xf32>
      %732 = arith.addf %730, %731 : vector<10x1xf32>
      %733 = tpu.reciprocal %732 {approx = true} : vector<10x1xf32> -> vector<10x1xf32>
      %734 = vector.broadcast %733 : vector<10x1xf32> to vector<10x50xf32>
      %735 = arith.mulf %23, %734 : vector<10x50xf32>
      %cst_119 = arith.constant dense<0.000000e+00> : vector<50xf32>
      %736 = vector.multi_reduction <add>, %735, %cst_119 [0] : vector<10x50xf32> to vector<50xf32>
      %737 = vector.shape_cast %736 : vector<50xf32> to vector<1x50xf32>
      %738 = vector.broadcast %cst_30 : f32 to vector<1x50xf32>
      %739 = arith.mulf %737, %738 : vector<1x50xf32>
      %740 = vector.broadcast %cst_31 : f32 to vector<1x50xf32>
      %741 = arith.addf %739, %740 : vector<1x50xf32>
      %742 = tpu.reciprocal %741 {approx = true} : vector<1x50xf32> -> vector<1x50xf32>
      %c37_i32 = arith.constant 37 : i32
      %743 = vector.broadcast %742 : vector<1x50xf32> to vector<10x50xf32>
      %744 = arith.mulf %23, %743 : vector<10x50xf32>
      %cst_120 = arith.constant dense<0.000000e+00> : vector<10xf32>
      %745 = vector.multi_reduction <add>, %744, %cst_120 [1] : vector<10x50xf32> to vector<10xf32>
      %746 = vector.shape_cast %745 : vector<10xf32> to vector<10x1xf32>
      %747 = vector.broadcast %cst_28 : f32 to vector<10x1xf32>
      %748 = arith.mulf %746, %747 : vector<10x1xf32>
      %749 = vector.broadcast %cst_29 : f32 to vector<10x1xf32>
      %750 = arith.addf %748, %749 : vector<10x1xf32>
      %751 = tpu.reciprocal %750 {approx = true} : vector<10x1xf32> -> vector<10x1xf32>
      %752 = vector.broadcast %751 : vector<10x1xf32> to vector<10x50xf32>
      %753 = arith.mulf %23, %752 : vector<10x50xf32>
      %cst_121 = arith.constant dense<0.000000e+00> : vector<50xf32>
      %754 = vector.multi_reduction <add>, %753, %cst_121 [0] : vector<10x50xf32> to vector<50xf32>
      %755 = vector.shape_cast %754 : vector<50xf32> to vector<1x50xf32>
      %756 = vector.broadcast %cst_30 : f32 to vector<1x50xf32>
      %757 = arith.mulf %755, %756 : vector<1x50xf32>
      %758 = vector.broadcast %cst_31 : f32 to vector<1x50xf32>
      %759 = arith.addf %757, %758 : vector<1x50xf32>
      %760 = tpu.reciprocal %759 {approx = true} : vector<1x50xf32> -> vector<1x50xf32>
      %c38_i32 = arith.constant 38 : i32
      %761 = vector.broadcast %760 : vector<1x50xf32> to vector<10x50xf32>
      %762 = arith.mulf %23, %761 : vector<10x50xf32>
      %cst_122 = arith.constant dense<0.000000e+00> : vector<10xf32>
      %763 = vector.multi_reduction <add>, %762, %cst_122 [1] : vector<10x50xf32> to vector<10xf32>
      %764 = vector.shape_cast %763 : vector<10xf32> to vector<10x1xf32>
      %765 = vector.broadcast %cst_28 : f32 to vector<10x1xf32>
      %766 = arith.mulf %764, %765 : vector<10x1xf32>
      %767 = vector.broadcast %cst_29 : f32 to vector<10x1xf32>
      %768 = arith.addf %766, %767 : vector<10x1xf32>
      %769 = tpu.reciprocal %768 {approx = true} : vector<10x1xf32> -> vector<10x1xf32>
      %770 = vector.broadcast %769 : vector<10x1xf32> to vector<10x50xf32>
      %771 = arith.mulf %23, %770 : vector<10x50xf32>
      %cst_123 = arith.constant dense<0.000000e+00> : vector<50xf32>
      %772 = vector.multi_reduction <add>, %771, %cst_123 [0] : vector<10x50xf32> to vector<50xf32>
      %773 = vector.shape_cast %772 : vector<50xf32> to vector<1x50xf32>
      %774 = vector.broadcast %cst_30 : f32 to vector<1x50xf32>
      %775 = arith.mulf %773, %774 : vector<1x50xf32>
      %776 = vector.broadcast %cst_31 : f32 to vector<1x50xf32>
      %777 = arith.addf %775, %776 : vector<1x50xf32>
      %778 = tpu.reciprocal %777 {approx = true} : vector<1x50xf32> -> vector<1x50xf32>
      %c39_i32 = arith.constant 39 : i32
      %779 = vector.broadcast %778 : vector<1x50xf32> to vector<10x50xf32>
      %780 = arith.mulf %23, %779 : vector<10x50xf32>
      %cst_124 = arith.constant dense<0.000000e+00> : vector<10xf32>
      %781 = vector.multi_reduction <add>, %780, %cst_124 [1] : vector<10x50xf32> to vector<10xf32>
      %782 = vector.shape_cast %781 : vector<10xf32> to vector<10x1xf32>
      %783 = vector.broadcast %cst_28 : f32 to vector<10x1xf32>
      %784 = arith.mulf %782, %783 : vector<10x1xf32>
      %785 = vector.broadcast %cst_29 : f32 to vector<10x1xf32>
      %786 = arith.addf %784, %785 : vector<10x1xf32>
      %787 = tpu.reciprocal %786 {approx = true} : vector<10x1xf32> -> vector<10x1xf32>
      %788 = vector.broadcast %787 : vector<10x1xf32> to vector<10x50xf32>
      %789 = arith.mulf %23, %788 : vector<10x50xf32>
      %cst_125 = arith.constant dense<0.000000e+00> : vector<50xf32>
      %790 = vector.multi_reduction <add>, %789, %cst_125 [0] : vector<10x50xf32> to vector<50xf32>
      %791 = vector.shape_cast %790 : vector<50xf32> to vector<1x50xf32>
      %792 = vector.broadcast %cst_30 : f32 to vector<1x50xf32>
      %793 = arith.mulf %791, %792 : vector<1x50xf32>
      %794 = vector.broadcast %cst_31 : f32 to vector<1x50xf32>
      %795 = arith.addf %793, %794 : vector<1x50xf32>
      %796 = tpu.reciprocal %795 {approx = true} : vector<1x50xf32> -> vector<1x50xf32>
      %c40_i32 = arith.constant 40 : i32
      %797 = vector.broadcast %796 : vector<1x50xf32> to vector<10x50xf32>
      %798 = arith.mulf %23, %797 : vector<10x50xf32>
      %cst_126 = arith.constant dense<0.000000e+00> : vector<10xf32>
      %799 = vector.multi_reduction <add>, %798, %cst_126 [1] : vector<10x50xf32> to vector<10xf32>
      %800 = vector.shape_cast %799 : vector<10xf32> to vector<10x1xf32>
      %801 = vector.broadcast %cst_28 : f32 to vector<10x1xf32>
      %802 = arith.mulf %800, %801 : vector<10x1xf32>
      %803 = vector.broadcast %cst_29 : f32 to vector<10x1xf32>
      %804 = arith.addf %802, %803 : vector<10x1xf32>
      %805 = tpu.reciprocal %804 {approx = true} : vector<10x1xf32> -> vector<10x1xf32>
      %806 = vector.broadcast %805 : vector<10x1xf32> to vector<10x50xf32>
      %807 = arith.mulf %23, %806 : vector<10x50xf32>
      %cst_127 = arith.constant dense<0.000000e+00> : vector<50xf32>
      %808 = vector.multi_reduction <add>, %807, %cst_127 [0] : vector<10x50xf32> to vector<50xf32>
      %809 = vector.shape_cast %808 : vector<50xf32> to vector<1x50xf32>
      %810 = vector.broadcast %cst_30 : f32 to vector<1x50xf32>
      %811 = arith.mulf %809, %810 : vector<1x50xf32>
      %812 = vector.broadcast %cst_31 : f32 to vector<1x50xf32>
      %813 = arith.addf %811, %812 : vector<1x50xf32>
      %814 = tpu.reciprocal %813 {approx = true} : vector<1x50xf32> -> vector<1x50xf32>
      %c41_i32 = arith.constant 41 : i32
      %815 = vector.broadcast %814 : vector<1x50xf32> to vector<10x50xf32>
      %816 = arith.mulf %23, %815 : vector<10x50xf32>
      %cst_128 = arith.constant dense<0.000000e+00> : vector<10xf32>
      %817 = vector.multi_reduction <add>, %816, %cst_128 [1] : vector<10x50xf32> to vector<10xf32>
      %818 = vector.shape_cast %817 : vector<10xf32> to vector<10x1xf32>
      %819 = vector.broadcast %cst_28 : f32 to vector<10x1xf32>
      %820 = arith.mulf %818, %819 : vector<10x1xf32>
      %821 = vector.broadcast %cst_29 : f32 to vector<10x1xf32>
      %822 = arith.addf %820, %821 : vector<10x1xf32>
      %823 = tpu.reciprocal %822 {approx = true} : vector<10x1xf32> -> vector<10x1xf32>
      %824 = vector.broadcast %823 : vector<10x1xf32> to vector<10x50xf32>
      %825 = arith.mulf %23, %824 : vector<10x50xf32>
      %cst_129 = arith.constant dense<0.000000e+00> : vector<50xf32>
      %826 = vector.multi_reduction <add>, %825, %cst_129 [0] : vector<10x50xf32> to vector<50xf32>
      %827 = vector.shape_cast %826 : vector<50xf32> to vector<1x50xf32>
      %828 = vector.broadcast %cst_30 : f32 to vector<1x50xf32>
      %829 = arith.mulf %827, %828 : vector<1x50xf32>
      %830 = vector.broadcast %cst_31 : f32 to vector<1x50xf32>
      %831 = arith.addf %829, %830 : vector<1x50xf32>
      %832 = tpu.reciprocal %831 {approx = true} : vector<1x50xf32> -> vector<1x50xf32>
      %c42_i32 = arith.constant 42 : i32
      %833 = vector.broadcast %832 : vector<1x50xf32> to vector<10x50xf32>
      %834 = arith.mulf %23, %833 : vector<10x50xf32>
      %cst_130 = arith.constant dense<0.000000e+00> : vector<10xf32>
      %835 = vector.multi_reduction <add>, %834, %cst_130 [1] : vector<10x50xf32> to vector<10xf32>
      %836 = vector.shape_cast %835 : vector<10xf32> to vector<10x1xf32>
      %837 = vector.broadcast %cst_28 : f32 to vector<10x1xf32>
      %838 = arith.mulf %836, %837 : vector<10x1xf32>
      %839 = vector.broadcast %cst_29 : f32 to vector<10x1xf32>
      %840 = arith.addf %838, %839 : vector<10x1xf32>
      %841 = tpu.reciprocal %840 {approx = true} : vector<10x1xf32> -> vector<10x1xf32>
      %842 = vector.broadcast %841 : vector<10x1xf32> to vector<10x50xf32>
      %843 = arith.mulf %23, %842 : vector<10x50xf32>
      %cst_131 = arith.constant dense<0.000000e+00> : vector<50xf32>
      %844 = vector.multi_reduction <add>, %843, %cst_131 [0] : vector<10x50xf32> to vector<50xf32>
      %845 = vector.shape_cast %844 : vector<50xf32> to vector<1x50xf32>
      %846 = vector.broadcast %cst_30 : f32 to vector<1x50xf32>
      %847 = arith.mulf %845, %846 : vector<1x50xf32>
      %848 = vector.broadcast %cst_31 : f32 to vector<1x50xf32>
      %849 = arith.addf %847, %848 : vector<1x50xf32>
      %850 = tpu.reciprocal %849 {approx = true} : vector<1x50xf32> -> vector<1x50xf32>
      %c43_i32 = arith.constant 43 : i32
      %851 = vector.broadcast %850 : vector<1x50xf32> to vector<10x50xf32>
      %852 = arith.mulf %23, %851 : vector<10x50xf32>
      %cst_132 = arith.constant dense<0.000000e+00> : vector<10xf32>
      %853 = vector.multi_reduction <add>, %852, %cst_132 [1] : vector<10x50xf32> to vector<10xf32>
      %854 = vector.shape_cast %853 : vector<10xf32> to vector<10x1xf32>
      %855 = vector.broadcast %cst_28 : f32 to vector<10x1xf32>
      %856 = arith.mulf %854, %855 : vector<10x1xf32>
      %857 = vector.broadcast %cst_29 : f32 to vector<10x1xf32>
      %858 = arith.addf %856, %857 : vector<10x1xf32>
      %859 = tpu.reciprocal %858 {approx = true} : vector<10x1xf32> -> vector<10x1xf32>
      %860 = vector.broadcast %859 : vector<10x1xf32> to vector<10x50xf32>
      %861 = arith.mulf %23, %860 : vector<10x50xf32>
      %cst_133 = arith.constant dense<0.000000e+00> : vector<50xf32>
      %862 = vector.multi_reduction <add>, %861, %cst_133 [0] : vector<10x50xf32> to vector<50xf32>
      %863 = vector.shape_cast %862 : vector<50xf32> to vector<1x50xf32>
      %864 = vector.broadcast %cst_30 : f32 to vector<1x50xf32>
      %865 = arith.mulf %863, %864 : vector<1x50xf32>
      %866 = vector.broadcast %cst_31 : f32 to vector<1x50xf32>
      %867 = arith.addf %865, %866 : vector<1x50xf32>
      %868 = tpu.reciprocal %867 {approx = true} : vector<1x50xf32> -> vector<1x50xf32>
      %c44_i32 = arith.constant 44 : i32
      %869 = vector.broadcast %868 : vector<1x50xf32> to vector<10x50xf32>
      %870 = arith.mulf %23, %869 : vector<10x50xf32>
      %cst_134 = arith.constant dense<0.000000e+00> : vector<10xf32>
      %871 = vector.multi_reduction <add>, %870, %cst_134 [1] : vector<10x50xf32> to vector<10xf32>
      %872 = vector.shape_cast %871 : vector<10xf32> to vector<10x1xf32>
      %873 = vector.broadcast %cst_28 : f32 to vector<10x1xf32>
      %874 = arith.mulf %872, %873 : vector<10x1xf32>
      %875 = vector.broadcast %cst_29 : f32 to vector<10x1xf32>
      %876 = arith.addf %874, %875 : vector<10x1xf32>
      %877 = tpu.reciprocal %876 {approx = true} : vector<10x1xf32> -> vector<10x1xf32>
      %878 = vector.broadcast %877 : vector<10x1xf32> to vector<10x50xf32>
      %879 = arith.mulf %23, %878 : vector<10x50xf32>
      %cst_135 = arith.constant dense<0.000000e+00> : vector<50xf32>
      %880 = vector.multi_reduction <add>, %879, %cst_135 [0] : vector<10x50xf32> to vector<50xf32>
      %881 = vector.shape_cast %880 : vector<50xf32> to vector<1x50xf32>
      %882 = vector.broadcast %cst_30 : f32 to vector<1x50xf32>
      %883 = arith.mulf %881, %882 : vector<1x50xf32>
      %884 = vector.broadcast %cst_31 : f32 to vector<1x50xf32>
      %885 = arith.addf %883, %884 : vector<1x50xf32>
      %886 = tpu.reciprocal %885 {approx = true} : vector<1x50xf32> -> vector<1x50xf32>
      %c45_i32 = arith.constant 45 : i32
      %887 = vector.broadcast %886 : vector<1x50xf32> to vector<10x50xf32>
      %888 = arith.mulf %23, %887 : vector<10x50xf32>
      %cst_136 = arith.constant dense<0.000000e+00> : vector<10xf32>
      %889 = vector.multi_reduction <add>, %888, %cst_136 [1] : vector<10x50xf32> to vector<10xf32>
      %890 = vector.shape_cast %889 : vector<10xf32> to vector<10x1xf32>
      %891 = vector.broadcast %cst_28 : f32 to vector<10x1xf32>
      %892 = arith.mulf %890, %891 : vector<10x1xf32>
      %893 = vector.broadcast %cst_29 : f32 to vector<10x1xf32>
      %894 = arith.addf %892, %893 : vector<10x1xf32>
      %895 = tpu.reciprocal %894 {approx = true} : vector<10x1xf32> -> vector<10x1xf32>
      %896 = vector.broadcast %895 : vector<10x1xf32> to vector<10x50xf32>
      %897 = arith.mulf %23, %896 : vector<10x50xf32>
      %cst_137 = arith.constant dense<0.000000e+00> : vector<50xf32>
      %898 = vector.multi_reduction <add>, %897, %cst_137 [0] : vector<10x50xf32> to vector<50xf32>
      %899 = vector.shape_cast %898 : vector<50xf32> to vector<1x50xf32>
      %900 = vector.broadcast %cst_30 : f32 to vector<1x50xf32>
      %901 = arith.mulf %899, %900 : vector<1x50xf32>
      %902 = vector.broadcast %cst_31 : f32 to vector<1x50xf32>
      %903 = arith.addf %901, %902 : vector<1x50xf32>
      %904 = tpu.reciprocal %903 {approx = true} : vector<1x50xf32> -> vector<1x50xf32>
      %c46_i32 = arith.constant 46 : i32
      %905 = vector.broadcast %904 : vector<1x50xf32> to vector<10x50xf32>
      %906 = arith.mulf %23, %905 : vector<10x50xf32>
      %cst_138 = arith.constant dense<0.000000e+00> : vector<10xf32>
      %907 = vector.multi_reduction <add>, %906, %cst_138 [1] : vector<10x50xf32> to vector<10xf32>
      %908 = vector.shape_cast %907 : vector<10xf32> to vector<10x1xf32>
      %909 = vector.broadcast %cst_28 : f32 to vector<10x1xf32>
      %910 = arith.mulf %908, %909 : vector<10x1xf32>
      %911 = vector.broadcast %cst_29 : f32 to vector<10x1xf32>
      %912 = arith.addf %910, %911 : vector<10x1xf32>
      %913 = tpu.reciprocal %912 {approx = true} : vector<10x1xf32> -> vector<10x1xf32>
      %914 = vector.broadcast %913 : vector<10x1xf32> to vector<10x50xf32>
      %915 = arith.mulf %23, %914 : vector<10x50xf32>
      %cst_139 = arith.constant dense<0.000000e+00> : vector<50xf32>
      %916 = vector.multi_reduction <add>, %915, %cst_139 [0] : vector<10x50xf32> to vector<50xf32>
      %917 = vector.shape_cast %916 : vector<50xf32> to vector<1x50xf32>
      %918 = vector.broadcast %cst_30 : f32 to vector<1x50xf32>
      %919 = arith.mulf %917, %918 : vector<1x50xf32>
      %920 = vector.broadcast %cst_31 : f32 to vector<1x50xf32>
      %921 = arith.addf %919, %920 : vector<1x50xf32>
      %922 = tpu.reciprocal %921 {approx = true} : vector<1x50xf32> -> vector<1x50xf32>
      %c47_i32 = arith.constant 47 : i32
      %923 = vector.broadcast %922 : vector<1x50xf32> to vector<10x50xf32>
      %924 = arith.mulf %23, %923 : vector<10x50xf32>
      %cst_140 = arith.constant dense<0.000000e+00> : vector<10xf32>
      %925 = vector.multi_reduction <add>, %924, %cst_140 [1] : vector<10x50xf32> to vector<10xf32>
      %926 = vector.shape_cast %925 : vector<10xf32> to vector<10x1xf32>
      %927 = vector.broadcast %cst_28 : f32 to vector<10x1xf32>
      %928 = arith.mulf %926, %927 : vector<10x1xf32>
      %929 = vector.broadcast %cst_29 : f32 to vector<10x1xf32>
      %930 = arith.addf %928, %929 : vector<10x1xf32>
      %931 = tpu.reciprocal %930 {approx = true} : vector<10x1xf32> -> vector<10x1xf32>
      %932 = vector.broadcast %931 : vector<10x1xf32> to vector<10x50xf32>
      %933 = arith.mulf %23, %932 : vector<10x50xf32>
      %cst_141 = arith.constant dense<0.000000e+00> : vector<50xf32>
      %934 = vector.multi_reduction <add>, %933, %cst_141 [0] : vector<10x50xf32> to vector<50xf32>
      %935 = vector.shape_cast %934 : vector<50xf32> to vector<1x50xf32>
      %936 = vector.broadcast %cst_30 : f32 to vector<1x50xf32>
      %937 = arith.mulf %935, %936 : vector<1x50xf32>
      %938 = vector.broadcast %cst_31 : f32 to vector<1x50xf32>
      %939 = arith.addf %937, %938 : vector<1x50xf32>
      %940 = tpu.reciprocal %939 {approx = true} : vector<1x50xf32> -> vector<1x50xf32>
      %941 = vector.broadcast %940 : vector<1x50xf32> to vector<10x50xf32>
      %942 = arith.mulf %23, %941 : vector<10x50xf32>
      %cst_142 = arith.constant dense<0.000000e+00> : vector<10xf32>
      %943 = vector.multi_reduction <add>, %942, %cst_142 [1] : vector<10x50xf32> to vector<10xf32>
      %944 = vector.shape_cast %943 : vector<10xf32> to vector<10x1xf32>
      %945 = vector.broadcast %cst_32 : f32 to vector<10x1xf32>
      %946 = arith.addf %944, %945 : vector<10x1xf32>
      %947 = vector.broadcast %cst_33 : f32 to vector<10x1xf32>
      %948 = arith.divf %947, %946 : vector<10x1xf32>
      %949 = vector.broadcast %948 : vector<10x1xf32> to vector<10x50xf32>
      %950 = arith.mulf %23, %949 : vector<10x50xf32>
      %cst_143 = arith.constant dense<0.000000e+00> : vector<50xf32>
      %951 = vector.multi_reduction <add>, %950, %cst_143 [0] : vector<10x50xf32> to vector<50xf32>
      %952 = vector.shape_cast %951 : vector<50xf32> to vector<1x50xf32>
      %953 = vector.broadcast %cst_32 : f32 to vector<1x50xf32>
      %954 = arith.addf %952, %953 : vector<1x50xf32>
      %955 = vector.broadcast %cst_34 : f32 to vector<1x50xf32>
      %956 = arith.divf %955, %954 : vector<1x50xf32>
      scf.yield %956, %948 : vector<1x50xf32>, vector<10x1xf32>
    } else {
      scf.yield %52#2, %52#3 : vector<1x50xf32>, vector<10x1xf32>
    }
    %cst_36 = arith.constant 0.000000e+00 : f32
    %57 = vector.broadcast %cst_36 : f32 to vector<10x50xf32>
    %58 = arith.cmpf ogt, %23, %57 : vector<10x50xf32>
    %59 = math.log %23 : vector<10x50xf32>
    %60 = arith.mulf %23, %59 : vector<10x50xf32>
    %cst_37 = arith.constant 0.000000e+00 : f32
    %61 = vector.broadcast %cst_37 : f32 to vector<10x50xf32>
    %62 = arith.select %58, %60, %61 : vector<10x50xi1>, vector<10x50xf32>
    %cst_38 = arith.constant 0.000000e+00 : f32
    %cst_39 = arith.constant 5.000000e-02 : f32
    %63 = arith.subf %cst_38, %cst_39 : f32
    %64 = vector.broadcast %63 : f32 to vector<10x50xf32>
    %65 = arith.mulf %64, %62 : vector<10x50xf32>
    %66 = vector.broadcast %56#0 : vector<1x50xf32> to vector<10x50xf32>
    %67 = arith.mulf %65, %66 : vector<10x50xf32>
    %68 = vector.broadcast %56#1 : vector<10x1xf32> to vector<10x50xf32>
    %69 = arith.mulf %67, %68 : vector<10x50xf32>
    %cst_40 = arith.constant dense<0.000000e+00> : vector<10xf32>
    %70 = vector.multi_reduction <add>, %69, %cst_40 [1] : vector<10x50xf32> to vector<10xf32>
    %71 = vector.shape_cast %70 : vector<10xf32> to vector<10x1xf32>
    %cst_41 = arith.constant dense<0.000000e+00> : vector<1xf32>
    %72 = vector.multi_reduction <add>, %71, %cst_41 [0] : vector<10x1xf32> to vector<1xf32>
    %73 = vector.shape_cast %72 : vector<1xf32> to vector<1x1xf32>
    %cst_42 = arith.constant 2.500000e+02 : f32
    %74 = vector.broadcast %cst_42 : f32 to vector<1x1xf32>
    %75 = arith.mulf %73, %74 : vector<1x1xf32>
    %c0_43 = arith.constant 0 : index
    %c0_44 = arith.constant 0 : index
    %76 = vector.load %arg2[%c0_43, %c0_44] : memref<1x1xf32, #tpu.memory_space<vmem>>, vector<1x1xf32>
    tpu.vector_store %arg2[%c0_43, %c0_44], %75 {strides = array<i32>} : memref<1x1xf32, #tpu.memory_space<vmem>>, vector<1x1xf32>,
    return
  }
}

</mosaic_0001>

<bundles_post_ra>
// kernel: tpu_custom_call.1
= control target key start
LH: loop header
LB: loop body
LE: loop exit
PB: predicated region body
PF: predicated region fallthrough
CT: control target
= control target key end

     0   :  { %vm23_vm0 = vcmask 261120   ;;  %s5061_s0 = inlined_call_operand.vmem [shape: f32[50,32], index: 0, kind: input, shape index: {}]   ;;  %s5062_s1 = inlined_call_operand.vmem [shape: f32[10,32], index: 1, kind: input, shape index: {}]   ;;  %s5063_s2 = inlined_call_operand.hbm [shape: f32[1,1], index: 2, kind: output, shape index: {}]  }
   0x1   :  { %v18_v0 = vld [vmem:[%s5061_s0 + $0x30] sm:$0x3] }
   0x2   :  { %7 = vsyncpa [#allocation3], 0  ;;  %v17_v1 = vld [vmem:[%s5061_s0 + $0x28] sm:$0xff]  ;;  %3263 = vmatpush.xpose.msk.msra.mxu2 %vm23_vm0, %v18_v0  ;;  %v37_v2 = vmul.f32 %v18_v0, %v18_v0  ;;  %3249 = vmatpush.xpose.msk.msra.mxu1 %vm23_vm0, %v18_v0  ;;  %v19_v4 = vld [vmem:[%s5062_s1] sm:$0xff]  ;;  %vm27_vm1 = vcmask 254976   ;;  %v4074_v20 = vmov 1.0  }
   0x3   :  { %v36_v3 = vmul.f32 %v17_v1, %v17_v1  ;;  %v16_v5 = vld [vmem:[%s5061_s0 + $0x20] sm:$0xff]  ;;  %v21_v6 = vmul.f32 %v19_v4, %v19_v4  ;;  %v20_v9 = vld [vmem:[%s5062_s1 + $0x8] sm:$0x3]  ;;  %v15_v10 = vld [vmem:[%s5061_s0 + $0x18] sm:$0xff]  ;;  %vm175_vm6 = vcmask 408576   ;;  %vm179_vm7 = vcmask 402432  }
   0x4   :  { %3241 = vmatpush.xpose.msk.msra.mxu0 %vm23_vm0, %v37_v2  ;;  %v35_v8 = vmul.f32 %v16_v5, %v16_v5  ;;  %v22_v11 = vmul.f32 %v20_v9, %v20_v9  ;;  %v34_v12 = vmul.f32 %v15_v10, %v15_v10  ;;  %v14_v13 = vld [vmem:[%s5061_s0 + $0x10] sm:$0xff]  ;;  %v13_v16 = vld [vmem:[%s5061_s0 + $0x8] sm:$0xff]  ;;  %v12_v18 = vld [vmem:[%s5061_s0] sm:$0xff] }
   0x5   :  { %v24_v7 = vsel %vm23_vm0, %v21_v6, 0.0  ;;  %v33_v15 = vmul.f32 %v14_v13, %v14_v13  ;;  %v32_v17 = vmul.f32 %v13_v16, %v13_v16  ;;  %v31_v19 = vmul.f32 %v12_v18, %v12_v18 }
   0x6   :  { %3264 = vmatpush.xpose.msk.msra.mxu2 %vm23_vm0, %v17_v1  ;;  %3250 = vmatpush.xpose.msk.msra.mxu1 %vm23_vm0, %v17_v1  ;;  %v28_v14 = vsel %vm27_vm1, %v22_v11, 0.0 }
   0x7   :  { %25 = vadd.xlane.f32.xlu0 %v24_v7 }
   0x8   :  { %3242 = vmatpush.xpose.msk.msra.mxu0 %vm23_vm0, %v36_v3 }
   0xa   :  { %3265 = vmatpush.xpose.msk.msra.mxu2 %vm23_vm0, %v16_v5  ;;  %3251 = vmatpush.xpose.msk.msra.mxu1 %vm23_vm0, %v16_v5 }
   0xc   :  { %3243 = vmatpush.xpose.msk.msra.mxu0 %vm23_vm0, %v35_v8 }
   0xe   :  { %3266 = vmatpush.xpose.msk.msra.mxu2 %vm23_vm0, %v15_v10  ;;  %3252 = vmatpush.xpose.msk.msra.mxu1 %vm23_vm0, %v15_v10 }
   0xf   :  { %29 = vadd.xlane.f32.xlu0 %v28_v14 }
  0x10   :  { %3244 = vmatpush.xpose.msk.msra.mxu0 %vm23_vm0, %v34_v12 }
  0x12   :  { %3267 = vmatpush.xpose.msk.msra.mxu2 %vm23_vm0, %v14_v13  ;;  %3253 = vmatpush.xpose.msk.msra.mxu1 %vm23_vm0, %v14_v13 }
  0x14   :  { %3245 = vmatpush.xpose.msk.msra.mxu0 %vm23_vm0, %v33_v15 }
  0x16   :  { %3268 = vmatpush.xpose.msk.msra.mxu2 %vm23_vm0, %v13_v16  ;;  %3254 = vmatpush.xpose.msk.msra.mxu1 %vm23_vm0, %v13_v16 }
  0x18   :  { %3246 = vmatpush.xpose.msk.msra.mxu0 %vm23_vm0, %v32_v17 }
  0x1a   :  { %3269 = vmatpush.xpose.msk.msra.mxu2 %vm23_vm0, %v12_v18  ;;  %3255 = vmatpush.xpose.msk.msra.mxu1 %vm23_vm0, %v12_v18 }
  0x1c   :  { %3247 = vmatpush.xpose.msk.msra.mxu0 %vm23_vm0, %v31_v19 }
  0x1d   :  { %3257 = vmatmul.msk.f32.vlgmr.msra.gmra.mxu2 %vm23_vm0, %v20_v9  ;;  %3256 = vmatmul.msk.f32.vlgmr.msra.gmra.mxu1 %vm23_vm0, %v19_v4 }
  0x1f   :  { %3248 = vmatmul.msk.f32.vlgmr.msra.gmra.mxu0 %vm23_vm0, %v4074_v20 }
  0x7a   :  { %v26_v21 = vpop.xlane.xlu0 %25 }
  0x82   :  { %v30_v26 = vpop.xlane.xlu0 %29 }
  0x9a   :  { %v126_v22 = vpop.f32.mrf.mxu1 }
  0x9b   :  { %v135_v25 = vmul.f32 2.0, %v126_v22 }
  0x9c   :  { %v79_v23 = vpop.f32.mrf.mxu0 }
  0x9d   :  { %v132_v24 = vperm.slane %v79_v23, 0 }
  0x9f   :  { %v133_v27 = vadd.f32 %v132_v24, %v26_v21  ;;  %v134_v29 = vadd.f32 %v132_v24, %v30_v26 }
  0xa0   :  { %v129_v28 = vpop.f32.mrf.mxu2 }
  0xa1   :  { %v137_v30 = vsub.f32 %v133_v27, %v135_v25  ;;  %v136_v31 = vmul.f32 2.0, %v129_v28 }
  0xa3   :  { %v139_v32 = vmax.f32 %v137_v30, 0.0  ;;  %v138_v33 = vsub.f32 %v134_v29, %v136_v31 }
  0xa5   :  { %3364 = vrsqrt.f32 %v139_v32  ;;  %v140_v34 = vmax.f32 %v138_v33, 0.0  ;;  %vm148_vm2 = vcmp.eq.f32.partialorder %v139_v32, inf  ;;  %v151_v48 = vand.u32 2147483648, %v139_v32 }
  0xa6   :  { %vm150_vm3 = vcmp.eq.f32.partialorder %v139_v32, 0.0 }
  0xa7   :  { %3366 = vrsqrt.f32 %v140_v34  ;;  %vm160_vm4 = vcmp.eq.f32.partialorder %v140_v34, inf  ;;  %v163_v52 = vand.u32 2147483648, %v140_v34  ;;  %vm162_vm5 = vcmp.eq.f32.partialorder %v140_v34, 0.0 }
  0xab   :  { %v3365_v35 = vpop.eup %3364 }
  0xac   :  { %v142_v36 = vmul.f32 %v3365_v35, %v139_v32 }
  0xad   :  { %v3367_v37 = vpop.eup %3366 }
  0xae   :  { %v143_v38 = vmul.f32 %v3365_v35, %v142_v36  ;;  %v154_v39 = vmul.f32 %v3367_v37, %v140_v34 }
  0xb0   :  { %v144_v40 = vmul.f32 0.5, %v143_v38  ;;  %v155_v41 = vmul.f32 %v3367_v37, %v154_v39 }
  0xb2   :  { %v145_v42 = vsub.f32 1.5, %v144_v40  ;;  %v156_v43 = vmul.f32 0.5, %v155_v41 }
  0xb4   :  { %v157_v44 = vsub.f32 1.5, %v156_v43  ;;  %v146_v45 = vmul.f32 %v3365_v35, %v145_v42 }
  0xb6   :  { %v147_v46 = vmul.f32 %v146_v45, %v139_v32  ;;  %v158_v47 = vmul.f32 %v3367_v37, %v157_v44 }
  0xb8   :  { %v149_v49 = vsel %vm148_vm2, %v139_v32, %v147_v46  ;;  %v159_v50 = vmul.f32 %v158_v47, %v140_v34 }
  0xb9   :  { %v152_v51 = vsel %vm150_vm3, %v151_v48, %v149_v49 }
  0xba   :  { %v165_v53 = vsub.f32 0.0, %v152_v51  ;;  %v161_v54 = vsel %vm160_vm4, %v140_v34, %v159_v50  ;;  %vm256_vm4 = vcmask 7168  }
  0xbb   :  { %v164_v55 = vsel %vm162_vm5, %v163_v52, %v161_v54  ;;  %vm258_vm5 = vcmask 1024  }
  0xbc   :  { %v167_v56 = vmul.f32 20.0, %v165_v53  ;;  %v166_v57 = vsub.f32 0.0, %v164_v55 }
  0xbe   :  { %v169_v58 = vmul.f32 1.442695, %v167_v56  ;;  %v168_v59 = vmul.f32 20.0, %v166_v57 }
  0xc0   :  { %3368 = vpow2.f32 %v169_v58  ;;  %v171_v60 = vmul.f32 1.442695, %v168_v59 }
  0xc2   :  { %3370 = vpow2.f32 %v171_v60 }
  0xc6   :  { %v4143_v61 = vpop.eup %3368 }
  0xc7   :  { %v173_v62 = vmul.f32 0.02, %v4143_v61 }
  0xc8   :  { %v4147_v0 = vpop.eup %3370 }
  0xc9   :  { %v176_v63 = vsel %vm175_vm6, %v173_v62, 0.0  ;;  %v174_v1 = vmul.f32 0.02, %v4147_v0 }
  0xca   :  { %177 = vadd.xlane.f32.xlu1 %v176_v63 }
  0xcb   :  { %v180_v2 = vsel %vm179_vm7, %v174_v1, 0.0 }
  0xd2   :  { %181 = vadd.xlane.f32.xlu1 %v180_v2 }
 0x13d   :  { %v178_v3 = vpop.xlane.xlu1 %177 }
 0x13e   :  { %v183_v4 = vadd.f32 1e-16, %v178_v3 }
 0x140   :  { %3372 = vrcp.f32 %v183_v4  ;;  %v196_v11 = vand.u32 2147483648, %v183_v4  ;;  %vm190_vm9 = vweird.f32 %v183_v4  ;;  %v194_v13 = vand.u32 2147483647, %v183_v4 }
 0x142   :  { %v197_v17 = vor.u32 1.1754944e-38, %v196_v11  ;;  %vm195_vm11 = vcmp.eq.f32.partialorder %v194_v13, 8.507059e+37 }
 0x145   :  { %v182_v5 = vpop.xlane.xlu1 %181 }
 0x146   :  { %v3373_v6 = vpop.eup %3372  ;;  %v184_v7 = vadd.f32 1e-16, %v182_v5 }
 0x147   :  { %v186_v8 = vmul.f32 %v3373_v6, %v183_v4  ;;  %vm191_vm8 = vweird.f32 %v3373_v6 }
 0x148   :  { %3374 = vrcp.f32 %v184_v7  ;;  %vm192_vm10 = vmor %vm190_vm9, %vm191_vm8  ;;  %v211_v20 = vand.u32 2147483648, %v184_v7  ;;  %v209_v22 = vand.u32 2147483647, %v184_v7  ;;  %vm205_vm13 = vweird.f32 %v184_v7 }
 0x149   :  { %v187_v9 = vsub.f32 1.0, %v186_v8 }
 0x14a   :  { %v212_v25 = vor.u32 1.1754944e-38, %v211_v20  ;;  %vm210_vm15 = vcmp.eq.f32.partialorder %v209_v22, 8.507059e+37 }
 0x14b   :  { %v188_v10 = vmul.f32 %v3373_v6, %v187_v9 }
 0x14d   :  { %v189_v12 = vadd.f32 %v3373_v6, %v188_v10 }
 0x14e   :  { %v3375_v14 = vpop.eup %3374 }
 0x14f   :  { %v193_v15 = vsel %vm192_vm10, %v3373_v6, %v189_v12  ;;  %v201_v16 = vmul.f32 %v3375_v14, %v184_v7  ;;  %vm206_vm12 = vweird.f32 %v3375_v14 }
 0x150   :  { %v198_v19 = vsel %vm195_vm11, %v197_v17, %v193_v15  ;;  %vm207_vm14 = vmor %vm205_vm13, %vm206_vm12 }
 0x151   :  { %v202_v18 = vsub.f32 1.0, %v201_v16  ;;  %v4151_v23 = vmul.f32 0.1, %v198_v19  }
 0x153   :  { %v203_v21 = vmul.f32 %v3375_v14, %v202_v18  ;;  %v215_v28 = vmul.f32 %v4143_v61, %v4151_v23 }
 0x155   :  { %v204_v24 = vadd.f32 %v3375_v14, %v203_v21  ;;  %v217_v31 = vsel %vm175_vm6, %v215_v28, 0.0 }
 0x157   :  { %v208_v26 = vsel %vm207_vm14, %v3375_v14, %v204_v24 }
 0x158   :  { %v213_v27 = vsel %vm210_vm15, %v212_v25, %v208_v26 }
 0x159   :  { %v214_v29 = vmul.f32 0.1, %v213_v27  }
 0x15b   :  { %v216_v30 = vmul.f32 %v4147_v0, %v214_v29 }
 0x15d   :  { %v218_v32 = vsel %vm179_vm7, %v216_v30, 0.0 }
 0x15e   :  { %v219_v33 = vadd.f32 %v218_v32, %v217_v31 }
 0x160   :  { %v220_v34 = vrot.slane %v219_v33, 4 }
 0x162   :  { %v221_v35 = vadd.f32 %v220_v34, %v219_v33 }
 0x164   :  { %v222_v36 = vrot.slane %v221_v35, 2 }
 0x166   :  { %v223_v37 = vadd.f32 %v222_v36, %v221_v35 }
 0x168   :  { %v224_v38 = vrot.slane %v223_v37, 1 }
 0x16a   :  { %v225_v39 = vadd.f32 %v224_v38, %v223_v37 }
 0x16c   :  { %v226_v40 = vadd.f32 1e-16, %v225_v39 }
 0x16e   :  { %3376 = vrcp.f32 %v226_v40  ;;  %v238_v44 = vand.u32 2147483648, %v226_v40  ;;  %v236_v46 = vand.u32 2147483647, %v226_v40  ;;  %vm232_vm1 = vweird.f32 %v226_v40 }
 0x170   :  { %v239_v48 = vor.u32 1.1754944e-38, %v238_v44  ;;  %vm237_vm3 = vcmp.eq.f32.partialorder %v236_v46, 8.507059e+37 }
 0x174   :  { %v3377_v41 = vpop.eup %3376 }
 0x175   :  { %v228_v42 = vmul.f32 %v3377_v41, %v226_v40  ;;  %vm233_vm0 = vweird.f32 %v3377_v41 }
 0x176   :  { %vm234_vm2 = vmor %vm232_vm1, %vm233_vm0 }
 0x177   :  { %v229_v43 = vsub.f32 1.0, %v228_v42 }
 0x179   :  { %v230_v45 = vmul.f32 %v3377_v41, %v229_v43 }
 0x17b   :  { %v231_v47 = vadd.f32 %v3377_v41, %v230_v45 }
 0x17d   :  { %v235_v49 = vsel %vm234_vm2, %v3377_v41, %v231_v47 }
 0x17e   :  { %v240_v50 = vsel %vm237_vm3, %v239_v48, %v235_v49 }
 0x17f   :  { %v241_v51 = vmul.f32 0.02, %v240_v50  }
 0x181   :  { %v242_v52 = vmul.f32 %v4143_v61, %v241_v51  ;;  %v243_v54 = vmul.f32 %v4147_v0, %v241_v51  ;;  %v5064_v12 = vmov %v241_v51 }
 0x183   :  { %v244_v53 = vsel %vm175_vm6, %v242_v52, 0.0  ;;  %v247_v55 = vsel %vm179_vm7, %v243_v54, 0.0 }
 0x184   :  { %245 = vadd.xlane.f32.xlu2 %v244_v53 }
 0x18c   :  { %248 = vadd.xlane.f32.xlu2 %v247_v55 }
 0x1f7   :  { %v246_v56 = vpop.xlane.xlu2 %245 }
 0x1f8   :  { %v250_v57 = vmul.f32 %v246_v56, %v4151_v23 }
 0x1fa   :  { %v3258_v58 = vadd.f32 -0.1, %v250_v57 }
 0x1fc   :  { %v254_v62 = vand.u32 2147483647, %v3258_v58 }
 0x1fe   :  { %v257_v2 = vsel %vm256_vm4, %v254_v62, 0.0 }
 0x1ff   :  { %v249_v59 = vpop.xlane.xlu2 %248 }
 0x200   :  { %v251_v60 = vmul.f32 %v249_v59, %v214_v29 }
 0x202   :  { %v3259_v63 = vadd.f32 -0.1, %v251_v60 }
 0x204   :  { %v255_v1 = vand.u32 2147483647, %v3259_v63 }
 0x206   :  { %v259_v3 = vsel %vm258_vm5, %v255_v1, 0.0 }
 0x207   :  { %v260_v4 = vadd.f32 %v259_v3, %v257_v2 }
 0x209   :  { %261 = vadd.xlane.f32.xlu0 %v260_v4 }
 0x27c   :  { %v262_v5 = vpop.xlane.xlu0 %261 }
 0x27d   :  { %v263_v6 = vrot.slane %v262_v5, 4 }
 0x27f   :  { %v264_v7 = vadd.f32 %v263_v6, %v262_v5 }
 0x281   :  { %v265_v8 = vrot.slane %v264_v7, 2 }
 0x283   :  { %v266_v9 = vadd.f32 %v265_v8, %v264_v7 }
 0x285   :  { %v267_v10 = vrot.slane %v266_v9, 1 }
 0x287   :  { %v268_v11 = vadd.f32 %v267_v10, %v266_v9 }
 0x289   :  { %3270 = vpush %v268_v11 }
 0x2ba   :  { %s3271_s0 = spop %3270  }
 0x2bb   :  { %p3227_p0 = scmp.gt.f32.partialorder %s3271_s0, 0.005 }
 0x2bc   :  { %s4176_s26 = smov (%p3227_p0), 0  }
 0x2bd   :  { %3230 = sbr.rel (!%p3227_p0) target bundleno = 9012 (0x2334), region = 37 }
 0x2c2 LB: > { %v282_v13 = vmul.f32 %v4040_v51, %v4143_v61  ;;  %v283_v15 = vmul.f32 %v4040_v51, %v4147_v0  ;;  %s1721_s26 = sadd.s32 1, %s4044_s26   ;;  %s4044_s26 = sphi %s4176_s26, %s1721_s26   ;;  %v4040_v51 = vphi %v241_v51, %v5065_v51  }
 0x2c3   : > { %p277_p2 = scmp.lt.s32.totalorder %s1721_s26, 99 }
 0x2c4   : > { %v284_v14 = vsel %vm175_vm6, %v282_v13, 0.0  ;;  %v287_v16 = vsel %vm179_vm7, %v283_v15, 0.0 }
 0x2c5   : > { %285 = vadd.xlane.f32.xlu0 %v284_v14 }
 0x2cd   : > { %288 = vadd.xlane.f32.xlu0 %v287_v16 }
 0x338   : > { %v286_v17 = vpop.xlane.xlu0 %285 }
 0x339   : > { %v290_v18 = vmul.f32 10.0, %v286_v17 }
 0x33b   : > { %v292_v19 = vadd.f32 1e-15, %v290_v18 }
 0x33d   : > { %3378 = vrcp.f32 %v292_v19 }
 0x340   : > { %v289_v20 = vpop.xlane.xlu0 %288 }
 0x341   : > { %v291_v21 = vmul.f32 10.0, %v289_v20 }
 0x343   : > { %v293_v22 = vadd.f32 1e-15, %v291_v21  ;;  %v3379_v23 = vpop.eup %3378 }
 0x344   : > { %v296_v24 = vmul.f32 %v3379_v23, %v4143_v61 }
 0x345   : > { %3380 = vrcp.f32 %v293_v22 }
 0x346   : > { %v298_v27 = vsel %vm175_vm6, %v296_v24, 0.0 }
 0x34b   : > { %v3381_v25 = vpop.eup %3380 }
 0x34c   : > { %v297_v26 = vmul.f32 %v3381_v25, %v4147_v0 }
 0x34e   : > { %v299_v28 = vsel %vm179_vm7, %v297_v26, 0.0 }
 0x34f   : > { %v300_v29 = vadd.f32 %v299_v28, %v298_v27 }
 0x351   : > { %v301_v30 = vrot.slane %v300_v29, 4 }
 0x353   : > { %v302_v31 = vadd.f32 %v301_v30, %v300_v29 }
 0x355   : > { %v303_v32 = vrot.slane %v302_v31, 2 }
 0x357   : > { %v304_v33 = vadd.f32 %v303_v32, %v302_v31 }
 0x359   : > { %v305_v34 = vrot.slane %v304_v33, 1 }
 0x35b   : > { %v306_v35 = vadd.f32 %v305_v34, %v304_v33 }
 0x35d   : > { %v307_v36 = vmul.f32 50.0, %v306_v35 }
 0x35f   : > { %v308_v37 = vadd.f32 5e-15, %v307_v36 }
 0x361   : > { %3382 = vrcp.f32 %v308_v37 }
 0x367   : > { %v3383_v38 = vpop.eup %3382 }
 0x368   : > { %v310_v39 = vmul.f32 %v3383_v38, %v4143_v61  ;;  %v311_v41 = vmul.f32 %v3383_v38, %v4147_v0 }
 0x36a   : > { %v312_v40 = vsel %vm175_vm6, %v310_v39, 0.0  ;;  %v315_v42 = vsel %vm179_vm7, %v311_v41, 0.0 }
 0x36b   : > { %313 = vadd.xlane.f32.xlu1 %v312_v40 }
 0x373   : > { %316 = vadd.xlane.f32.xlu1 %v315_v42 }
 0x3de   : > { %v314_v43 = vpop.xlane.xlu1 %313 }
 0x3df   : > { %v318_v44 = vmul.f32 10.0, %v314_v43 }
 0x3e1   : > { %v320_v45 = vadd.f32 1e-15, %v318_v44 }
 0x3e3   : > { %3384 = vrcp.f32 %v320_v45 }
 0x3e6   : > { %v317_v46 = vpop.xlane.xlu1 %316 }
 0x3e7   : > { %v319_v47 = vmul.f32 10.0, %v317_v46 }
 0x3e9   : > { %v321_v48 = vadd.f32 1e-15, %v319_v47  ;;  %v3385_v49 = vpop.eup %3384 }
 0x3ea   : > { %v324_v50 = vmul.f32 %v3385_v49, %v4143_v61 }
 0x3eb   : > { %3386 = vrcp.f32 %v321_v48 }
 0x3ec   : > { %v326_v53 = vsel %vm175_vm6, %v324_v50, 0.0 }
 0x3f1   : > { %v3387_v51 = vpop.eup %3386 }
 0x3f2   : > { %v325_v52 = vmul.f32 %v3387_v51, %v4147_v0 }
 0x3f4   : > { %v327_v54 = vsel %vm179_vm7, %v325_v52, 0.0 }
 0x3f5   : > { %v328_v55 = vadd.f32 %v327_v54, %v326_v53 }
 0x3f7   : > { %v329_v56 = vrot.slane %v328_v55, 4 }
 0x3f9   : > { %v330_v57 = vadd.f32 %v329_v56, %v328_v55 }
 0x3fb   : > { %v331_v58 = vrot.slane %v330_v57, 2 }
 0x3fd   : > { %v332_v59 = vadd.f32 %v331_v58, %v330_v57 }
 0x3ff   : > { %v333_v60 = vrot.slane %v332_v59, 1 }
 0x401   : > { %v334_v62 = vadd.f32 %v333_v60, %v332_v59 }
 0x403   : > { %v335_v63 = vmul.f32 50.0, %v334_v62 }
 0x405   : > { %v336_v1 = vadd.f32 5e-15, %v335_v63 }
 0x407   : > { %3388 = vrcp.f32 %v336_v1 }
 0x40d   : > { %v3389_v2 = vpop.eup %3388 }
 0x40e   : > { %v338_v3 = vmul.f32 %v3389_v2, %v4143_v61  ;;  %v339_v5 = vmul.f32 %v3389_v2, %v4147_v0 }
 0x410   : > { %v340_v4 = vsel %vm175_vm6, %v338_v3, 0.0  ;;  %v343_v6 = vsel %vm179_vm7, %v339_v5, 0.0 }
 0x411   : > { %341 = vadd.xlane.f32.xlu2 %v340_v4 }
 0x419   : > { %344 = vadd.xlane.f32.xlu2 %v343_v6 }
 0x484   : > { %v342_v7 = vpop.xlane.xlu2 %341 }
 0x485   : > { %v346_v8 = vmul.f32 10.0, %v342_v7 }
 0x487   : > { %v348_v9 = vadd.f32 1e-15, %v346_v8 }
 0x489   : > { %3390 = vrcp.f32 %v348_v9 }
 0x48c   : > { %v345_v10 = vpop.xlane.xlu2 %344 }
 0x48d   : > { %v347_v11 = vmul.f32 10.0, %v345_v10 }
 0x48f   : > { %v349_v12 = vadd.f32 1e-15, %v347_v11  ;;  %v3391_v13 = vpop.eup %3390 }
 0x490   : > { %v352_v14 = vmul.f32 %v3391_v13, %v4143_v61 }
 0x491   : > { %3392 = vrcp.f32 %v349_v12 }
 0x492   : > { %v354_v17 = vsel %vm175_vm6, %v352_v14, 0.0 }
 0x497   : > { %v3393_v15 = vpop.eup %3392 }
 0x498   : > { %v353_v16 = vmul.f32 %v3393_v15, %v4147_v0 }
 0x49a   : > { %v355_v18 = vsel %vm179_vm7, %v353_v16, 0.0 }
 0x49b   : > { %v356_v19 = vadd.f32 %v355_v18, %v354_v17 }
 0x49d   : > { %v357_v20 = vrot.slane %v356_v19, 4 }
 0x49f   : > { %v358_v21 = vadd.f32 %v357_v20, %v356_v19 }
 0x4a1   : > { %v359_v22 = vrot.slane %v358_v21, 2 }
 0x4a3   : > { %v360_v23 = vadd.f32 %v359_v22, %v358_v21 }
 0x4a5   : > { %v361_v24 = vrot.slane %v360_v23, 1 }
 0x4a7   : > { %v362_v25 = vadd.f32 %v361_v24, %v360_v23 }
 0x4a9   : > { %v363_v26 = vmul.f32 50.0, %v362_v25 }
 0x4ab   : > { %v364_v27 = vadd.f32 5e-15, %v363_v26 }
 0x4ad   : > { %3394 = vrcp.f32 %v364_v27 }
 0x4b3   : > { %v3395_v28 = vpop.eup %3394 }
 0x4b4   : > { %v367_v29 = vmul.f32 %v3395_v28, %v4147_v0  ;;  %v366_v30 = vmul.f32 %v3395_v28, %v4143_v61 }
 0x4b6   : > { %v371_v31 = vsel %vm179_vm7, %v367_v29, 0.0  ;;  %v368_v32 = vsel %vm175_vm6, %v366_v30, 0.0 }
 0x4b7   : > { %372 = vadd.xlane.f32.xlu1 %v371_v31  ;;  %369 = vadd.xlane.f32.xlu0 %v368_v32 }
 0x52a   : > { %v373_v33 = vpop.xlane.xlu1 %372  ;;  %v370_v34 = vpop.xlane.xlu0 %369 }
 0x52b   : > { %v375_v35 = vmul.f32 10.0, %v373_v33  ;;  %v374_v36 = vmul.f32 10.0, %v370_v34 }
 0x52d   : > { %v377_v37 = vadd.f32 1e-15, %v375_v35  ;;  %v376_v38 = vadd.f32 1e-15, %v374_v36 }
 0x52f   : > { %3396 = vrcp.f32 %v377_v37 }
 0x530   : > { %3398 = vrcp.f32 %v376_v38 }
 0x535   : > { %v3397_v39 = vpop.eup %3396 }
 0x536   : > { %v3399_v40 = vpop.eup %3398  ;;  %v381_v41 = vmul.f32 %v3397_v39, %v4147_v0 }
 0x537   : > { %v380_v42 = vmul.f32 %v3399_v40, %v4143_v61 }
 0x538   : > { %v383_v43 = vsel %vm179_vm7, %v381_v41, 0.0 }
 0x539   : > { %v382_v44 = vsel %vm175_vm6, %v380_v42, 0.0 }
 0x53a   : > { %v384_v45 = vadd.f32 %v383_v43, %v382_v44 }
 0x53c   : > { %v385_v46 = vrot.slane %v384_v45, 4 }
 0x53e   : > { %v386_v47 = vadd.f32 %v385_v46, %v384_v45 }
 0x540   : > { %v387_v48 = vrot.slane %v386_v47, 2 }
 0x542   : > { %v388_v49 = vadd.f32 %v387_v48, %v386_v47 }
 0x544   : > { %v389_v50 = vrot.slane %v388_v49, 1 }
 0x546   : > { %v390_v51 = vadd.f32 %v389_v50, %v388_v49 }
 0x548   : > { %v391_v52 = vmul.f32 50.0, %v390_v51 }
 0x54a   : > { %v392_v53 = vadd.f32 5e-15, %v391_v52 }
 0x54c   : > { %3400 = vrcp.f32 %v392_v53 }
 0x552   : > { %v3401_v54 = vpop.eup %3400 }
 0x553   : > { %v395_v55 = vmul.f32 %v3401_v54, %v4147_v0  ;;  %v394_v56 = vmul.f32 %v3401_v54, %v4143_v61 }
 0x555   : > { %v399_v57 = vsel %vm179_vm7, %v395_v55, 0.0  ;;  %v396_v58 = vsel %vm175_vm6, %v394_v56, 0.0 }
 0x556   : > { %400 = vadd.xlane.f32.xlu0 %v399_v57  ;;  %397 = vadd.xlane.f32.xlu2 %v396_v58 }
 0x5c9   : > { %v401_v59 = vpop.xlane.xlu0 %400  ;;  %v398_v60 = vpop.xlane.xlu2 %397 }
 0x5ca   : > { %v403_v62 = vmul.f32 10.0, %v401_v59  ;;  %v402_v63 = vmul.f32 10.0, %v398_v60 }
 0x5cc   : > { %v405_v1 = vadd.f32 1e-15, %v403_v62  ;;  %v404_v2 = vadd.f32 1e-15, %v402_v63 }
 0x5ce   : > { %3402 = vrcp.f32 %v405_v1 }
 0x5cf   : > { %3404 = vrcp.f32 %v404_v2 }
 0x5d4   : > { %v3403_v3 = vpop.eup %3402 }
 0x5d5   : > { %v3405_v4 = vpop.eup %3404  ;;  %v409_v5 = vmul.f32 %v3403_v3, %v4147_v0 }
 0x5d6   : > { %v408_v6 = vmul.f32 %v3405_v4, %v4143_v61 }
 0x5d7   : > { %v411_v7 = vsel %vm179_vm7, %v409_v5, 0.0 }
 0x5d8   : > { %v410_v8 = vsel %vm175_vm6, %v408_v6, 0.0 }
 0x5d9   : > { %v412_v9 = vadd.f32 %v411_v7, %v410_v8 }
 0x5db   : > { %v413_v10 = vrot.slane %v412_v9, 4 }
 0x5dd   : > { %v414_v11 = vadd.f32 %v413_v10, %v412_v9 }
 0x5df   : > { %v415_v12 = vrot.slane %v414_v11, 2 }
 0x5e1   : > { %v416_v13 = vadd.f32 %v415_v12, %v414_v11 }
 0x5e3   : > { %v417_v14 = vrot.slane %v416_v13, 1 }
 0x5e5   : > { %v418_v15 = vadd.f32 %v417_v14, %v416_v13 }
 0x5e7   : > { %v419_v16 = vmul.f32 50.0, %v418_v15 }
 0x5e9   : > { %v420_v17 = vadd.f32 5e-15, %v419_v16 }
 0x5eb   : > { %3406 = vrcp.f32 %v420_v17 }
 0x5f1   : > { %v3407_v18 = vpop.eup %3406 }
 0x5f2   : > { %v423_v19 = vmul.f32 %v3407_v18, %v4147_v0  ;;  %v422_v20 = vmul.f32 %v3407_v18, %v4143_v61 }
 0x5f4   : > { %v427_v21 = vsel %vm179_vm7, %v423_v19, 0.0  ;;  %v424_v22 = vsel %vm175_vm6, %v422_v20, 0.0 }
 0x5f5   : > { %428 = vadd.xlane.f32.xlu2 %v427_v21  ;;  %425 = vadd.xlane.f32.xlu1 %v424_v22 }
 0x668   : > { %v429_v23 = vpop.xlane.xlu2 %428  ;;  %v426_v24 = vpop.xlane.xlu1 %425 }
 0x669   : > { %v431_v25 = vmul.f32 10.0, %v429_v23  ;;  %v430_v26 = vmul.f32 10.0, %v426_v24 }
 0x66b   : > { %v433_v27 = vadd.f32 1e-15, %v431_v25  ;;  %v432_v28 = vadd.f32 1e-15, %v430_v26 }
 0x66d   : > { %3408 = vrcp.f32 %v433_v27 }
 0x66e   : > { %3410 = vrcp.f32 %v432_v28 }
 0x673   : > { %v3409_v29 = vpop.eup %3408 }
 0x674   : > { %v3411_v30 = vpop.eup %3410  ;;  %v437_v31 = vmul.f32 %v3409_v29, %v4147_v0 }
 0x675   : > { %v436_v32 = vmul.f32 %v3411_v30, %v4143_v61 }
 0x676   : > { %v439_v33 = vsel %vm179_vm7, %v437_v31, 0.0 }
 0x677   : > { %v438_v34 = vsel %vm175_vm6, %v436_v32, 0.0 }
 0x678   : > { %v440_v35 = vadd.f32 %v439_v33, %v438_v34 }
 0x67a   : > { %v441_v36 = vrot.slane %v440_v35, 4 }
 0x67c   : > { %v442_v37 = vadd.f32 %v441_v36, %v440_v35 }
 0x67e   : > { %v443_v38 = vrot.slane %v442_v37, 2 }
 0x680   : > { %v444_v39 = vadd.f32 %v443_v38, %v442_v37 }
 0x682   : > { %v445_v40 = vrot.slane %v444_v39, 1 }
 0x684   : > { %v446_v41 = vadd.f32 %v445_v40, %v444_v39 }
 0x686   : > { %v447_v42 = vmul.f32 50.0, %v446_v41 }
 0x688   : > { %v448_v43 = vadd.f32 5e-15, %v447_v42 }
 0x68a   : > { %3412 = vrcp.f32 %v448_v43 }
 0x690   : > { %v3413_v44 = vpop.eup %3412 }
 0x691   : > { %v451_v45 = vmul.f32 %v3413_v44, %v4147_v0  ;;  %v450_v46 = vmul.f32 %v3413_v44, %v4143_v61 }
 0x693   : > { %v455_v47 = vsel %vm179_vm7, %v451_v45, 0.0  ;;  %v452_v48 = vsel %vm175_vm6, %v450_v46, 0.0 }
 0x694   : > { %456 = vadd.xlane.f32.xlu1 %v455_v47  ;;  %453 = vadd.xlane.f32.xlu0 %v452_v48 }
 0x707   : > { %v457_v49 = vpop.xlane.xlu1 %456  ;;  %v454_v50 = vpop.xlane.xlu0 %453 }
 0x708   : > { %v459_v51 = vmul.f32 10.0, %v457_v49  ;;  %v458_v52 = vmul.f32 10.0, %v454_v50 }
 0x70a   : > { %v461_v53 = vadd.f32 1e-15, %v459_v51  ;;  %v460_v54 = vadd.f32 1e-15, %v458_v52 }
 0x70c   : > { %3414 = vrcp.f32 %v461_v53 }
 0x70d   : > { %3416 = vrcp.f32 %v460_v54 }
 0x712   : > { %v3415_v55 = vpop.eup %3414 }
 0x713   : > { %v3417_v56 = vpop.eup %3416  ;;  %v465_v57 = vmul.f32 %v3415_v55, %v4147_v0 }
 0x714   : > { %v464_v58 = vmul.f32 %v3417_v56, %v4143_v61 }
 0x715   : > { %v467_v59 = vsel %vm179_vm7, %v465_v57, 0.0 }
 0x716   : > { %v466_v60 = vsel %vm175_vm6, %v464_v58, 0.0 }
 0x717   : > { %v468_v62 = vadd.f32 %v467_v59, %v466_v60 }
 0x719   : > { %v469_v63 = vrot.slane %v468_v62, 4 }
 0x71b   : > { %v470_v1 = vadd.f32 %v469_v63, %v468_v62 }
 0x71d   : > { %v471_v2 = vrot.slane %v470_v1, 2 }
 0x71f   : > { %v472_v3 = vadd.f32 %v471_v2, %v470_v1 }
 0x721   : > { %v473_v4 = vrot.slane %v472_v3, 1 }
 0x723   : > { %v474_v5 = vadd.f32 %v473_v4, %v472_v3 }
 0x725   : > { %v475_v6 = vmul.f32 50.0, %v474_v5 }
 0x727   : > { %v476_v7 = vadd.f32 5e-15, %v475_v6 }
 0x729   : > { %3418 = vrcp.f32 %v476_v7 }
 0x72f   : > { %v3419_v8 = vpop.eup %3418 }
 0x730   : > { %v479_v9 = vmul.f32 %v3419_v8, %v4147_v0  ;;  %v478_v10 = vmul.f32 %v3419_v8, %v4143_v61 }
 0x732   : > { %v483_v11 = vsel %vm179_vm7, %v479_v9, 0.0  ;;  %v480_v12 = vsel %vm175_vm6, %v478_v10, 0.0 }
 0x733   : > { %484 = vadd.xlane.f32.xlu0 %v483_v11  ;;  %481 = vadd.xlane.f32.xlu2 %v480_v12 }
 0x7a6   : > { %v485_v13 = vpop.xlane.xlu0 %484  ;;  %v482_v14 = vpop.xlane.xlu2 %481 }
 0x7a7   : > { %v487_v15 = vmul.f32 10.0, %v485_v13  ;;  %v486_v16 = vmul.f32 10.0, %v482_v14 }
 0x7a9   : > { %v489_v17 = vadd.f32 1e-15, %v487_v15  ;;  %v488_v18 = vadd.f32 1e-15, %v486_v16 }
 0x7ab   : > { %3420 = vrcp.f32 %v489_v17 }
 0x7ac   : > { %3422 = vrcp.f32 %v488_v18 }
 0x7b1   : > { %v3421_v19 = vpop.eup %3420 }
 0x7b2   : > { %v3423_v20 = vpop.eup %3422  ;;  %v493_v21 = vmul.f32 %v3421_v19, %v4147_v0 }
 0x7b3   : > { %v492_v22 = vmul.f32 %v3423_v20, %v4143_v61 }
 0x7b4   : > { %v495_v23 = vsel %vm179_vm7, %v493_v21, 0.0 }
 0x7b5   : > { %v494_v24 = vsel %vm175_vm6, %v492_v22, 0.0 }
 0x7b6   : > { %v496_v25 = vadd.f32 %v495_v23, %v494_v24 }
 0x7b8   : > { %v497_v26 = vrot.slane %v496_v25, 4 }
 0x7ba   : > { %v498_v27 = vadd.f32 %v497_v26, %v496_v25 }
 0x7bc   : > { %v499_v28 = vrot.slane %v498_v27, 2 }
 0x7be   : > { %v500_v29 = vadd.f32 %v499_v28, %v498_v27 }
 0x7c0   : > { %v501_v30 = vrot.slane %v500_v29, 1 }
 0x7c2   : > { %v502_v31 = vadd.f32 %v501_v30, %v500_v29 }
 0x7c4   : > { %v503_v32 = vmul.f32 50.0, %v502_v31 }
 0x7c6   : > { %v504_v33 = vadd.f32 5e-15, %v503_v32 }
 0x7c8   : > { %3424 = vrcp.f32 %v504_v33 }
 0x7ce   : > { %v3425_v34 = vpop.eup %3424 }
 0x7cf   : > { %v507_v35 = vmul.f32 %v3425_v34, %v4147_v0  ;;  %v506_v36 = vmul.f32 %v3425_v34, %v4143_v61 }
 0x7d1   : > { %v511_v37 = vsel %vm179_vm7, %v507_v35, 0.0  ;;  %v508_v38 = vsel %vm175_vm6, %v506_v36, 0.0 }
 0x7d2   : > { %512 = vadd.xlane.f32.xlu2 %v511_v37  ;;  %509 = vadd.xlane.f32.xlu1 %v508_v38 }
 0x845   : > { %v513_v39 = vpop.xlane.xlu2 %512  ;;  %v510_v40 = vpop.xlane.xlu1 %509 }
 0x846   : > { %v515_v41 = vmul.f32 10.0, %v513_v39  ;;  %v514_v42 = vmul.f32 10.0, %v510_v40 }
 0x848   : > { %v517_v43 = vadd.f32 1e-15, %v515_v41  ;;  %v516_v44 = vadd.f32 1e-15, %v514_v42 }
 0x84a   : > { %3426 = vrcp.f32 %v517_v43 }
 0x84b   : > { %3428 = vrcp.f32 %v516_v44 }
 0x850   : > { %v3427_v45 = vpop.eup %3426 }
 0x851   : > { %v3429_v46 = vpop.eup %3428  ;;  %v521_v47 = vmul.f32 %v3427_v45, %v4147_v0 }
 0x852   : > { %v520_v48 = vmul.f32 %v3429_v46, %v4143_v61 }
 0x853   : > { %v523_v49 = vsel %vm179_vm7, %v521_v47, 0.0 }
 0x854   : > { %v522_v50 = vsel %vm175_vm6, %v520_v48, 0.0 }
 0x855   : > { %v524_v51 = vadd.f32 %v523_v49, %v522_v50 }
 0x857   : > { %v525_v52 = vrot.slane %v524_v51, 4 }
 0x859   : > { %v526_v53 = vadd.f32 %v525_v52, %v524_v51 }
 0x85b   : > { %v527_v54 = vrot.slane %v526_v53, 2 }
 0x85d   : > { %v528_v55 = vadd.f32 %v527_v54, %v526_v53 }
 0x85f   : > { %v529_v56 = vrot.slane %v528_v55, 1 }
 0x861   : > { %v530_v57 = vadd.f32 %v529_v56, %v528_v55 }
 0x863   : > { %v531_v58 = vmul.f32 50.0, %v530_v57 }
 0x865   : > { %v532_v59 = vadd.f32 5e-15, %v531_v58 }
 0x867   : > { %3430 = vrcp.f32 %v532_v59 }
 0x86d   : > { %v3431_v60 = vpop.eup %3430 }
 0x86e   : > { %v535_v62 = vmul.f32 %v3431_v60, %v4147_v0  ;;  %v534_v63 = vmul.f32 %v3431_v60, %v4143_v61 }
 0x870   : > { %v539_v1 = vsel %vm179_vm7, %v535_v62, 0.0  ;;  %v536_v2 = vsel %vm175_vm6, %v534_v63, 0.0 }
 0x871   : > { %540 = vadd.xlane.f32.xlu1 %v539_v1  ;;  %537 = vadd.xlane.f32.xlu0 %v536_v2 }
 0x8e4   : > { %v541_v3 = vpop.xlane.xlu1 %540  ;;  %v538_v4 = vpop.xlane.xlu0 %537 }
 0x8e5   : > { %v543_v5 = vmul.f32 10.0, %v541_v3  ;;  %v542_v6 = vmul.f32 10.0, %v538_v4 }
 0x8e7   : > { %v545_v7 = vadd.f32 1e-15, %v543_v5  ;;  %v544_v8 = vadd.f32 1e-15, %v542_v6 }
 0x8e9   : > { %3432 = vrcp.f32 %v545_v7 }
 0x8ea   : > { %3434 = vrcp.f32 %v544_v8 }
 0x8ef   : > { %v3433_v9 = vpop.eup %3432 }
 0x8f0   : > { %v3435_v10 = vpop.eup %3434  ;;  %v549_v11 = vmul.f32 %v3433_v9, %v4147_v0 }
 0x8f1   : > { %v548_v12 = vmul.f32 %v3435_v10, %v4143_v61 }
 0x8f2   : > { %v551_v13 = vsel %vm179_vm7, %v549_v11, 0.0 }
 0x8f3   : > { %v550_v14 = vsel %vm175_vm6, %v548_v12, 0.0 }
 0x8f4   : > { %v552_v15 = vadd.f32 %v551_v13, %v550_v14 }
 0x8f6   : > { %v553_v16 = vrot.slane %v552_v15, 4 }
 0x8f8   : > { %v554_v17 = vadd.f32 %v553_v16, %v552_v15 }
 0x8fa   : > { %v555_v18 = vrot.slane %v554_v17, 2 }
 0x8fc   : > { %v556_v19 = vadd.f32 %v555_v18, %v554_v17 }
 0x8fe   : > { %v557_v20 = vrot.slane %v556_v19, 1 }
 0x900   : > { %v558_v21 = vadd.f32 %v557_v20, %v556_v19 }
 0x902   : > { %v559_v22 = vmul.f32 50.0, %v558_v21 }
 0x904   : > { %v560_v23 = vadd.f32 5e-15, %v559_v22 }
 0x906   : > { %3436 = vrcp.f32 %v560_v23 }
 0x90c   : > { %v3437_v24 = vpop.eup %3436 }
 0x90d   : > { %v563_v25 = vmul.f32 %v3437_v24, %v4147_v0  ;;  %v562_v26 = vmul.f32 %v3437_v24, %v4143_v61 }
 0x90f   : > { %v567_v27 = vsel %vm179_vm7, %v563_v25, 0.0  ;;  %v564_v28 = vsel %vm175_vm6, %v562_v26, 0.0 }
 0x910   : > { %568 = vadd.xlane.f32.xlu0 %v567_v27  ;;  %565 = vadd.xlane.f32.xlu2 %v564_v28 }
 0x983   : > { %v569_v29 = vpop.xlane.xlu0 %568  ;;  %v566_v30 = vpop.xlane.xlu2 %565 }
 0x984   : > { %v571_v31 = vmul.f32 10.0, %v569_v29  ;;  %v570_v32 = vmul.f32 10.0, %v566_v30 }
 0x986   : > { %v573_v33 = vadd.f32 1e-15, %v571_v31  ;;  %v572_v34 = vadd.f32 1e-15, %v570_v32 }
 0x988   : > { %3438 = vrcp.f32 %v573_v33 }
 0x989   : > { %3440 = vrcp.f32 %v572_v34 }
 0x98e   : > { %v3439_v35 = vpop.eup %3438 }
 0x98f   : > { %v3441_v36 = vpop.eup %3440  ;;  %v577_v37 = vmul.f32 %v3439_v35, %v4147_v0 }
 0x990   : > { %v576_v38 = vmul.f32 %v3441_v36, %v4143_v61 }
 0x991   : > { %v579_v39 = vsel %vm179_vm7, %v577_v37, 0.0 }
 0x992   : > { %v578_v40 = vsel %vm175_vm6, %v576_v38, 0.0 }
 0x993   : > { %v580_v41 = vadd.f32 %v579_v39, %v578_v40 }
 0x995   : > { %v581_v42 = vrot.slane %v580_v41, 4 }
 0x997   : > { %v582_v43 = vadd.f32 %v581_v42, %v580_v41 }
 0x999   : > { %v583_v44 = vrot.slane %v582_v43, 2 }
 0x99b   : > { %v584_v45 = vadd.f32 %v583_v44, %v582_v43 }
 0x99d   : > { %v585_v46 = vrot.slane %v584_v45, 1 }
 0x99f   : > { %v586_v47 = vadd.f32 %v585_v46, %v584_v45 }
 0x9a1   : > { %v587_v48 = vmul.f32 50.0, %v586_v47 }
 0x9a3   : > { %v588_v49 = vadd.f32 5e-15, %v587_v48 }
 0x9a5   : > { %3442 = vrcp.f32 %v588_v49 }
 0x9ab   : > { %v3443_v50 = vpop.eup %3442 }
 0x9ac   : > { %v591_v51 = vmul.f32 %v3443_v50, %v4147_v0  ;;  %v590_v52 = vmul.f32 %v3443_v50, %v4143_v61 }
 0x9ae   : > { %v595_v53 = vsel %vm179_vm7, %v591_v51, 0.0  ;;  %v592_v54 = vsel %vm175_vm6, %v590_v52, 0.0 }
 0x9af   : > { %596 = vadd.xlane.f32.xlu2 %v595_v53  ;;  %593 = vadd.xlane.f32.xlu1 %v592_v54 }
 0xa22   : > { %v597_v55 = vpop.xlane.xlu2 %596  ;;  %v594_v56 = vpop.xlane.xlu1 %593 }
 0xa23   : > { %v599_v57 = vmul.f32 10.0, %v597_v55  ;;  %v598_v58 = vmul.f32 10.0, %v594_v56 }
 0xa25   : > { %v601_v59 = vadd.f32 1e-15, %v599_v57  ;;  %v600_v60 = vadd.f32 1e-15, %v598_v58 }
 0xa27   : > { %3444 = vrcp.f32 %v601_v59 }
 0xa28   : > { %3446 = vrcp.f32 %v600_v60 }
 0xa2d   : > { %v3445_v62 = vpop.eup %3444 }
 0xa2e   : > { %v3447_v63 = vpop.eup %3446  ;;  %v605_v1 = vmul.f32 %v3445_v62, %v4147_v0 }
 0xa2f   : > { %v604_v2 = vmul.f32 %v3447_v63, %v4143_v61 }
 0xa30   : > { %v607_v3 = vsel %vm179_vm7, %v605_v1, 0.0 }
 0xa31   : > { %v606_v4 = vsel %vm175_vm6, %v604_v2, 0.0 }
 0xa32   : > { %v608_v5 = vadd.f32 %v607_v3, %v606_v4 }
 0xa34   : > { %v609_v6 = vrot.slane %v608_v5, 4 }
 0xa36   : > { %v610_v7 = vadd.f32 %v609_v6, %v608_v5 }
 0xa38   : > { %v611_v8 = vrot.slane %v610_v7, 2 }
 0xa3a   : > { %v612_v9 = vadd.f32 %v611_v8, %v610_v7 }
 0xa3c   : > { %v613_v10 = vrot.slane %v612_v9, 1 }
 0xa3e   : > { %v614_v11 = vadd.f32 %v613_v10, %v612_v9 }
 0xa40   : > { %v615_v12 = vmul.f32 50.0, %v614_v11 }
 0xa42   : > { %v616_v13 = vadd.f32 5e-15, %v615_v12 }
 0xa44   : > { %3448 = vrcp.f32 %v616_v13 }
 0xa4a   : > { %v3449_v14 = vpop.eup %3448 }
 0xa4b   : > { %v619_v15 = vmul.f32 %v3449_v14, %v4147_v0  ;;  %v618_v16 = vmul.f32 %v3449_v14, %v4143_v61 }
 0xa4d   : > { %v623_v17 = vsel %vm179_vm7, %v619_v15, 0.0  ;;  %v620_v18 = vsel %vm175_vm6, %v618_v16, 0.0 }
 0xa4e   : > { %624 = vadd.xlane.f32.xlu1 %v623_v17  ;;  %621 = vadd.xlane.f32.xlu0 %v620_v18 }
 0xac1   : > { %v625_v19 = vpop.xlane.xlu1 %624  ;;  %v622_v20 = vpop.xlane.xlu0 %621 }
 0xac2   : > { %v627_v21 = vmul.f32 10.0, %v625_v19  ;;  %v626_v22 = vmul.f32 10.0, %v622_v20 }
 0xac4   : > { %v629_v23 = vadd.f32 1e-15, %v627_v21  ;;  %v628_v24 = vadd.f32 1e-15, %v626_v22 }
 0xac6   : > { %3450 = vrcp.f32 %v629_v23 }
 0xac7   : > { %3452 = vrcp.f32 %v628_v24 }
 0xacc   : > { %v3451_v25 = vpop.eup %3450 }
 0xacd   : > { %v3453_v26 = vpop.eup %3452  ;;  %v633_v27 = vmul.f32 %v3451_v25, %v4147_v0 }
 0xace   : > { %v632_v28 = vmul.f32 %v3453_v26, %v4143_v61 }
 0xacf   : > { %v635_v29 = vsel %vm179_vm7, %v633_v27, 0.0 }
 0xad0   : > { %v634_v30 = vsel %vm175_vm6, %v632_v28, 0.0 }
 0xad1   : > { %v636_v31 = vadd.f32 %v635_v29, %v634_v30 }
 0xad3   : > { %v637_v32 = vrot.slane %v636_v31, 4 }
 0xad5   : > { %v638_v33 = vadd.f32 %v637_v32, %v636_v31 }
 0xad7   : > { %v639_v34 = vrot.slane %v638_v33, 2 }
 0xad9   : > { %v640_v35 = vadd.f32 %v639_v34, %v638_v33 }
 0xadb   : > { %v641_v36 = vrot.slane %v640_v35, 1 }
 0xadd   : > { %v642_v37 = vadd.f32 %v641_v36, %v640_v35 }
 0xadf   : > { %v643_v38 = vmul.f32 50.0, %v642_v37 }
 0xae1   : > { %v644_v39 = vadd.f32 5e-15, %v643_v38 }
 0xae3   : > { %3454 = vrcp.f32 %v644_v39 }
 0xae9   : > { %v3455_v40 = vpop.eup %3454 }
 0xaea   : > { %v647_v41 = vmul.f32 %v3455_v40, %v4147_v0  ;;  %v646_v42 = vmul.f32 %v3455_v40, %v4143_v61 }
 0xaec   : > { %v651_v43 = vsel %vm179_vm7, %v647_v41, 0.0  ;;  %v648_v44 = vsel %vm175_vm6, %v646_v42, 0.0 }
 0xaed   : > { %652 = vadd.xlane.f32.xlu0 %v651_v43  ;;  %649 = vadd.xlane.f32.xlu2 %v648_v44 }
 0xb60   : > { %v653_v45 = vpop.xlane.xlu0 %652  ;;  %v650_v46 = vpop.xlane.xlu2 %649 }
 0xb61   : > { %v655_v47 = vmul.f32 10.0, %v653_v45  ;;  %v654_v48 = vmul.f32 10.0, %v650_v46 }
 0xb63   : > { %v657_v49 = vadd.f32 1e-15, %v655_v47  ;;  %v656_v50 = vadd.f32 1e-15, %v654_v48 }
 0xb65   : > { %3456 = vrcp.f32 %v657_v49 }
 0xb66   : > { %3458 = vrcp.f32 %v656_v50 }
 0xb6b   : > { %v3457_v51 = vpop.eup %3456 }
 0xb6c   : > { %v3459_v52 = vpop.eup %3458  ;;  %v661_v53 = vmul.f32 %v3457_v51, %v4147_v0 }
 0xb6d   : > { %v660_v54 = vmul.f32 %v3459_v52, %v4143_v61 }
 0xb6e   : > { %v663_v55 = vsel %vm179_vm7, %v661_v53, 0.0 }
 0xb6f   : > { %v662_v56 = vsel %vm175_vm6, %v660_v54, 0.0 }
 0xb70   : > { %v664_v57 = vadd.f32 %v663_v55, %v662_v56 }
 0xb72   : > { %v665_v58 = vrot.slane %v664_v57, 4 }
 0xb74   : > { %v666_v59 = vadd.f32 %v665_v58, %v664_v57 }
 0xb76   : > { %v667_v60 = vrot.slane %v666_v59, 2 }
 0xb78   : > { %v668_v62 = vadd.f32 %v667_v60, %v666_v59 }
 0xb7a   : > { %v669_v63 = vrot.slane %v668_v62, 1 }
 0xb7c   : > { %v670_v1 = vadd.f32 %v669_v63, %v668_v62 }
 0xb7e   : > { %v671_v2 = vmul.f32 50.0, %v670_v1 }
 0xb80   : > { %v672_v3 = vadd.f32 5e-15, %v671_v2 }
 0xb82   : > { %3460 = vrcp.f32 %v672_v3 }
 0xb88   : > { %v3461_v4 = vpop.eup %3460 }
 0xb89   : > { %v675_v5 = vmul.f32 %v3461_v4, %v4147_v0  ;;  %v674_v6 = vmul.f32 %v3461_v4, %v4143_v61 }
 0xb8b   : > { %v679_v7 = vsel %vm179_vm7, %v675_v5, 0.0  ;;  %v676_v8 = vsel %vm175_vm6, %v674_v6, 0.0 }
 0xb8c   : > { %680 = vadd.xlane.f32.xlu2 %v679_v7  ;;  %677 = vadd.xlane.f32.xlu1 %v676_v8 }
 0xbff   : > { %v681_v9 = vpop.xlane.xlu2 %680  ;;  %v678_v10 = vpop.xlane.xlu1 %677 }
 0xc00   : > { %v683_v11 = vmul.f32 10.0, %v681_v9  ;;  %v682_v12 = vmul.f32 10.0, %v678_v10 }
 0xc02   : > { %v685_v13 = vadd.f32 1e-15, %v683_v11  ;;  %v684_v14 = vadd.f32 1e-15, %v682_v12 }
 0xc04   : > { %3462 = vrcp.f32 %v685_v13 }
 0xc05   : > { %3464 = vrcp.f32 %v684_v14 }
 0xc0a   : > { %v3463_v15 = vpop.eup %3462 }
 0xc0b   : > { %v3465_v16 = vpop.eup %3464  ;;  %v689_v17 = vmul.f32 %v3463_v15, %v4147_v0 }
 0xc0c   : > { %v688_v18 = vmul.f32 %v3465_v16, %v4143_v61 }
 0xc0d   : > { %v691_v19 = vsel %vm179_vm7, %v689_v17, 0.0 }
 0xc0e   : > { %v690_v20 = vsel %vm175_vm6, %v688_v18, 0.0 }
 0xc0f   : > { %v692_v21 = vadd.f32 %v691_v19, %v690_v20 }
 0xc11   : > { %v693_v22 = vrot.slane %v692_v21, 4 }
 0xc13   : > { %v694_v23 = vadd.f32 %v693_v22, %v692_v21 }
 0xc15   : > { %v695_v24 = vrot.slane %v694_v23, 2 }
 0xc17   : > { %v696_v25 = vadd.f32 %v695_v24, %v694_v23 }
 0xc19   : > { %v697_v26 = vrot.slane %v696_v25, 1 }
 0xc1b   : > { %v698_v27 = vadd.f32 %v697_v26, %v696_v25 }
 0xc1d   : > { %v699_v28 = vmul.f32 50.0, %v698_v27 }
 0xc1f   : > { %v700_v29 = vadd.f32 5e-15, %v699_v28 }
 0xc21   : > { %3466 = vrcp.f32 %v700_v29 }
 0xc27   : > { %v3467_v30 = vpop.eup %3466 }
 0xc28   : > { %v703_v31 = vmul.f32 %v3467_v30, %v4147_v0  ;;  %v702_v32 = vmul.f32 %v3467_v30, %v4143_v61 }
 0xc2a   : > { %v707_v33 = vsel %vm179_vm7, %v703_v31, 0.0  ;;  %v704_v34 = vsel %vm175_vm6, %v702_v32, 0.0 }
 0xc2b   : > { %708 = vadd.xlane.f32.xlu1 %v707_v33  ;;  %705 = vadd.xlane.f32.xlu0 %v704_v34 }
 0xc9e   : > { %v709_v35 = vpop.xlane.xlu1 %708  ;;  %v706_v36 = vpop.xlane.xlu0 %705 }
 0xc9f   : > { %v711_v37 = vmul.f32 10.0, %v709_v35  ;;  %v710_v38 = vmul.f32 10.0, %v706_v36 }
 0xca1   : > { %v713_v39 = vadd.f32 1e-15, %v711_v37  ;;  %v712_v40 = vadd.f32 1e-15, %v710_v38 }
 0xca3   : > { %3468 = vrcp.f32 %v713_v39 }
 0xca4   : > { %3470 = vrcp.f32 %v712_v40 }
 0xca9   : > { %v3469_v41 = vpop.eup %3468 }
 0xcaa   : > { %v3471_v42 = vpop.eup %3470  ;;  %v717_v43 = vmul.f32 %v3469_v41, %v4147_v0 }
 0xcab   : > { %v716_v44 = vmul.f32 %v3471_v42, %v4143_v61 }
 0xcac   : > { %v719_v45 = vsel %vm179_vm7, %v717_v43, 0.0 }
 0xcad   : > { %v718_v46 = vsel %vm175_vm6, %v716_v44, 0.0 }
 0xcae   : > { %v720_v47 = vadd.f32 %v719_v45, %v718_v46 }
 0xcb0   : > { %v721_v48 = vrot.slane %v720_v47, 4 }
 0xcb2   : > { %v722_v49 = vadd.f32 %v721_v48, %v720_v47 }
 0xcb4   : > { %v723_v50 = vrot.slane %v722_v49, 2 }
 0xcb6   : > { %v724_v51 = vadd.f32 %v723_v50, %v722_v49 }
 0xcb8   : > { %v725_v52 = vrot.slane %v724_v51, 1 }
 0xcba   : > { %v726_v53 = vadd.f32 %v725_v52, %v724_v51 }
 0xcbc   : > { %v727_v54 = vmul.f32 50.0, %v726_v53 }
 0xcbe   : > { %v728_v55 = vadd.f32 5e-15, %v727_v54 }
 0xcc0   : > { %3472 = vrcp.f32 %v728_v55 }
 0xcc6   : > { %v3473_v56 = vpop.eup %3472 }
 0xcc7   : > { %v731_v57 = vmul.f32 %v3473_v56, %v4147_v0  ;;  %v730_v58 = vmul.f32 %v3473_v56, %v4143_v61 }
 0xcc9   : > { %v735_v59 = vsel %vm179_vm7, %v731_v57, 0.0  ;;  %v732_v60 = vsel %vm175_vm6, %v730_v58, 0.0 }
 0xcca   : > { %736 = vadd.xlane.f32.xlu0 %v735_v59  ;;  %733 = vadd.xlane.f32.xlu2 %v732_v60 }
 0xd3d   : > { %v737_v62 = vpop.xlane.xlu0 %736  ;;  %v734_v63 = vpop.xlane.xlu2 %733 }
 0xd3e   : > { %v739_v1 = vmul.f32 10.0, %v737_v62  ;;  %v738_v2 = vmul.f32 10.0, %v734_v63 }
 0xd40   : > { %v741_v3 = vadd.f32 1e-15, %v739_v1  ;;  %v740_v4 = vadd.f32 1e-15, %v738_v2 }
 0xd42   : > { %3474 = vrcp.f32 %v741_v3 }
 0xd43   : > { %3476 = vrcp.f32 %v740_v4 }
 0xd48   : > { %v3475_v5 = vpop.eup %3474 }
 0xd49   : > { %v3477_v6 = vpop.eup %3476  ;;  %v745_v7 = vmul.f32 %v3475_v5, %v4147_v0 }
 0xd4a   : > { %v744_v8 = vmul.f32 %v3477_v6, %v4143_v61 }
 0xd4b   : > { %v747_v9 = vsel %vm179_vm7, %v745_v7, 0.0 }
 0xd4c   : > { %v746_v10 = vsel %vm175_vm6, %v744_v8, 0.0 }
 0xd4d   : > { %v748_v11 = vadd.f32 %v747_v9, %v746_v10 }
 0xd4f   : > { %v749_v12 = vrot.slane %v748_v11, 4 }
 0xd51   : > { %v750_v13 = vadd.f32 %v749_v12, %v748_v11 }
 0xd53   : > { %v751_v14 = vrot.slane %v750_v13, 2 }
 0xd55   : > { %v752_v15 = vadd.f32 %v751_v14, %v750_v13 }
 0xd57   : > { %v753_v16 = vrot.slane %v752_v15, 1 }
 0xd59   : > { %v754_v17 = vadd.f32 %v753_v16, %v752_v15 }
 0xd5b   : > { %v755_v18 = vmul.f32 50.0, %v754_v17 }
 0xd5d   : > { %v756_v19 = vadd.f32 5e-15, %v755_v18 }
 0xd5f   : > { %3478 = vrcp.f32 %v756_v19 }
 0xd65   : > { %v3479_v20 = vpop.eup %3478 }
 0xd66   : > { %v759_v21 = vmul.f32 %v3479_v20, %v4147_v0  ;;  %v758_v22 = vmul.f32 %v3479_v20, %v4143_v61 }
 0xd68   : > { %v763_v23 = vsel %vm179_vm7, %v759_v21, 0.0  ;;  %v760_v24 = vsel %vm175_vm6, %v758_v22, 0.0 }
 0xd69   : > { %764 = vadd.xlane.f32.xlu2 %v763_v23  ;;  %761 = vadd.xlane.f32.xlu1 %v760_v24 }
 0xddc   : > { %v765_v25 = vpop.xlane.xlu2 %764  ;;  %v762_v26 = vpop.xlane.xlu1 %761 }
 0xddd   : > { %v767_v27 = vmul.f32 10.0, %v765_v25  ;;  %v766_v28 = vmul.f32 10.0, %v762_v26 }
 0xddf   : > { %v769_v29 = vadd.f32 1e-15, %v767_v27  ;;  %v768_v30 = vadd.f32 1e-15, %v766_v28 }
 0xde1   : > { %3480 = vrcp.f32 %v769_v29 }
 0xde2   : > { %3482 = vrcp.f32 %v768_v30 }
 0xde7   : > { %v3481_v31 = vpop.eup %3480 }
 0xde8   : > { %v3483_v32 = vpop.eup %3482  ;;  %v773_v33 = vmul.f32 %v3481_v31, %v4147_v0 }
 0xde9   : > { %v772_v34 = vmul.f32 %v3483_v32, %v4143_v61 }
 0xdea   : > { %v775_v35 = vsel %vm179_vm7, %v773_v33, 0.0 }
 0xdeb   : > { %v774_v36 = vsel %vm175_vm6, %v772_v34, 0.0 }
 0xdec   : > { %v776_v37 = vadd.f32 %v775_v35, %v774_v36 }
 0xdee   : > { %v777_v38 = vrot.slane %v776_v37, 4 }
 0xdf0   : > { %v778_v39 = vadd.f32 %v777_v38, %v776_v37 }
 0xdf2   : > { %v779_v40 = vrot.slane %v778_v39, 2 }
 0xdf4   : > { %v780_v41 = vadd.f32 %v779_v40, %v778_v39 }
 0xdf6   : > { %v781_v42 = vrot.slane %v780_v41, 1 }
 0xdf8   : > { %v782_v43 = vadd.f32 %v781_v42, %v780_v41 }
 0xdfa   : > { %v783_v44 = vmul.f32 50.0, %v782_v43 }
 0xdfc   : > { %v784_v45 = vadd.f32 5e-15, %v783_v44 }
 0xdfe   : > { %3484 = vrcp.f32 %v784_v45 }
 0xe04   : > { %v3485_v46 = vpop.eup %3484 }
 0xe05   : > { %v787_v47 = vmul.f32 %v3485_v46, %v4147_v0  ;;  %v786_v48 = vmul.f32 %v3485_v46, %v4143_v61 }
 0xe07   : > { %v791_v49 = vsel %vm179_vm7, %v787_v47, 0.0  ;;  %v788_v50 = vsel %vm175_vm6, %v786_v48, 0.0 }
 0xe08   : > { %792 = vadd.xlane.f32.xlu1 %v791_v49  ;;  %789 = vadd.xlane.f32.xlu0 %v788_v50 }
 0xe7b   : > { %v793_v51 = vpop.xlane.xlu1 %792  ;;  %v790_v52 = vpop.xlane.xlu0 %789 }
 0xe7c   : > { %v795_v53 = vmul.f32 10.0, %v793_v51  ;;  %v794_v54 = vmul.f32 10.0, %v790_v52 }
 0xe7e   : > { %v797_v55 = vadd.f32 1e-15, %v795_v53  ;;  %v796_v56 = vadd.f32 1e-15, %v794_v54 }
 0xe80   : > { %3486 = vrcp.f32 %v797_v55 }
 0xe81   : > { %3488 = vrcp.f32 %v796_v56 }
 0xe86   : > { %v3487_v57 = vpop.eup %3486 }
 0xe87   : > { %v3489_v58 = vpop.eup %3488  ;;  %v801_v59 = vmul.f32 %v3487_v57, %v4147_v0 }
 0xe88   : > { %v800_v60 = vmul.f32 %v3489_v58, %v4143_v61 }
 0xe89   : > { %v803_v62 = vsel %vm179_vm7, %v801_v59, 0.0 }
 0xe8a   : > { %v802_v63 = vsel %vm175_vm6, %v800_v60, 0.0 }
 0xe8b   : > { %v804_v1 = vadd.f32 %v803_v62, %v802_v63 }
 0xe8d   : > { %v805_v2 = vrot.slane %v804_v1, 4 }
 0xe8f   : > { %v806_v3 = vadd.f32 %v805_v2, %v804_v1 }
 0xe91   : > { %v807_v4 = vrot.slane %v806_v3, 2 }
 0xe93   : > { %v808_v5 = vadd.f32 %v807_v4, %v806_v3 }
 0xe95   : > { %v809_v6 = vrot.slane %v808_v5, 1 }
 0xe97   : > { %v810_v7 = vadd.f32 %v809_v6, %v808_v5 }
 0xe99   : > { %v811_v8 = vmul.f32 50.0, %v810_v7 }
 0xe9b   : > { %v812_v9 = vadd.f32 5e-15, %v811_v8 }
 0xe9d   : > { %3490 = vrcp.f32 %v812_v9 }
 0xea3   : > { %v3491_v10 = vpop.eup %3490 }
 0xea4   : > { %v815_v11 = vmul.f32 %v3491_v10, %v4147_v0  ;;  %v814_v12 = vmul.f32 %v3491_v10, %v4143_v61 }
 0xea6   : > { %v819_v13 = vsel %vm179_vm7, %v815_v11, 0.0  ;;  %v816_v14 = vsel %vm175_vm6, %v814_v12, 0.0 }
 0xea7   : > { %820 = vadd.xlane.f32.xlu0 %v819_v13  ;;  %817 = vadd.xlane.f32.xlu2 %v816_v14 }
 0xf1a   : > { %v821_v15 = vpop.xlane.xlu0 %820  ;;  %v818_v16 = vpop.xlane.xlu2 %817 }
 0xf1b   : > { %v823_v17 = vmul.f32 10.0, %v821_v15  ;;  %v822_v18 = vmul.f32 10.0, %v818_v16 }
 0xf1d   : > { %v825_v19 = vadd.f32 1e-15, %v823_v17  ;;  %v824_v20 = vadd.f32 1e-15, %v822_v18 }
 0xf1f   : > { %3492 = vrcp.f32 %v825_v19 }
 0xf20   : > { %3494 = vrcp.f32 %v824_v20 }
 0xf25   : > { %v3493_v21 = vpop.eup %3492 }
 0xf26   : > { %v3495_v22 = vpop.eup %3494  ;;  %v829_v23 = vmul.f32 %v3493_v21, %v4147_v0 }
 0xf27   : > { %v828_v24 = vmul.f32 %v3495_v22, %v4143_v61 }
 0xf28   : > { %v831_v25 = vsel %vm179_vm7, %v829_v23, 0.0 }
 0xf29   : > { %v830_v26 = vsel %vm175_vm6, %v828_v24, 0.0 }
 0xf2a   : > { %v832_v27 = vadd.f32 %v831_v25, %v830_v26 }
 0xf2c   : > { %v833_v28 = vrot.slane %v832_v27, 4 }
 0xf2e   : > { %v834_v29 = vadd.f32 %v833_v28, %v832_v27 }
 0xf30   : > { %v835_v30 = vrot.slane %v834_v29, 2 }
 0xf32   : > { %v836_v31 = vadd.f32 %v835_v30, %v834_v29 }
 0xf34   : > { %v837_v32 = vrot.slane %v836_v31, 1 }
 0xf36   : > { %v838_v33 = vadd.f32 %v837_v32, %v836_v31 }
 0xf38   : > { %v839_v34 = vmul.f32 50.0, %v838_v33 }
 0xf3a   : > { %v840_v35 = vadd.f32 5e-15, %v839_v34 }
 0xf3c   : > { %3496 = vrcp.f32 %v840_v35 }
 0xf42   : > { %v3497_v36 = vpop.eup %3496 }
 0xf43   : > { %v843_v37 = vmul.f32 %v3497_v36, %v4147_v0  ;;  %v842_v38 = vmul.f32 %v3497_v36, %v4143_v61 }
 0xf45   : > { %v847_v39 = vsel %vm179_vm7, %v843_v37, 0.0  ;;  %v844_v40 = vsel %vm175_vm6, %v842_v38, 0.0 }
 0xf46   : > { %848 = vadd.xlane.f32.xlu2 %v847_v39  ;;  %845 = vadd.xlane.f32.xlu1 %v844_v40 }
 0xfb9   : > { %v849_v41 = vpop.xlane.xlu2 %848  ;;  %v846_v42 = vpop.xlane.xlu1 %845 }
 0xfba   : > { %v851_v43 = vmul.f32 10.0, %v849_v41  ;;  %v850_v44 = vmul.f32 10.0, %v846_v42 }
 0xfbc   : > { %v853_v45 = vadd.f32 1e-15, %v851_v43  ;;  %v852_v46 = vadd.f32 1e-15, %v850_v44 }
 0xfbe   : > { %3498 = vrcp.f32 %v853_v45 }
 0xfbf   : > { %3500 = vrcp.f32 %v852_v46 }
 0xfc4   : > { %v3499_v47 = vpop.eup %3498 }
 0xfc5   : > { %v3501_v48 = vpop.eup %3500  ;;  %v857_v49 = vmul.f32 %v3499_v47, %v4147_v0 }
 0xfc6   : > { %v856_v50 = vmul.f32 %v3501_v48, %v4143_v61 }
 0xfc7   : > { %v859_v51 = vsel %vm179_vm7, %v857_v49, 0.0 }
 0xfc8   : > { %v858_v52 = vsel %vm175_vm6, %v856_v50, 0.0 }
 0xfc9   : > { %v860_v53 = vadd.f32 %v859_v51, %v858_v52 }
 0xfcb   : > { %v861_v54 = vrot.slane %v860_v53, 4 }
 0xfcd   : > { %v862_v55 = vadd.f32 %v861_v54, %v860_v53 }
 0xfcf   : > { %v863_v56 = vrot.slane %v862_v55, 2 }
 0xfd1   : > { %v864_v57 = vadd.f32 %v863_v56, %v862_v55 }
 0xfd3   : > { %v865_v58 = vrot.slane %v864_v57, 1 }
 0xfd5   : > { %v866_v59 = vadd.f32 %v865_v58, %v864_v57 }
 0xfd7   : > { %v867_v60 = vmul.f32 50.0, %v866_v59 }
 0xfd9   : > { %v868_v62 = vadd.f32 5e-15, %v867_v60 }
 0xfdb   : > { %3502 = vrcp.f32 %v868_v62 }
 0xfe1   : > { %v3503_v63 = vpop.eup %3502 }
 0xfe2   : > { %v871_v1 = vmul.f32 %v3503_v63, %v4147_v0  ;;  %v870_v2 = vmul.f32 %v3503_v63, %v4143_v61 }
 0xfe4   : > { %v875_v3 = vsel %vm179_vm7, %v871_v1, 0.0  ;;  %v872_v4 = vsel %vm175_vm6, %v870_v2, 0.0 }
 0xfe5   : > { %876 = vadd.xlane.f32.xlu1 %v875_v3  ;;  %873 = vadd.xlane.f32.xlu0 %v872_v4 }
0x1058   : > { %v877_v5 = vpop.xlane.xlu1 %876  ;;  %v874_v6 = vpop.xlane.xlu0 %873 }
0x1059   : > { %v879_v7 = vmul.f32 10.0, %v877_v5  ;;  %v878_v8 = vmul.f32 10.0, %v874_v6 }
0x105b   : > { %v881_v9 = vadd.f32 1e-15, %v879_v7  ;;  %v880_v10 = vadd.f32 1e-15, %v878_v8 }
0x105d   : > { %3504 = vrcp.f32 %v881_v9 }
0x105e   : > { %3506 = vrcp.f32 %v880_v10 }
0x1063   : > { %v3505_v11 = vpop.eup %3504 }
0x1064   : > { %v3507_v12 = vpop.eup %3506  ;;  %v885_v13 = vmul.f32 %v3505_v11, %v4147_v0 }
0x1065   : > { %v884_v14 = vmul.f32 %v3507_v12, %v4143_v61 }
0x1066   : > { %v887_v15 = vsel %vm179_vm7, %v885_v13, 0.0 }
0x1067   : > { %v886_v16 = vsel %vm175_vm6, %v884_v14, 0.0 }
0x1068   : > { %v888_v17 = vadd.f32 %v887_v15, %v886_v16 }
0x106a   : > { %v889_v18 = vrot.slane %v888_v17, 4 }
0x106c   : > { %v890_v19 = vadd.f32 %v889_v18, %v888_v17 }
0x106e   : > { %v891_v20 = vrot.slane %v890_v19, 2 }
0x1070   : > { %v892_v21 = vadd.f32 %v891_v20, %v890_v19 }
0x1072   : > { %v893_v22 = vrot.slane %v892_v21, 1 }
0x1074   : > { %v894_v23 = vadd.f32 %v893_v22, %v892_v21 }
0x1076   : > { %v895_v24 = vmul.f32 50.0, %v894_v23 }
0x1078   : > { %v896_v25 = vadd.f32 5e-15, %v895_v24 }
0x107a   : > { %3508 = vrcp.f32 %v896_v25 }
0x1080   : > { %v3509_v26 = vpop.eup %3508 }
0x1081   : > { %v899_v27 = vmul.f32 %v3509_v26, %v4147_v0  ;;  %v898_v28 = vmul.f32 %v3509_v26, %v4143_v61 }
0x1083   : > { %v903_v29 = vsel %vm179_vm7, %v899_v27, 0.0  ;;  %v900_v30 = vsel %vm175_vm6, %v898_v28, 0.0 }
0x1084   : > { %904 = vadd.xlane.f32.xlu0 %v903_v29  ;;  %901 = vadd.xlane.f32.xlu2 %v900_v30 }
0x10f7   : > { %v905_v31 = vpop.xlane.xlu0 %904  ;;  %v902_v32 = vpop.xlane.xlu2 %901 }
0x10f8   : > { %v907_v33 = vmul.f32 10.0, %v905_v31  ;;  %v906_v34 = vmul.f32 10.0, %v902_v32 }
0x10fa   : > { %v909_v35 = vadd.f32 1e-15, %v907_v33  ;;  %v908_v36 = vadd.f32 1e-15, %v906_v34 }
0x10fc   : > { %3510 = vrcp.f32 %v909_v35 }
0x10fd   : > { %3512 = vrcp.f32 %v908_v36 }
0x1102   : > { %v3511_v37 = vpop.eup %3510 }
0x1103   : > { %v3513_v38 = vpop.eup %3512  ;;  %v913_v39 = vmul.f32 %v3511_v37, %v4147_v0 }
0x1104   : > { %v912_v40 = vmul.f32 %v3513_v38, %v4143_v61 }
0x1105   : > { %v915_v41 = vsel %vm179_vm7, %v913_v39, 0.0 }
0x1106   : > { %v914_v42 = vsel %vm175_vm6, %v912_v40, 0.0 }
0x1107   : > { %v916_v43 = vadd.f32 %v915_v41, %v914_v42 }
0x1109   : > { %v917_v44 = vrot.slane %v916_v43, 4 }
0x110b   : > { %v918_v45 = vadd.f32 %v917_v44, %v916_v43 }
0x110d   : > { %v919_v46 = vrot.slane %v918_v45, 2 }
0x110f   : > { %v920_v47 = vadd.f32 %v919_v46, %v918_v45 }
0x1111   : > { %v921_v48 = vrot.slane %v920_v47, 1 }
0x1113   : > { %v922_v49 = vadd.f32 %v921_v48, %v920_v47 }
0x1115   : > { %v923_v50 = vmul.f32 50.0, %v922_v49 }
0x1117   : > { %v924_v51 = vadd.f32 5e-15, %v923_v50 }
0x1119   : > { %3514 = vrcp.f32 %v924_v51 }
0x111f   : > { %v3515_v52 = vpop.eup %3514 }
0x1120   : > { %v927_v53 = vmul.f32 %v3515_v52, %v4147_v0  ;;  %v926_v54 = vmul.f32 %v3515_v52, %v4143_v61 }
0x1122   : > { %v931_v55 = vsel %vm179_vm7, %v927_v53, 0.0  ;;  %v928_v56 = vsel %vm175_vm6, %v926_v54, 0.0 }
0x1123   : > { %932 = vadd.xlane.f32.xlu2 %v931_v55  ;;  %929 = vadd.xlane.f32.xlu1 %v928_v56 }
0x1196   : > { %v933_v57 = vpop.xlane.xlu2 %932  ;;  %v930_v58 = vpop.xlane.xlu1 %929 }
0x1197   : > { %v935_v59 = vmul.f32 10.0, %v933_v57  ;;  %v934_v60 = vmul.f32 10.0, %v930_v58 }
0x1199   : > { %v937_v62 = vadd.f32 1e-15, %v935_v59  ;;  %v936_v63 = vadd.f32 1e-15, %v934_v60 }
0x119b   : > { %3516 = vrcp.f32 %v937_v62 }
0x119c   : > { %3518 = vrcp.f32 %v936_v63 }
0x11a1   : > { %v3517_v1 = vpop.eup %3516 }
0x11a2   : > { %v3519_v2 = vpop.eup %3518  ;;  %v941_v3 = vmul.f32 %v3517_v1, %v4147_v0 }
0x11a3   : > { %v940_v4 = vmul.f32 %v3519_v2, %v4143_v61 }
0x11a4   : > { %v943_v5 = vsel %vm179_vm7, %v941_v3, 0.0 }
0x11a5   : > { %v942_v6 = vsel %vm175_vm6, %v940_v4, 0.0 }
0x11a6   : > { %v944_v7 = vadd.f32 %v943_v5, %v942_v6 }
0x11a8   : > { %v945_v8 = vrot.slane %v944_v7, 4 }
0x11aa   : > { %v946_v9 = vadd.f32 %v945_v8, %v944_v7 }
0x11ac   : > { %v947_v10 = vrot.slane %v946_v9, 2 }
0x11ae   : > { %v948_v11 = vadd.f32 %v947_v10, %v946_v9 }
0x11b0   : > { %v949_v12 = vrot.slane %v948_v11, 1 }
0x11b2   : > { %v950_v13 = vadd.f32 %v949_v12, %v948_v11 }
0x11b4   : > { %v951_v14 = vmul.f32 50.0, %v950_v13 }
0x11b6   : > { %v952_v15 = vadd.f32 5e-15, %v951_v14 }
0x11b8   : > { %3520 = vrcp.f32 %v952_v15 }
0x11be   : > { %v3521_v16 = vpop.eup %3520 }
0x11bf   : > { %v955_v17 = vmul.f32 %v3521_v16, %v4147_v0  ;;  %v954_v18 = vmul.f32 %v3521_v16, %v4143_v61 }
0x11c1   : > { %v959_v19 = vsel %vm179_vm7, %v955_v17, 0.0  ;;  %v956_v20 = vsel %vm175_vm6, %v954_v18, 0.0 }
0x11c2   : > { %960 = vadd.xlane.f32.xlu1 %v959_v19  ;;  %957 = vadd.xlane.f32.xlu0 %v956_v20 }
0x1235   : > { %v961_v21 = vpop.xlane.xlu1 %960  ;;  %v958_v22 = vpop.xlane.xlu0 %957 }
0x1236   : > { %v963_v23 = vmul.f32 10.0, %v961_v21  ;;  %v962_v24 = vmul.f32 10.0, %v958_v22 }
0x1238   : > { %v965_v25 = vadd.f32 1e-15, %v963_v23  ;;  %v964_v26 = vadd.f32 1e-15, %v962_v24 }
0x123a   : > { %3522 = vrcp.f32 %v965_v25 }
0x123b   : > { %3524 = vrcp.f32 %v964_v26 }
0x1240   : > { %v3523_v27 = vpop.eup %3522 }
0x1241   : > { %v3525_v28 = vpop.eup %3524  ;;  %v969_v29 = vmul.f32 %v3523_v27, %v4147_v0 }
0x1242   : > { %v968_v30 = vmul.f32 %v3525_v28, %v4143_v61 }
0x1243   : > { %v971_v31 = vsel %vm179_vm7, %v969_v29, 0.0 }
0x1244   : > { %v970_v32 = vsel %vm175_vm6, %v968_v30, 0.0 }
0x1245   : > { %v972_v33 = vadd.f32 %v971_v31, %v970_v32 }
0x1247   : > { %v973_v34 = vrot.slane %v972_v33, 4 }
0x1249   : > { %v974_v35 = vadd.f32 %v973_v34, %v972_v33 }
0x124b   : > { %v975_v36 = vrot.slane %v974_v35, 2 }
0x124d   : > { %v976_v37 = vadd.f32 %v975_v36, %v974_v35 }
0x124f   : > { %v977_v38 = vrot.slane %v976_v37, 1 }
0x1251   : > { %v978_v39 = vadd.f32 %v977_v38, %v976_v37 }
0x1253   : > { %v979_v40 = vmul.f32 50.0, %v978_v39 }
0x1255   : > { %v980_v41 = vadd.f32 5e-15, %v979_v40 }
0x1257   : > { %3526 = vrcp.f32 %v980_v41 }
0x125d   : > { %v3527_v42 = vpop.eup %3526 }
0x125e   : > { %v983_v43 = vmul.f32 %v3527_v42, %v4147_v0  ;;  %v982_v44 = vmul.f32 %v3527_v42, %v4143_v61 }
0x1260   : > { %v987_v45 = vsel %vm179_vm7, %v983_v43, 0.0  ;;  %v984_v46 = vsel %vm175_vm6, %v982_v44, 0.0 }
0x1261   : > { %988 = vadd.xlane.f32.xlu0 %v987_v45  ;;  %985 = vadd.xlane.f32.xlu2 %v984_v46 }
0x12d4   : > { %v989_v47 = vpop.xlane.xlu0 %988  ;;  %v986_v48 = vpop.xlane.xlu2 %985 }
0x12d5   : > { %v991_v49 = vmul.f32 10.0, %v989_v47  ;;  %v990_v50 = vmul.f32 10.0, %v986_v48 }
0x12d7   : > { %v993_v51 = vadd.f32 1e-15, %v991_v49  ;;  %v992_v52 = vadd.f32 1e-15, %v990_v50 }
0x12d9   : > { %3528 = vrcp.f32 %v993_v51 }
0x12da   : > { %3530 = vrcp.f32 %v992_v52 }
0x12df   : > { %v3529_v53 = vpop.eup %3528 }
0x12e0   : > { %v3531_v54 = vpop.eup %3530  ;;  %v997_v55 = vmul.f32 %v3529_v53, %v4147_v0 }
0x12e1   : > { %v996_v56 = vmul.f32 %v3531_v54, %v4143_v61 }
0x12e2   : > { %v999_v57 = vsel %vm179_vm7, %v997_v55, 0.0 }
0x12e3   : > { %v998_v58 = vsel %vm175_vm6, %v996_v56, 0.0 }
0x12e4   : > { %v1000_v59 = vadd.f32 %v999_v57, %v998_v58 }
0x12e6   : > { %v1001_v60 = vrot.slane %v1000_v59, 4 }
0x12e8   : > { %v1002_v62 = vadd.f32 %v1001_v60, %v1000_v59 }
0x12ea   : > { %v1003_v63 = vrot.slane %v1002_v62, 2 }
0x12ec   : > { %v1004_v1 = vadd.f32 %v1003_v63, %v1002_v62 }
0x12ee   : > { %v1005_v2 = vrot.slane %v1004_v1, 1 }
0x12f0   : > { %v1006_v3 = vadd.f32 %v1005_v2, %v1004_v1 }
0x12f2   : > { %v1007_v4 = vmul.f32 50.0, %v1006_v3 }
0x12f4   : > { %v1008_v5 = vadd.f32 5e-15, %v1007_v4 }
0x12f6   : > { %3532 = vrcp.f32 %v1008_v5 }
0x12fc   : > { %v3533_v6 = vpop.eup %3532 }
0x12fd   : > { %v1011_v7 = vmul.f32 %v3533_v6, %v4147_v0  ;;  %v1010_v8 = vmul.f32 %v3533_v6, %v4143_v61 }
0x12ff   : > { %v1015_v9 = vsel %vm179_vm7, %v1011_v7, 0.0  ;;  %v1012_v10 = vsel %vm175_vm6, %v1010_v8, 0.0 }
0x1300   : > { %1016 = vadd.xlane.f32.xlu2 %v1015_v9  ;;  %1013 = vadd.xlane.f32.xlu1 %v1012_v10 }
0x1373   : > { %v1017_v11 = vpop.xlane.xlu2 %1016  ;;  %v1014_v12 = vpop.xlane.xlu1 %1013 }
0x1374   : > { %v1019_v13 = vmul.f32 10.0, %v1017_v11  ;;  %v1018_v14 = vmul.f32 10.0, %v1014_v12 }
0x1376   : > { %v1021_v15 = vadd.f32 1e-15, %v1019_v13  ;;  %v1020_v16 = vadd.f32 1e-15, %v1018_v14 }
0x1378   : > { %3534 = vrcp.f32 %v1021_v15 }
0x1379   : > { %3536 = vrcp.f32 %v1020_v16 }
0x137e   : > { %v3535_v17 = vpop.eup %3534 }
0x137f   : > { %v3537_v18 = vpop.eup %3536  ;;  %v1025_v19 = vmul.f32 %v3535_v17, %v4147_v0 }
0x1380   : > { %v1024_v20 = vmul.f32 %v3537_v18, %v4143_v61 }
0x1381   : > { %v1027_v21 = vsel %vm179_vm7, %v1025_v19, 0.0 }
0x1382   : > { %v1026_v22 = vsel %vm175_vm6, %v1024_v20, 0.0 }
0x1383   : > { %v1028_v23 = vadd.f32 %v1027_v21, %v1026_v22 }
0x1385   : > { %v1029_v24 = vrot.slane %v1028_v23, 4 }
0x1387   : > { %v1030_v25 = vadd.f32 %v1029_v24, %v1028_v23 }
0x1389   : > { %v1031_v26 = vrot.slane %v1030_v25, 2 }
0x138b   : > { %v1032_v27 = vadd.f32 %v1031_v26, %v1030_v25 }
0x138d   : > { %v1033_v28 = vrot.slane %v1032_v27, 1 }
0x138f   : > { %v1034_v29 = vadd.f32 %v1033_v28, %v1032_v27 }
0x1391   : > { %v1035_v30 = vmul.f32 50.0, %v1034_v29 }
0x1393   : > { %v1036_v31 = vadd.f32 5e-15, %v1035_v30 }
0x1395   : > { %3538 = vrcp.f32 %v1036_v31 }
0x139b   : > { %v3539_v32 = vpop.eup %3538 }
0x139c   : > { %v1039_v33 = vmul.f32 %v3539_v32, %v4147_v0  ;;  %v1038_v34 = vmul.f32 %v3539_v32, %v4143_v61 }
0x139e   : > { %v1043_v35 = vsel %vm179_vm7, %v1039_v33, 0.0  ;;  %v1040_v36 = vsel %vm175_vm6, %v1038_v34, 0.0 }
0x139f   : > { %1044 = vadd.xlane.f32.xlu1 %v1043_v35  ;;  %1041 = vadd.xlane.f32.xlu0 %v1040_v36 }
0x1412   : > { %v1045_v37 = vpop.xlane.xlu1 %1044  ;;  %v1042_v38 = vpop.xlane.xlu0 %1041 }
0x1413   : > { %v1047_v39 = vmul.f32 10.0, %v1045_v37  ;;  %v1046_v40 = vmul.f32 10.0, %v1042_v38 }
0x1415   : > { %v1049_v41 = vadd.f32 1e-15, %v1047_v39  ;;  %v1048_v42 = vadd.f32 1e-15, %v1046_v40 }
0x1417   : > { %3540 = vrcp.f32 %v1049_v41 }
0x1418   : > { %3542 = vrcp.f32 %v1048_v42 }
0x141d   : > { %v3541_v43 = vpop.eup %3540 }
0x141e   : > { %v3543_v44 = vpop.eup %3542  ;;  %v1053_v45 = vmul.f32 %v3541_v43, %v4147_v0 }
0x141f   : > { %v1052_v46 = vmul.f32 %v3543_v44, %v4143_v61 }
0x1420   : > { %v1055_v47 = vsel %vm179_vm7, %v1053_v45, 0.0 }
0x1421   : > { %v1054_v48 = vsel %vm175_vm6, %v1052_v46, 0.0 }
0x1422   : > { %v1056_v49 = vadd.f32 %v1055_v47, %v1054_v48 }
0x1424   : > { %v1057_v50 = vrot.slane %v1056_v49, 4 }
0x1426   : > { %v1058_v51 = vadd.f32 %v1057_v50, %v1056_v49 }
0x1428   : > { %v1059_v52 = vrot.slane %v1058_v51, 2 }
0x142a   : > { %v1060_v53 = vadd.f32 %v1059_v52, %v1058_v51 }
0x142c   : > { %v1061_v54 = vrot.slane %v1060_v53, 1 }
0x142e   : > { %v1062_v55 = vadd.f32 %v1061_v54, %v1060_v53 }
0x1430   : > { %v1063_v56 = vmul.f32 50.0, %v1062_v55 }
0x1432   : > { %v1064_v57 = vadd.f32 5e-15, %v1063_v56 }
0x1434   : > { %3544 = vrcp.f32 %v1064_v57 }
0x143a   : > { %v3545_v58 = vpop.eup %3544 }
0x143b   : > { %v1067_v59 = vmul.f32 %v3545_v58, %v4147_v0  ;;  %v1066_v60 = vmul.f32 %v3545_v58, %v4143_v61 }
0x143d   : > { %v1071_v62 = vsel %vm179_vm7, %v1067_v59, 0.0  ;;  %v1068_v63 = vsel %vm175_vm6, %v1066_v60, 0.0 }
0x143e   : > { %1072 = vadd.xlane.f32.xlu0 %v1071_v62  ;;  %1069 = vadd.xlane.f32.xlu2 %v1068_v63 }
0x14b1   : > { %v1073_v1 = vpop.xlane.xlu0 %1072  ;;  %v1070_v2 = vpop.xlane.xlu2 %1069 }
0x14b2   : > { %v1075_v3 = vmul.f32 10.0, %v1073_v1  ;;  %v1074_v4 = vmul.f32 10.0, %v1070_v2 }
0x14b4   : > { %v1077_v5 = vadd.f32 1e-15, %v1075_v3  ;;  %v1076_v6 = vadd.f32 1e-15, %v1074_v4 }
0x14b6   : > { %3546 = vrcp.f32 %v1077_v5 }
0x14b7   : > { %3548 = vrcp.f32 %v1076_v6 }
0x14bc   : > { %v3547_v7 = vpop.eup %3546 }
0x14bd   : > { %v3549_v8 = vpop.eup %3548  ;;  %v1081_v9 = vmul.f32 %v3547_v7, %v4147_v0 }
0x14be   : > { %v1080_v10 = vmul.f32 %v3549_v8, %v4143_v61 }
0x14bf   : > { %v1083_v11 = vsel %vm179_vm7, %v1081_v9, 0.0 }
0x14c0   : > { %v1082_v12 = vsel %vm175_vm6, %v1080_v10, 0.0 }
0x14c1   : > { %v1084_v13 = vadd.f32 %v1083_v11, %v1082_v12 }
0x14c3   : > { %v1085_v14 = vrot.slane %v1084_v13, 4 }
0x14c5   : > { %v1086_v15 = vadd.f32 %v1085_v14, %v1084_v13 }
0x14c7   : > { %v1087_v16 = vrot.slane %v1086_v15, 2 }
0x14c9   : > { %v1088_v17 = vadd.f32 %v1087_v16, %v1086_v15 }
0x14cb   : > { %v1089_v18 = vrot.slane %v1088_v17, 1 }
0x14cd   : > { %v1090_v19 = vadd.f32 %v1089_v18, %v1088_v17 }
0x14cf   : > { %v1091_v20 = vmul.f32 50.0, %v1090_v19 }
0x14d1   : > { %v1092_v21 = vadd.f32 5e-15, %v1091_v20 }
0x14d3   : > { %3550 = vrcp.f32 %v1092_v21 }
0x14d9   : > { %v3551_v22 = vpop.eup %3550 }
0x14da   : > { %v1095_v23 = vmul.f32 %v3551_v22, %v4147_v0  ;;  %v1094_v24 = vmul.f32 %v3551_v22, %v4143_v61 }
0x14dc   : > { %v1099_v25 = vsel %vm179_vm7, %v1095_v23, 0.0  ;;  %v1096_v26 = vsel %vm175_vm6, %v1094_v24, 0.0 }
0x14dd   : > { %1100 = vadd.xlane.f32.xlu2 %v1099_v25  ;;  %1097 = vadd.xlane.f32.xlu1 %v1096_v26 }
0x1550   : > { %v1101_v27 = vpop.xlane.xlu2 %1100  ;;  %v1098_v28 = vpop.xlane.xlu1 %1097 }
0x1551   : > { %v1103_v29 = vmul.f32 10.0, %v1101_v27  ;;  %v1102_v30 = vmul.f32 10.0, %v1098_v28 }
0x1553   : > { %v1105_v31 = vadd.f32 1e-15, %v1103_v29  ;;  %v1104_v32 = vadd.f32 1e-15, %v1102_v30 }
0x1555   : > { %3552 = vrcp.f32 %v1105_v31 }
0x1556   : > { %3554 = vrcp.f32 %v1104_v32 }
0x155b   : > { %v3553_v33 = vpop.eup %3552 }
0x155c   : > { %v3555_v34 = vpop.eup %3554  ;;  %v1109_v35 = vmul.f32 %v3553_v33, %v4147_v0 }
0x155d   : > { %v1108_v36 = vmul.f32 %v3555_v34, %v4143_v61 }
0x155e   : > { %v1111_v37 = vsel %vm179_vm7, %v1109_v35, 0.0 }
0x155f   : > { %v1110_v38 = vsel %vm175_vm6, %v1108_v36, 0.0 }
0x1560   : > { %v1112_v39 = vadd.f32 %v1111_v37, %v1110_v38 }
0x1562   : > { %v1113_v40 = vrot.slane %v1112_v39, 4 }
0x1564   : > { %v1114_v41 = vadd.f32 %v1113_v40, %v1112_v39 }
0x1566   : > { %v1115_v42 = vrot.slane %v1114_v41, 2 }
0x1568   : > { %v1116_v43 = vadd.f32 %v1115_v42, %v1114_v41 }
0x156a   : > { %v1117_v44 = vrot.slane %v1116_v43, 1 }
0x156c   : > { %v1118_v45 = vadd.f32 %v1117_v44, %v1116_v43 }
0x156e   : > { %v1119_v46 = vmul.f32 50.0, %v1118_v45 }
0x1570   : > { %v1120_v47 = vadd.f32 5e-15, %v1119_v46 }
0x1572   : > { %3556 = vrcp.f32 %v1120_v47 }
0x1578   : > { %v3557_v48 = vpop.eup %3556 }
0x1579   : > { %v1123_v49 = vmul.f32 %v3557_v48, %v4147_v0  ;;  %v1122_v50 = vmul.f32 %v3557_v48, %v4143_v61 }
0x157b   : > { %v1127_v51 = vsel %vm179_vm7, %v1123_v49, 0.0  ;;  %v1124_v52 = vsel %vm175_vm6, %v1122_v50, 0.0 }
0x157c   : > { %1128 = vadd.xlane.f32.xlu1 %v1127_v51  ;;  %1125 = vadd.xlane.f32.xlu0 %v1124_v52 }
0x15ef   : > { %v1129_v53 = vpop.xlane.xlu1 %1128  ;;  %v1126_v54 = vpop.xlane.xlu0 %1125 }
0x15f0   : > { %v1131_v55 = vmul.f32 10.0, %v1129_v53  ;;  %v1130_v56 = vmul.f32 10.0, %v1126_v54 }
0x15f2   : > { %v1133_v57 = vadd.f32 1e-15, %v1131_v55  ;;  %v1132_v58 = vadd.f32 1e-15, %v1130_v56 }
0x15f4   : > { %3558 = vrcp.f32 %v1133_v57 }
0x15f5   : > { %3560 = vrcp.f32 %v1132_v58 }
0x15fa   : > { %v3559_v59 = vpop.eup %3558 }
0x15fb   : > { %v3561_v60 = vpop.eup %3560  ;;  %v1137_v62 = vmul.f32 %v3559_v59, %v4147_v0 }
0x15fc   : > { %v1136_v63 = vmul.f32 %v3561_v60, %v4143_v61 }
0x15fd   : > { %v1139_v1 = vsel %vm179_vm7, %v1137_v62, 0.0 }
0x15fe   : > { %v1138_v2 = vsel %vm175_vm6, %v1136_v63, 0.0 }
0x15ff   : > { %v1140_v3 = vadd.f32 %v1139_v1, %v1138_v2 }
0x1601   : > { %v1141_v4 = vrot.slane %v1140_v3, 4 }
0x1603   : > { %v1142_v5 = vadd.f32 %v1141_v4, %v1140_v3 }
0x1605   : > { %v1143_v6 = vrot.slane %v1142_v5, 2 }
0x1607   : > { %v1144_v7 = vadd.f32 %v1143_v6, %v1142_v5 }
0x1609   : > { %v1145_v8 = vrot.slane %v1144_v7, 1 }
0x160b   : > { %v1146_v9 = vadd.f32 %v1145_v8, %v1144_v7 }
0x160d   : > { %v1147_v10 = vmul.f32 50.0, %v1146_v9 }
0x160f   : > { %v1148_v11 = vadd.f32 5e-15, %v1147_v10 }
0x1611   : > { %3562 = vrcp.f32 %v1148_v11 }
0x1617   : > { %v3563_v12 = vpop.eup %3562 }
0x1618   : > { %v1151_v13 = vmul.f32 %v3563_v12, %v4147_v0  ;;  %v1150_v14 = vmul.f32 %v3563_v12, %v4143_v61 }
0x161a   : > { %v1155_v15 = vsel %vm179_vm7, %v1151_v13, 0.0  ;;  %v1152_v16 = vsel %vm175_vm6, %v1150_v14, 0.0 }
0x161b   : > { %1156 = vadd.xlane.f32.xlu0 %v1155_v15  ;;  %1153 = vadd.xlane.f32.xlu2 %v1152_v16 }
0x168e   : > { %v1157_v17 = vpop.xlane.xlu0 %1156  ;;  %v1154_v18 = vpop.xlane.xlu2 %1153 }
0x168f   : > { %v1159_v19 = vmul.f32 10.0, %v1157_v17  ;;  %v1158_v20 = vmul.f32 10.0, %v1154_v18 }
0x1691   : > { %v1161_v21 = vadd.f32 1e-15, %v1159_v19  ;;  %v1160_v22 = vadd.f32 1e-15, %v1158_v20 }
0x1693   : > { %3564 = vrcp.f32 %v1161_v21 }
0x1694   : > { %3566 = vrcp.f32 %v1160_v22 }
0x1699   : > { %v3565_v23 = vpop.eup %3564 }
0x169a   : > { %v3567_v24 = vpop.eup %3566  ;;  %v1165_v25 = vmul.f32 %v3565_v23, %v4147_v0 }
0x169b   : > { %v1164_v26 = vmul.f32 %v3567_v24, %v4143_v61 }
0x169c   : > { %v1167_v27 = vsel %vm179_vm7, %v1165_v25, 0.0 }
0x169d   : > { %v1166_v28 = vsel %vm175_vm6, %v1164_v26, 0.0 }
0x169e   : > { %v1168_v29 = vadd.f32 %v1167_v27, %v1166_v28 }
0x16a0   : > { %v1169_v30 = vrot.slane %v1168_v29, 4 }
0x16a2   : > { %v1170_v31 = vadd.f32 %v1169_v30, %v1168_v29 }
0x16a4   : > { %v1171_v32 = vrot.slane %v1170_v31, 2 }
0x16a6   : > { %v1172_v33 = vadd.f32 %v1171_v32, %v1170_v31 }
0x16a8   : > { %v1173_v34 = vrot.slane %v1172_v33, 1 }
0x16aa   : > { %v1174_v35 = vadd.f32 %v1173_v34, %v1172_v33 }
0x16ac   : > { %v1175_v36 = vmul.f32 50.0, %v1174_v35 }
0x16ae   : > { %v1176_v37 = vadd.f32 5e-15, %v1175_v36 }
0x16b0   : > { %3568 = vrcp.f32 %v1176_v37 }
0x16b6   : > { %v3569_v38 = vpop.eup %3568 }
0x16b7   : > { %v1179_v39 = vmul.f32 %v3569_v38, %v4147_v0  ;;  %v1178_v40 = vmul.f32 %v3569_v38, %v4143_v61 }
0x16b9   : > { %v1183_v41 = vsel %vm179_vm7, %v1179_v39, 0.0  ;;  %v1180_v42 = vsel %vm175_vm6, %v1178_v40, 0.0 }
0x16ba   : > { %1184 = vadd.xlane.f32.xlu2 %v1183_v41  ;;  %1181 = vadd.xlane.f32.xlu1 %v1180_v42 }
0x172d   : > { %v1185_v43 = vpop.xlane.xlu2 %1184  ;;  %v1182_v44 = vpop.xlane.xlu1 %1181 }
0x172e   : > { %v1187_v45 = vmul.f32 10.0, %v1185_v43  ;;  %v1186_v46 = vmul.f32 10.0, %v1182_v44 }
0x1730   : > { %v1189_v47 = vadd.f32 1e-15, %v1187_v45  ;;  %v1188_v48 = vadd.f32 1e-15, %v1186_v46 }
0x1732   : > { %3570 = vrcp.f32 %v1189_v47 }
0x1733   : > { %3572 = vrcp.f32 %v1188_v48 }
0x1738   : > { %v3571_v49 = vpop.eup %3570 }
0x1739   : > { %v3573_v50 = vpop.eup %3572  ;;  %v1193_v51 = vmul.f32 %v3571_v49, %v4147_v0 }
0x173a   : > { %v1192_v52 = vmul.f32 %v3573_v50, %v4143_v61 }
0x173b   : > { %v1195_v53 = vsel %vm179_vm7, %v1193_v51, 0.0 }
0x173c   : > { %v1194_v54 = vsel %vm175_vm6, %v1192_v52, 0.0 }
0x173d   : > { %v1196_v55 = vadd.f32 %v1195_v53, %v1194_v54 }
0x173f   : > { %v1197_v56 = vrot.slane %v1196_v55, 4 }
0x1741   : > { %v1198_v57 = vadd.f32 %v1197_v56, %v1196_v55 }
0x1743   : > { %v1199_v58 = vrot.slane %v1198_v57, 2 }
0x1745   : > { %v1200_v59 = vadd.f32 %v1199_v58, %v1198_v57 }
0x1747   : > { %v1201_v60 = vrot.slane %v1200_v59, 1 }
0x1749   : > { %v1202_v62 = vadd.f32 %v1201_v60, %v1200_v59 }
0x174b   : > { %v1203_v63 = vmul.f32 50.0, %v1202_v62 }
0x174d   : > { %v1204_v1 = vadd.f32 5e-15, %v1203_v63 }
0x174f   : > { %3574 = vrcp.f32 %v1204_v1 }
0x1755   : > { %v3575_v2 = vpop.eup %3574 }
0x1756   : > { %v1207_v3 = vmul.f32 %v3575_v2, %v4147_v0  ;;  %v1206_v4 = vmul.f32 %v3575_v2, %v4143_v61 }
0x1758   : > { %v1211_v5 = vsel %vm179_vm7, %v1207_v3, 0.0  ;;  %v1208_v6 = vsel %vm175_vm6, %v1206_v4, 0.0 }
0x1759   : > { %1212 = vadd.xlane.f32.xlu1 %v1211_v5  ;;  %1209 = vadd.xlane.f32.xlu0 %v1208_v6 }
0x17cc   : > { %v1213_v7 = vpop.xlane.xlu1 %1212  ;;  %v1210_v8 = vpop.xlane.xlu0 %1209 }
0x17cd   : > { %v1215_v9 = vmul.f32 10.0, %v1213_v7  ;;  %v1214_v10 = vmul.f32 10.0, %v1210_v8 }
0x17cf   : > { %v1217_v11 = vadd.f32 1e-15, %v1215_v9  ;;  %v1216_v12 = vadd.f32 1e-15, %v1214_v10 }
0x17d1   : > { %3576 = vrcp.f32 %v1217_v11 }
0x17d2   : > { %3578 = vrcp.f32 %v1216_v12 }
0x17d7   : > { %v3577_v13 = vpop.eup %3576 }
0x17d8   : > { %v3579_v14 = vpop.eup %3578  ;;  %v1221_v15 = vmul.f32 %v3577_v13, %v4147_v0 }
0x17d9   : > { %v1220_v16 = vmul.f32 %v3579_v14, %v4143_v61 }
0x17da   : > { %v1223_v17 = vsel %vm179_vm7, %v1221_v15, 0.0 }
0x17db   : > { %v1222_v18 = vsel %vm175_vm6, %v1220_v16, 0.0 }
0x17dc   : > { %v1224_v19 = vadd.f32 %v1223_v17, %v1222_v18 }
0x17de   : > { %v1225_v20 = vrot.slane %v1224_v19, 4 }
0x17e0   : > { %v1226_v21 = vadd.f32 %v1225_v20, %v1224_v19 }
0x17e2   : > { %v1227_v22 = vrot.slane %v1226_v21, 2 }
0x17e4   : > { %v1228_v23 = vadd.f32 %v1227_v22, %v1226_v21 }
0x17e6   : > { %v1229_v24 = vrot.slane %v1228_v23, 1 }
0x17e8   : > { %v1230_v25 = vadd.f32 %v1229_v24, %v1228_v23 }
0x17ea   : > { %v1231_v26 = vmul.f32 50.0, %v1230_v25 }
0x17ec   : > { %v1232_v27 = vadd.f32 5e-15, %v1231_v26 }
0x17ee   : > { %3580 = vrcp.f32 %v1232_v27 }
0x17f4   : > { %v3581_v28 = vpop.eup %3580 }
0x17f5   : > { %v1235_v29 = vmul.f32 %v3581_v28, %v4147_v0  ;;  %v1234_v30 = vmul.f32 %v3581_v28, %v4143_v61 }
0x17f7   : > { %v1239_v31 = vsel %vm179_vm7, %v1235_v29, 0.0  ;;  %v1236_v32 = vsel %vm175_vm6, %v1234_v30, 0.0 }
0x17f8   : > { %1240 = vadd.xlane.f32.xlu0 %v1239_v31  ;;  %1237 = vadd.xlane.f32.xlu2 %v1236_v32 }
0x186b   : > { %v1241_v33 = vpop.xlane.xlu0 %1240  ;;  %v1238_v34 = vpop.xlane.xlu2 %1237 }
0x186c   : > { %v1243_v35 = vmul.f32 10.0, %v1241_v33  ;;  %v1242_v36 = vmul.f32 10.0, %v1238_v34 }
0x186e   : > { %v1245_v37 = vadd.f32 1e-15, %v1243_v35  ;;  %v1244_v38 = vadd.f32 1e-15, %v1242_v36 }
0x1870   : > { %3582 = vrcp.f32 %v1245_v37 }
0x1871   : > { %3584 = vrcp.f32 %v1244_v38 }
0x1876   : > { %v3583_v39 = vpop.eup %3582 }
0x1877   : > { %v3585_v40 = vpop.eup %3584  ;;  %v1249_v41 = vmul.f32 %v3583_v39, %v4147_v0 }
0x1878   : > { %v1248_v42 = vmul.f32 %v3585_v40, %v4143_v61 }
0x1879   : > { %v1251_v43 = vsel %vm179_vm7, %v1249_v41, 0.0 }
0x187a   : > { %v1250_v44 = vsel %vm175_vm6, %v1248_v42, 0.0 }
0x187b   : > { %v1252_v45 = vadd.f32 %v1251_v43, %v1250_v44 }
0x187d   : > { %v1253_v46 = vrot.slane %v1252_v45, 4 }
0x187f   : > { %v1254_v47 = vadd.f32 %v1253_v46, %v1252_v45 }
0x1881   : > { %v1255_v48 = vrot.slane %v1254_v47, 2 }
0x1883   : > { %v1256_v49 = vadd.f32 %v1255_v48, %v1254_v47 }
0x1885   : > { %v1257_v50 = vrot.slane %v1256_v49, 1 }
0x1887   : > { %v1258_v51 = vadd.f32 %v1257_v50, %v1256_v49 }
0x1889   : > { %v1259_v52 = vmul.f32 50.0, %v1258_v51 }
0x188b   : > { %v1260_v53 = vadd.f32 5e-15, %v1259_v52 }
0x188d   : > { %3586 = vrcp.f32 %v1260_v53 }
0x1893   : > { %v3587_v54 = vpop.eup %3586 }
0x1894   : > { %v1263_v55 = vmul.f32 %v3587_v54, %v4147_v0  ;;  %v1262_v56 = vmul.f32 %v3587_v54, %v4143_v61 }
0x1896   : > { %v1267_v57 = vsel %vm179_vm7, %v1263_v55, 0.0  ;;  %v1264_v58 = vsel %vm175_vm6, %v1262_v56, 0.0 }
0x1897   : > { %1268 = vadd.xlane.f32.xlu2 %v1267_v57  ;;  %1265 = vadd.xlane.f32.xlu1 %v1264_v58 }
0x190a   : > { %v1269_v59 = vpop.xlane.xlu2 %1268  ;;  %v1266_v60 = vpop.xlane.xlu1 %1265 }
0x190b   : > { %v1271_v62 = vmul.f32 10.0, %v1269_v59  ;;  %v1270_v63 = vmul.f32 10.0, %v1266_v60 }
0x190d   : > { %v1273_v1 = vadd.f32 1e-15, %v1271_v62  ;;  %v1272_v2 = vadd.f32 1e-15, %v1270_v63 }
0x190f   : > { %3588 = vrcp.f32 %v1273_v1 }
0x1910   : > { %3590 = vrcp.f32 %v1272_v2 }
0x1915   : > { %v3589_v3 = vpop.eup %3588 }
0x1916   : > { %v3591_v4 = vpop.eup %3590  ;;  %v1277_v5 = vmul.f32 %v3589_v3, %v4147_v0 }
0x1917   : > { %v1276_v6 = vmul.f32 %v3591_v4, %v4143_v61 }
0x1918   : > { %v1279_v7 = vsel %vm179_vm7, %v1277_v5, 0.0 }
0x1919   : > { %v1278_v8 = vsel %vm175_vm6, %v1276_v6, 0.0 }
0x191a   : > { %v1280_v9 = vadd.f32 %v1279_v7, %v1278_v8 }
0x191c   : > { %v1281_v10 = vrot.slane %v1280_v9, 4 }
0x191e   : > { %v1282_v11 = vadd.f32 %v1281_v10, %v1280_v9 }
0x1920   : > { %v1283_v12 = vrot.slane %v1282_v11, 2 }
0x1922   : > { %v1284_v13 = vadd.f32 %v1283_v12, %v1282_v11 }
0x1924   : > { %v1285_v14 = vrot.slane %v1284_v13, 1 }
0x1926   : > { %v1286_v15 = vadd.f32 %v1285_v14, %v1284_v13 }
0x1928   : > { %v1287_v16 = vmul.f32 50.0, %v1286_v15 }
0x192a   : > { %v1288_v17 = vadd.f32 5e-15, %v1287_v16 }
0x192c   : > { %3592 = vrcp.f32 %v1288_v17 }
0x1932   : > { %v3593_v18 = vpop.eup %3592 }
0x1933   : > { %v1291_v19 = vmul.f32 %v3593_v18, %v4147_v0  ;;  %v1290_v20 = vmul.f32 %v3593_v18, %v4143_v61 }
0x1935   : > { %v1295_v21 = vsel %vm179_vm7, %v1291_v19, 0.0  ;;  %v1292_v22 = vsel %vm175_vm6, %v1290_v20, 0.0 }
0x1936   : > { %1296 = vadd.xlane.f32.xlu1 %v1295_v21  ;;  %1293 = vadd.xlane.f32.xlu0 %v1292_v22 }
0x19a9   : > { %v1297_v23 = vpop.xlane.xlu1 %1296  ;;  %v1294_v24 = vpop.xlane.xlu0 %1293 }
0x19aa   : > { %v1299_v25 = vmul.f32 10.0, %v1297_v23  ;;  %v1298_v26 = vmul.f32 10.0, %v1294_v24 }
0x19ac   : > { %v1301_v27 = vadd.f32 1e-15, %v1299_v25  ;;  %v1300_v28 = vadd.f32 1e-15, %v1298_v26 }
0x19ae   : > { %3594 = vrcp.f32 %v1301_v27 }
0x19af   : > { %3596 = vrcp.f32 %v1300_v28 }
0x19b4   : > { %v3595_v29 = vpop.eup %3594 }
0x19b5   : > { %v3597_v30 = vpop.eup %3596  ;;  %v1305_v31 = vmul.f32 %v3595_v29, %v4147_v0 }
0x19b6   : > { %v1304_v32 = vmul.f32 %v3597_v30, %v4143_v61 }
0x19b7   : > { %v1307_v33 = vsel %vm179_vm7, %v1305_v31, 0.0 }
0x19b8   : > { %v1306_v34 = vsel %vm175_vm6, %v1304_v32, 0.0 }
0x19b9   : > { %v1308_v35 = vadd.f32 %v1307_v33, %v1306_v34 }
0x19bb   : > { %v1309_v36 = vrot.slane %v1308_v35, 4 }
0x19bd   : > { %v1310_v37 = vadd.f32 %v1309_v36, %v1308_v35 }
0x19bf   : > { %v1311_v38 = vrot.slane %v1310_v37, 2 }
0x19c1   : > { %v1312_v39 = vadd.f32 %v1311_v38, %v1310_v37 }
0x19c3   : > { %v1313_v40 = vrot.slane %v1312_v39, 1 }
0x19c5   : > { %v1314_v41 = vadd.f32 %v1313_v40, %v1312_v39 }
0x19c7   : > { %v1315_v42 = vmul.f32 50.0, %v1314_v41 }
0x19c9   : > { %v1316_v43 = vadd.f32 5e-15, %v1315_v42 }
0x19cb   : > { %3598 = vrcp.f32 %v1316_v43 }
0x19d1   : > { %v3599_v44 = vpop.eup %3598 }
0x19d2   : > { %v1319_v45 = vmul.f32 %v3599_v44, %v4147_v0  ;;  %v1318_v46 = vmul.f32 %v3599_v44, %v4143_v61 }
0x19d4   : > { %v1323_v47 = vsel %vm179_vm7, %v1319_v45, 0.0  ;;  %v1320_v48 = vsel %vm175_vm6, %v1318_v46, 0.0 }
0x19d5   : > { %1324 = vadd.xlane.f32.xlu0 %v1323_v47  ;;  %1321 = vadd.xlane.f32.xlu2 %v1320_v48 }
0x1a48   : > { %v1325_v49 = vpop.xlane.xlu0 %1324  ;;  %v1322_v50 = vpop.xlane.xlu2 %1321 }
0x1a49   : > { %v1327_v51 = vmul.f32 10.0, %v1325_v49  ;;  %v1326_v52 = vmul.f32 10.0, %v1322_v50 }
0x1a4b   : > { %v1329_v53 = vadd.f32 1e-15, %v1327_v51  ;;  %v1328_v54 = vadd.f32 1e-15, %v1326_v52 }
0x1a4d   : > { %3600 = vrcp.f32 %v1329_v53 }
0x1a4e   : > { %3602 = vrcp.f32 %v1328_v54 }
0x1a53   : > { %v3601_v55 = vpop.eup %3600 }
0x1a54   : > { %v3603_v56 = vpop.eup %3602  ;;  %v1333_v57 = vmul.f32 %v3601_v55, %v4147_v0 }
0x1a55   : > { %v1332_v58 = vmul.f32 %v3603_v56, %v4143_v61 }
0x1a56   : > { %v1335_v59 = vsel %vm179_vm7, %v1333_v57, 0.0 }
0x1a57   : > { %v1334_v60 = vsel %vm175_vm6, %v1332_v58, 0.0 }
0x1a58   : > { %v1336_v62 = vadd.f32 %v1335_v59, %v1334_v60 }
0x1a5a   : > { %v1337_v63 = vrot.slane %v1336_v62, 4 }
0x1a5c   : > { %v1338_v1 = vadd.f32 %v1337_v63, %v1336_v62 }
0x1a5e   : > { %v1339_v2 = vrot.slane %v1338_v1, 2 }
0x1a60   : > { %v1340_v3 = vadd.f32 %v1339_v2, %v1338_v1 }
0x1a62   : > { %v1341_v4 = vrot.slane %v1340_v3, 1 }
0x1a64   : > { %v1342_v5 = vadd.f32 %v1341_v4, %v1340_v3 }
0x1a66   : > { %v1343_v6 = vmul.f32 50.0, %v1342_v5 }
0x1a68   : > { %v1344_v7 = vadd.f32 5e-15, %v1343_v6 }
0x1a6a   : > { %3604 = vrcp.f32 %v1344_v7 }
0x1a70   : > { %v3605_v8 = vpop.eup %3604 }
0x1a71   : > { %v1347_v9 = vmul.f32 %v3605_v8, %v4147_v0  ;;  %v1346_v10 = vmul.f32 %v3605_v8, %v4143_v61 }
0x1a73   : > { %v1351_v11 = vsel %vm179_vm7, %v1347_v9, 0.0  ;;  %v1348_v12 = vsel %vm175_vm6, %v1346_v10, 0.0 }
0x1a74   : > { %1352 = vadd.xlane.f32.xlu2 %v1351_v11  ;;  %1349 = vadd.xlane.f32.xlu1 %v1348_v12 }
0x1ae7   : > { %v1353_v13 = vpop.xlane.xlu2 %1352  ;;  %v1350_v14 = vpop.xlane.xlu1 %1349 }
0x1ae8   : > { %v1355_v15 = vmul.f32 10.0, %v1353_v13  ;;  %v1354_v16 = vmul.f32 10.0, %v1350_v14 }
0x1aea   : > { %v1357_v17 = vadd.f32 1e-15, %v1355_v15  ;;  %v1356_v18 = vadd.f32 1e-15, %v1354_v16 }
0x1aec   : > { %3606 = vrcp.f32 %v1357_v17 }
0x1aed   : > { %3608 = vrcp.f32 %v1356_v18 }
0x1af2   : > { %v3607_v19 = vpop.eup %3606 }
0x1af3   : > { %v3609_v20 = vpop.eup %3608  ;;  %v1361_v21 = vmul.f32 %v3607_v19, %v4147_v0 }
0x1af4   : > { %v1360_v22 = vmul.f32 %v3609_v20, %v4143_v61 }
0x1af5   : > { %v1363_v23 = vsel %vm179_vm7, %v1361_v21, 0.0 }
0x1af6   : > { %v1362_v24 = vsel %vm175_vm6, %v1360_v22, 0.0 }
0x1af7   : > { %v1364_v25 = vadd.f32 %v1363_v23, %v1362_v24 }
0x1af9   : > { %v1365_v26 = vrot.slane %v1364_v25, 4 }
0x1afb   : > { %v1366_v27 = vadd.f32 %v1365_v26, %v1364_v25 }
0x1afd   : > { %v1367_v28 = vrot.slane %v1366_v27, 2 }
0x1aff   : > { %v1368_v29 = vadd.f32 %v1367_v28, %v1366_v27 }
0x1b01   : > { %v1369_v30 = vrot.slane %v1368_v29, 1 }
0x1b03   : > { %v1370_v31 = vadd.f32 %v1369_v30, %v1368_v29 }
0x1b05   : > { %v1371_v32 = vmul.f32 50.0, %v1370_v31 }
0x1b07   : > { %v1372_v33 = vadd.f32 5e-15, %v1371_v32 }
0x1b09   : > { %3610 = vrcp.f32 %v1372_v33 }
0x1b0f   : > { %v3611_v34 = vpop.eup %3610 }
0x1b10   : > { %v1375_v35 = vmul.f32 %v3611_v34, %v4147_v0  ;;  %v1374_v36 = vmul.f32 %v3611_v34, %v4143_v61 }
0x1b12   : > { %v1379_v37 = vsel %vm179_vm7, %v1375_v35, 0.0  ;;  %v1376_v38 = vsel %vm175_vm6, %v1374_v36, 0.0 }
0x1b13   : > { %1380 = vadd.xlane.f32.xlu1 %v1379_v37  ;;  %1377 = vadd.xlane.f32.xlu0 %v1376_v38 }
0x1b86   : > { %v1381_v39 = vpop.xlane.xlu1 %1380  ;;  %v1378_v40 = vpop.xlane.xlu0 %1377 }
0x1b87   : > { %v1383_v41 = vmul.f32 10.0, %v1381_v39  ;;  %v1382_v42 = vmul.f32 10.0, %v1378_v40 }
0x1b89   : > { %v1385_v43 = vadd.f32 1e-15, %v1383_v41  ;;  %v1384_v44 = vadd.f32 1e-15, %v1382_v42 }
0x1b8b   : > { %3612 = vrcp.f32 %v1385_v43 }
0x1b8c   : > { %3614 = vrcp.f32 %v1384_v44 }
0x1b91   : > { %v3613_v45 = vpop.eup %3612 }
0x1b92   : > { %v3615_v46 = vpop.eup %3614  ;;  %v1389_v47 = vmul.f32 %v3613_v45, %v4147_v0 }
0x1b93   : > { %v1388_v48 = vmul.f32 %v3615_v46, %v4143_v61 }
0x1b94   : > { %v1391_v49 = vsel %vm179_vm7, %v1389_v47, 0.0 }
0x1b95   : > { %v1390_v50 = vsel %vm175_vm6, %v1388_v48, 0.0 }
0x1b96   : > { %v1392_v51 = vadd.f32 %v1391_v49, %v1390_v50 }
0x1b98   : > { %v1393_v52 = vrot.slane %v1392_v51, 4 }
0x1b9a   : > { %v1394_v53 = vadd.f32 %v1393_v52, %v1392_v51 }
0x1b9c   : > { %v1395_v54 = vrot.slane %v1394_v53, 2 }
0x1b9e   : > { %v1396_v55 = vadd.f32 %v1395_v54, %v1394_v53 }
0x1ba0   : > { %v1397_v56 = vrot.slane %v1396_v55, 1 }
0x1ba2   : > { %v1398_v57 = vadd.f32 %v1397_v56, %v1396_v55 }
0x1ba4   : > { %v1399_v58 = vmul.f32 50.0, %v1398_v57 }
0x1ba6   : > { %v1400_v59 = vadd.f32 5e-15, %v1399_v58 }
0x1ba8   : > { %3616 = vrcp.f32 %v1400_v59 }
0x1bae   : > { %v3617_v60 = vpop.eup %3616 }
0x1baf   : > { %v1403_v62 = vmul.f32 %v3617_v60, %v4147_v0  ;;  %v1402_v63 = vmul.f32 %v3617_v60, %v4143_v61 }
0x1bb1   : > { %v1407_v1 = vsel %vm179_vm7, %v1403_v62, 0.0  ;;  %v1404_v2 = vsel %vm175_vm6, %v1402_v63, 0.0 }
0x1bb2   : > { %1408 = vadd.xlane.f32.xlu0 %v1407_v1  ;;  %1405 = vadd.xlane.f32.xlu2 %v1404_v2 }
0x1c25   : > { %v1409_v3 = vpop.xlane.xlu0 %1408  ;;  %v1406_v4 = vpop.xlane.xlu2 %1405 }
0x1c26   : > { %v1411_v5 = vmul.f32 10.0, %v1409_v3  ;;  %v1410_v6 = vmul.f32 10.0, %v1406_v4 }
0x1c28   : > { %v1413_v7 = vadd.f32 1e-15, %v1411_v5  ;;  %v1412_v8 = vadd.f32 1e-15, %v1410_v6 }
0x1c2a   : > { %3618 = vrcp.f32 %v1413_v7 }
0x1c2b   : > { %3620 = vrcp.f32 %v1412_v8 }
0x1c30   : > { %v3619_v9 = vpop.eup %3618 }
0x1c31   : > { %v3621_v10 = vpop.eup %3620  ;;  %v1417_v11 = vmul.f32 %v3619_v9, %v4147_v0 }
0x1c32   : > { %v1416_v12 = vmul.f32 %v3621_v10, %v4143_v61 }
0x1c33   : > { %v1419_v13 = vsel %vm179_vm7, %v1417_v11, 0.0 }
0x1c34   : > { %v1418_v14 = vsel %vm175_vm6, %v1416_v12, 0.0 }
0x1c35   : > { %v1420_v15 = vadd.f32 %v1419_v13, %v1418_v14 }
0x1c37   : > { %v1421_v16 = vrot.slane %v1420_v15, 4 }
0x1c39   : > { %v1422_v17 = vadd.f32 %v1421_v16, %v1420_v15 }
0x1c3b   : > { %v1423_v18 = vrot.slane %v1422_v17, 2 }
0x1c3d   : > { %v1424_v19 = vadd.f32 %v1423_v18, %v1422_v17 }
0x1c3f   : > { %v1425_v20 = vrot.slane %v1424_v19, 1 }
0x1c41   : > { %v1426_v21 = vadd.f32 %v1425_v20, %v1424_v19 }
0x1c43   : > { %v1427_v22 = vmul.f32 50.0, %v1426_v21 }
0x1c45   : > { %v1428_v23 = vadd.f32 5e-15, %v1427_v22 }
0x1c47   : > { %3622 = vrcp.f32 %v1428_v23 }
0x1c4d   : > { %v3623_v24 = vpop.eup %3622 }
0x1c4e   : > { %v1431_v25 = vmul.f32 %v3623_v24, %v4147_v0  ;;  %v1430_v26 = vmul.f32 %v3623_v24, %v4143_v61 }
0x1c50   : > { %v1435_v27 = vsel %vm179_vm7, %v1431_v25, 0.0  ;;  %v1432_v28 = vsel %vm175_vm6, %v1430_v26, 0.0 }
0x1c51   : > { %1436 = vadd.xlane.f32.xlu2 %v1435_v27  ;;  %1433 = vadd.xlane.f32.xlu1 %v1432_v28 }
0x1cc4   : > { %v1437_v29 = vpop.xlane.xlu2 %1436  ;;  %v1434_v30 = vpop.xlane.xlu1 %1433 }
0x1cc5   : > { %v1439_v31 = vmul.f32 10.0, %v1437_v29  ;;  %v1438_v32 = vmul.f32 10.0, %v1434_v30 }
0x1cc7   : > { %v1441_v33 = vadd.f32 1e-15, %v1439_v31  ;;  %v1440_v34 = vadd.f32 1e-15, %v1438_v32 }
0x1cc9   : > { %3624 = vrcp.f32 %v1441_v33 }
0x1cca   : > { %3626 = vrcp.f32 %v1440_v34 }
0x1ccf   : > { %v3625_v35 = vpop.eup %3624 }
0x1cd0   : > { %v3627_v36 = vpop.eup %3626  ;;  %v1445_v37 = vmul.f32 %v3625_v35, %v4147_v0 }
0x1cd1   : > { %v1444_v38 = vmul.f32 %v3627_v36, %v4143_v61 }
0x1cd2   : > { %v1447_v39 = vsel %vm179_vm7, %v1445_v37, 0.0 }
0x1cd3   : > { %v1446_v40 = vsel %vm175_vm6, %v1444_v38, 0.0 }
0x1cd4   : > { %v1448_v41 = vadd.f32 %v1447_v39, %v1446_v40 }
0x1cd6   : > { %v1449_v42 = vrot.slane %v1448_v41, 4 }
0x1cd8   : > { %v1450_v43 = vadd.f32 %v1449_v42, %v1448_v41 }
0x1cda   : > { %v1451_v44 = vrot.slane %v1450_v43, 2 }
0x1cdc   : > { %v1452_v45 = vadd.f32 %v1451_v44, %v1450_v43 }
0x1cde   : > { %v1453_v46 = vrot.slane %v1452_v45, 1 }
0x1ce0   : > { %v1454_v47 = vadd.f32 %v1453_v46, %v1452_v45 }
0x1ce2   : > { %v1455_v48 = vmul.f32 50.0, %v1454_v47 }
0x1ce4   : > { %v1456_v49 = vadd.f32 5e-15, %v1455_v48 }
0x1ce6   : > { %3628 = vrcp.f32 %v1456_v49 }
0x1cec   : > { %v3629_v50 = vpop.eup %3628 }
0x1ced   : > { %v1459_v51 = vmul.f32 %v3629_v50, %v4147_v0  ;;  %v1458_v52 = vmul.f32 %v3629_v50, %v4143_v61 }
0x1cef   : > { %v1463_v53 = vsel %vm179_vm7, %v1459_v51, 0.0  ;;  %v1460_v54 = vsel %vm175_vm6, %v1458_v52, 0.0 }
0x1cf0   : > { %1464 = vadd.xlane.f32.xlu1 %v1463_v53  ;;  %1461 = vadd.xlane.f32.xlu0 %v1460_v54 }
0x1d63   : > { %v1465_v55 = vpop.xlane.xlu1 %1464  ;;  %v1462_v56 = vpop.xlane.xlu0 %1461 }
0x1d64   : > { %v1467_v57 = vmul.f32 10.0, %v1465_v55  ;;  %v1466_v58 = vmul.f32 10.0, %v1462_v56 }
0x1d66   : > { %v1469_v59 = vadd.f32 1e-15, %v1467_v57  ;;  %v1468_v60 = vadd.f32 1e-15, %v1466_v58 }
0x1d68   : > { %3630 = vrcp.f32 %v1469_v59 }
0x1d69   : > { %3632 = vrcp.f32 %v1468_v60 }
0x1d6e   : > { %v3631_v62 = vpop.eup %3630 }
0x1d6f   : > { %v3633_v63 = vpop.eup %3632  ;;  %v1473_v1 = vmul.f32 %v3631_v62, %v4147_v0 }
0x1d70   : > { %v1472_v2 = vmul.f32 %v3633_v63, %v4143_v61 }
0x1d71   : > { %v1475_v3 = vsel %vm179_vm7, %v1473_v1, 0.0 }
0x1d72   : > { %v1474_v4 = vsel %vm175_vm6, %v1472_v2, 0.0 }
0x1d73   : > { %v1476_v5 = vadd.f32 %v1475_v3, %v1474_v4 }
0x1d75   : > { %v1477_v6 = vrot.slane %v1476_v5, 4 }
0x1d77   : > { %v1478_v7 = vadd.f32 %v1477_v6, %v1476_v5 }
0x1d79   : > { %v1479_v8 = vrot.slane %v1478_v7, 2 }
0x1d7b   : > { %v1480_v9 = vadd.f32 %v1479_v8, %v1478_v7 }
0x1d7d   : > { %v1481_v10 = vrot.slane %v1480_v9, 1 }
0x1d7f   : > { %v1482_v11 = vadd.f32 %v1481_v10, %v1480_v9 }
0x1d81   : > { %v1483_v12 = vmul.f32 50.0, %v1482_v11 }
0x1d83   : > { %v1484_v13 = vadd.f32 5e-15, %v1483_v12 }
0x1d85   : > { %3634 = vrcp.f32 %v1484_v13 }
0x1d8b   : > { %v3635_v14 = vpop.eup %3634 }
0x1d8c   : > { %v1487_v15 = vmul.f32 %v3635_v14, %v4147_v0  ;;  %v1486_v16 = vmul.f32 %v3635_v14, %v4143_v61 }
0x1d8e   : > { %v1491_v17 = vsel %vm179_vm7, %v1487_v15, 0.0  ;;  %v1488_v18 = vsel %vm175_vm6, %v1486_v16, 0.0 }
0x1d8f   : > { %1492 = vadd.xlane.f32.xlu0 %v1491_v17  ;;  %1489 = vadd.xlane.f32.xlu2 %v1488_v18 }
0x1e02   : > { %v1493_v19 = vpop.xlane.xlu0 %1492  ;;  %v1490_v20 = vpop.xlane.xlu2 %1489 }
0x1e03   : > { %v1495_v21 = vmul.f32 10.0, %v1493_v19  ;;  %v1494_v22 = vmul.f32 10.0, %v1490_v20 }
0x1e05   : > { %v1497_v23 = vadd.f32 1e-15, %v1495_v21  ;;  %v1496_v24 = vadd.f32 1e-15, %v1494_v22 }
0x1e07   : > { %3636 = vrcp.f32 %v1497_v23 }
0x1e08   : > { %3638 = vrcp.f32 %v1496_v24 }
0x1e0d   : > { %v3637_v25 = vpop.eup %3636 }
0x1e0e   : > { %v3639_v26 = vpop.eup %3638  ;;  %v1501_v27 = vmul.f32 %v3637_v25, %v4147_v0 }
0x1e0f   : > { %v1500_v28 = vmul.f32 %v3639_v26, %v4143_v61 }
0x1e10   : > { %v1503_v29 = vsel %vm179_vm7, %v1501_v27, 0.0 }
0x1e11   : > { %v1502_v30 = vsel %vm175_vm6, %v1500_v28, 0.0 }
0x1e12   : > { %v1504_v31 = vadd.f32 %v1503_v29, %v1502_v30 }
0x1e14   : > { %v1505_v32 = vrot.slane %v1504_v31, 4 }
0x1e16   : > { %v1506_v33 = vadd.f32 %v1505_v32, %v1504_v31 }
0x1e18   : > { %v1507_v34 = vrot.slane %v1506_v33, 2 }
0x1e1a   : > { %v1508_v35 = vadd.f32 %v1507_v34, %v1506_v33 }
0x1e1c   : > { %v1509_v36 = vrot.slane %v1508_v35, 1 }
0x1e1e   : > { %v1510_v37 = vadd.f32 %v1509_v36, %v1508_v35 }
0x1e20   : > { %v1511_v38 = vmul.f32 50.0, %v1510_v37 }
0x1e22   : > { %v1512_v39 = vadd.f32 5e-15, %v1511_v38 }
0x1e24   : > { %3640 = vrcp.f32 %v1512_v39 }
0x1e2a   : > { %v3641_v40 = vpop.eup %3640 }
0x1e2b   : > { %v1515_v41 = vmul.f32 %v3641_v40, %v4147_v0  ;;  %v1514_v42 = vmul.f32 %v3641_v40, %v4143_v61 }
0x1e2d   : > { %v1519_v43 = vsel %vm179_vm7, %v1515_v41, 0.0  ;;  %v1516_v44 = vsel %vm175_vm6, %v1514_v42, 0.0 }
0x1e2e   : > { %1520 = vadd.xlane.f32.xlu2 %v1519_v43  ;;  %1517 = vadd.xlane.f32.xlu1 %v1516_v44 }
0x1ea1   : > { %v1521_v45 = vpop.xlane.xlu2 %1520  ;;  %v1518_v46 = vpop.xlane.xlu1 %1517 }
0x1ea2   : > { %v1523_v47 = vmul.f32 10.0, %v1521_v45  ;;  %v1522_v48 = vmul.f32 10.0, %v1518_v46 }
0x1ea4   : > { %v1525_v49 = vadd.f32 1e-15, %v1523_v47  ;;  %v1524_v50 = vadd.f32 1e-15, %v1522_v48 }
0x1ea6   : > { %3642 = vrcp.f32 %v1525_v49 }
0x1ea7   : > { %3644 = vrcp.f32 %v1524_v50 }
0x1eac   : > { %v3643_v51 = vpop.eup %3642 }
0x1ead   : > { %v3645_v52 = vpop.eup %3644  ;;  %v1529_v53 = vmul.f32 %v3643_v51, %v4147_v0 }
0x1eae   : > { %v1528_v54 = vmul.f32 %v3645_v52, %v4143_v61 }
0x1eaf   : > { %v1531_v55 = vsel %vm179_vm7, %v1529_v53, 0.0 }
0x1eb0   : > { %v1530_v56 = vsel %vm175_vm6, %v1528_v54, 0.0 }
0x1eb1   : > { %v1532_v57 = vadd.f32 %v1531_v55, %v1530_v56 }
0x1eb3   : > { %v1533_v58 = vrot.slane %v1532_v57, 4 }
0x1eb5   : > { %v1534_v59 = vadd.f32 %v1533_v58, %v1532_v57 }
0x1eb7   : > { %v1535_v60 = vrot.slane %v1534_v59, 2 }
0x1eb9   : > { %v1536_v62 = vadd.f32 %v1535_v60, %v1534_v59 }
0x1ebb   : > { %v1537_v63 = vrot.slane %v1536_v62, 1 }
0x1ebd   : > { %v1538_v1 = vadd.f32 %v1537_v63, %v1536_v62 }
0x1ebf   : > { %v1539_v2 = vmul.f32 50.0, %v1538_v1 }
0x1ec1   : > { %v1540_v3 = vadd.f32 5e-15, %v1539_v2 }
0x1ec3   : > { %3646 = vrcp.f32 %v1540_v3 }
0x1ec9   : > { %v3647_v4 = vpop.eup %3646 }
0x1eca   : > { %v1543_v5 = vmul.f32 %v3647_v4, %v4147_v0  ;;  %v1542_v6 = vmul.f32 %v3647_v4, %v4143_v61 }
0x1ecc   : > { %v1547_v7 = vsel %vm179_vm7, %v1543_v5, 0.0  ;;  %v1544_v8 = vsel %vm175_vm6, %v1542_v6, 0.0 }
0x1ecd   : > { %1548 = vadd.xlane.f32.xlu1 %v1547_v7  ;;  %1545 = vadd.xlane.f32.xlu0 %v1544_v8 }
0x1f40   : > { %v1549_v9 = vpop.xlane.xlu1 %1548  ;;  %v1546_v10 = vpop.xlane.xlu0 %1545 }
0x1f41   : > { %v1551_v11 = vmul.f32 10.0, %v1549_v9  ;;  %v1550_v12 = vmul.f32 10.0, %v1546_v10 }
0x1f43   : > { %v1553_v13 = vadd.f32 1e-15, %v1551_v11  ;;  %v1552_v14 = vadd.f32 1e-15, %v1550_v12 }
0x1f45   : > { %3648 = vrcp.f32 %v1553_v13 }
0x1f46   : > { %3650 = vrcp.f32 %v1552_v14 }
0x1f4b   : > { %v3649_v15 = vpop.eup %3648 }
0x1f4c   : > { %v3651_v16 = vpop.eup %3650  ;;  %v1557_v17 = vmul.f32 %v3649_v15, %v4147_v0 }
0x1f4d   : > { %v1556_v18 = vmul.f32 %v3651_v16, %v4143_v61 }
0x1f4e   : > { %v1559_v19 = vsel %vm179_vm7, %v1557_v17, 0.0 }
0x1f4f   : > { %v1558_v20 = vsel %vm175_vm6, %v1556_v18, 0.0 }
0x1f50   : > { %v1560_v21 = vadd.f32 %v1559_v19, %v1558_v20 }
0x1f52   : > { %v1561_v22 = vrot.slane %v1560_v21, 4 }
0x1f54   : > { %v1562_v23 = vadd.f32 %v1561_v22, %v1560_v21 }
0x1f56   : > { %v1563_v24 = vrot.slane %v1562_v23, 2 }
0x1f58   : > { %v1564_v25 = vadd.f32 %v1563_v24, %v1562_v23 }
0x1f5a   : > { %v1565_v26 = vrot.slane %v1564_v25, 1 }
0x1f5c   : > { %v1566_v27 = vadd.f32 %v1565_v26, %v1564_v25 }
0x1f5e   : > { %v1567_v28 = vmul.f32 50.0, %v1566_v27 }
0x1f60   : > { %v1568_v29 = vadd.f32 5e-15, %v1567_v28 }
0x1f62   : > { %3652 = vrcp.f32 %v1568_v29 }
0x1f68   : > { %v3653_v30 = vpop.eup %3652 }
0x1f69   : > { %v1571_v31 = vmul.f32 %v3653_v30, %v4147_v0  ;;  %v1570_v32 = vmul.f32 %v3653_v30, %v4143_v61 }
0x1f6b   : > { %v1575_v33 = vsel %vm179_vm7, %v1571_v31, 0.0  ;;  %v1572_v34 = vsel %vm175_vm6, %v1570_v32, 0.0 }
0x1f6c   : > { %1576 = vadd.xlane.f32.xlu0 %v1575_v33  ;;  %1573 = vadd.xlane.f32.xlu2 %v1572_v34 }
0x1fdf   : > { %v1577_v35 = vpop.xlane.xlu0 %1576  ;;  %v1574_v36 = vpop.xlane.xlu2 %1573 }
0x1fe0   : > { %v1579_v37 = vmul.f32 10.0, %v1577_v35  ;;  %v1578_v38 = vmul.f32 10.0, %v1574_v36 }
0x1fe2   : > { %v1581_v39 = vadd.f32 1e-15, %v1579_v37  ;;  %v1580_v40 = vadd.f32 1e-15, %v1578_v38 }
0x1fe4   : > { %3654 = vrcp.f32 %v1581_v39 }
0x1fe5   : > { %3656 = vrcp.f32 %v1580_v40 }
0x1fea   : > { %v3655_v41 = vpop.eup %3654 }
0x1feb   : > { %v3657_v42 = vpop.eup %3656  ;;  %v1585_v43 = vmul.f32 %v3655_v41, %v4147_v0 }
0x1fec   : > { %v1584_v44 = vmul.f32 %v3657_v42, %v4143_v61 }
0x1fed   : > { %v1587_v45 = vsel %vm179_vm7, %v1585_v43, 0.0 }
0x1fee   : > { %v1586_v46 = vsel %vm175_vm6, %v1584_v44, 0.0 }
0x1fef   : > { %v1588_v47 = vadd.f32 %v1587_v45, %v1586_v46 }
0x1ff1   : > { %v1589_v48 = vrot.slane %v1588_v47, 4 }
0x1ff3   : > { %v1590_v49 = vadd.f32 %v1589_v48, %v1588_v47 }
0x1ff5   : > { %v1591_v50 = vrot.slane %v1590_v49, 2 }
0x1ff7   : > { %v1592_v51 = vadd.f32 %v1591_v50, %v1590_v49 }
0x1ff9   : > { %v1593_v52 = vrot.slane %v1592_v51, 1 }
0x1ffb   : > { %v1594_v53 = vadd.f32 %v1593_v52, %v1592_v51 }
0x1ffd   : > { %v1595_v54 = vmul.f32 50.0, %v1594_v53 }
0x1fff   : > { %v1596_v55 = vadd.f32 5e-15, %v1595_v54 }
0x2001   : > { %3658 = vrcp.f32 %v1596_v55 }
0x2007   : > { %v3659_v56 = vpop.eup %3658 }
0x2008   : > { %v1599_v57 = vmul.f32 %v3659_v56, %v4147_v0  ;;  %v1598_v58 = vmul.f32 %v3659_v56, %v4143_v61 }
0x200a   : > { %v1603_v59 = vsel %vm179_vm7, %v1599_v57, 0.0  ;;  %v1600_v60 = vsel %vm175_vm6, %v1598_v58, 0.0 }
0x200b   : > { %1604 = vadd.xlane.f32.xlu2 %v1603_v59  ;;  %1601 = vadd.xlane.f32.xlu1 %v1600_v60 }
0x207e   : > { %v1605_v62 = vpop.xlane.xlu2 %1604  ;;  %v1602_v63 = vpop.xlane.xlu1 %1601 }
0x207f   : > { %v1607_v1 = vmul.f32 10.0, %v1605_v62  ;;  %v1606_v2 = vmul.f32 10.0, %v1602_v63 }
0x2081   : > { %v1609_v3 = vadd.f32 1e-15, %v1607_v1  ;;  %v1608_v4 = vadd.f32 1e-15, %v1606_v2 }
0x2083   : > { %3660 = vrcp.f32 %v1609_v3 }
0x2084   : > { %3662 = vrcp.f32 %v1608_v4 }
0x2089   : > { %v3661_v5 = vpop.eup %3660 }
0x208a   : > { %v3663_v6 = vpop.eup %3662  ;;  %v1613_v7 = vmul.f32 %v3661_v5, %v4147_v0 }
0x208b   : > { %v1612_v8 = vmul.f32 %v3663_v6, %v4143_v61 }
0x208c   : > { %v1615_v9 = vsel %vm179_vm7, %v1613_v7, 0.0 }
0x208d   : > { %v1614_v10 = vsel %vm175_vm6, %v1612_v8, 0.0 }
0x208e   : > { %v1616_v11 = vadd.f32 %v1615_v9, %v1614_v10 }
0x2090   : > { %v1617_v12 = vrot.slane %v1616_v11, 4 }
0x2092   : > { %v1618_v13 = vadd.f32 %v1617_v12, %v1616_v11 }
0x2094   : > { %v1619_v14 = vrot.slane %v1618_v13, 2 }
0x2096   : > { %v1620_v15 = vadd.f32 %v1619_v14, %v1618_v13 }
0x2098   : > { %v1621_v16 = vrot.slane %v1620_v15, 1 }
0x209a   : > { %v1622_v17 = vadd.f32 %v1621_v16, %v1620_v15 }
0x209c   : > { %v1623_v18 = vmul.f32 50.0, %v1622_v17 }
0x209e   : > { %v1624_v19 = vadd.f32 5e-15, %v1623_v18 }
0x20a0   : > { %3664 = vrcp.f32 %v1624_v19 }
0x20a6   : > { %v3665_v20 = vpop.eup %3664 }
0x20a7   : > { %v1627_v21 = vmul.f32 %v3665_v20, %v4147_v0  ;;  %v1626_v22 = vmul.f32 %v3665_v20, %v4143_v61 }
0x20a9   : > { %v1631_v23 = vsel %vm179_vm7, %v1627_v21, 0.0  ;;  %v1628_v24 = vsel %vm175_vm6, %v1626_v22, 0.0 }
0x20aa   : > { %1632 = vadd.xlane.f32.xlu1 %v1631_v23  ;;  %1629 = vadd.xlane.f32.xlu0 %v1628_v24 }
0x211d   : > { %v1633_v25 = vpop.xlane.xlu1 %1632  ;;  %v1630_v26 = vpop.xlane.xlu0 %1629 }
0x211e   : > { %v1635_v27 = vmul.f32 10.0, %v1633_v25  ;;  %v1634_v28 = vmul.f32 10.0, %v1630_v26 }
0x2120   : > { %v1637_v29 = vadd.f32 1e-15, %v1635_v27  ;;  %v1636_v30 = vadd.f32 1e-15, %v1634_v28 }
0x2122   : > { %3666 = vrcp.f32 %v1637_v29 }
0x2123   : > { %3668 = vrcp.f32 %v1636_v30 }
0x2128   : > { %v3667_v31 = vpop.eup %3666 }
0x2129   : > { %v3669_v32 = vpop.eup %3668  ;;  %v1641_v33 = vmul.f32 %v3667_v31, %v4147_v0 }
0x212a   : > { %v1640_v34 = vmul.f32 %v3669_v32, %v4143_v61 }
0x212b   : > { %v1643_v35 = vsel %vm179_vm7, %v1641_v33, 0.0 }
0x212c   : > { %v1642_v36 = vsel %vm175_vm6, %v1640_v34, 0.0 }
0x212d   : > { %v1644_v37 = vadd.f32 %v1643_v35, %v1642_v36 }
0x212f   : > { %v1645_v38 = vrot.slane %v1644_v37, 4 }
0x2131   : > { %v1646_v39 = vadd.f32 %v1645_v38, %v1644_v37 }
0x2133   : > { %v1647_v40 = vrot.slane %v1646_v39, 2 }
0x2135   : > { %v1648_v41 = vadd.f32 %v1647_v40, %v1646_v39 }
0x2137   : > { %v1649_v42 = vrot.slane %v1648_v41, 1 }
0x2139   : > { %v1650_v43 = vadd.f32 %v1649_v42, %v1648_v41 }
0x213b   : > { %v1651_v44 = vmul.f32 50.0, %v1650_v43 }
0x213d   : > { %v1652_v45 = vadd.f32 5e-15, %v1651_v44 }
0x213f   : > { %3670 = vrcp.f32 %v1652_v45 }
0x2145   : > { %v3671_v46 = vpop.eup %3670 }
0x2146   : > { %v1655_v47 = vmul.f32 %v3671_v46, %v4147_v0  ;;  %v1654_v48 = vmul.f32 %v3671_v46, %v4143_v61 }
0x2148   : > { %v1659_v49 = vsel %vm179_vm7, %v1655_v47, 0.0  ;;  %v1656_v50 = vsel %vm175_vm6, %v1654_v48, 0.0 }
0x2149   : > { %1660 = vadd.xlane.f32.xlu0 %v1659_v49  ;;  %1657 = vadd.xlane.f32.xlu2 %v1656_v50 }
0x21bc   : > { %v1661_v51 = vpop.xlane.xlu0 %1660  ;;  %v1658_v52 = vpop.xlane.xlu2 %1657 }
0x21bd   : > { %v1663_v53 = vadd.f32 1e-16, %v1661_v51  ;;  %v1662_v54 = vadd.f32 1e-16, %v1658_v52 }
0x21bf   : > { %3672 = vrcp.f32 %v1663_v53  ;;  %v1690_v60 = vand.u32 2147483648, %v1663_v53  ;;  %v1688_v1 = vand.u32 2147483647, %v1663_v53  ;;  %v1675_v2 = vand.u32 2147483648, %v1662_v54 }
0x21c0   : > { %3674 = vrcp.f32 %v1662_v54  ;;  %v1673_v4 = vand.u32 2147483647, %v1662_v54  ;;  %vm1684_vm10 = vweird.f32 %v1663_v53  ;;  %vm1669_vm12 = vweird.f32 %v1662_v54 }
0x21c1   : > { %v1691_v6 = vor.u32 1.1754944e-38, %v1690_v60  ;;  %vm1689_vm13 = vcmp.eq.f32.partialorder %v1688_v1, 8.507059e+37  ;;  %v1676_v9 = vor.u32 1.1754944e-38, %v1675_v2 }
0x21c2   : > { %vm1674_vm15 = vcmp.eq.f32.partialorder %v1673_v4, 8.507059e+37 }
0x21c5   : > { %v3673_v55 = vpop.eup %3672 }
0x21c6   : > { %v3675_v56 = vpop.eup %3674  ;;  %v1680_v57 = vmul.f32 %v3673_v55, %v1663_v53  ;;  %vm1685_vm8 = vweird.f32 %v3673_v55 }
0x21c7   : > { %v1665_v58 = vmul.f32 %v3675_v56, %v1662_v54  ;;  %vm1670_vm9 = vweird.f32 %v3675_v56  ;;  %vm1686_vm11 = vmor %vm1684_vm10, %vm1685_vm8 }
0x21c8   : > { %v1681_v59 = vsub.f32 1.0, %v1680_v57  ;;  %vm1671_vm14 = vmor %vm1669_vm12, %vm1670_vm9 }
0x21c9   : > { %v1666_v62 = vsub.f32 1.0, %v1665_v58 }
0x21ca   : > { %v1682_v63 = vmul.f32 %v3673_v55, %v1681_v59 }
0x21cb   : > { %v1667_v3 = vmul.f32 %v3675_v56, %v1666_v62 }
0x21cc   : > { %v1683_v5 = vadd.f32 %v3673_v55, %v1682_v63 }
0x21cd   : > { %v1668_v7 = vadd.f32 %v3675_v56, %v1667_v3 }
0x21ce   : > { %v1687_v8 = vsel %vm1686_vm11, %v3673_v55, %v1683_v5 }
0x21cf   : > { %v1692_v10 = vsel %vm1689_vm13, %v1691_v6, %v1687_v8  ;;  %v1672_v11 = vsel %vm1671_vm14, %v3675_v56, %v1668_v7 }
0x21d0   : > { %v4578_v29 = vmul.f32 0.1, %v1692_v10   ;;  %v1677_v12 = vsel %vm1674_vm15, %v1676_v9, %v1672_v11 }
0x21d1   : > { %v4580_v23 = vmul.f32 0.1, %v1677_v12  }
0x21d2   : > { %v1695_v13 = vmul.f32 %v4147_v0, %v4578_v29 }
0x21d3   : > { %v1694_v14 = vmul.f32 %v4143_v61, %v4580_v23 }
0x21d4   : > { %v1697_v15 = vsel %vm179_vm7, %v1695_v13, 0.0 }
0x21d5   : > { %v1696_v16 = vsel %vm175_vm6, %v1694_v14, 0.0 }
0x21d6   : > { %v1698_v17 = vadd.f32 %v1697_v15, %v1696_v16 }
0x21d8   : > { %v1699_v18 = vrot.slane %v1698_v17, 4 }
0x21da   : > { %v1700_v19 = vadd.f32 %v1699_v18, %v1698_v17 }
0x21dc   : > { %v1701_v20 = vrot.slane %v1700_v19, 2 }
0x21de   : > { %v1702_v21 = vadd.f32 %v1701_v20, %v1700_v19 }
0x21e0   : > { %v1703_v22 = vrot.slane %v1702_v21, 1 }
0x21e2   : > { %v1704_v24 = vadd.f32 %v1703_v22, %v1702_v21 }
0x21e4   : > { %v1705_v25 = vadd.f32 1e-16, %v1704_v24 }
0x21e6   : > { %3676 = vrcp.f32 %v1705_v25  ;;  %v1717_v30 = vand.u32 2147483648, %v1705_v25  ;;  %v1715_v32 = vand.u32 2147483647, %v1705_v25  ;;  %vm1711_vm1 = vweird.f32 %v1705_v25 }
0x21e8   : > { %v1718_v34 = vor.u32 1.1754944e-38, %v1717_v30  ;;  %vm1716_vm3 = vcmp.eq.f32.partialorder %v1715_v32, 8.507059e+37 }
0x21ec   : > { %v3677_v26 = vpop.eup %3676 }
0x21ed   : > { %v1707_v27 = vmul.f32 %v3677_v26, %v1705_v25  ;;  %vm1712_vm0 = vweird.f32 %v3677_v26 }
0x21ee   : > { %vm1713_vm2 = vmor %vm1711_vm1, %vm1712_vm0 }
0x21ef   : > { %v1708_v28 = vsub.f32 1.0, %v1707_v27 }
0x21f1   : > { %v1709_v31 = vmul.f32 %v3677_v26, %v1708_v28 }
0x21f3   : > { %v1710_v33 = vadd.f32 %v3677_v26, %v1709_v31 }
0x21f5   : > { %v1714_v35 = vsel %vm1713_vm2, %v3677_v26, %v1710_v33 }
0x21f6   : > { %v1719_v36 = vsel %vm1716_vm3, %v1718_v34, %v1714_v35 }
0x21f7   : > { %v1720_v37 = vmul.f32 0.02, %v1719_v36  }
0x21f9   : > { %v1723_v38 = vmul.f32 %v4147_v0, %v1720_v37  ;;  %v1722_v39 = vmul.f32 %v4143_v61, %v1720_v37 }
0x21fb   : > { %v1727_v40 = vsel %vm179_vm7, %v1723_v38, 0.0  ;;  %v1724_v41 = vsel %vm175_vm6, %v1722_v39, 0.0 }
0x21fc   : > { %1728 = vadd.xlane.f32.xlu2 %v1727_v40  ;;  %1725 = vadd.xlane.f32.xlu1 %v1724_v41 }
0x226f   : > { %v1729_v42 = vpop.xlane.xlu2 %1728  ;;  %v1726_v43 = vpop.xlane.xlu1 %1725 }
0x2270   : > { %v1731_v44 = vmul.f32 %v1729_v42, %v4578_v29  ;;  %v1730_v45 = vmul.f32 %v1726_v43, %v4580_v23 }
0x2272   : > { %v3262_v46 = vadd.f32 -0.1, %v1731_v44  ;;  %v3261_v47 = vadd.f32 -0.1, %v1730_v45 }
0x2274   : > { %v1735_v48 = vand.u32 2147483647, %v3262_v46  ;;  %v1734_v49 = vand.u32 2147483647, %v3261_v47 }
0x2276   : > { %v1737_v50 = vsel %vm258_vm5, %v1735_v48, 0.0  ;;  %v1736_v51 = vsel %vm256_vm4, %v1734_v49, 0.0 }
0x2277   : > { %v1738_v52 = vadd.f32 %v1737_v50, %v1736_v51  ;;  %v5065_v51 = vmov %v1720_v37 }
0x2279   : > { %1739 = vadd.xlane.f32.xlu0 %v1738_v52 }
0x22ec   : > { %v1740_v53 = vpop.xlane.xlu0 %1739 }
0x22ed   : > { %v1741_v54 = vrot.slane %v1740_v53, 4 }
0x22ef   : > { %v1742_v55 = vadd.f32 %v1741_v54, %v1740_v53 }
0x22f1   : > { %v1743_v56 = vrot.slane %v1742_v55, 2 }
0x22f3   : > { %v1744_v57 = vadd.f32 %v1743_v56, %v1742_v55 }
0x22f5   : > { %v1745_v58 = vrot.slane %v1744_v57, 1 }
0x22f7   : > { %v1746_v59 = vadd.f32 %v1745_v58, %v1744_v57 }
0x22f9   : > { %3272 = vpush %v1746_v59 }
0x232a   : > { %s3273_s0 = spop %3272  }
0x232b   : > { %p276_p1 = scmp.gt.f32.partialorder %s3273_s0, 0.005 }
0x232d   : > { %p278_p3 = pnand %p277_p2, %p276_p1 }
0x232e   :  { %v5066_v12 = vmov (%p278_p3), %v1720_v37 }
0x232f   :  { %281 = sbr.rel (!%p278_p3) target bundleno = 706 (0x2c2), region = 43 }
0x2334 PF:  { %p1748_p4 = scmp.gt.f32.partialorder %s4060_s0, 0.005  ;;  %v4624_v60 = vmov 0   ;;  %v4626_v62 = vmov 0   ;;  %v4628_v63 = vmov 0   ;;  %s4060_s0 = sphi %s3271_s0, %s3273_s0   ;;  %v4056_v12 = vphi %v5064_v12, %v5066_v12   ;;  %v4052_v23 = vphi %v4151_v23, %v4580_v23   ;;  %v4048_v29 = vphi %v214_v29, %v4578_v29  }
0x2335   :  { %v1752_v1 = vmul.f32 (%p1748_p4), %v4056_v12, %v4143_v61  ;;  %v1753_v3 = vmul.f32 (%p1748_p4), %v4056_v12, %v4147_v0 }
0x2336   :  { %1751 = sbr.rel (!%p1748_p4) target bundleno = 16844 (0x41cc), region = 20 }
0x2337   :  { %v1754_v2 = vsel (%p1748_p4), %vm175_vm6, %v1752_v1, 0.0  ;;  %v1757_v4 = vsel (%p1748_p4), %vm179_vm7, %v1753_v3, 0.0 }
0x2338   :  { %1755 = vadd.xlane.f32.xlu0 (%p1748_p4), %v1754_v2 }
0x2340   :  { %1758 = vadd.xlane.f32.xlu0 %v1757_v4 }
0x23ab   :  { %v1756_v5 = vpop.xlane.xlu0 %1755 }
0x23ac   :  { %v1760_v6 = vmul.f32 10.0, %v1756_v5 }
0x23ae   :  { %v1762_v7 = vadd.f32 1e-15, %v1760_v6 }
0x23b0   :  { %3678 = vrcp.f32 %v1762_v7 }
0x23b3   :  { %v1759_v8 = vpop.xlane.xlu0 %1758 }
0x23b4   :  { %v1761_v9 = vmul.f32 10.0, %v1759_v8 }
0x23b6   :  { %v1763_v10 = vadd.f32 1e-15, %v1761_v9  ;;  %v3679_v11 = vpop.eup %3678 }
0x23b7   :  { %v1766_v13 = vmul.f32 %v3679_v11, %v4143_v61 }
0x23b8   :  { %3680 = vrcp.f32 %v1763_v10 }
0x23b9   :  { %v1768_v16 = vsel %vm175_vm6, %v1766_v13, 0.0 }
0x23be   :  { %v3681_v14 = vpop.eup %3680 }
0x23bf   :  { %v1767_v15 = vmul.f32 %v3681_v14, %v4147_v0 }
0x23c1   :  { %v1769_v17 = vsel %vm179_vm7, %v1767_v15, 0.0 }
0x23c2   :  { %v1770_v18 = vadd.f32 %v1769_v17, %v1768_v16 }
0x23c4   :  { %v1771_v19 = vrot.slane %v1770_v18, 4 }
0x23c6   :  { %v1772_v20 = vadd.f32 %v1771_v19, %v1770_v18 }
0x23c8   :  { %v1773_v21 = vrot.slane %v1772_v20, 2 }
0x23ca   :  { %v1774_v22 = vadd.f32 %v1773_v21, %v1772_v20 }
0x23cc   :  { %v1775_v24 = vrot.slane %v1774_v22, 1 }
0x23ce   :  { %v1776_v25 = vadd.f32 %v1775_v24, %v1774_v22 }
0x23d0   :  { %v1777_v26 = vmul.f32 50.0, %v1776_v25 }
0x23d2   :  { %v1778_v27 = vadd.f32 5e-15, %v1777_v26 }
0x23d4   :  { %3682 = vrcp.f32 %v1778_v27 }
0x23da   :  { %v3683_v28 = vpop.eup %3682 }
0x23db   :  { %v1780_v30 = vmul.f32 %v3683_v28, %v4143_v61  ;;  %v1781_v32 = vmul.f32 %v3683_v28, %v4147_v0 }
0x23dd   :  { %v1782_v31 = vsel %vm175_vm6, %v1780_v30, 0.0  ;;  %v1785_v33 = vsel %vm179_vm7, %v1781_v32, 0.0 }
0x23de   :  { %1783 = vadd.xlane.f32.xlu1 %v1782_v31 }
0x23e6   :  { %1786 = vadd.xlane.f32.xlu1 %v1785_v33 }
0x2451   :  { %v1784_v34 = vpop.xlane.xlu1 %1783 }
0x2452   :  { %v1788_v35 = vmul.f32 10.0, %v1784_v34 }
0x2454   :  { %v1790_v36 = vadd.f32 1e-15, %v1788_v35 }
0x2456   :  { %3684 = vrcp.f32 %v1790_v36 }
0x2459   :  { %v1787_v37 = vpop.xlane.xlu1 %1786 }
0x245a   :  { %v1789_v38 = vmul.f32 10.0, %v1787_v37 }
0x245c   :  { %v1791_v39 = vadd.f32 1e-15, %v1789_v38  ;;  %v3685_v40 = vpop.eup %3684 }
0x245d   :  { %v1794_v41 = vmul.f32 %v3685_v40, %v4143_v61 }
0x245e   :  { %3686 = vrcp.f32 %v1791_v39 }
0x245f   :  { %v1796_v44 = vsel %vm175_vm6, %v1794_v41, 0.0 }
0x2464   :  { %v3687_v42 = vpop.eup %3686 }
0x2465   :  { %v1795_v43 = vmul.f32 %v3687_v42, %v4147_v0 }
0x2467   :  { %v1797_v45 = vsel %vm179_vm7, %v1795_v43, 0.0 }
0x2468   :  { %v1798_v46 = vadd.f32 %v1797_v45, %v1796_v44 }
0x246a   :  { %v1799_v47 = vrot.slane %v1798_v46, 4 }
0x246c   :  { %v1800_v48 = vadd.f32 %v1799_v47, %v1798_v46 }
0x246e   :  { %v1801_v49 = vrot.slane %v1800_v48, 2 }
0x2470   :  { %v1802_v50 = vadd.f32 %v1801_v49, %v1800_v48 }
0x2472   :  { %v1803_v51 = vrot.slane %v1802_v50, 1 }
0x2474   :  { %v1804_v52 = vadd.f32 %v1803_v51, %v1802_v50 }
0x2476   :  { %v1805_v53 = vmul.f32 50.0, %v1804_v52 }
0x2478   :  { %v1806_v54 = vadd.f32 5e-15, %v1805_v53 }
0x247a   :  { %3688 = vrcp.f32 %v1806_v54 }
0x2480   :  { %v3689_v55 = vpop.eup %3688 }
0x2481   :  { %v1808_v56 = vmul.f32 %v3689_v55, %v4143_v61  ;;  %v1809_v58 = vmul.f32 %v3689_v55, %v4147_v0 }
0x2483   :  { %v1810_v57 = vsel %vm175_vm6, %v1808_v56, 0.0  ;;  %v1813_v59 = vsel %vm179_vm7, %v1809_v58, 0.0 }
0x2484   :  { %1811 = vadd.xlane.f32.xlu2 %v1810_v57 }
0x248c   :  { %1814 = vadd.xlane.f32.xlu2 %v1813_v59 }
0x24f7   :  { %v1812_v60 = vpop.xlane.xlu2 %1811 }
0x24f8   :  { %v1816_v62 = vmul.f32 10.0, %v1812_v60 }
0x24fa   :  { %v1818_v63 = vadd.f32 1e-15, %v1816_v62 }
0x24fc   :  { %3690 = vrcp.f32 %v1818_v63 }
0x24ff   :  { %v1815_v1 = vpop.xlane.xlu2 %1814 }
0x2500   :  { %v1817_v2 = vmul.f32 10.0, %v1815_v1 }
0x2502   :  { %v1819_v3 = vadd.f32 1e-15, %v1817_v2  ;;  %v3691_v4 = vpop.eup %3690 }
0x2503   :  { %v1822_v5 = vmul.f32 %v3691_v4, %v4143_v61 }
0x2504   :  { %3692 = vrcp.f32 %v1819_v3 }
0x2505   :  { %v1824_v8 = vsel %vm175_vm6, %v1822_v5, 0.0 }
0x250a   :  { %v3693_v6 = vpop.eup %3692 }
0x250b   :  { %v1823_v7 = vmul.f32 %v3693_v6, %v4147_v0 }
0x250d   :  { %v1825_v9 = vsel %vm179_vm7, %v1823_v7, 0.0 }
0x250e   :  { %v1826_v10 = vadd.f32 %v1825_v9, %v1824_v8 }
0x2510   :  { %v1827_v11 = vrot.slane %v1826_v10, 4 }
0x2512   :  { %v1828_v13 = vadd.f32 %v1827_v11, %v1826_v10 }
0x2514   :  { %v1829_v14 = vrot.slane %v1828_v13, 2 }
0x2516   :  { %v1830_v15 = vadd.f32 %v1829_v14, %v1828_v13 }
0x2518   :  { %v1831_v16 = vrot.slane %v1830_v15, 1 }
0x251a   :  { %v1832_v17 = vadd.f32 %v1831_v16, %v1830_v15 }
0x251c   :  { %v1833_v18 = vmul.f32 50.0, %v1832_v17 }
0x251e   :  { %v1834_v19 = vadd.f32 5e-15, %v1833_v18 }
0x2520   :  { %3694 = vrcp.f32 %v1834_v19 }
0x2526   :  { %v3695_v20 = vpop.eup %3694 }
0x2527   :  { %v1837_v21 = vmul.f32 %v3695_v20, %v4147_v0  ;;  %v1836_v22 = vmul.f32 %v3695_v20, %v4143_v61 }
0x2529   :  { %v1841_v24 = vsel %vm179_vm7, %v1837_v21, 0.0  ;;  %v1838_v25 = vsel %vm175_vm6, %v1836_v22, 0.0 }
0x252a   :  { %1842 = vadd.xlane.f32.xlu1 %v1841_v24  ;;  %1839 = vadd.xlane.f32.xlu0 %v1838_v25 }
0x259d   :  { %v1843_v26 = vpop.xlane.xlu1 %1842  ;;  %v1840_v27 = vpop.xlane.xlu0 %1839 }
0x259e   :  { %v1845_v28 = vmul.f32 10.0, %v1843_v26  ;;  %v1844_v30 = vmul.f32 10.0, %v1840_v27 }
0x25a0   :  { %v1847_v31 = vadd.f32 1e-15, %v1845_v28  ;;  %v1846_v32 = vadd.f32 1e-15, %v1844_v30 }
0x25a2   :  { %3696 = vrcp.f32 %v1847_v31 }
0x25a3   :  { %3698 = vrcp.f32 %v1846_v32 }
0x25a8   :  { %v3697_v33 = vpop.eup %3696 }
0x25a9   :  { %v3699_v34 = vpop.eup %3698  ;;  %v1851_v35 = vmul.f32 %v3697_v33, %v4147_v0 }
0x25aa   :  { %v1850_v36 = vmul.f32 %v3699_v34, %v4143_v61 }
0x25ab   :  { %v1853_v37 = vsel %vm179_vm7, %v1851_v35, 0.0 }
0x25ac   :  { %v1852_v38 = vsel %vm175_vm6, %v1850_v36, 0.0 }
0x25ad   :  { %v1854_v39 = vadd.f32 %v1853_v37, %v1852_v38 }
0x25af   :  { %v1855_v40 = vrot.slane %v1854_v39, 4 }
0x25b1   :  { %v1856_v41 = vadd.f32 %v1855_v40, %v1854_v39 }
0x25b3   :  { %v1857_v42 = vrot.slane %v1856_v41, 2 }
0x25b5   :  { %v1858_v43 = vadd.f32 %v1857_v42, %v1856_v41 }
0x25b7   :  { %v1859_v44 = vrot.slane %v1858_v43, 1 }
0x25b9   :  { %v1860_v45 = vadd.f32 %v1859_v44, %v1858_v43 }
0x25bb   :  { %v1861_v46 = vmul.f32 50.0, %v1860_v45 }
0x25bd   :  { %v1862_v47 = vadd.f32 5e-15, %v1861_v46 }
0x25bf   :  { %3700 = vrcp.f32 %v1862_v47 }
0x25c5   :  { %v3701_v48 = vpop.eup %3700 }
0x25c6   :  { %v1865_v49 = vmul.f32 %v3701_v48, %v4147_v0  ;;  %v1864_v50 = vmul.f32 %v3701_v48, %v4143_v61 }
0x25c8   :  { %v1869_v51 = vsel %vm179_vm7, %v1865_v49, 0.0  ;;  %v1866_v52 = vsel %vm175_vm6, %v1864_v50, 0.0 }
0x25c9   :  { %1870 = vadd.xlane.f32.xlu0 %v1869_v51  ;;  %1867 = vadd.xlane.f32.xlu2 %v1866_v52 }
0x263c   :  { %v1871_v53 = vpop.xlane.xlu0 %1870  ;;  %v1868_v54 = vpop.xlane.xlu2 %1867 }
0x263d   :  { %v1873_v55 = vmul.f32 10.0, %v1871_v53  ;;  %v1872_v56 = vmul.f32 10.0, %v1868_v54 }
0x263f   :  { %v1875_v57 = vadd.f32 1e-15, %v1873_v55  ;;  %v1874_v58 = vadd.f32 1e-15, %v1872_v56 }
0x2641   :  { %3702 = vrcp.f32 %v1875_v57 }
0x2642   :  { %3704 = vrcp.f32 %v1874_v58 }
0x2647   :  { %v3703_v59 = vpop.eup %3702 }
0x2648   :  { %v3705_v60 = vpop.eup %3704  ;;  %v1879_v62 = vmul.f32 %v3703_v59, %v4147_v0 }
0x2649   :  { %v1878_v63 = vmul.f32 %v3705_v60, %v4143_v61 }
0x264a   :  { %v1881_v1 = vsel %vm179_vm7, %v1879_v62, 0.0 }
0x264b   :  { %v1880_v2 = vsel %vm175_vm6, %v1878_v63, 0.0 }
0x264c   :  { %v1882_v3 = vadd.f32 %v1881_v1, %v1880_v2 }
0x264e   :  { %v1883_v4 = vrot.slane %v1882_v3, 4 }
0x2650   :  { %v1884_v5 = vadd.f32 %v1883_v4, %v1882_v3 }
0x2652   :  { %v1885_v6 = vrot.slane %v1884_v5, 2 }
0x2654   :  { %v1886_v7 = vadd.f32 %v1885_v6, %v1884_v5 }
0x2656   :  { %v1887_v8 = vrot.slane %v1886_v7, 1 }
0x2658   :  { %v1888_v9 = vadd.f32 %v1887_v8, %v1886_v7 }
0x265a   :  { %v1889_v10 = vmul.f32 50.0, %v1888_v9 }
0x265c   :  { %v1890_v11 = vadd.f32 5e-15, %v1889_v10 }
0x265e   :  { %3706 = vrcp.f32 %v1890_v11 }
0x2664   :  { %v3707_v13 = vpop.eup %3706 }
0x2665   :  { %v1893_v14 = vmul.f32 %v3707_v13, %v4147_v0  ;;  %v1892_v15 = vmul.f32 %v3707_v13, %v4143_v61 }
0x2667   :  { %v1897_v16 = vsel %vm179_vm7, %v1893_v14, 0.0  ;;  %v1894_v17 = vsel %vm175_vm6, %v1892_v15, 0.0 }
0x2668   :  { %1898 = vadd.xlane.f32.xlu2 %v1897_v16  ;;  %1895 = vadd.xlane.f32.xlu1 %v1894_v17 }
0x26db   :  { %v1899_v18 = vpop.xlane.xlu2 %1898  ;;  %v1896_v19 = vpop.xlane.xlu1 %1895 }
0x26dc   :  { %v1901_v20 = vmul.f32 10.0, %v1899_v18  ;;  %v1900_v21 = vmul.f32 10.0, %v1896_v19 }
0x26de   :  { %v1903_v22 = vadd.f32 1e-15, %v1901_v20  ;;  %v1902_v24 = vadd.f32 1e-15, %v1900_v21 }
0x26e0   :  { %3708 = vrcp.f32 %v1903_v22 }
0x26e1   :  { %3710 = vrcp.f32 %v1902_v24 }
0x26e6   :  { %v3709_v25 = vpop.eup %3708 }
0x26e7   :  { %v3711_v26 = vpop.eup %3710  ;;  %v1907_v27 = vmul.f32 %v3709_v25, %v4147_v0 }
0x26e8   :  { %v1906_v28 = vmul.f32 %v3711_v26, %v4143_v61 }
0x26e9   :  { %v1909_v30 = vsel %vm179_vm7, %v1907_v27, 0.0 }
0x26ea   :  { %v1908_v31 = vsel %vm175_vm6, %v1906_v28, 0.0 }
0x26eb   :  { %v1910_v32 = vadd.f32 %v1909_v30, %v1908_v31 }
0x26ed   :  { %v1911_v33 = vrot.slane %v1910_v32, 4 }
0x26ef   :  { %v1912_v34 = vadd.f32 %v1911_v33, %v1910_v32 }
0x26f1   :  { %v1913_v35 = vrot.slane %v1912_v34, 2 }
0x26f3   :  { %v1914_v36 = vadd.f32 %v1913_v35, %v1912_v34 }
0x26f5   :  { %v1915_v37 = vrot.slane %v1914_v36, 1 }
0x26f7   :  { %v1916_v38 = vadd.f32 %v1915_v37, %v1914_v36 }
0x26f9   :  { %v1917_v39 = vmul.f32 50.0, %v1916_v38 }
0x26fb   :  { %v1918_v40 = vadd.f32 5e-15, %v1917_v39 }
0x26fd   :  { %3712 = vrcp.f32 %v1918_v40 }
0x2703   :  { %v3713_v41 = vpop.eup %3712 }
0x2704   :  { %v1921_v42 = vmul.f32 %v3713_v41, %v4147_v0  ;;  %v1920_v43 = vmul.f32 %v3713_v41, %v4143_v61 }
0x2706   :  { %v1925_v44 = vsel %vm179_vm7, %v1921_v42, 0.0  ;;  %v1922_v45 = vsel %vm175_vm6, %v1920_v43, 0.0 }
0x2707   :  { %1926 = vadd.xlane.f32.xlu1 %v1925_v44  ;;  %1923 = vadd.xlane.f32.xlu0 %v1922_v45 }
0x277a   :  { %v1927_v46 = vpop.xlane.xlu1 %1926  ;;  %v1924_v47 = vpop.xlane.xlu0 %1923 }
0x277b   :  { %v1929_v48 = vmul.f32 10.0, %v1927_v46  ;;  %v1928_v49 = vmul.f32 10.0, %v1924_v47 }
0x277d   :  { %v1931_v50 = vadd.f32 1e-15, %v1929_v48  ;;  %v1930_v51 = vadd.f32 1e-15, %v1928_v49 }
0x277f   :  { %3714 = vrcp.f32 %v1931_v50 }
0x2780   :  { %3716 = vrcp.f32 %v1930_v51 }
0x2785   :  { %v3715_v52 = vpop.eup %3714 }
0x2786   :  { %v3717_v53 = vpop.eup %3716  ;;  %v1935_v54 = vmul.f32 %v3715_v52, %v4147_v0 }
0x2787   :  { %v1934_v55 = vmul.f32 %v3717_v53, %v4143_v61 }
0x2788   :  { %v1937_v56 = vsel %vm179_vm7, %v1935_v54, 0.0 }
0x2789   :  { %v1936_v57 = vsel %vm175_vm6, %v1934_v55, 0.0 }
0x278a   :  { %v1938_v58 = vadd.f32 %v1937_v56, %v1936_v57 }
0x278c   :  { %v1939_v59 = vrot.slane %v1938_v58, 4 }
0x278e   :  { %v1940_v60 = vadd.f32 %v1939_v59, %v1938_v58 }
0x2790   :  { %v1941_v62 = vrot.slane %v1940_v60, 2 }
0x2792   :  { %v1942_v63 = vadd.f32 %v1941_v62, %v1940_v60 }
0x2794   :  { %v1943_v1 = vrot.slane %v1942_v63, 1 }
0x2796   :  { %v1944_v2 = vadd.f32 %v1943_v1, %v1942_v63 }
0x2798   :  { %v1945_v3 = vmul.f32 50.0, %v1944_v2 }
0x279a   :  { %v1946_v4 = vadd.f32 5e-15, %v1945_v3 }
0x279c   :  { %3718 = vrcp.f32 %v1946_v4 }
0x27a2   :  { %v3719_v5 = vpop.eup %3718 }
0x27a3   :  { %v1949_v6 = vmul.f32 %v3719_v5, %v4147_v0  ;;  %v1948_v7 = vmul.f32 %v3719_v5, %v4143_v61 }
0x27a5   :  { %v1953_v8 = vsel %vm179_vm7, %v1949_v6, 0.0  ;;  %v1950_v9 = vsel %vm175_vm6, %v1948_v7, 0.0 }
0x27a6   :  { %1954 = vadd.xlane.f32.xlu0 %v1953_v8  ;;  %1951 = vadd.xlane.f32.xlu2 %v1950_v9 }
0x2819   :  { %v1955_v10 = vpop.xlane.xlu0 %1954  ;;  %v1952_v11 = vpop.xlane.xlu2 %1951 }
0x281a   :  { %v1957_v13 = vmul.f32 10.0, %v1955_v10  ;;  %v1956_v14 = vmul.f32 10.0, %v1952_v11 }
0x281c   :  { %v1959_v15 = vadd.f32 1e-15, %v1957_v13  ;;  %v1958_v16 = vadd.f32 1e-15, %v1956_v14 }
0x281e   :  { %3720 = vrcp.f32 %v1959_v15 }
0x281f   :  { %3722 = vrcp.f32 %v1958_v16 }
0x2824   :  { %v3721_v17 = vpop.eup %3720 }
0x2825   :  { %v3723_v18 = vpop.eup %3722  ;;  %v1963_v19 = vmul.f32 %v3721_v17, %v4147_v0 }
0x2826   :  { %v1962_v20 = vmul.f32 %v3723_v18, %v4143_v61 }
0x2827   :  { %v1965_v21 = vsel %vm179_vm7, %v1963_v19, 0.0 }
0x2828   :  { %v1964_v22 = vsel %vm175_vm6, %v1962_v20, 0.0 }
0x2829   :  { %v1966_v24 = vadd.f32 %v1965_v21, %v1964_v22 }
0x282b   :  { %v1967_v25 = vrot.slane %v1966_v24, 4 }
0x282d   :  { %v1968_v26 = vadd.f32 %v1967_v25, %v1966_v24 }
0x282f   :  { %v1969_v27 = vrot.slane %v1968_v26, 2 }
0x2831   :  { %v1970_v28 = vadd.f32 %v1969_v27, %v1968_v26 }
0x2833   :  { %v1971_v30 = vrot.slane %v1970_v28, 1 }
0x2835   :  { %v1972_v31 = vadd.f32 %v1971_v30, %v1970_v28 }
0x2837   :  { %v1973_v32 = vmul.f32 50.0, %v1972_v31 }
0x2839   :  { %v1974_v33 = vadd.f32 5e-15, %v1973_v32 }
0x283b   :  { %3724 = vrcp.f32 %v1974_v33 }
0x2841   :  { %v3725_v34 = vpop.eup %3724 }
0x2842   :  { %v1977_v35 = vmul.f32 %v3725_v34, %v4147_v0  ;;  %v1976_v36 = vmul.f32 %v3725_v34, %v4143_v61 }
0x2844   :  { %v1981_v37 = vsel %vm179_vm7, %v1977_v35, 0.0  ;;  %v1978_v38 = vsel %vm175_vm6, %v1976_v36, 0.0 }
0x2845   :  { %1982 = vadd.xlane.f32.xlu2 %v1981_v37  ;;  %1979 = vadd.xlane.f32.xlu1 %v1978_v38 }
0x28b8   :  { %v1983_v39 = vpop.xlane.xlu2 %1982  ;;  %v1980_v40 = vpop.xlane.xlu1 %1979 }
0x28b9   :  { %v1985_v41 = vmul.f32 10.0, %v1983_v39  ;;  %v1984_v42 = vmul.f32 10.0, %v1980_v40 }
0x28bb   :  { %v1987_v43 = vadd.f32 1e-15, %v1985_v41  ;;  %v1986_v44 = vadd.f32 1e-15, %v1984_v42 }
0x28bd   :  { %3726 = vrcp.f32 %v1987_v43 }
0x28be   :  { %3728 = vrcp.f32 %v1986_v44 }
0x28c3   :  { %v3727_v45 = vpop.eup %3726 }
0x28c4   :  { %v3729_v46 = vpop.eup %3728  ;;  %v1991_v47 = vmul.f32 %v3727_v45, %v4147_v0 }
0x28c5   :  { %v1990_v48 = vmul.f32 %v3729_v46, %v4143_v61 }
0x28c6   :  { %v1993_v49 = vsel %vm179_vm7, %v1991_v47, 0.0 }
0x28c7   :  { %v1992_v50 = vsel %vm175_vm6, %v1990_v48, 0.0 }
0x28c8   :  { %v1994_v51 = vadd.f32 %v1993_v49, %v1992_v50 }
0x28ca   :  { %v1995_v52 = vrot.slane %v1994_v51, 4 }
0x28cc   :  { %v1996_v53 = vadd.f32 %v1995_v52, %v1994_v51 }
0x28ce   :  { %v1997_v54 = vrot.slane %v1996_v53, 2 }
0x28d0   :  { %v1998_v55 = vadd.f32 %v1997_v54, %v1996_v53 }
0x28d2   :  { %v1999_v56 = vrot.slane %v1998_v55, 1 }
0x28d4   :  { %v2000_v57 = vadd.f32 %v1999_v56, %v1998_v55 }
0x28d6   :  { %v2001_v58 = vmul.f32 50.0, %v2000_v57 }
0x28d8   :  { %v2002_v59 = vadd.f32 5e-15, %v2001_v58 }
0x28da   :  { %3730 = vrcp.f32 %v2002_v59 }
0x28e0   :  { %v3731_v60 = vpop.eup %3730 }
0x28e1   :  { %v2005_v62 = vmul.f32 %v3731_v60, %v4147_v0  ;;  %v2004_v63 = vmul.f32 %v3731_v60, %v4143_v61 }
0x28e3   :  { %v2009_v1 = vsel %vm179_vm7, %v2005_v62, 0.0  ;;  %v2006_v2 = vsel %vm175_vm6, %v2004_v63, 0.0 }
0x28e4   :  { %2010 = vadd.xlane.f32.xlu1 %v2009_v1  ;;  %2007 = vadd.xlane.f32.xlu0 %v2006_v2 }
0x2957   :  { %v2011_v3 = vpop.xlane.xlu1 %2010  ;;  %v2008_v4 = vpop.xlane.xlu0 %2007 }
0x2958   :  { %v2013_v5 = vmul.f32 10.0, %v2011_v3  ;;  %v2012_v6 = vmul.f32 10.0, %v2008_v4 }
0x295a   :  { %v2015_v7 = vadd.f32 1e-15, %v2013_v5  ;;  %v2014_v8 = vadd.f32 1e-15, %v2012_v6 }
0x295c   :  { %3732 = vrcp.f32 %v2015_v7 }
0x295d   :  { %3734 = vrcp.f32 %v2014_v8 }
0x2962   :  { %v3733_v9 = vpop.eup %3732 }
0x2963   :  { %v3735_v10 = vpop.eup %3734  ;;  %v2019_v11 = vmul.f32 %v3733_v9, %v4147_v0 }
0x2964   :  { %v2018_v13 = vmul.f32 %v3735_v10, %v4143_v61 }
0x2965   :  { %v2021_v14 = vsel %vm179_vm7, %v2019_v11, 0.0 }
0x2966   :  { %v2020_v15 = vsel %vm175_vm6, %v2018_v13, 0.0 }
0x2967   :  { %v2022_v16 = vadd.f32 %v2021_v14, %v2020_v15 }
0x2969   :  { %v2023_v17 = vrot.slane %v2022_v16, 4 }
0x296b   :  { %v2024_v18 = vadd.f32 %v2023_v17, %v2022_v16 }
0x296d   :  { %v2025_v19 = vrot.slane %v2024_v18, 2 }
0x296f   :  { %v2026_v20 = vadd.f32 %v2025_v19, %v2024_v18 }
0x2971   :  { %v2027_v21 = vrot.slane %v2026_v20, 1 }
0x2973   :  { %v2028_v22 = vadd.f32 %v2027_v21, %v2026_v20 }
0x2975   :  { %v2029_v24 = vmul.f32 50.0, %v2028_v22 }
0x2977   :  { %v2030_v25 = vadd.f32 5e-15, %v2029_v24 }
0x2979   :  { %3736 = vrcp.f32 %v2030_v25 }
0x297f   :  { %v3737_v26 = vpop.eup %3736 }
0x2980   :  { %v2033_v27 = vmul.f32 %v3737_v26, %v4147_v0  ;;  %v2032_v28 = vmul.f32 %v3737_v26, %v4143_v61 }
0x2982   :  { %v2037_v30 = vsel %vm179_vm7, %v2033_v27, 0.0  ;;  %v2034_v31 = vsel %vm175_vm6, %v2032_v28, 0.0 }
0x2983   :  { %2038 = vadd.xlane.f32.xlu0 %v2037_v30  ;;  %2035 = vadd.xlane.f32.xlu2 %v2034_v31 }
0x29f6   :  { %v2039_v32 = vpop.xlane.xlu0 %2038  ;;  %v2036_v33 = vpop.xlane.xlu2 %2035 }
0x29f7   :  { %v2041_v34 = vmul.f32 10.0, %v2039_v32  ;;  %v2040_v35 = vmul.f32 10.0, %v2036_v33 }
0x29f9   :  { %v2043_v36 = vadd.f32 1e-15, %v2041_v34  ;;  %v2042_v37 = vadd.f32 1e-15, %v2040_v35 }
0x29fb   :  { %3738 = vrcp.f32 %v2043_v36 }
0x29fc   :  { %3740 = vrcp.f32 %v2042_v37 }
0x2a01   :  { %v3739_v38 = vpop.eup %3738 }
0x2a02   :  { %v3741_v39 = vpop.eup %3740  ;;  %v2047_v40 = vmul.f32 %v3739_v38, %v4147_v0 }
0x2a03   :  { %v2046_v41 = vmul.f32 %v3741_v39, %v4143_v61 }
0x2a04   :  { %v2049_v42 = vsel %vm179_vm7, %v2047_v40, 0.0 }
0x2a05   :  { %v2048_v43 = vsel %vm175_vm6, %v2046_v41, 0.0 }
0x2a06   :  { %v2050_v44 = vadd.f32 %v2049_v42, %v2048_v43 }
0x2a08   :  { %v2051_v45 = vrot.slane %v2050_v44, 4 }
0x2a0a   :  { %v2052_v46 = vadd.f32 %v2051_v45, %v2050_v44 }
0x2a0c   :  { %v2053_v47 = vrot.slane %v2052_v46, 2 }
0x2a0e   :  { %v2054_v48 = vadd.f32 %v2053_v47, %v2052_v46 }
0x2a10   :  { %v2055_v49 = vrot.slane %v2054_v48, 1 }
0x2a12   :  { %v2056_v50 = vadd.f32 %v2055_v49, %v2054_v48 }
0x2a14   :  { %v2057_v51 = vmul.f32 50.0, %v2056_v50 }
0x2a16   :  { %v2058_v52 = vadd.f32 5e-15, %v2057_v51 }
0x2a18   :  { %3742 = vrcp.f32 %v2058_v52 }
0x2a1e   :  { %v3743_v53 = vpop.eup %3742 }
0x2a1f   :  { %v2061_v54 = vmul.f32 %v3743_v53, %v4147_v0  ;;  %v2060_v55 = vmul.f32 %v3743_v53, %v4143_v61 }
0x2a21   :  { %v2065_v56 = vsel %vm179_vm7, %v2061_v54, 0.0  ;;  %v2062_v57 = vsel %vm175_vm6, %v2060_v55, 0.0 }
0x2a22   :  { %2066 = vadd.xlane.f32.xlu2 %v2065_v56  ;;  %2063 = vadd.xlane.f32.xlu1 %v2062_v57 }
0x2a95   :  { %v2067_v58 = vpop.xlane.xlu2 %2066  ;;  %v2064_v59 = vpop.xlane.xlu1 %2063 }
0x2a96   :  { %v2069_v60 = vmul.f32 10.0, %v2067_v58  ;;  %v2068_v62 = vmul.f32 10.0, %v2064_v59 }
0x2a98   :  { %v2071_v63 = vadd.f32 1e-15, %v2069_v60  ;;  %v2070_v1 = vadd.f32 1e-15, %v2068_v62 }
0x2a9a   :  { %3744 = vrcp.f32 %v2071_v63 }
0x2a9b   :  { %3746 = vrcp.f32 %v2070_v1 }
0x2aa0   :  { %v3745_v2 = vpop.eup %3744 }
0x2aa1   :  { %v3747_v3 = vpop.eup %3746  ;;  %v2075_v4 = vmul.f32 %v3745_v2, %v4147_v0 }
0x2aa2   :  { %v2074_v5 = vmul.f32 %v3747_v3, %v4143_v61 }
0x2aa3   :  { %v2077_v6 = vsel %vm179_vm7, %v2075_v4, 0.0 }
0x2aa4   :  { %v2076_v7 = vsel %vm175_vm6, %v2074_v5, 0.0 }
0x2aa5   :  { %v2078_v8 = vadd.f32 %v2077_v6, %v2076_v7 }
0x2aa7   :  { %v2079_v9 = vrot.slane %v2078_v8, 4 }
0x2aa9   :  { %v2080_v10 = vadd.f32 %v2079_v9, %v2078_v8 }
0x2aab   :  { %v2081_v11 = vrot.slane %v2080_v10, 2 }
0x2aad   :  { %v2082_v13 = vadd.f32 %v2081_v11, %v2080_v10 }
0x2aaf   :  { %v2083_v14 = vrot.slane %v2082_v13, 1 }
0x2ab1   :  { %v2084_v15 = vadd.f32 %v2083_v14, %v2082_v13 }
0x2ab3   :  { %v2085_v16 = vmul.f32 50.0, %v2084_v15 }
0x2ab5   :  { %v2086_v17 = vadd.f32 5e-15, %v2085_v16 }
0x2ab7   :  { %3748 = vrcp.f32 %v2086_v17 }
0x2abd   :  { %v3749_v18 = vpop.eup %3748 }
0x2abe   :  { %v2089_v19 = vmul.f32 %v3749_v18, %v4147_v0  ;;  %v2088_v20 = vmul.f32 %v3749_v18, %v4143_v61 }
0x2ac0   :  { %v2093_v21 = vsel %vm179_vm7, %v2089_v19, 0.0  ;;  %v2090_v22 = vsel %vm175_vm6, %v2088_v20, 0.0 }
0x2ac1   :  { %2094 = vadd.xlane.f32.xlu1 %v2093_v21  ;;  %2091 = vadd.xlane.f32.xlu0 %v2090_v22 }
0x2b34   :  { %v2095_v24 = vpop.xlane.xlu1 %2094  ;;  %v2092_v25 = vpop.xlane.xlu0 %2091 }
0x2b35   :  { %v2097_v26 = vmul.f32 10.0, %v2095_v24  ;;  %v2096_v27 = vmul.f32 10.0, %v2092_v25 }
0x2b37   :  { %v2099_v28 = vadd.f32 1e-15, %v2097_v26  ;;  %v2098_v30 = vadd.f32 1e-15, %v2096_v27 }
0x2b39   :  { %3750 = vrcp.f32 %v2099_v28 }
0x2b3a   :  { %3752 = vrcp.f32 %v2098_v30 }
0x2b3f   :  { %v3751_v31 = vpop.eup %3750 }
0x2b40   :  { %v3753_v32 = vpop.eup %3752  ;;  %v2103_v33 = vmul.f32 %v3751_v31, %v4147_v0 }
0x2b41   :  { %v2102_v34 = vmul.f32 %v3753_v32, %v4143_v61 }
0x2b42   :  { %v2105_v35 = vsel %vm179_vm7, %v2103_v33, 0.0 }
0x2b43   :  { %v2104_v36 = vsel %vm175_vm6, %v2102_v34, 0.0 }
0x2b44   :  { %v2106_v37 = vadd.f32 %v2105_v35, %v2104_v36 }
0x2b46   :  { %v2107_v38 = vrot.slane %v2106_v37, 4 }
0x2b48   :  { %v2108_v39 = vadd.f32 %v2107_v38, %v2106_v37 }
0x2b4a   :  { %v2109_v40 = vrot.slane %v2108_v39, 2 }
0x2b4c   :  { %v2110_v41 = vadd.f32 %v2109_v40, %v2108_v39 }
0x2b4e   :  { %v2111_v42 = vrot.slane %v2110_v41, 1 }
0x2b50   :  { %v2112_v43 = vadd.f32 %v2111_v42, %v2110_v41 }
0x2b52   :  { %v2113_v44 = vmul.f32 50.0, %v2112_v43 }
0x2b54   :  { %v2114_v45 = vadd.f32 5e-15, %v2113_v44 }
0x2b56   :  { %3754 = vrcp.f32 %v2114_v45 }
0x2b5c   :  { %v3755_v46 = vpop.eup %3754 }
0x2b5d   :  { %v2117_v47 = vmul.f32 %v3755_v46, %v4147_v0  ;;  %v2116_v48 = vmul.f32 %v3755_v46, %v4143_v61 }
0x2b5f   :  { %v2121_v49 = vsel %vm179_vm7, %v2117_v47, 0.0  ;;  %v2118_v50 = vsel %vm175_vm6, %v2116_v48, 0.0 }
0x2b60   :  { %2122 = vadd.xlane.f32.xlu0 %v2121_v49  ;;  %2119 = vadd.xlane.f32.xlu2 %v2118_v50 }
0x2bd3   :  { %v2123_v51 = vpop.xlane.xlu0 %2122  ;;  %v2120_v52 = vpop.xlane.xlu2 %2119 }
0x2bd4   :  { %v2125_v53 = vmul.f32 10.0, %v2123_v51  ;;  %v2124_v54 = vmul.f32 10.0, %v2120_v52 }
0x2bd6   :  { %v2127_v55 = vadd.f32 1e-15, %v2125_v53  ;;  %v2126_v56 = vadd.f32 1e-15, %v2124_v54 }
0x2bd8   :  { %3756 = vrcp.f32 %v2127_v55 }
0x2bd9   :  { %3758 = vrcp.f32 %v2126_v56 }
0x2bde   :  { %v3757_v57 = vpop.eup %3756 }
0x2bdf   :  { %v3759_v58 = vpop.eup %3758  ;;  %v2131_v59 = vmul.f32 %v3757_v57, %v4147_v0 }
0x2be0   :  { %v2130_v60 = vmul.f32 %v3759_v58, %v4143_v61 }
0x2be1   :  { %v2133_v62 = vsel %vm179_vm7, %v2131_v59, 0.0 }
0x2be2   :  { %v2132_v63 = vsel %vm175_vm6, %v2130_v60, 0.0 }
0x2be3   :  { %v2134_v1 = vadd.f32 %v2133_v62, %v2132_v63 }
0x2be5   :  { %v2135_v2 = vrot.slane %v2134_v1, 4 }
0x2be7   :  { %v2136_v3 = vadd.f32 %v2135_v2, %v2134_v1 }
0x2be9   :  { %v2137_v4 = vrot.slane %v2136_v3, 2 }
0x2beb   :  { %v2138_v5 = vadd.f32 %v2137_v4, %v2136_v3 }
0x2bed   :  { %v2139_v6 = vrot.slane %v2138_v5, 1 }
0x2bef   :  { %v2140_v7 = vadd.f32 %v2139_v6, %v2138_v5 }
0x2bf1   :  { %v2141_v8 = vmul.f32 50.0, %v2140_v7 }
0x2bf3   :  { %v2142_v9 = vadd.f32 5e-15, %v2141_v8 }
0x2bf5   :  { %3760 = vrcp.f32 %v2142_v9 }
0x2bfb   :  { %v3761_v10 = vpop.eup %3760 }
0x2bfc   :  { %v2145_v11 = vmul.f32 %v3761_v10, %v4147_v0  ;;  %v2144_v13 = vmul.f32 %v3761_v10, %v4143_v61 }
0x2bfe   :  { %v2149_v14 = vsel %vm179_vm7, %v2145_v11, 0.0  ;;  %v2146_v15 = vsel %vm175_vm6, %v2144_v13, 0.0 }
0x2bff   :  { %2150 = vadd.xlane.f32.xlu2 %v2149_v14  ;;  %2147 = vadd.xlane.f32.xlu1 %v2146_v15 }
0x2c72   :  { %v2151_v16 = vpop.xlane.xlu2 %2150  ;;  %v2148_v17 = vpop.xlane.xlu1 %2147 }
0x2c73   :  { %v2153_v18 = vmul.f32 10.0, %v2151_v16  ;;  %v2152_v19 = vmul.f32 10.0, %v2148_v17 }
0x2c75   :  { %v2155_v20 = vadd.f32 1e-15, %v2153_v18  ;;  %v2154_v21 = vadd.f32 1e-15, %v2152_v19 }
0x2c77   :  { %3762 = vrcp.f32 %v2155_v20 }
0x2c78   :  { %3764 = vrcp.f32 %v2154_v21 }
0x2c7d   :  { %v3763_v22 = vpop.eup %3762 }
0x2c7e   :  { %v3765_v24 = vpop.eup %3764  ;;  %v2159_v25 = vmul.f32 %v3763_v22, %v4147_v0 }
0x2c7f   :  { %v2158_v26 = vmul.f32 %v3765_v24, %v4143_v61 }
0x2c80   :  { %v2161_v27 = vsel %vm179_vm7, %v2159_v25, 0.0 }
0x2c81   :  { %v2160_v28 = vsel %vm175_vm6, %v2158_v26, 0.0 }
0x2c82   :  { %v2162_v30 = vadd.f32 %v2161_v27, %v2160_v28 }
0x2c84   :  { %v2163_v31 = vrot.slane %v2162_v30, 4 }
0x2c86   :  { %v2164_v32 = vadd.f32 %v2163_v31, %v2162_v30 }
0x2c88   :  { %v2165_v33 = vrot.slane %v2164_v32, 2 }
0x2c8a   :  { %v2166_v34 = vadd.f32 %v2165_v33, %v2164_v32 }
0x2c8c   :  { %v2167_v35 = vrot.slane %v2166_v34, 1 }
0x2c8e   :  { %v2168_v36 = vadd.f32 %v2167_v35, %v2166_v34 }
0x2c90   :  { %v2169_v37 = vmul.f32 50.0, %v2168_v36 }
0x2c92   :  { %v2170_v38 = vadd.f32 5e-15, %v2169_v37 }
0x2c94   :  { %3766 = vrcp.f32 %v2170_v38 }
0x2c9a   :  { %v3767_v39 = vpop.eup %3766 }
0x2c9b   :  { %v2173_v40 = vmul.f32 %v3767_v39, %v4147_v0  ;;  %v2172_v41 = vmul.f32 %v3767_v39, %v4143_v61 }
0x2c9d   :  { %v2177_v42 = vsel %vm179_vm7, %v2173_v40, 0.0  ;;  %v2174_v43 = vsel %vm175_vm6, %v2172_v41, 0.0 }
0x2c9e   :  { %2178 = vadd.xlane.f32.xlu1 %v2177_v42  ;;  %2175 = vadd.xlane.f32.xlu0 %v2174_v43 }
0x2d11   :  { %v2179_v44 = vpop.xlane.xlu1 %2178  ;;  %v2176_v45 = vpop.xlane.xlu0 %2175 }
0x2d12   :  { %v2181_v46 = vmul.f32 10.0, %v2179_v44  ;;  %v2180_v47 = vmul.f32 10.0, %v2176_v45 }
0x2d14   :  { %v2183_v48 = vadd.f32 1e-15, %v2181_v46  ;;  %v2182_v49 = vadd.f32 1e-15, %v2180_v47 }
0x2d16   :  { %3768 = vrcp.f32 %v2183_v48 }
0x2d17   :  { %3770 = vrcp.f32 %v2182_v49 }
0x2d1c   :  { %v3769_v50 = vpop.eup %3768 }
0x2d1d   :  { %v3771_v51 = vpop.eup %3770  ;;  %v2187_v52 = vmul.f32 %v3769_v50, %v4147_v0 }
0x2d1e   :  { %v2186_v53 = vmul.f32 %v3771_v51, %v4143_v61 }
0x2d1f   :  { %v2189_v54 = vsel %vm179_vm7, %v2187_v52, 0.0 }
0x2d20   :  { %v2188_v55 = vsel %vm175_vm6, %v2186_v53, 0.0 }
0x2d21   :  { %v2190_v56 = vadd.f32 %v2189_v54, %v2188_v55 }
0x2d23   :  { %v2191_v57 = vrot.slane %v2190_v56, 4 }
0x2d25   :  { %v2192_v58 = vadd.f32 %v2191_v57, %v2190_v56 }
0x2d27   :  { %v2193_v59 = vrot.slane %v2192_v58, 2 }
0x2d29   :  { %v2194_v60 = vadd.f32 %v2193_v59, %v2192_v58 }
0x2d2b   :  { %v2195_v62 = vrot.slane %v2194_v60, 1 }
0x2d2d   :  { %v2196_v63 = vadd.f32 %v2195_v62, %v2194_v60 }
0x2d2f   :  { %v2197_v1 = vmul.f32 50.0, %v2196_v63 }
0x2d31   :  { %v2198_v2 = vadd.f32 5e-15, %v2197_v1 }
0x2d33   :  { %3772 = vrcp.f32 %v2198_v2 }
0x2d39   :  { %v3773_v3 = vpop.eup %3772 }
0x2d3a   :  { %v2201_v4 = vmul.f32 %v3773_v3, %v4147_v0  ;;  %v2200_v5 = vmul.f32 %v3773_v3, %v4143_v61 }
0x2d3c   :  { %v2205_v6 = vsel %vm179_vm7, %v2201_v4, 0.0  ;;  %v2202_v7 = vsel %vm175_vm6, %v2200_v5, 0.0 }
0x2d3d   :  { %2206 = vadd.xlane.f32.xlu0 %v2205_v6  ;;  %2203 = vadd.xlane.f32.xlu2 %v2202_v7 }
0x2db0   :  { %v2207_v8 = vpop.xlane.xlu0 %2206  ;;  %v2204_v9 = vpop.xlane.xlu2 %2203 }
0x2db1   :  { %v2209_v10 = vmul.f32 10.0, %v2207_v8  ;;  %v2208_v11 = vmul.f32 10.0, %v2204_v9 }
0x2db3   :  { %v2211_v13 = vadd.f32 1e-15, %v2209_v10  ;;  %v2210_v14 = vadd.f32 1e-15, %v2208_v11 }
0x2db5   :  { %3774 = vrcp.f32 %v2211_v13 }
0x2db6   :  { %3776 = vrcp.f32 %v2210_v14 }
0x2dbb   :  { %v3775_v15 = vpop.eup %3774 }
0x2dbc   :  { %v3777_v16 = vpop.eup %3776  ;;  %v2215_v17 = vmul.f32 %v3775_v15, %v4147_v0 }
0x2dbd   :  { %v2214_v18 = vmul.f32 %v3777_v16, %v4143_v61 }
0x2dbe   :  { %v2217_v19 = vsel %vm179_vm7, %v2215_v17, 0.0 }
0x2dbf   :  { %v2216_v20 = vsel %vm175_vm6, %v2214_v18, 0.0 }
0x2dc0   :  { %v2218_v21 = vadd.f32 %v2217_v19, %v2216_v20 }
0x2dc2   :  { %v2219_v22 = vrot.slane %v2218_v21, 4 }
0x2dc4   :  { %v2220_v24 = vadd.f32 %v2219_v22, %v2218_v21 }
0x2dc6   :  { %v2221_v25 = vrot.slane %v2220_v24, 2 }
0x2dc8   :  { %v2222_v26 = vadd.f32 %v2221_v25, %v2220_v24 }
0x2dca   :  { %v2223_v27 = vrot.slane %v2222_v26, 1 }
0x2dcc   :  { %v2224_v28 = vadd.f32 %v2223_v27, %v2222_v26 }
0x2dce   :  { %v2225_v30 = vmul.f32 50.0, %v2224_v28 }
0x2dd0   :  { %v2226_v31 = vadd.f32 5e-15, %v2225_v30 }
0x2dd2   :  { %3778 = vrcp.f32 %v2226_v31 }
0x2dd8   :  { %v3779_v32 = vpop.eup %3778 }
0x2dd9   :  { %v2229_v33 = vmul.f32 %v3779_v32, %v4147_v0  ;;  %v2228_v34 = vmul.f32 %v3779_v32, %v4143_v61 }
0x2ddb   :  { %v2233_v35 = vsel %vm179_vm7, %v2229_v33, 0.0  ;;  %v2230_v36 = vsel %vm175_vm6, %v2228_v34, 0.0 }
0x2ddc   :  { %2234 = vadd.xlane.f32.xlu2 %v2233_v35  ;;  %2231 = vadd.xlane.f32.xlu1 %v2230_v36 }
0x2e4f   :  { %v2235_v37 = vpop.xlane.xlu2 %2234  ;;  %v2232_v38 = vpop.xlane.xlu1 %2231 }
0x2e50   :  { %v2237_v39 = vmul.f32 10.0, %v2235_v37  ;;  %v2236_v40 = vmul.f32 10.0, %v2232_v38 }
0x2e52   :  { %v2239_v41 = vadd.f32 1e-15, %v2237_v39  ;;  %v2238_v42 = vadd.f32 1e-15, %v2236_v40 }
0x2e54   :  { %3780 = vrcp.f32 %v2239_v41 }
0x2e55   :  { %3782 = vrcp.f32 %v2238_v42 }
0x2e5a   :  { %v3781_v43 = vpop.eup %3780 }
0x2e5b   :  { %v3783_v44 = vpop.eup %3782  ;;  %v2243_v45 = vmul.f32 %v3781_v43, %v4147_v0 }
0x2e5c   :  { %v2242_v46 = vmul.f32 %v3783_v44, %v4143_v61 }
0x2e5d   :  { %v2245_v47 = vsel %vm179_vm7, %v2243_v45, 0.0 }
0x2e5e   :  { %v2244_v48 = vsel %vm175_vm6, %v2242_v46, 0.0 }
0x2e5f   :  { %v2246_v49 = vadd.f32 %v2245_v47, %v2244_v48 }
0x2e61   :  { %v2247_v50 = vrot.slane %v2246_v49, 4 }
0x2e63   :  { %v2248_v51 = vadd.f32 %v2247_v50, %v2246_v49 }
0x2e65   :  { %v2249_v52 = vrot.slane %v2248_v51, 2 }
0x2e67   :  { %v2250_v53 = vadd.f32 %v2249_v52, %v2248_v51 }
0x2e69   :  { %v2251_v54 = vrot.slane %v2250_v53, 1 }
0x2e6b   :  { %v2252_v55 = vadd.f32 %v2251_v54, %v2250_v53 }
0x2e6d   :  { %v2253_v56 = vmul.f32 50.0, %v2252_v55 }
0x2e6f   :  { %v2254_v57 = vadd.f32 5e-15, %v2253_v56 }
0x2e71   :  { %3784 = vrcp.f32 %v2254_v57 }
0x2e77   :  { %v3785_v58 = vpop.eup %3784 }
0x2e78   :  { %v2257_v59 = vmul.f32 %v3785_v58, %v4147_v0  ;;  %v2256_v60 = vmul.f32 %v3785_v58, %v4143_v61 }
0x2e7a   :  { %v2261_v62 = vsel %vm179_vm7, %v2257_v59, 0.0  ;;  %v2258_v63 = vsel %vm175_vm6, %v2256_v60, 0.0 }
0x2e7b   :  { %2262 = vadd.xlane.f32.xlu1 %v2261_v62  ;;  %2259 = vadd.xlane.f32.xlu0 %v2258_v63 }
0x2eee   :  { %v2263_v1 = vpop.xlane.xlu1 %2262  ;;  %v2260_v2 = vpop.xlane.xlu0 %2259 }
0x2eef   :  { %v2265_v3 = vmul.f32 10.0, %v2263_v1  ;;  %v2264_v4 = vmul.f32 10.0, %v2260_v2 }
0x2ef1   :  { %v2267_v5 = vadd.f32 1e-15, %v2265_v3  ;;  %v2266_v6 = vadd.f32 1e-15, %v2264_v4 }
0x2ef3   :  { %3786 = vrcp.f32 %v2267_v5 }
0x2ef4   :  { %3788 = vrcp.f32 %v2266_v6 }
0x2ef9   :  { %v3787_v7 = vpop.eup %3786 }
0x2efa   :  { %v3789_v8 = vpop.eup %3788  ;;  %v2271_v9 = vmul.f32 %v3787_v7, %v4147_v0 }
0x2efb   :  { %v2270_v10 = vmul.f32 %v3789_v8, %v4143_v61 }
0x2efc   :  { %v2273_v11 = vsel %vm179_vm7, %v2271_v9, 0.0 }
0x2efd   :  { %v2272_v13 = vsel %vm175_vm6, %v2270_v10, 0.0 }
0x2efe   :  { %v2274_v14 = vadd.f32 %v2273_v11, %v2272_v13 }
0x2f00   :  { %v2275_v15 = vrot.slane %v2274_v14, 4 }
0x2f02   :  { %v2276_v16 = vadd.f32 %v2275_v15, %v2274_v14 }
0x2f04   :  { %v2277_v17 = vrot.slane %v2276_v16, 2 }
0x2f06   :  { %v2278_v18 = vadd.f32 %v2277_v17, %v2276_v16 }
0x2f08   :  { %v2279_v19 = vrot.slane %v2278_v18, 1 }
0x2f0a   :  { %v2280_v20 = vadd.f32 %v2279_v19, %v2278_v18 }
0x2f0c   :  { %v2281_v21 = vmul.f32 50.0, %v2280_v20 }
0x2f0e   :  { %v2282_v22 = vadd.f32 5e-15, %v2281_v21 }
0x2f10   :  { %3790 = vrcp.f32 %v2282_v22 }
0x2f16   :  { %v3791_v24 = vpop.eup %3790 }
0x2f17   :  { %v2285_v25 = vmul.f32 %v3791_v24, %v4147_v0  ;;  %v2284_v26 = vmul.f32 %v3791_v24, %v4143_v61 }
0x2f19   :  { %v2289_v27 = vsel %vm179_vm7, %v2285_v25, 0.0  ;;  %v2286_v28 = vsel %vm175_vm6, %v2284_v26, 0.0 }
0x2f1a   :  { %2290 = vadd.xlane.f32.xlu0 %v2289_v27  ;;  %2287 = vadd.xlane.f32.xlu2 %v2286_v28 }
0x2f8d   :  { %v2291_v30 = vpop.xlane.xlu0 %2290  ;;  %v2288_v31 = vpop.xlane.xlu2 %2287 }
0x2f8e   :  { %v2293_v32 = vmul.f32 10.0, %v2291_v30  ;;  %v2292_v33 = vmul.f32 10.0, %v2288_v31 }
0x2f90   :  { %v2295_v34 = vadd.f32 1e-15, %v2293_v32  ;;  %v2294_v35 = vadd.f32 1e-15, %v2292_v33 }
0x2f92   :  { %3792 = vrcp.f32 %v2295_v34 }
0x2f93   :  { %3794 = vrcp.f32 %v2294_v35 }
0x2f98   :  { %v3793_v36 = vpop.eup %3792 }
0x2f99   :  { %v3795_v37 = vpop.eup %3794  ;;  %v2299_v38 = vmul.f32 %v3793_v36, %v4147_v0 }
0x2f9a   :  { %v2298_v39 = vmul.f32 %v3795_v37, %v4143_v61 }
0x2f9b   :  { %v2301_v40 = vsel %vm179_vm7, %v2299_v38, 0.0 }
0x2f9c   :  { %v2300_v41 = vsel %vm175_vm6, %v2298_v39, 0.0 }
0x2f9d   :  { %v2302_v42 = vadd.f32 %v2301_v40, %v2300_v41 }
0x2f9f   :  { %v2303_v43 = vrot.slane %v2302_v42, 4 }
0x2fa1   :  { %v2304_v44 = vadd.f32 %v2303_v43, %v2302_v42 }
0x2fa3   :  { %v2305_v45 = vrot.slane %v2304_v44, 2 }
0x2fa5   :  { %v2306_v46 = vadd.f32 %v2305_v45, %v2304_v44 }
0x2fa7   :  { %v2307_v47 = vrot.slane %v2306_v46, 1 }
0x2fa9   :  { %v2308_v48 = vadd.f32 %v2307_v47, %v2306_v46 }
0x2fab   :  { %v2309_v49 = vmul.f32 50.0, %v2308_v48 }
0x2fad   :  { %v2310_v50 = vadd.f32 5e-15, %v2309_v49 }
0x2faf   :  { %3796 = vrcp.f32 %v2310_v50 }
0x2fb5   :  { %v3797_v51 = vpop.eup %3796 }
0x2fb6   :  { %v2313_v52 = vmul.f32 %v3797_v51, %v4147_v0  ;;  %v2312_v53 = vmul.f32 %v3797_v51, %v4143_v61 }
0x2fb8   :  { %v2317_v54 = vsel %vm179_vm7, %v2313_v52, 0.0  ;;  %v2314_v55 = vsel %vm175_vm6, %v2312_v53, 0.0 }
0x2fb9   :  { %2318 = vadd.xlane.f32.xlu2 %v2317_v54  ;;  %2315 = vadd.xlane.f32.xlu1 %v2314_v55 }
0x302c   :  { %v2319_v56 = vpop.xlane.xlu2 %2318  ;;  %v2316_v57 = vpop.xlane.xlu1 %2315 }
0x302d   :  { %v2321_v58 = vmul.f32 10.0, %v2319_v56  ;;  %v2320_v59 = vmul.f32 10.0, %v2316_v57 }
0x302f   :  { %v2323_v60 = vadd.f32 1e-15, %v2321_v58  ;;  %v2322_v62 = vadd.f32 1e-15, %v2320_v59 }
0x3031   :  { %3798 = vrcp.f32 %v2323_v60 }
0x3032   :  { %3800 = vrcp.f32 %v2322_v62 }
0x3037   :  { %v3799_v63 = vpop.eup %3798 }
0x3038   :  { %v3801_v1 = vpop.eup %3800  ;;  %v2327_v2 = vmul.f32 %v3799_v63, %v4147_v0 }
0x3039   :  { %v2326_v3 = vmul.f32 %v3801_v1, %v4143_v61 }
0x303a   :  { %v2329_v4 = vsel %vm179_vm7, %v2327_v2, 0.0 }
0x303b   :  { %v2328_v5 = vsel %vm175_vm6, %v2326_v3, 0.0 }
0x303c   :  { %v2330_v6 = vadd.f32 %v2329_v4, %v2328_v5 }
0x303e   :  { %v2331_v7 = vrot.slane %v2330_v6, 4 }
0x3040   :  { %v2332_v8 = vadd.f32 %v2331_v7, %v2330_v6 }
0x3042   :  { %v2333_v9 = vrot.slane %v2332_v8, 2 }
0x3044   :  { %v2334_v10 = vadd.f32 %v2333_v9, %v2332_v8 }
0x3046   :  { %v2335_v11 = vrot.slane %v2334_v10, 1 }
0x3048   :  { %v2336_v13 = vadd.f32 %v2335_v11, %v2334_v10 }
0x304a   :  { %v2337_v14 = vmul.f32 50.0, %v2336_v13 }
0x304c   :  { %v2338_v15 = vadd.f32 5e-15, %v2337_v14 }
0x304e   :  { %3802 = vrcp.f32 %v2338_v15 }
0x3054   :  { %v3803_v16 = vpop.eup %3802 }
0x3055   :  { %v2341_v17 = vmul.f32 %v3803_v16, %v4147_v0  ;;  %v2340_v18 = vmul.f32 %v3803_v16, %v4143_v61 }
0x3057   :  { %v2345_v19 = vsel %vm179_vm7, %v2341_v17, 0.0  ;;  %v2342_v20 = vsel %vm175_vm6, %v2340_v18, 0.0 }
0x3058   :  { %2346 = vadd.xlane.f32.xlu1 %v2345_v19  ;;  %2343 = vadd.xlane.f32.xlu0 %v2342_v20 }
0x30cb   :  { %v2347_v21 = vpop.xlane.xlu1 %2346  ;;  %v2344_v22 = vpop.xlane.xlu0 %2343 }
0x30cc   :  { %v2349_v24 = vmul.f32 10.0, %v2347_v21  ;;  %v2348_v25 = vmul.f32 10.0, %v2344_v22 }
0x30ce   :  { %v2351_v26 = vadd.f32 1e-15, %v2349_v24  ;;  %v2350_v27 = vadd.f32 1e-15, %v2348_v25 }
0x30d0   :  { %3804 = vrcp.f32 %v2351_v26 }
0x30d1   :  { %3806 = vrcp.f32 %v2350_v27 }
0x30d6   :  { %v3805_v28 = vpop.eup %3804 }
0x30d7   :  { %v3807_v30 = vpop.eup %3806  ;;  %v2355_v31 = vmul.f32 %v3805_v28, %v4147_v0 }
0x30d8   :  { %v2354_v32 = vmul.f32 %v3807_v30, %v4143_v61 }
0x30d9   :  { %v2357_v33 = vsel %vm179_vm7, %v2355_v31, 0.0 }
0x30da   :  { %v2356_v34 = vsel %vm175_vm6, %v2354_v32, 0.0 }
0x30db   :  { %v2358_v35 = vadd.f32 %v2357_v33, %v2356_v34 }
0x30dd   :  { %v2359_v36 = vrot.slane %v2358_v35, 4 }
0x30df   :  { %v2360_v37 = vadd.f32 %v2359_v36, %v2358_v35 }
0x30e1   :  { %v2361_v38 = vrot.slane %v2360_v37, 2 }
0x30e3   :  { %v2362_v39 = vadd.f32 %v2361_v38, %v2360_v37 }
0x30e5   :  { %v2363_v40 = vrot.slane %v2362_v39, 1 }
0x30e7   :  { %v2364_v41 = vadd.f32 %v2363_v40, %v2362_v39 }
0x30e9   :  { %v2365_v42 = vmul.f32 50.0, %v2364_v41 }
0x30eb   :  { %v2366_v43 = vadd.f32 5e-15, %v2365_v42 }
0x30ed   :  { %3808 = vrcp.f32 %v2366_v43 }
0x30f3   :  { %v3809_v44 = vpop.eup %3808 }
0x30f4   :  { %v2369_v45 = vmul.f32 %v3809_v44, %v4147_v0  ;;  %v2368_v46 = vmul.f32 %v3809_v44, %v4143_v61 }
0x30f6   :  { %v2373_v47 = vsel %vm179_vm7, %v2369_v45, 0.0  ;;  %v2370_v48 = vsel %vm175_vm6, %v2368_v46, 0.0 }
0x30f7   :  { %2374 = vadd.xlane.f32.xlu0 %v2373_v47  ;;  %2371 = vadd.xlane.f32.xlu2 %v2370_v48 }
0x316a   :  { %v2375_v49 = vpop.xlane.xlu0 %2374  ;;  %v2372_v50 = vpop.xlane.xlu2 %2371 }
0x316b   :  { %v2377_v51 = vmul.f32 10.0, %v2375_v49  ;;  %v2376_v52 = vmul.f32 10.0, %v2372_v50 }
0x316d   :  { %v2379_v53 = vadd.f32 1e-15, %v2377_v51  ;;  %v2378_v54 = vadd.f32 1e-15, %v2376_v52 }
0x316f   :  { %3810 = vrcp.f32 %v2379_v53 }
0x3170   :  { %3812 = vrcp.f32 %v2378_v54 }
0x3175   :  { %v3811_v55 = vpop.eup %3810 }
0x3176   :  { %v3813_v56 = vpop.eup %3812  ;;  %v2383_v57 = vmul.f32 %v3811_v55, %v4147_v0 }
0x3177   :  { %v2382_v58 = vmul.f32 %v3813_v56, %v4143_v61 }
0x3178   :  { %v2385_v59 = vsel %vm179_vm7, %v2383_v57, 0.0 }
0x3179   :  { %v2384_v60 = vsel %vm175_vm6, %v2382_v58, 0.0 }
0x317a   :  { %v2386_v62 = vadd.f32 %v2385_v59, %v2384_v60 }
0x317c   :  { %v2387_v63 = vrot.slane %v2386_v62, 4 }
0x317e   :  { %v2388_v1 = vadd.f32 %v2387_v63, %v2386_v62 }
0x3180   :  { %v2389_v2 = vrot.slane %v2388_v1, 2 }
0x3182   :  { %v2390_v3 = vadd.f32 %v2389_v2, %v2388_v1 }
0x3184   :  { %v2391_v4 = vrot.slane %v2390_v3, 1 }
0x3186   :  { %v2392_v5 = vadd.f32 %v2391_v4, %v2390_v3 }
0x3188   :  { %v2393_v6 = vmul.f32 50.0, %v2392_v5 }
0x318a   :  { %v2394_v7 = vadd.f32 5e-15, %v2393_v6 }
0x318c   :  { %3814 = vrcp.f32 %v2394_v7 }
0x3192   :  { %v3815_v8 = vpop.eup %3814 }
0x3193   :  { %v2397_v9 = vmul.f32 %v3815_v8, %v4147_v0  ;;  %v2396_v10 = vmul.f32 %v3815_v8, %v4143_v61 }
0x3195   :  { %v2401_v11 = vsel %vm179_vm7, %v2397_v9, 0.0  ;;  %v2398_v13 = vsel %vm175_vm6, %v2396_v10, 0.0 }
0x3196   :  { %2402 = vadd.xlane.f32.xlu2 %v2401_v11  ;;  %2399 = vadd.xlane.f32.xlu1 %v2398_v13 }
0x3209   :  { %v2403_v14 = vpop.xlane.xlu2 %2402  ;;  %v2400_v15 = vpop.xlane.xlu1 %2399 }
0x320a   :  { %v2405_v16 = vmul.f32 10.0, %v2403_v14  ;;  %v2404_v17 = vmul.f32 10.0, %v2400_v15 }
0x320c   :  { %v2407_v18 = vadd.f32 1e-15, %v2405_v16  ;;  %v2406_v19 = vadd.f32 1e-15, %v2404_v17 }
0x320e   :  { %3816 = vrcp.f32 %v2407_v18 }
0x320f   :  { %3818 = vrcp.f32 %v2406_v19 }
0x3214   :  { %v3817_v20 = vpop.eup %3816 }
0x3215   :  { %v3819_v21 = vpop.eup %3818  ;;  %v2411_v22 = vmul.f32 %v3817_v20, %v4147_v0 }
0x3216   :  { %v2410_v24 = vmul.f32 %v3819_v21, %v4143_v61 }
0x3217   :  { %v2413_v25 = vsel %vm179_vm7, %v2411_v22, 0.0 }
0x3218   :  { %v2412_v26 = vsel %vm175_vm6, %v2410_v24, 0.0 }
0x3219   :  { %v2414_v27 = vadd.f32 %v2413_v25, %v2412_v26 }
0x321b   :  { %v2415_v28 = vrot.slane %v2414_v27, 4 }
0x321d   :  { %v2416_v30 = vadd.f32 %v2415_v28, %v2414_v27 }
0x321f   :  { %v2417_v31 = vrot.slane %v2416_v30, 2 }
0x3221   :  { %v2418_v32 = vadd.f32 %v2417_v31, %v2416_v30 }
0x3223   :  { %v2419_v33 = vrot.slane %v2418_v32, 1 }
0x3225   :  { %v2420_v34 = vadd.f32 %v2419_v33, %v2418_v32 }
0x3227   :  { %v2421_v35 = vmul.f32 50.0, %v2420_v34 }
0x3229   :  { %v2422_v36 = vadd.f32 5e-15, %v2421_v35 }
0x322b   :  { %3820 = vrcp.f32 %v2422_v36 }
0x3231   :  { %v3821_v37 = vpop.eup %3820 }
0x3232   :  { %v2425_v38 = vmul.f32 %v3821_v37, %v4147_v0  ;;  %v2424_v39 = vmul.f32 %v3821_v37, %v4143_v61 }
0x3234   :  { %v2429_v40 = vsel %vm179_vm7, %v2425_v38, 0.0  ;;  %v2426_v41 = vsel %vm175_vm6, %v2424_v39, 0.0 }
0x3235   :  { %2430 = vadd.xlane.f32.xlu1 %v2429_v40  ;;  %2427 = vadd.xlane.f32.xlu0 %v2426_v41 }
0x32a8   :  { %v2431_v42 = vpop.xlane.xlu1 %2430  ;;  %v2428_v43 = vpop.xlane.xlu0 %2427 }
0x32a9   :  { %v2433_v44 = vmul.f32 10.0, %v2431_v42  ;;  %v2432_v45 = vmul.f32 10.0, %v2428_v43 }
0x32ab   :  { %v2435_v46 = vadd.f32 1e-15, %v2433_v44  ;;  %v2434_v47 = vadd.f32 1e-15, %v2432_v45 }
0x32ad   :  { %3822 = vrcp.f32 %v2435_v46 }
0x32ae   :  { %3824 = vrcp.f32 %v2434_v47 }
0x32b3   :  { %v3823_v48 = vpop.eup %3822 }
0x32b4   :  { %v3825_v49 = vpop.eup %3824  ;;  %v2439_v50 = vmul.f32 %v3823_v48, %v4147_v0 }
0x32b5   :  { %v2438_v51 = vmul.f32 %v3825_v49, %v4143_v61 }
0x32b6   :  { %v2441_v52 = vsel %vm179_vm7, %v2439_v50, 0.0 }
0x32b7   :  { %v2440_v53 = vsel %vm175_vm6, %v2438_v51, 0.0 }
0x32b8   :  { %v2442_v54 = vadd.f32 %v2441_v52, %v2440_v53 }
0x32ba   :  { %v2443_v55 = vrot.slane %v2442_v54, 4 }
0x32bc   :  { %v2444_v56 = vadd.f32 %v2443_v55, %v2442_v54 }
0x32be   :  { %v2445_v57 = vrot.slane %v2444_v56, 2 }
0x32c0   :  { %v2446_v58 = vadd.f32 %v2445_v57, %v2444_v56 }
0x32c2   :  { %v2447_v59 = vrot.slane %v2446_v58, 1 }
0x32c4   :  { %v2448_v60 = vadd.f32 %v2447_v59, %v2446_v58 }
0x32c6   :  { %v2449_v62 = vmul.f32 50.0, %v2448_v60 }
0x32c8   :  { %v2450_v63 = vadd.f32 5e-15, %v2449_v62 }
0x32ca   :  { %3826 = vrcp.f32 %v2450_v63 }
0x32d0   :  { %v3827_v1 = vpop.eup %3826 }
0x32d1   :  { %v2453_v2 = vmul.f32 %v3827_v1, %v4147_v0  ;;  %v2452_v3 = vmul.f32 %v3827_v1, %v4143_v61 }
0x32d3   :  { %v2457_v4 = vsel %vm179_vm7, %v2453_v2, 0.0  ;;  %v2454_v5 = vsel %vm175_vm6, %v2452_v3, 0.0 }
0x32d4   :  { %2458 = vadd.xlane.f32.xlu0 %v2457_v4  ;;  %2455 = vadd.xlane.f32.xlu2 %v2454_v5 }
0x3347   :  { %v2459_v6 = vpop.xlane.xlu0 %2458  ;;  %v2456_v7 = vpop.xlane.xlu2 %2455 }
0x3348   :  { %v2461_v8 = vmul.f32 10.0, %v2459_v6  ;;  %v2460_v9 = vmul.f32 10.0, %v2456_v7 }
0x334a   :  { %v2463_v10 = vadd.f32 1e-15, %v2461_v8  ;;  %v2462_v11 = vadd.f32 1e-15, %v2460_v9 }
0x334c   :  { %3828 = vrcp.f32 %v2463_v10 }
0x334d   :  { %3830 = vrcp.f32 %v2462_v11 }
0x3352   :  { %v3829_v13 = vpop.eup %3828 }
0x3353   :  { %v3831_v14 = vpop.eup %3830  ;;  %v2467_v15 = vmul.f32 %v3829_v13, %v4147_v0 }
0x3354   :  { %v2466_v16 = vmul.f32 %v3831_v14, %v4143_v61 }
0x3355   :  { %v2469_v17 = vsel %vm179_vm7, %v2467_v15, 0.0 }
0x3356   :  { %v2468_v18 = vsel %vm175_vm6, %v2466_v16, 0.0 }
0x3357   :  { %v2470_v19 = vadd.f32 %v2469_v17, %v2468_v18 }
0x3359   :  { %v2471_v20 = vrot.slane %v2470_v19, 4 }
0x335b   :  { %v2472_v21 = vadd.f32 %v2471_v20, %v2470_v19 }
0x335d   :  { %v2473_v22 = vrot.slane %v2472_v21, 2 }
0x335f   :  { %v2474_v24 = vadd.f32 %v2473_v22, %v2472_v21 }
0x3361   :  { %v2475_v25 = vrot.slane %v2474_v24, 1 }
0x3363   :  { %v2476_v26 = vadd.f32 %v2475_v25, %v2474_v24 }
0x3365   :  { %v2477_v27 = vmul.f32 50.0, %v2476_v26 }
0x3367   :  { %v2478_v28 = vadd.f32 5e-15, %v2477_v27 }
0x3369   :  { %3832 = vrcp.f32 %v2478_v28 }
0x336f   :  { %v3833_v30 = vpop.eup %3832 }
0x3370   :  { %v2481_v31 = vmul.f32 %v3833_v30, %v4147_v0  ;;  %v2480_v32 = vmul.f32 %v3833_v30, %v4143_v61 }
0x3372   :  { %v2485_v33 = vsel %vm179_vm7, %v2481_v31, 0.0  ;;  %v2482_v34 = vsel %vm175_vm6, %v2480_v32, 0.0 }
0x3373   :  { %2486 = vadd.xlane.f32.xlu2 %v2485_v33  ;;  %2483 = vadd.xlane.f32.xlu1 %v2482_v34 }
0x33e6   :  { %v2487_v35 = vpop.xlane.xlu2 %2486  ;;  %v2484_v36 = vpop.xlane.xlu1 %2483 }
0x33e7   :  { %v2489_v37 = vmul.f32 10.0, %v2487_v35  ;;  %v2488_v38 = vmul.f32 10.0, %v2484_v36 }
0x33e9   :  { %v2491_v39 = vadd.f32 1e-15, %v2489_v37  ;;  %v2490_v40 = vadd.f32 1e-15, %v2488_v38 }
0x33eb   :  { %3834 = vrcp.f32 %v2491_v39 }
0x33ec   :  { %3836 = vrcp.f32 %v2490_v40 }
0x33f1   :  { %v3835_v41 = vpop.eup %3834 }
0x33f2   :  { %v3837_v42 = vpop.eup %3836  ;;  %v2495_v43 = vmul.f32 %v3835_v41, %v4147_v0 }
0x33f3   :  { %v2494_v44 = vmul.f32 %v3837_v42, %v4143_v61 }
0x33f4   :  { %v2497_v45 = vsel %vm179_vm7, %v2495_v43, 0.0 }
0x33f5   :  { %v2496_v46 = vsel %vm175_vm6, %v2494_v44, 0.0 }
0x33f6   :  { %v2498_v47 = vadd.f32 %v2497_v45, %v2496_v46 }
0x33f8   :  { %v2499_v48 = vrot.slane %v2498_v47, 4 }
0x33fa   :  { %v2500_v49 = vadd.f32 %v2499_v48, %v2498_v47 }
0x33fc   :  { %v2501_v50 = vrot.slane %v2500_v49, 2 }
0x33fe   :  { %v2502_v51 = vadd.f32 %v2501_v50, %v2500_v49 }
0x3400   :  { %v2503_v52 = vrot.slane %v2502_v51, 1 }
0x3402   :  { %v2504_v53 = vadd.f32 %v2503_v52, %v2502_v51 }
0x3404   :  { %v2505_v54 = vmul.f32 50.0, %v2504_v53 }
0x3406   :  { %v2506_v55 = vadd.f32 5e-15, %v2505_v54 }
0x3408   :  { %3838 = vrcp.f32 %v2506_v55 }
0x340e   :  { %v3839_v56 = vpop.eup %3838 }
0x340f   :  { %v2509_v57 = vmul.f32 %v3839_v56, %v4147_v0  ;;  %v2508_v58 = vmul.f32 %v3839_v56, %v4143_v61 }
0x3411   :  { %v2513_v59 = vsel %vm179_vm7, %v2509_v57, 0.0  ;;  %v2510_v60 = vsel %vm175_vm6, %v2508_v58, 0.0 }
0x3412   :  { %2514 = vadd.xlane.f32.xlu1 %v2513_v59  ;;  %2511 = vadd.xlane.f32.xlu0 %v2510_v60 }
0x3485   :  { %v2515_v62 = vpop.xlane.xlu1 %2514  ;;  %v2512_v63 = vpop.xlane.xlu0 %2511 }
0x3486   :  { %v2517_v1 = vmul.f32 10.0, %v2515_v62  ;;  %v2516_v2 = vmul.f32 10.0, %v2512_v63 }
0x3488   :  { %v2519_v3 = vadd.f32 1e-15, %v2517_v1  ;;  %v2518_v4 = vadd.f32 1e-15, %v2516_v2 }
0x348a   :  { %3840 = vrcp.f32 %v2519_v3 }
0x348b   :  { %3842 = vrcp.f32 %v2518_v4 }
0x3490   :  { %v3841_v5 = vpop.eup %3840 }
0x3491   :  { %v3843_v6 = vpop.eup %3842  ;;  %v2523_v7 = vmul.f32 %v3841_v5, %v4147_v0 }
0x3492   :  { %v2522_v8 = vmul.f32 %v3843_v6, %v4143_v61 }
0x3493   :  { %v2525_v9 = vsel %vm179_vm7, %v2523_v7, 0.0 }
0x3494   :  { %v2524_v10 = vsel %vm175_vm6, %v2522_v8, 0.0 }
0x3495   :  { %v2526_v11 = vadd.f32 %v2525_v9, %v2524_v10 }
0x3497   :  { %v2527_v13 = vrot.slane %v2526_v11, 4 }
0x3499   :  { %v2528_v14 = vadd.f32 %v2527_v13, %v2526_v11 }
0x349b   :  { %v2529_v15 = vrot.slane %v2528_v14, 2 }
0x349d   :  { %v2530_v16 = vadd.f32 %v2529_v15, %v2528_v14 }
0x349f   :  { %v2531_v17 = vrot.slane %v2530_v16, 1 }
0x34a1   :  { %v2532_v18 = vadd.f32 %v2531_v17, %v2530_v16 }
0x34a3   :  { %v2533_v19 = vmul.f32 50.0, %v2532_v18 }
0x34a5   :  { %v2534_v20 = vadd.f32 5e-15, %v2533_v19 }
0x34a7   :  { %3844 = vrcp.f32 %v2534_v20 }
0x34ad   :  { %v3845_v21 = vpop.eup %3844 }
0x34ae   :  { %v2537_v22 = vmul.f32 %v3845_v21, %v4147_v0  ;;  %v2536_v24 = vmul.f32 %v3845_v21, %v4143_v61 }
0x34b0   :  { %v2541_v25 = vsel %vm179_vm7, %v2537_v22, 0.0  ;;  %v2538_v26 = vsel %vm175_vm6, %v2536_v24, 0.0 }
0x34b1   :  { %2542 = vadd.xlane.f32.xlu0 %v2541_v25  ;;  %2539 = vadd.xlane.f32.xlu2 %v2538_v26 }
0x3524   :  { %v2543_v27 = vpop.xlane.xlu0 %2542  ;;  %v2540_v28 = vpop.xlane.xlu2 %2539 }
0x3525   :  { %v2545_v30 = vmul.f32 10.0, %v2543_v27  ;;  %v2544_v31 = vmul.f32 10.0, %v2540_v28 }
0x3527   :  { %v2547_v32 = vadd.f32 1e-15, %v2545_v30  ;;  %v2546_v33 = vadd.f32 1e-15, %v2544_v31 }
0x3529   :  { %3846 = vrcp.f32 %v2547_v32 }
0x352a   :  { %3848 = vrcp.f32 %v2546_v33 }
0x352f   :  { %v3847_v34 = vpop.eup %3846 }
0x3530   :  { %v3849_v35 = vpop.eup %3848  ;;  %v2551_v36 = vmul.f32 %v3847_v34, %v4147_v0 }
0x3531   :  { %v2550_v37 = vmul.f32 %v3849_v35, %v4143_v61 }
0x3532   :  { %v2553_v38 = vsel %vm179_vm7, %v2551_v36, 0.0 }
0x3533   :  { %v2552_v39 = vsel %vm175_vm6, %v2550_v37, 0.0 }
0x3534   :  { %v2554_v40 = vadd.f32 %v2553_v38, %v2552_v39 }
0x3536   :  { %v2555_v41 = vrot.slane %v2554_v40, 4 }
0x3538   :  { %v2556_v42 = vadd.f32 %v2555_v41, %v2554_v40 }
0x353a   :  { %v2557_v43 = vrot.slane %v2556_v42, 2 }
0x353c   :  { %v2558_v44 = vadd.f32 %v2557_v43, %v2556_v42 }
0x353e   :  { %v2559_v45 = vrot.slane %v2558_v44, 1 }
0x3540   :  { %v2560_v46 = vadd.f32 %v2559_v45, %v2558_v44 }
0x3542   :  { %v2561_v47 = vmul.f32 50.0, %v2560_v46 }
0x3544   :  { %v2562_v48 = vadd.f32 5e-15, %v2561_v47 }
0x3546   :  { %3850 = vrcp.f32 %v2562_v48 }
0x354c   :  { %v3851_v49 = vpop.eup %3850 }
0x354d   :  { %v2565_v50 = vmul.f32 %v3851_v49, %v4147_v0  ;;  %v2564_v51 = vmul.f32 %v3851_v49, %v4143_v61 }
0x354f   :  { %v2569_v52 = vsel %vm179_vm7, %v2565_v50, 0.0  ;;  %v2566_v53 = vsel %vm175_vm6, %v2564_v51, 0.0 }
0x3550   :  { %2570 = vadd.xlane.f32.xlu2 %v2569_v52  ;;  %2567 = vadd.xlane.f32.xlu1 %v2566_v53 }
0x35c3   :  { %v2571_v54 = vpop.xlane.xlu2 %2570  ;;  %v2568_v55 = vpop.xlane.xlu1 %2567 }
0x35c4   :  { %v2573_v56 = vmul.f32 10.0, %v2571_v54  ;;  %v2572_v57 = vmul.f32 10.0, %v2568_v55 }
0x35c6   :  { %v2575_v58 = vadd.f32 1e-15, %v2573_v56  ;;  %v2574_v59 = vadd.f32 1e-15, %v2572_v57 }
0x35c8   :  { %3852 = vrcp.f32 %v2575_v58 }
0x35c9   :  { %3854 = vrcp.f32 %v2574_v59 }
0x35ce   :  { %v3853_v60 = vpop.eup %3852 }
0x35cf   :  { %v3855_v62 = vpop.eup %3854  ;;  %v2579_v63 = vmul.f32 %v3853_v60, %v4147_v0 }
0x35d0   :  { %v2578_v1 = vmul.f32 %v3855_v62, %v4143_v61 }
0x35d1   :  { %v2581_v2 = vsel %vm179_vm7, %v2579_v63, 0.0 }
0x35d2   :  { %v2580_v3 = vsel %vm175_vm6, %v2578_v1, 0.0 }
0x35d3   :  { %v2582_v4 = vadd.f32 %v2581_v2, %v2580_v3 }
0x35d5   :  { %v2583_v5 = vrot.slane %v2582_v4, 4 }
0x35d7   :  { %v2584_v6 = vadd.f32 %v2583_v5, %v2582_v4 }
0x35d9   :  { %v2585_v7 = vrot.slane %v2584_v6, 2 }
0x35db   :  { %v2586_v8 = vadd.f32 %v2585_v7, %v2584_v6 }
0x35dd   :  { %v2587_v9 = vrot.slane %v2586_v8, 1 }
0x35df   :  { %v2588_v10 = vadd.f32 %v2587_v9, %v2586_v8 }
0x35e1   :  { %v2589_v11 = vmul.f32 50.0, %v2588_v10 }
0x35e3   :  { %v2590_v13 = vadd.f32 5e-15, %v2589_v11 }
0x35e5   :  { %3856 = vrcp.f32 %v2590_v13 }
0x35eb   :  { %v3857_v14 = vpop.eup %3856 }
0x35ec   :  { %v2593_v15 = vmul.f32 %v3857_v14, %v4147_v0  ;;  %v2592_v16 = vmul.f32 %v3857_v14, %v4143_v61 }
0x35ee   :  { %v2597_v17 = vsel %vm179_vm7, %v2593_v15, 0.0  ;;  %v2594_v18 = vsel %vm175_vm6, %v2592_v16, 0.0 }
0x35ef   :  { %2598 = vadd.xlane.f32.xlu1 %v2597_v17  ;;  %2595 = vadd.xlane.f32.xlu0 %v2594_v18 }
0x3662   :  { %v2599_v19 = vpop.xlane.xlu1 %2598  ;;  %v2596_v20 = vpop.xlane.xlu0 %2595 }
0x3663   :  { %v2601_v21 = vmul.f32 10.0, %v2599_v19  ;;  %v2600_v22 = vmul.f32 10.0, %v2596_v20 }
0x3665   :  { %v2603_v24 = vadd.f32 1e-15, %v2601_v21  ;;  %v2602_v25 = vadd.f32 1e-15, %v2600_v22 }
0x3667   :  { %3858 = vrcp.f32 %v2603_v24 }
0x3668   :  { %3860 = vrcp.f32 %v2602_v25 }
0x366d   :  { %v3859_v26 = vpop.eup %3858 }
0x366e   :  { %v3861_v27 = vpop.eup %3860  ;;  %v2607_v28 = vmul.f32 %v3859_v26, %v4147_v0 }
0x366f   :  { %v2606_v30 = vmul.f32 %v3861_v27, %v4143_v61 }
0x3670   :  { %v2609_v31 = vsel %vm179_vm7, %v2607_v28, 0.0 }
0x3671   :  { %v2608_v32 = vsel %vm175_vm6, %v2606_v30, 0.0 }
0x3672   :  { %v2610_v33 = vadd.f32 %v2609_v31, %v2608_v32 }
0x3674   :  { %v2611_v34 = vrot.slane %v2610_v33, 4 }
0x3676   :  { %v2612_v35 = vadd.f32 %v2611_v34, %v2610_v33 }
0x3678   :  { %v2613_v36 = vrot.slane %v2612_v35, 2 }
0x367a   :  { %v2614_v37 = vadd.f32 %v2613_v36, %v2612_v35 }
0x367c   :  { %v2615_v38 = vrot.slane %v2614_v37, 1 }
0x367e   :  { %v2616_v39 = vadd.f32 %v2615_v38, %v2614_v37 }
0x3680   :  { %v2617_v40 = vmul.f32 50.0, %v2616_v39 }
0x3682   :  { %v2618_v41 = vadd.f32 5e-15, %v2617_v40 }
0x3684   :  { %3862 = vrcp.f32 %v2618_v41 }
0x368a   :  { %v3863_v42 = vpop.eup %3862 }
0x368b   :  { %v2621_v43 = vmul.f32 %v3863_v42, %v4147_v0  ;;  %v2620_v44 = vmul.f32 %v3863_v42, %v4143_v61 }
0x368d   :  { %v2625_v45 = vsel %vm179_vm7, %v2621_v43, 0.0  ;;  %v2622_v46 = vsel %vm175_vm6, %v2620_v44, 0.0 }
0x368e   :  { %2626 = vadd.xlane.f32.xlu0 %v2625_v45  ;;  %2623 = vadd.xlane.f32.xlu2 %v2622_v46 }
0x3701   :  { %v2627_v47 = vpop.xlane.xlu0 %2626  ;;  %v2624_v48 = vpop.xlane.xlu2 %2623 }
0x3702   :  { %v2629_v49 = vmul.f32 10.0, %v2627_v47  ;;  %v2628_v50 = vmul.f32 10.0, %v2624_v48 }
0x3704   :  { %v2631_v51 = vadd.f32 1e-15, %v2629_v49  ;;  %v2630_v52 = vadd.f32 1e-15, %v2628_v50 }
0x3706   :  { %3864 = vrcp.f32 %v2631_v51 }
0x3707   :  { %3866 = vrcp.f32 %v2630_v52 }
0x370c   :  { %v3865_v53 = vpop.eup %3864 }
0x370d   :  { %v3867_v54 = vpop.eup %3866  ;;  %v2635_v55 = vmul.f32 %v3865_v53, %v4147_v0 }
0x370e   :  { %v2634_v56 = vmul.f32 %v3867_v54, %v4143_v61 }
0x370f   :  { %v2637_v57 = vsel %vm179_vm7, %v2635_v55, 0.0 }
0x3710   :  { %v2636_v58 = vsel %vm175_vm6, %v2634_v56, 0.0 }
0x3711   :  { %v2638_v59 = vadd.f32 %v2637_v57, %v2636_v58 }
0x3713   :  { %v2639_v60 = vrot.slane %v2638_v59, 4 }
0x3715   :  { %v2640_v62 = vadd.f32 %v2639_v60, %v2638_v59 }
0x3717   :  { %v2641_v63 = vrot.slane %v2640_v62, 2 }
0x3719   :  { %v2642_v1 = vadd.f32 %v2641_v63, %v2640_v62 }
0x371b   :  { %v2643_v2 = vrot.slane %v2642_v1, 1 }
0x371d   :  { %v2644_v3 = vadd.f32 %v2643_v2, %v2642_v1 }
0x371f   :  { %v2645_v4 = vmul.f32 50.0, %v2644_v3 }
0x3721   :  { %v2646_v5 = vadd.f32 5e-15, %v2645_v4 }
0x3723   :  { %3868 = vrcp.f32 %v2646_v5 }
0x3729   :  { %v3869_v6 = vpop.eup %3868 }
0x372a   :  { %v2649_v7 = vmul.f32 %v3869_v6, %v4147_v0  ;;  %v2648_v8 = vmul.f32 %v3869_v6, %v4143_v61 }
0x372c   :  { %v2653_v9 = vsel %vm179_vm7, %v2649_v7, 0.0  ;;  %v2650_v10 = vsel %vm175_vm6, %v2648_v8, 0.0 }
0x372d   :  { %2654 = vadd.xlane.f32.xlu2 %v2653_v9  ;;  %2651 = vadd.xlane.f32.xlu1 %v2650_v10 }
0x37a0   :  { %v2655_v11 = vpop.xlane.xlu2 %2654  ;;  %v2652_v13 = vpop.xlane.xlu1 %2651 }
0x37a1   :  { %v2657_v14 = vmul.f32 10.0, %v2655_v11  ;;  %v2656_v15 = vmul.f32 10.0, %v2652_v13 }
0x37a3   :  { %v2659_v16 = vadd.f32 1e-15, %v2657_v14  ;;  %v2658_v17 = vadd.f32 1e-15, %v2656_v15 }
0x37a5   :  { %3870 = vrcp.f32 %v2659_v16 }
0x37a6   :  { %3872 = vrcp.f32 %v2658_v17 }
0x37ab   :  { %v3871_v18 = vpop.eup %3870 }
0x37ac   :  { %v3873_v19 = vpop.eup %3872  ;;  %v2663_v20 = vmul.f32 %v3871_v18, %v4147_v0 }
0x37ad   :  { %v2662_v21 = vmul.f32 %v3873_v19, %v4143_v61 }
0x37ae   :  { %v2665_v22 = vsel %vm179_vm7, %v2663_v20, 0.0 }
0x37af   :  { %v2664_v24 = vsel %vm175_vm6, %v2662_v21, 0.0 }
0x37b0   :  { %v2666_v25 = vadd.f32 %v2665_v22, %v2664_v24 }
0x37b2   :  { %v2667_v26 = vrot.slane %v2666_v25, 4 }
0x37b4   :  { %v2668_v27 = vadd.f32 %v2667_v26, %v2666_v25 }
0x37b6   :  { %v2669_v28 = vrot.slane %v2668_v27, 2 }
0x37b8   :  { %v2670_v30 = vadd.f32 %v2669_v28, %v2668_v27 }
0x37ba   :  { %v2671_v31 = vrot.slane %v2670_v30, 1 }
0x37bc   :  { %v2672_v32 = vadd.f32 %v2671_v31, %v2670_v30 }
0x37be   :  { %v2673_v33 = vmul.f32 50.0, %v2672_v32 }
0x37c0   :  { %v2674_v34 = vadd.f32 5e-15, %v2673_v33 }
0x37c2   :  { %3874 = vrcp.f32 %v2674_v34 }
0x37c8   :  { %v3875_v35 = vpop.eup %3874 }
0x37c9   :  { %v2677_v36 = vmul.f32 %v3875_v35, %v4147_v0  ;;  %v2676_v37 = vmul.f32 %v3875_v35, %v4143_v61 }
0x37cb   :  { %v2681_v38 = vsel %vm179_vm7, %v2677_v36, 0.0  ;;  %v2678_v39 = vsel %vm175_vm6, %v2676_v37, 0.0 }
0x37cc   :  { %2682 = vadd.xlane.f32.xlu1 %v2681_v38  ;;  %2679 = vadd.xlane.f32.xlu0 %v2678_v39 }
0x383f   :  { %v2683_v40 = vpop.xlane.xlu1 %2682  ;;  %v2680_v41 = vpop.xlane.xlu0 %2679 }
0x3840   :  { %v2685_v42 = vmul.f32 10.0, %v2683_v40  ;;  %v2684_v43 = vmul.f32 10.0, %v2680_v41 }
0x3842   :  { %v2687_v44 = vadd.f32 1e-15, %v2685_v42  ;;  %v2686_v45 = vadd.f32 1e-15, %v2684_v43 }
0x3844   :  { %3876 = vrcp.f32 %v2687_v44 }
0x3845   :  { %3878 = vrcp.f32 %v2686_v45 }
0x384a   :  { %v3877_v46 = vpop.eup %3876 }
0x384b   :  { %v3879_v47 = vpop.eup %3878  ;;  %v2691_v48 = vmul.f32 %v3877_v46, %v4147_v0 }
0x384c   :  { %v2690_v49 = vmul.f32 %v3879_v47, %v4143_v61 }
0x384d   :  { %v2693_v50 = vsel %vm179_vm7, %v2691_v48, 0.0 }
0x384e   :  { %v2692_v51 = vsel %vm175_vm6, %v2690_v49, 0.0 }
0x384f   :  { %v2694_v52 = vadd.f32 %v2693_v50, %v2692_v51 }
0x3851   :  { %v2695_v53 = vrot.slane %v2694_v52, 4 }
0x3853   :  { %v2696_v54 = vadd.f32 %v2695_v53, %v2694_v52 }
0x3855   :  { %v2697_v55 = vrot.slane %v2696_v54, 2 }
0x3857   :  { %v2698_v56 = vadd.f32 %v2697_v55, %v2696_v54 }
0x3859   :  { %v2699_v57 = vrot.slane %v2698_v56, 1 }
0x385b   :  { %v2700_v58 = vadd.f32 %v2699_v57, %v2698_v56 }
0x385d   :  { %v2701_v59 = vmul.f32 50.0, %v2700_v58 }
0x385f   :  { %v2702_v60 = vadd.f32 5e-15, %v2701_v59 }
0x3861   :  { %3880 = vrcp.f32 %v2702_v60 }
0x3867   :  { %v3881_v62 = vpop.eup %3880 }
0x3868   :  { %v2705_v63 = vmul.f32 %v3881_v62, %v4147_v0  ;;  %v2704_v1 = vmul.f32 %v3881_v62, %v4143_v61 }
0x386a   :  { %v2709_v2 = vsel %vm179_vm7, %v2705_v63, 0.0  ;;  %v2706_v3 = vsel %vm175_vm6, %v2704_v1, 0.0 }
0x386b   :  { %2710 = vadd.xlane.f32.xlu0 %v2709_v2  ;;  %2707 = vadd.xlane.f32.xlu2 %v2706_v3 }
0x38de   :  { %v2711_v4 = vpop.xlane.xlu0 %2710  ;;  %v2708_v5 = vpop.xlane.xlu2 %2707 }
0x38df   :  { %v2713_v6 = vmul.f32 10.0, %v2711_v4  ;;  %v2712_v7 = vmul.f32 10.0, %v2708_v5 }
0x38e1   :  { %v2715_v8 = vadd.f32 1e-15, %v2713_v6  ;;  %v2714_v9 = vadd.f32 1e-15, %v2712_v7 }
0x38e3   :  { %3882 = vrcp.f32 %v2715_v8 }
0x38e4   :  { %3884 = vrcp.f32 %v2714_v9 }
0x38e9   :  { %v3883_v10 = vpop.eup %3882 }
0x38ea   :  { %v3885_v11 = vpop.eup %3884  ;;  %v2719_v13 = vmul.f32 %v3883_v10, %v4147_v0 }
0x38eb   :  { %v2718_v14 = vmul.f32 %v3885_v11, %v4143_v61 }
0x38ec   :  { %v2721_v15 = vsel %vm179_vm7, %v2719_v13, 0.0 }
0x38ed   :  { %v2720_v16 = vsel %vm175_vm6, %v2718_v14, 0.0 }
0x38ee   :  { %v2722_v17 = vadd.f32 %v2721_v15, %v2720_v16 }
0x38f0   :  { %v2723_v18 = vrot.slane %v2722_v17, 4 }
0x38f2   :  { %v2724_v19 = vadd.f32 %v2723_v18, %v2722_v17 }
0x38f4   :  { %v2725_v20 = vrot.slane %v2724_v19, 2 }
0x38f6   :  { %v2726_v21 = vadd.f32 %v2725_v20, %v2724_v19 }
0x38f8   :  { %v2727_v22 = vrot.slane %v2726_v21, 1 }
0x38fa   :  { %v2728_v24 = vadd.f32 %v2727_v22, %v2726_v21 }
0x38fc   :  { %v2729_v25 = vmul.f32 50.0, %v2728_v24 }
0x38fe   :  { %v2730_v26 = vadd.f32 5e-15, %v2729_v25 }
0x3900   :  { %3886 = vrcp.f32 %v2730_v26 }
0x3906   :  { %v3887_v27 = vpop.eup %3886 }
0x3907   :  { %v2733_v28 = vmul.f32 %v3887_v27, %v4147_v0  ;;  %v2732_v30 = vmul.f32 %v3887_v27, %v4143_v61 }
0x3909   :  { %v2737_v31 = vsel %vm179_vm7, %v2733_v28, 0.0  ;;  %v2734_v32 = vsel %vm175_vm6, %v2732_v30, 0.0 }
0x390a   :  { %2738 = vadd.xlane.f32.xlu2 %v2737_v31  ;;  %2735 = vadd.xlane.f32.xlu1 %v2734_v32 }
0x397d   :  { %v2739_v33 = vpop.xlane.xlu2 %2738  ;;  %v2736_v34 = vpop.xlane.xlu1 %2735 }
0x397e   :  { %v2741_v35 = vmul.f32 10.0, %v2739_v33  ;;  %v2740_v36 = vmul.f32 10.0, %v2736_v34 }
0x3980   :  { %v2743_v37 = vadd.f32 1e-15, %v2741_v35  ;;  %v2742_v38 = vadd.f32 1e-15, %v2740_v36 }
0x3982   :  { %3888 = vrcp.f32 %v2743_v37 }
0x3983   :  { %3890 = vrcp.f32 %v2742_v38 }
0x3988   :  { %v3889_v39 = vpop.eup %3888 }
0x3989   :  { %v3891_v40 = vpop.eup %3890  ;;  %v2747_v41 = vmul.f32 %v3889_v39, %v4147_v0 }
0x398a   :  { %v2746_v42 = vmul.f32 %v3891_v40, %v4143_v61 }
0x398b   :  { %v2749_v43 = vsel %vm179_vm7, %v2747_v41, 0.0 }
0x398c   :  { %v2748_v44 = vsel %vm175_vm6, %v2746_v42, 0.0 }
0x398d   :  { %v2750_v45 = vadd.f32 %v2749_v43, %v2748_v44 }
0x398f   :  { %v2751_v46 = vrot.slane %v2750_v45, 4 }
0x3991   :  { %v2752_v47 = vadd.f32 %v2751_v46, %v2750_v45 }
0x3993   :  { %v2753_v48 = vrot.slane %v2752_v47, 2 }
0x3995   :  { %v2754_v49 = vadd.f32 %v2753_v48, %v2752_v47 }
0x3997   :  { %v2755_v50 = vrot.slane %v2754_v49, 1 }
0x3999   :  { %v2756_v51 = vadd.f32 %v2755_v50, %v2754_v49 }
0x399b   :  { %v2757_v52 = vmul.f32 50.0, %v2756_v51 }
0x399d   :  { %v2758_v53 = vadd.f32 5e-15, %v2757_v52 }
0x399f   :  { %3892 = vrcp.f32 %v2758_v53 }
0x39a5   :  { %v3893_v54 = vpop.eup %3892 }
0x39a6   :  { %v2761_v55 = vmul.f32 %v3893_v54, %v4147_v0  ;;  %v2760_v56 = vmul.f32 %v3893_v54, %v4143_v61 }
0x39a8   :  { %v2765_v57 = vsel %vm179_vm7, %v2761_v55, 0.0  ;;  %v2762_v58 = vsel %vm175_vm6, %v2760_v56, 0.0 }
0x39a9   :  { %2766 = vadd.xlane.f32.xlu1 %v2765_v57  ;;  %2763 = vadd.xlane.f32.xlu0 %v2762_v58 }
0x3a1c   :  { %v2767_v59 = vpop.xlane.xlu1 %2766  ;;  %v2764_v60 = vpop.xlane.xlu0 %2763 }
0x3a1d   :  { %v2769_v62 = vmul.f32 10.0, %v2767_v59  ;;  %v2768_v63 = vmul.f32 10.0, %v2764_v60 }
0x3a1f   :  { %v2771_v1 = vadd.f32 1e-15, %v2769_v62  ;;  %v2770_v2 = vadd.f32 1e-15, %v2768_v63 }
0x3a21   :  { %3894 = vrcp.f32 %v2771_v1 }
0x3a22   :  { %3896 = vrcp.f32 %v2770_v2 }
0x3a27   :  { %v3895_v3 = vpop.eup %3894 }
0x3a28   :  { %v3897_v4 = vpop.eup %3896  ;;  %v2775_v5 = vmul.f32 %v3895_v3, %v4147_v0 }
0x3a29   :  { %v2774_v6 = vmul.f32 %v3897_v4, %v4143_v61 }
0x3a2a   :  { %v2777_v7 = vsel %vm179_vm7, %v2775_v5, 0.0 }
0x3a2b   :  { %v2776_v8 = vsel %vm175_vm6, %v2774_v6, 0.0 }
0x3a2c   :  { %v2778_v9 = vadd.f32 %v2777_v7, %v2776_v8 }
0x3a2e   :  { %v2779_v10 = vrot.slane %v2778_v9, 4 }
0x3a30   :  { %v2780_v11 = vadd.f32 %v2779_v10, %v2778_v9 }
0x3a32   :  { %v2781_v13 = vrot.slane %v2780_v11, 2 }
0x3a34   :  { %v2782_v14 = vadd.f32 %v2781_v13, %v2780_v11 }
0x3a36   :  { %v2783_v15 = vrot.slane %v2782_v14, 1 }
0x3a38   :  { %v2784_v16 = vadd.f32 %v2783_v15, %v2782_v14 }
0x3a3a   :  { %v2785_v17 = vmul.f32 50.0, %v2784_v16 }
0x3a3c   :  { %v2786_v18 = vadd.f32 5e-15, %v2785_v17 }
0x3a3e   :  { %3898 = vrcp.f32 %v2786_v18 }
0x3a44   :  { %v3899_v19 = vpop.eup %3898 }
0x3a45   :  { %v2789_v20 = vmul.f32 %v3899_v19, %v4147_v0  ;;  %v2788_v21 = vmul.f32 %v3899_v19, %v4143_v61 }
0x3a47   :  { %v2793_v22 = vsel %vm179_vm7, %v2789_v20, 0.0  ;;  %v2790_v24 = vsel %vm175_vm6, %v2788_v21, 0.0 }
0x3a48   :  { %2794 = vadd.xlane.f32.xlu0 %v2793_v22  ;;  %2791 = vadd.xlane.f32.xlu2 %v2790_v24 }
0x3abb   :  { %v2795_v25 = vpop.xlane.xlu0 %2794  ;;  %v2792_v26 = vpop.xlane.xlu2 %2791 }
0x3abc   :  { %v2797_v27 = vmul.f32 10.0, %v2795_v25  ;;  %v2796_v28 = vmul.f32 10.0, %v2792_v26 }
0x3abe   :  { %v2799_v30 = vadd.f32 1e-15, %v2797_v27  ;;  %v2798_v31 = vadd.f32 1e-15, %v2796_v28 }
0x3ac0   :  { %3900 = vrcp.f32 %v2799_v30 }
0x3ac1   :  { %3902 = vrcp.f32 %v2798_v31 }
0x3ac6   :  { %v3901_v32 = vpop.eup %3900 }
0x3ac7   :  { %v3903_v33 = vpop.eup %3902  ;;  %v2803_v34 = vmul.f32 %v3901_v32, %v4147_v0 }
0x3ac8   :  { %v2802_v35 = vmul.f32 %v3903_v33, %v4143_v61 }
0x3ac9   :  { %v2805_v36 = vsel %vm179_vm7, %v2803_v34, 0.0 }
0x3aca   :  { %v2804_v37 = vsel %vm175_vm6, %v2802_v35, 0.0 }
0x3acb   :  { %v2806_v38 = vadd.f32 %v2805_v36, %v2804_v37 }
0x3acd   :  { %v2807_v39 = vrot.slane %v2806_v38, 4 }
0x3acf   :  { %v2808_v40 = vadd.f32 %v2807_v39, %v2806_v38 }
0x3ad1   :  { %v2809_v41 = vrot.slane %v2808_v40, 2 }
0x3ad3   :  { %v2810_v42 = vadd.f32 %v2809_v41, %v2808_v40 }
0x3ad5   :  { %v2811_v43 = vrot.slane %v2810_v42, 1 }
0x3ad7   :  { %v2812_v44 = vadd.f32 %v2811_v43, %v2810_v42 }
0x3ad9   :  { %v2813_v45 = vmul.f32 50.0, %v2812_v44 }
0x3adb   :  { %v2814_v46 = vadd.f32 5e-15, %v2813_v45 }
0x3add   :  { %3904 = vrcp.f32 %v2814_v46 }
0x3ae3   :  { %v3905_v47 = vpop.eup %3904 }
0x3ae4   :  { %v2817_v48 = vmul.f32 %v3905_v47, %v4147_v0  ;;  %v2816_v49 = vmul.f32 %v3905_v47, %v4143_v61 }
0x3ae6   :  { %v2821_v50 = vsel %vm179_vm7, %v2817_v48, 0.0  ;;  %v2818_v51 = vsel %vm175_vm6, %v2816_v49, 0.0 }
0x3ae7   :  { %2822 = vadd.xlane.f32.xlu2 %v2821_v50  ;;  %2819 = vadd.xlane.f32.xlu1 %v2818_v51 }
0x3b5a   :  { %v2823_v52 = vpop.xlane.xlu2 %2822  ;;  %v2820_v53 = vpop.xlane.xlu1 %2819 }
0x3b5b   :  { %v2825_v54 = vmul.f32 10.0, %v2823_v52  ;;  %v2824_v55 = vmul.f32 10.0, %v2820_v53 }
0x3b5d   :  { %v2827_v56 = vadd.f32 1e-15, %v2825_v54  ;;  %v2826_v57 = vadd.f32 1e-15, %v2824_v55 }
0x3b5f   :  { %3906 = vrcp.f32 %v2827_v56 }
0x3b60   :  { %3908 = vrcp.f32 %v2826_v57 }
0x3b65   :  { %v3907_v58 = vpop.eup %3906 }
0x3b66   :  { %v3909_v59 = vpop.eup %3908  ;;  %v2831_v60 = vmul.f32 %v3907_v58, %v4147_v0 }
0x3b67   :  { %v2830_v62 = vmul.f32 %v3909_v59, %v4143_v61 }
0x3b68   :  { %v2833_v63 = vsel %vm179_vm7, %v2831_v60, 0.0 }
0x3b69   :  { %v2832_v1 = vsel %vm175_vm6, %v2830_v62, 0.0 }
0x3b6a   :  { %v2834_v2 = vadd.f32 %v2833_v63, %v2832_v1 }
0x3b6c   :  { %v2835_v3 = vrot.slane %v2834_v2, 4 }
0x3b6e   :  { %v2836_v4 = vadd.f32 %v2835_v3, %v2834_v2 }
0x3b70   :  { %v2837_v5 = vrot.slane %v2836_v4, 2 }
0x3b72   :  { %v2838_v6 = vadd.f32 %v2837_v5, %v2836_v4 }
0x3b74   :  { %v2839_v7 = vrot.slane %v2838_v6, 1 }
0x3b76   :  { %v2840_v8 = vadd.f32 %v2839_v7, %v2838_v6 }
0x3b78   :  { %v2841_v9 = vmul.f32 50.0, %v2840_v8 }
0x3b7a   :  { %v2842_v10 = vadd.f32 5e-15, %v2841_v9 }
0x3b7c   :  { %3910 = vrcp.f32 %v2842_v10 }
0x3b82   :  { %v3911_v11 = vpop.eup %3910 }
0x3b83   :  { %v2845_v13 = vmul.f32 %v3911_v11, %v4147_v0  ;;  %v2844_v14 = vmul.f32 %v3911_v11, %v4143_v61 }
0x3b85   :  { %v2849_v15 = vsel %vm179_vm7, %v2845_v13, 0.0  ;;  %v2846_v16 = vsel %vm175_vm6, %v2844_v14, 0.0 }
0x3b86   :  { %2850 = vadd.xlane.f32.xlu1 %v2849_v15  ;;  %2847 = vadd.xlane.f32.xlu0 %v2846_v16 }
0x3bf9   :  { %v2851_v17 = vpop.xlane.xlu1 %2850  ;;  %v2848_v18 = vpop.xlane.xlu0 %2847 }
0x3bfa   :  { %v2853_v19 = vmul.f32 10.0, %v2851_v17  ;;  %v2852_v20 = vmul.f32 10.0, %v2848_v18 }
0x3bfc   :  { %v2855_v21 = vadd.f32 1e-15, %v2853_v19  ;;  %v2854_v22 = vadd.f32 1e-15, %v2852_v20 }
0x3bfe   :  { %3912 = vrcp.f32 %v2855_v21 }
0x3bff   :  { %3914 = vrcp.f32 %v2854_v22 }
0x3c04   :  { %v3913_v24 = vpop.eup %3912 }
0x3c05   :  { %v3915_v25 = vpop.eup %3914  ;;  %v2859_v26 = vmul.f32 %v3913_v24, %v4147_v0 }
0x3c06   :  { %v2858_v27 = vmul.f32 %v3915_v25, %v4143_v61 }
0x3c07   :  { %v2861_v28 = vsel %vm179_vm7, %v2859_v26, 0.0 }
0x3c08   :  { %v2860_v30 = vsel %vm175_vm6, %v2858_v27, 0.0 }
0x3c09   :  { %v2862_v31 = vadd.f32 %v2861_v28, %v2860_v30 }
0x3c0b   :  { %v2863_v32 = vrot.slane %v2862_v31, 4 }
0x3c0d   :  { %v2864_v33 = vadd.f32 %v2863_v32, %v2862_v31 }
0x3c0f   :  { %v2865_v34 = vrot.slane %v2864_v33, 2 }
0x3c11   :  { %v2866_v35 = vadd.f32 %v2865_v34, %v2864_v33 }
0x3c13   :  { %v2867_v36 = vrot.slane %v2866_v35, 1 }
0x3c15   :  { %v2868_v37 = vadd.f32 %v2867_v36, %v2866_v35 }
0x3c17   :  { %v2869_v38 = vmul.f32 50.0, %v2868_v37 }
0x3c19   :  { %v2870_v39 = vadd.f32 5e-15, %v2869_v38 }
0x3c1b   :  { %3916 = vrcp.f32 %v2870_v39 }
0x3c21   :  { %v3917_v40 = vpop.eup %3916 }
0x3c22   :  { %v2873_v41 = vmul.f32 %v3917_v40, %v4147_v0  ;;  %v2872_v42 = vmul.f32 %v3917_v40, %v4143_v61 }
0x3c24   :  { %v2877_v43 = vsel %vm179_vm7, %v2873_v41, 0.0  ;;  %v2874_v44 = vsel %vm175_vm6, %v2872_v42, 0.0 }
0x3c25   :  { %2878 = vadd.xlane.f32.xlu0 %v2877_v43  ;;  %2875 = vadd.xlane.f32.xlu2 %v2874_v44 }
0x3c98   :  { %v2879_v45 = vpop.xlane.xlu0 %2878  ;;  %v2876_v46 = vpop.xlane.xlu2 %2875 }
0x3c99   :  { %v2881_v47 = vmul.f32 10.0, %v2879_v45  ;;  %v2880_v48 = vmul.f32 10.0, %v2876_v46 }
0x3c9b   :  { %v2883_v49 = vadd.f32 1e-15, %v2881_v47  ;;  %v2882_v50 = vadd.f32 1e-15, %v2880_v48 }
0x3c9d   :  { %3918 = vrcp.f32 %v2883_v49 }
0x3c9e   :  { %3920 = vrcp.f32 %v2882_v50 }
0x3ca3   :  { %v3919_v51 = vpop.eup %3918 }
0x3ca4   :  { %v3921_v52 = vpop.eup %3920  ;;  %v2887_v53 = vmul.f32 %v3919_v51, %v4147_v0 }
0x3ca5   :  { %v2886_v54 = vmul.f32 %v3921_v52, %v4143_v61 }
0x3ca6   :  { %v2889_v55 = vsel %vm179_vm7, %v2887_v53, 0.0 }
0x3ca7   :  { %v2888_v56 = vsel %vm175_vm6, %v2886_v54, 0.0 }
0x3ca8   :  { %v2890_v57 = vadd.f32 %v2889_v55, %v2888_v56 }
0x3caa   :  { %v2891_v58 = vrot.slane %v2890_v57, 4 }
0x3cac   :  { %v2892_v59 = vadd.f32 %v2891_v58, %v2890_v57 }
0x3cae   :  { %v2893_v60 = vrot.slane %v2892_v59, 2 }
0x3cb0   :  { %v2894_v62 = vadd.f32 %v2893_v60, %v2892_v59 }
0x3cb2   :  { %v2895_v63 = vrot.slane %v2894_v62, 1 }
0x3cb4   :  { %v2896_v1 = vadd.f32 %v2895_v63, %v2894_v62 }
0x3cb6   :  { %v2897_v2 = vmul.f32 50.0, %v2896_v1 }
0x3cb8   :  { %v2898_v3 = vadd.f32 5e-15, %v2897_v2 }
0x3cba   :  { %3922 = vrcp.f32 %v2898_v3 }
0x3cc0   :  { %v3923_v4 = vpop.eup %3922 }
0x3cc1   :  { %v2901_v5 = vmul.f32 %v3923_v4, %v4147_v0  ;;  %v2900_v6 = vmul.f32 %v3923_v4, %v4143_v61 }
0x3cc3   :  { %v2905_v7 = vsel %vm179_vm7, %v2901_v5, 0.0  ;;  %v2902_v8 = vsel %vm175_vm6, %v2900_v6, 0.0 }
0x3cc4   :  { %2906 = vadd.xlane.f32.xlu2 %v2905_v7  ;;  %2903 = vadd.xlane.f32.xlu1 %v2902_v8 }
0x3d37   :  { %v2907_v9 = vpop.xlane.xlu2 %2906  ;;  %v2904_v10 = vpop.xlane.xlu1 %2903 }
0x3d38   :  { %v2909_v11 = vmul.f32 10.0, %v2907_v9  ;;  %v2908_v13 = vmul.f32 10.0, %v2904_v10 }
0x3d3a   :  { %v2911_v14 = vadd.f32 1e-15, %v2909_v11  ;;  %v2910_v15 = vadd.f32 1e-15, %v2908_v13 }
0x3d3c   :  { %3924 = vrcp.f32 %v2911_v14 }
0x3d3d   :  { %3926 = vrcp.f32 %v2910_v15 }
0x3d42   :  { %v3925_v16 = vpop.eup %3924 }
0x3d43   :  { %v3927_v17 = vpop.eup %3926  ;;  %v2915_v18 = vmul.f32 %v3925_v16, %v4147_v0 }
0x3d44   :  { %v2914_v19 = vmul.f32 %v3927_v17, %v4143_v61 }
0x3d45   :  { %v2917_v20 = vsel %vm179_vm7, %v2915_v18, 0.0 }
0x3d46   :  { %v2916_v21 = vsel %vm175_vm6, %v2914_v19, 0.0 }
0x3d47   :  { %v2918_v22 = vadd.f32 %v2917_v20, %v2916_v21 }
0x3d49   :  { %v2919_v24 = vrot.slane %v2918_v22, 4 }
0x3d4b   :  { %v2920_v25 = vadd.f32 %v2919_v24, %v2918_v22 }
0x3d4d   :  { %v2921_v26 = vrot.slane %v2920_v25, 2 }
0x3d4f   :  { %v2922_v27 = vadd.f32 %v2921_v26, %v2920_v25 }
0x3d51   :  { %v2923_v28 = vrot.slane %v2922_v27, 1 }
0x3d53   :  { %v2924_v30 = vadd.f32 %v2923_v28, %v2922_v27 }
0x3d55   :  { %v2925_v31 = vmul.f32 50.0, %v2924_v30 }
0x3d57   :  { %v2926_v32 = vadd.f32 5e-15, %v2925_v31 }
0x3d59   :  { %3928 = vrcp.f32 %v2926_v32 }
0x3d5f   :  { %v3929_v33 = vpop.eup %3928 }
0x3d60   :  { %v2929_v34 = vmul.f32 %v3929_v33, %v4147_v0  ;;  %v2928_v35 = vmul.f32 %v3929_v33, %v4143_v61 }
0x3d62   :  { %v2933_v36 = vsel %vm179_vm7, %v2929_v34, 0.0  ;;  %v2930_v37 = vsel %vm175_vm6, %v2928_v35, 0.0 }
0x3d63   :  { %2934 = vadd.xlane.f32.xlu1 %v2933_v36  ;;  %2931 = vadd.xlane.f32.xlu0 %v2930_v37 }
0x3dd6   :  { %v2935_v38 = vpop.xlane.xlu1 %2934  ;;  %v2932_v39 = vpop.xlane.xlu0 %2931 }
0x3dd7   :  { %v2937_v40 = vmul.f32 10.0, %v2935_v38  ;;  %v2936_v41 = vmul.f32 10.0, %v2932_v39 }
0x3dd9   :  { %v2939_v42 = vadd.f32 1e-15, %v2937_v40  ;;  %v2938_v43 = vadd.f32 1e-15, %v2936_v41 }
0x3ddb   :  { %3930 = vrcp.f32 %v2939_v42 }
0x3ddc   :  { %3932 = vrcp.f32 %v2938_v43 }
0x3de1   :  { %v3931_v44 = vpop.eup %3930 }
0x3de2   :  { %v3933_v45 = vpop.eup %3932  ;;  %v2943_v46 = vmul.f32 %v3931_v44, %v4147_v0 }
0x3de3   :  { %v2942_v47 = vmul.f32 %v3933_v45, %v4143_v61 }
0x3de4   :  { %v2945_v48 = vsel %vm179_vm7, %v2943_v46, 0.0 }
0x3de5   :  { %v2944_v49 = vsel %vm175_vm6, %v2942_v47, 0.0 }
0x3de6   :  { %v2946_v50 = vadd.f32 %v2945_v48, %v2944_v49 }
0x3de8   :  { %v2947_v51 = vrot.slane %v2946_v50, 4 }
0x3dea   :  { %v2948_v52 = vadd.f32 %v2947_v51, %v2946_v50 }
0x3dec   :  { %v2949_v53 = vrot.slane %v2948_v52, 2 }
0x3dee   :  { %v2950_v54 = vadd.f32 %v2949_v53, %v2948_v52 }
0x3df0   :  { %v2951_v55 = vrot.slane %v2950_v54, 1 }
0x3df2   :  { %v2952_v56 = vadd.f32 %v2951_v55, %v2950_v54 }
0x3df4   :  { %v2953_v57 = vmul.f32 50.0, %v2952_v56 }
0x3df6   :  { %v2954_v58 = vadd.f32 5e-15, %v2953_v57 }
0x3df8   :  { %3934 = vrcp.f32 %v2954_v58 }
0x3dfe   :  { %v3935_v59 = vpop.eup %3934 }
0x3dff   :  { %v2957_v60 = vmul.f32 %v3935_v59, %v4147_v0  ;;  %v2956_v62 = vmul.f32 %v3935_v59, %v4143_v61 }
0x3e01   :  { %v2961_v63 = vsel %vm179_vm7, %v2957_v60, 0.0  ;;  %v2958_v1 = vsel %vm175_vm6, %v2956_v62, 0.0 }
0x3e02   :  { %2962 = vadd.xlane.f32.xlu0 %v2961_v63  ;;  %2959 = vadd.xlane.f32.xlu2 %v2958_v1 }
0x3e75   :  { %v2963_v2 = vpop.xlane.xlu0 %2962  ;;  %v2960_v3 = vpop.xlane.xlu2 %2959 }
0x3e76   :  { %v2965_v4 = vmul.f32 10.0, %v2963_v2  ;;  %v2964_v5 = vmul.f32 10.0, %v2960_v3 }
0x3e78   :  { %v2967_v6 = vadd.f32 1e-15, %v2965_v4  ;;  %v2966_v7 = vadd.f32 1e-15, %v2964_v5 }
0x3e7a   :  { %3936 = vrcp.f32 %v2967_v6 }
0x3e7b   :  { %3938 = vrcp.f32 %v2966_v7 }
0x3e80   :  { %v3937_v8 = vpop.eup %3936 }
0x3e81   :  { %v3939_v9 = vpop.eup %3938  ;;  %v2971_v10 = vmul.f32 %v3937_v8, %v4147_v0 }
0x3e82   :  { %v2970_v11 = vmul.f32 %v3939_v9, %v4143_v61 }
0x3e83   :  { %v2973_v13 = vsel %vm179_vm7, %v2971_v10, 0.0 }
0x3e84   :  { %v2972_v14 = vsel %vm175_vm6, %v2970_v11, 0.0 }
0x3e85   :  { %v2974_v15 = vadd.f32 %v2973_v13, %v2972_v14 }
0x3e87   :  { %v2975_v16 = vrot.slane %v2974_v15, 4 }
0x3e89   :  { %v2976_v17 = vadd.f32 %v2975_v16, %v2974_v15 }
0x3e8b   :  { %v2977_v18 = vrot.slane %v2976_v17, 2 }
0x3e8d   :  { %v2978_v19 = vadd.f32 %v2977_v18, %v2976_v17 }
0x3e8f   :  { %v2979_v20 = vrot.slane %v2978_v19, 1 }
0x3e91   :  { %v2980_v21 = vadd.f32 %v2979_v20, %v2978_v19 }
0x3e93   :  { %v2981_v22 = vmul.f32 50.0, %v2980_v21 }
0x3e95   :  { %v2982_v24 = vadd.f32 5e-15, %v2981_v22 }
0x3e97   :  { %3940 = vrcp.f32 %v2982_v24 }
0x3e9d   :  { %v3941_v25 = vpop.eup %3940 }
0x3e9e   :  { %v2985_v26 = vmul.f32 %v3941_v25, %v4147_v0  ;;  %v2984_v27 = vmul.f32 %v3941_v25, %v4143_v61 }
0x3ea0   :  { %v2989_v28 = vsel %vm179_vm7, %v2985_v26, 0.0  ;;  %v2986_v30 = vsel %vm175_vm6, %v2984_v27, 0.0 }
0x3ea1   :  { %2990 = vadd.xlane.f32.xlu2 %v2989_v28  ;;  %2987 = vadd.xlane.f32.xlu1 %v2986_v30 }
0x3f14   :  { %v2991_v31 = vpop.xlane.xlu2 %2990  ;;  %v2988_v32 = vpop.xlane.xlu1 %2987 }
0x3f15   :  { %v2993_v33 = vmul.f32 10.0, %v2991_v31  ;;  %v2992_v34 = vmul.f32 10.0, %v2988_v32 }
0x3f17   :  { %v2995_v35 = vadd.f32 1e-15, %v2993_v33  ;;  %v2994_v36 = vadd.f32 1e-15, %v2992_v34 }
0x3f19   :  { %3942 = vrcp.f32 %v2995_v35 }
0x3f1a   :  { %3944 = vrcp.f32 %v2994_v36 }
0x3f1f   :  { %v3943_v37 = vpop.eup %3942 }
0x3f20   :  { %v3945_v38 = vpop.eup %3944  ;;  %v2999_v39 = vmul.f32 %v3943_v37, %v4147_v0 }
0x3f21   :  { %v2998_v40 = vmul.f32 %v3945_v38, %v4143_v61 }
0x3f22   :  { %v3001_v41 = vsel %vm179_vm7, %v2999_v39, 0.0 }
0x3f23   :  { %v3000_v42 = vsel %vm175_vm6, %v2998_v40, 0.0 }
0x3f24   :  { %v3002_v43 = vadd.f32 %v3001_v41, %v3000_v42 }
0x3f26   :  { %v3003_v44 = vrot.slane %v3002_v43, 4 }
0x3f28   :  { %v3004_v45 = vadd.f32 %v3003_v44, %v3002_v43 }
0x3f2a   :  { %v3005_v46 = vrot.slane %v3004_v45, 2 }
0x3f2c   :  { %v3006_v47 = vadd.f32 %v3005_v46, %v3004_v45 }
0x3f2e   :  { %v3007_v48 = vrot.slane %v3006_v47, 1 }
0x3f30   :  { %v3008_v49 = vadd.f32 %v3007_v48, %v3006_v47 }
0x3f32   :  { %v3009_v50 = vmul.f32 50.0, %v3008_v49 }
0x3f34   :  { %v3010_v51 = vadd.f32 5e-15, %v3009_v50 }
0x3f36   :  { %3946 = vrcp.f32 %v3010_v51 }
0x3f3c   :  { %v3947_v52 = vpop.eup %3946 }
0x3f3d   :  { %v3013_v53 = vmul.f32 %v3947_v52, %v4147_v0  ;;  %v3012_v54 = vmul.f32 %v3947_v52, %v4143_v61 }
0x3f3f   :  { %v3017_v55 = vsel %vm179_vm7, %v3013_v53, 0.0  ;;  %v3014_v56 = vsel %vm175_vm6, %v3012_v54, 0.0 }
0x3f40   :  { %3018 = vadd.xlane.f32.xlu1 %v3017_v55  ;;  %3015 = vadd.xlane.f32.xlu0 %v3014_v56 }
0x3fb3   :  { %v3019_v57 = vpop.xlane.xlu1 %3018  ;;  %v3016_v58 = vpop.xlane.xlu0 %3015 }
0x3fb4   :  { %v3021_v59 = vmul.f32 10.0, %v3019_v57  ;;  %v3020_v60 = vmul.f32 10.0, %v3016_v58 }
0x3fb6   :  { %v3023_v62 = vadd.f32 1e-15, %v3021_v59  ;;  %v3022_v63 = vadd.f32 1e-15, %v3020_v60 }
0x3fb8   :  { %3948 = vrcp.f32 %v3023_v62 }
0x3fb9   :  { %3950 = vrcp.f32 %v3022_v63 }
0x3fbe   :  { %v3949_v1 = vpop.eup %3948 }
0x3fbf   :  { %v3951_v2 = vpop.eup %3950  ;;  %v3027_v3 = vmul.f32 %v3949_v1, %v4147_v0 }
0x3fc0   :  { %v3026_v4 = vmul.f32 %v3951_v2, %v4143_v61 }
0x3fc1   :  { %v3029_v5 = vsel %vm179_vm7, %v3027_v3, 0.0 }
0x3fc2   :  { %v3028_v6 = vsel %vm175_vm6, %v3026_v4, 0.0 }
0x3fc3   :  { %v3030_v7 = vadd.f32 %v3029_v5, %v3028_v6 }
0x3fc5   :  { %v3031_v8 = vrot.slane %v3030_v7, 4 }
0x3fc7   :  { %v3032_v9 = vadd.f32 %v3031_v8, %v3030_v7 }
0x3fc9   :  { %v3033_v10 = vrot.slane %v3032_v9, 2 }
0x3fcb   :  { %v3034_v11 = vadd.f32 %v3033_v10, %v3032_v9 }
0x3fcd   :  { %v3035_v13 = vrot.slane %v3034_v11, 1 }
0x3fcf   :  { %v3036_v14 = vadd.f32 %v3035_v13, %v3034_v11 }
0x3fd1   :  { %v3037_v15 = vmul.f32 50.0, %v3036_v14 }
0x3fd3   :  { %v3038_v16 = vadd.f32 5e-15, %v3037_v15 }
0x3fd5   :  { %3952 = vrcp.f32 %v3038_v16 }
0x3fdb   :  { %v3953_v17 = vpop.eup %3952 }
0x3fdc   :  { %v3041_v18 = vmul.f32 %v3953_v17, %v4147_v0  ;;  %v3040_v19 = vmul.f32 %v3953_v17, %v4143_v61 }
0x3fde   :  { %v3045_v20 = vsel %vm179_vm7, %v3041_v18, 0.0  ;;  %v3042_v21 = vsel %vm175_vm6, %v3040_v19, 0.0 }
0x3fdf   :  { %3046 = vadd.xlane.f32.xlu0 %v3045_v20  ;;  %3043 = vadd.xlane.f32.xlu2 %v3042_v21 }
0x4052   :  { %v3047_v22 = vpop.xlane.xlu0 %3046  ;;  %v3044_v24 = vpop.xlane.xlu2 %3043 }
0x4053   :  { %v3049_v25 = vmul.f32 10.0, %v3047_v22  ;;  %v3048_v26 = vmul.f32 10.0, %v3044_v24 }
0x4055   :  { %v3051_v27 = vadd.f32 1e-15, %v3049_v25  ;;  %v3050_v28 = vadd.f32 1e-15, %v3048_v26 }
0x4057   :  { %3954 = vrcp.f32 %v3051_v27 }
0x4058   :  { %3956 = vrcp.f32 %v3050_v28 }
0x405d   :  { %v3955_v30 = vpop.eup %3954 }
0x405e   :  { %v3957_v31 = vpop.eup %3956  ;;  %v3055_v32 = vmul.f32 %v3955_v30, %v4147_v0 }
0x405f   :  { %v3054_v33 = vmul.f32 %v3957_v31, %v4143_v61 }
0x4060   :  { %v3057_v34 = vsel %vm179_vm7, %v3055_v32, 0.0 }
0x4061   :  { %v3056_v35 = vsel %vm175_vm6, %v3054_v33, 0.0 }
0x4062   :  { %v3058_v36 = vadd.f32 %v3057_v34, %v3056_v35 }
0x4064   :  { %v3059_v37 = vrot.slane %v3058_v36, 4 }
0x4066   :  { %v3060_v38 = vadd.f32 %v3059_v37, %v3058_v36 }
0x4068   :  { %v3061_v39 = vrot.slane %v3060_v38, 2 }
0x406a   :  { %v3062_v40 = vadd.f32 %v3061_v39, %v3060_v38 }
0x406c   :  { %v3063_v41 = vrot.slane %v3062_v40, 1 }
0x406e   :  { %v3064_v42 = vadd.f32 %v3063_v41, %v3062_v40 }
0x4070   :  { %v3065_v43 = vmul.f32 50.0, %v3064_v42 }
0x4072   :  { %v3066_v44 = vadd.f32 5e-15, %v3065_v43 }
0x4074   :  { %3958 = vrcp.f32 %v3066_v44 }
0x407a   :  { %v3959_v45 = vpop.eup %3958 }
0x407b   :  { %v3069_v46 = vmul.f32 %v3959_v45, %v4147_v0  ;;  %v3068_v47 = vmul.f32 %v3959_v45, %v4143_v61 }
0x407d   :  { %v3073_v48 = vsel %vm179_vm7, %v3069_v46, 0.0  ;;  %v3070_v49 = vsel %vm175_vm6, %v3068_v47, 0.0 }
0x407e   :  { %3074 = vadd.xlane.f32.xlu2 %v3073_v48  ;;  %3071 = vadd.xlane.f32.xlu1 %v3070_v49 }
0x40f1   :  { %v3075_v50 = vpop.xlane.xlu2 %3074  ;;  %v3072_v51 = vpop.xlane.xlu1 %3071 }
0x40f2   :  { %v3077_v52 = vmul.f32 10.0, %v3075_v50  ;;  %v3076_v53 = vmul.f32 10.0, %v3072_v51 }
0x40f4   :  { %v3079_v54 = vadd.f32 1e-15, %v3077_v52  ;;  %v3078_v55 = vadd.f32 1e-15, %v3076_v53 }
0x40f6   :  { %3960 = vrcp.f32 %v3079_v54 }
0x40f7   :  { %3962 = vrcp.f32 %v3078_v55 }
0x40fc   :  { %v3961_v56 = vpop.eup %3960 }
0x40fd   :  { %v3963_v57 = vpop.eup %3962  ;;  %v3083_v58 = vmul.f32 %v3961_v56, %v4147_v0 }
0x40fe   :  { %v3082_v59 = vmul.f32 %v3963_v57, %v4143_v61 }
0x40ff   :  { %v3085_v60 = vsel %vm179_vm7, %v3083_v58, 0.0 }
0x4100   :  { %v3084_v62 = vsel %vm175_vm6, %v3082_v59, 0.0 }
0x4101   :  { %v3086_v63 = vadd.f32 %v3085_v60, %v3084_v62 }
0x4103   :  { %v3087_v1 = vrot.slane %v3086_v63, 4 }
0x4105   :  { %v3088_v2 = vadd.f32 %v3087_v1, %v3086_v63 }
0x4107   :  { %v3089_v3 = vrot.slane %v3088_v2, 2 }
0x4109   :  { %v3090_v4 = vadd.f32 %v3089_v3, %v3088_v2 }
0x410b   :  { %v3091_v5 = vrot.slane %v3090_v4, 1 }
0x410d   :  { %v3092_v6 = vadd.f32 %v3091_v5, %v3090_v4 }
0x410f   :  { %v3093_v7 = vmul.f32 50.0, %v3092_v6 }
0x4111   :  { %v3094_v8 = vadd.f32 5e-15, %v3093_v7 }
0x4113   :  { %3964 = vrcp.f32 %v3094_v8 }
0x4119   :  { %v3965_v9 = vpop.eup %3964 }
0x411a   :  { %v3097_v10 = vmul.f32 %v3965_v9, %v4147_v0  ;;  %v3096_v11 = vmul.f32 %v3965_v9, %v4143_v61 }
0x411c   :  { %v3101_v13 = vsel %vm179_vm7, %v3097_v10, 0.0  ;;  %v3098_v14 = vsel %vm175_vm6, %v3096_v11, 0.0 }
0x411d   :  { %3102 = vadd.xlane.f32.xlu1 %v3101_v13  ;;  %3099 = vadd.xlane.f32.xlu0 %v3098_v14 }
0x4190   :  { %v3103_v15 = vpop.xlane.xlu1 %3102  ;;  %v3100_v16 = vpop.xlane.xlu0 %3099 }
0x4191   :  { %v3105_v17 = vadd.f32 1e-16, %v3103_v15  ;;  %v3104_v18 = vadd.f32 1e-16, %v3100_v16 }
0x4193   :  { %3966 = vrcp.f32 %v3105_v17  ;;  %v3132_v25 = vand.u32 2147483648, %v3105_v17  ;;  %v3130_v28 = vand.u32 2147483647, %v3105_v17  ;;  %v3117_v30 = vand.u32 2147483648, %v3104_v18 }
0x4194   :  { %3968 = vrcp.f32 %v3104_v18  ;;  %v3115_v32 = vand.u32 2147483647, %v3104_v18  ;;  %vm3126_vm8 = vweird.f32 %v3105_v17  ;;  %vm3111_vm10 = vweird.f32 %v3104_v18 }
0x4195   :  { %v3133_v34 = vor.u32 1.1754944e-38, %v3132_v25  ;;  %vm3131_vm11 = vcmp.eq.f32.partialorder %v3130_v28, 8.507059e+37  ;;  %v3118_v37 = vor.u32 1.1754944e-38, %v3117_v30 }
0x4196   :  { %vm3116_vm13 = vcmp.eq.f32.partialorder %v3115_v32, 8.507059e+37 }
0x4199   :  { %v3967_v19 = vpop.eup %3966 }
0x419a   :  { %v3969_v20 = vpop.eup %3968  ;;  %v3122_v21 = vmul.f32 %v3967_v19, %v3105_v17  ;;  %vm3127_vm4 = vweird.f32 %v3967_v19 }
0x419b   :  { %v3107_v22 = vmul.f32 %v3969_v20, %v3104_v18  ;;  %vm3112_vm5 = vweird.f32 %v3969_v20  ;;  %vm3128_vm9 = vmor %vm3126_vm8, %vm3127_vm4 }
0x419c   :  { %v3123_v24 = vsub.f32 1.0, %v3122_v21  ;;  %vm3113_vm12 = vmor %vm3111_vm10, %vm3112_vm5 }
0x419d   :  { %v3108_v26 = vsub.f32 1.0, %v3107_v22 }
0x419e   :  { %v3124_v27 = vmul.f32 %v3967_v19, %v3123_v24 }
0x419f   :  { %v3109_v31 = vmul.f32 %v3969_v20, %v3108_v26 }
0x41a0   :  { %v3125_v33 = vadd.f32 %v3967_v19, %v3124_v27 }
0x41a1   :  { %v3110_v35 = vadd.f32 %v3969_v20, %v3109_v31 }
0x41a2   :  { %v3129_v36 = vsel %vm3128_vm9, %v3967_v19, %v3125_v33 }
0x41a3   :  { %v3134_v38 = vsel %vm3131_vm11, %v3133_v34, %v3129_v36  ;;  %v3114_v39 = vsel %vm3113_vm12, %v3969_v20, %v3110_v35 }
0x41a4   :  { %v3135_v60 = vmul.f32 0.1, %v3134_v38   ;;  %v3119_v40 = vsel %vm3116_vm13, %v3118_v37, %v3114_v39 }
0x41a5   :  { %v3120_v62 = vmul.f32 0.1, %v3119_v40  }
0x41a6   :  { %v3137_v41 = vmul.f32 %v4147_v0, %v3135_v60 }
0x41a7   :  { %v3136_v42 = vmul.f32 %v4143_v61, %v3120_v62 }
0x41a8   :  { %v3139_v43 = vsel %vm179_vm7, %v3137_v41, 0.0 }
0x41a9   :  { %v3138_v44 = vsel %vm175_vm6, %v3136_v42, 0.0 }
0x41aa   :  { %v3140_v45 = vadd.f32 %v3139_v43, %v3138_v44 }
0x41ac   :  { %v3141_v46 = vrot.slane %v3140_v45, 4 }
0x41ae   :  { %v3142_v47 = vadd.f32 %v3141_v46, %v3140_v45 }
0x41b0   :  { %v3143_v48 = vrot.slane %v3142_v47, 2 }
0x41b2   :  { %v3144_v49 = vadd.f32 %v3143_v48, %v3142_v47 }
0x41b4   :  { %v3145_v50 = vrot.slane %v3144_v49, 1 }
0x41b6   :  { %v3146_v51 = vadd.f32 %v3145_v50, %v3144_v49 }
0x41b8   :  { %v3147_v52 = vadd.f32 1e-16, %v3146_v51 }
0x41ba   :  { %3970 = vrcp.f32 %v3147_v52  ;;  %v3159_v56 = vand.u32 2147483648, %v3147_v52  ;;  %v3157_v58 = vand.u32 2147483647, %v3147_v52  ;;  %vm3153_vm15 = vweird.f32 %v3147_v52 }
0x41bc   :  { %v3160_v63 = vor.u32 1.1754944e-38, %v3159_v56  ;;  %vm3158_vm1 = vcmp.eq.f32.partialorder %v3157_v58, 8.507059e+37 }
0x41c0   :  { %v3971_v53 = vpop.eup %3970 }
0x41c1   :  { %v3149_v54 = vmul.f32 %v3971_v53, %v3147_v52  ;;  %vm3154_vm14 = vweird.f32 %v3971_v53 }
0x41c2   :  { %vm3155_vm0 = vmor %vm3153_vm15, %vm3154_vm14 }
0x41c3   :  { %v3150_v55 = vsub.f32 1.0, %v3149_v54 }
0x41c5   :  { %v3151_v57 = vmul.f32 %v3971_v53, %v3150_v55 }
0x41c7   :  { %v3152_v59 = vadd.f32 %v3971_v53, %v3151_v57 }
0x41c9   :  { %v3156_v1 = vsel %vm3155_vm0, %v3971_v53, %v3152_v59 }
0x41ca   :  { %v3161_v2 = vsel %vm3158_vm1, %v3160_v63, %v3156_v1 }
0x41cb   :  { %v3162_v63 = vmul.f32 0.02, %v3161_v2  }
0x41cc PF:  { %s3287_s27 = scalar_select %p1748_p4, 0, 1  ;;  %3972 = vlog2.f32 %v4147_v0  ;;  %vm3173_vm3 = vcmp.gt.f32.partialorder %v4147_v0, 0.0  ;;  %vm3172_vm4 = vcmp.gt.f32.partialorder %v4143_v61, 0.0  ;;  %vm3194_vm5 = vcmask 1041408   ;;  %v4072_v63 = vphi %v4628_v63, %v3162_v63   ;;  %v4068_v62 = vphi %v4626_v62, %v3120_v62   ;;  %v4064_v60 = vphi %v4624_v60, %v3135_v60  }
0x41cd   :  { %3974 = vlog2.f32 %v4143_v61  ;;  %s4075_s28 = smov [#allocation2]   ;;  %s3213_s4 = sshll.u32 %s5063_s2, 4  ;;  %s3214_s4 = int_to_ptr.hbm [resolvable:$true] %s3213_s4 }
0x41ce   :  { %v3276_v3 = vstv %s3287_s27  ;;  %s3211_s29 = sshll.u32 %s4075_s28, 4  ;;  %s3212_s29 = int_to_ptr.vmem [resolvable:$true] %s3211_s29 }
0x41cf   :  { %vm5039_vm2 = vcmp.ne.s32.totalorder %v3276_v3, 0 }
0x41d0   :  { %v3278_v11 = vsel %vm5039_vm2, %v4056_v12, %v4072_v63  ;;  %v3286_v16 = vsel %vm5039_vm2, %v4048_v29, %v4064_v60 }
0x41d2   :  { %v3973_v4 = vpop.eup %3972 }
0x41d3   :  { %v3975_v5 = vpop.eup %3974  ;;  %v3177_v6 = vmul.f32 0.6931472, %v3973_v4 }
0x41d4   :  { %v3175_v8 = vmul.f32 0.6931472, %v3975_v5 }
0x41d5   :  { %v3179_v9 = vmul.f32 %v4147_v0, %v3177_v6  ;;  %v3282_v0 = vsel %vm5039_vm2, %v4052_v23, %v4068_v62 }
0x41d6   :  { %v3178_v10 = vmul.f32 %v4143_v61, %v3175_v8 }
0x41d7   :  { %v3181_v13 = vsel %vm3173_vm3, %v3179_v9, 0.0 }
0x41d8   :  { %v3183_v14 = vmul.f32 -0.05, %v3181_v13  ;;  %v3180_v15 = vsel %vm3172_vm4, %v3178_v10, 0.0 }
0x41d9   :  { %v3182_v17 = vmul.f32 -0.05, %v3180_v15 }
0x41da   :  { %v3185_v18 = vmul.f32 %v3278_v11, %v3183_v14 }
0x41db   :  { %v3184_v20 = vmul.f32 %v3278_v11, %v3182_v17 }
0x41dc   :  { %v3187_v19 = vmul.f32 %v3286_v16, %v3185_v18 }
0x41dd   :  { %v3186_v21 = vmul.f32 %v3282_v0, %v3184_v20 }
0x41de   :  { %v3191_v61 = vsel %vm179_vm7, %v3187_v19, 0.0  ;;  %vm3204_vm7 = vcmask 0  }
0x41df   :  { %3192 = vadd.xlane.f32.xlu0 %v3191_v61  ;;  %v3188_v12 = vsel %vm175_vm6, %v3186_v21, 0.0 }
0x41e7   :  { %3189 = vadd.xlane.f32.xlu0 %v3188_v12 }
0x4252   :  { %v3193_v22 = vpop.xlane.xlu0 %3192 }
0x4253   :  { %v3195_v24 = vsel %vm3194_vm5, %v3193_v22, 0.0 }
0x425a   :  { %v3190_v25 = vpop.xlane.xlu0 %3189 }
0x425b   :  { %v3196_v29 = vadd.f32 %v3195_v24, %v3190_v25 }
0x425d   :  { %v3197_v60 = vrot.slane %v3196_v29, 4 }
0x425f   :  { %v3198_v26 = vadd.f32 %v3197_v60, %v3196_v29 }
0x4261   :  { %v3199_v27 = vrot.slane %v3198_v26, 2 }
0x4263   :  { %v3200_v28 = vadd.f32 %v3199_v27, %v3198_v26 }
0x4265   :  { %v3201_v30 = vrot.slane %v3200_v28, 1 }
0x4267   :  { %v3202_v23 = vadd.f32 %v3201_v30, %v3200_v28 }
0x4269   :  { %v3203_v62 = vmul.f32 250.0, %v3202_v23 }
0x426b   :  { %3205 = vst.msk [vmem:[#allocation2] sm:$0x1] %vm3204_vm7, %v3203_v62 }
0x426c   :  { %3216 = dma.vmem_to_hbm [thread:$0]  %s3212_s29, 16, %s3214_s4, [#allocation3]  }
0x426d   :  { %4036 = dma.done.wait [#allocation3], 16  }
0x426e   :  { %4037 = vsyncadd [#allocation3], 4294967280 }
0x426f   :  { %3221 = vsyncpa [#allocation3], 1 }

</bundles_post_ra>
